<compile_context>
chip_gen: v5e
topology: v5e:2x2
jax: 0.10.0
libtpu: 0.0.40
codegen_flags: <defaults>
</compile_context>

<pallas_src>
import functools

import jax
import jax.numpy as jnp
from jax.experimental import pallas as pl
from jax.experimental.pallas import tpu as pltpu

# TODO(synk): PyTorch nn.GELU() is the exact erf GELU; the tanh approximation is used
# in-kernel (guaranteed Mosaic lowering) -- numerics differ at ~1e-3 level.
_GELU = functools.partial(jax.nn.gelu, approximate=True)

# GradMultiply / feature_grad_mult and dropout are identity in the forward pass (eval).

# --------------------------------------------------------------------------- #
# Model config (small synthetic instance, deterministic init, eval mode)
# --------------------------------------------------------------------------- #
CONV_CFG = [  # (out_channels, kernel, stride)
    (32, 10, 5),
    (32, 3, 2),
]
HIDDEN = 64
HEADS = 4
HEAD_DIM = HIDDEN // HEADS
FFN = 128
N_LAYERS = 2
N_LABELS = 10
POS_KERNEL = 3
POS_GROUPS = 4
AUX_PAD = 128          # lane-dense padded width of the aux head output
K0_PAD = 16            # lane-padded tap axis of the conv0 im2col patches
LN_EPS = 1e-5


# --------------------------------------------------------------------------- #
# In-kernel helpers
# --------------------------------------------------------------------------- #
def _bf(x):
    return x.astype(jnp.bfloat16)


def _mm(a, b):
    """MXU matmul: bf16 operands, f32 accumulation (weights already bf16)."""
    return jnp.dot(_bf(a), _bf(b), preferred_element_type=jnp.float32)


def _ln(x, g, b, eps=LN_EPS):
    """LayerNorm over the last (lane) axis in f32, with affine."""
    x = x.astype(jnp.float32)
    m = jnp.mean(x, axis=-1, keepdims=True)
    v = jnp.mean(jnp.square(x - m), axis=-1, keepdims=True)
    return (x - m) * jax.lax.rsqrt(v + eps) * g + b


# --------------------------------------------------------------------------- #
# The single fused kernel (per-batch grid step)
# --------------------------------------------------------------------------- #
def _w2v2_kernel(wave_ref, patch_ref,
                 w0_ref, gn_g_ref, gn_b_ref, w1_ref,
                 fp_ln_g_ref, fp_ln_b_ref, fp_w_ref, fp_b_ref,
                 pos_w_ref, pos_b_ref,
                 qkv_w_ref, qkv_b_ref, o_w_ref, o_b_ref,
                 ln1_g_ref, ln1_b_ref, ff1_w_ref, ff1_b_ref,
                 ff2_w_ref, ff2_b_ref, ln2_g_ref, ln2_b_ref,
                 enc_g_ref, enc_b_ref, aux_w_ref, aux_b_ref,
                 out_ref,
                 y_scr, pos_scr, qkv_scr,
                 *, t1, conv1_k, conv1_stride, pos_k,
                 n_layers, n_heads, head_dim):
    # ---------------- frontend ------------------------------------------------
    # waveform LayerNorm (no affine), folded into the conv0 im2col patches
    wave = wave_ref[0].astype(jnp.float32)                         # (1, T_wav)
    mean = jnp.mean(wave, axis=-1, keepdims=True)
    var = jnp.mean(jnp.square(wave - mean), axis=-1, keepdims=True)
    rstd = jax.lax.rsqrt(var + LN_EPS)
    patches = (patch_ref[0].astype(jnp.float32) - mean) * rstd     # (T0, K0_PAD)

    # conv0 (1 -> C0) as an im2col matmul (padded tap rows of w0 are zero)
    y = _mm(patches, w0_ref[...])                                  # (T0, C0)

    # GroupNorm(num_groups == num_channels): per-channel stats over time
    cm = jnp.mean(y, axis=0, keepdims=True)                        # (1, C0)
    cv = jnp.mean(jnp.square(y - cm), axis=0, keepdims=True)
    y = (y - cm) * jax.lax.rsqrt(cv + LN_EPS) * gn_g_ref[...] + gn_b_ref[...]
    y_scr[...] = _GELU(y)                                          # stage for strided reads

    # conv1 (k=3, stride=2, no bias): strided sublane reads, one matmul per tap
    c1 = w1_ref.shape[-1]
    z = jnp.zeros((t1, c1), jnp.float32)
    for k in range(conv1_k):
        xk = y_scr[pl.ds(k, t1, stride=conv1_stride), :]           # (T1, C0) exact rows
        z = z + _mm(xk, w1_ref[k])
    z = _GELU(z)                                                   # (T1, C1)

    # FeatureProjection: LayerNorm(C1) + Linear(C1 -> D)
    z = _ln(z, fp_ln_g_ref[...], fp_ln_b_ref[...])
    h = _mm(z, fp_w_ref[...]) + fp_b_ref[...]                      # (T1, D)

    # Conv positional embedding (grouped, k=3, pad=1) + GELU + residual:
    # shifted reads from a zero-padded scratch (exact zero padding at the edges).
    d = h.shape[-1]
    pos_scr[...] = jnp.zeros((t1 + 2, d), jnp.float32)
    pos_scr[1:t1 + 1, :] = h
    pos = jnp.zeros((t1, d), jnp.float32)
    for k in range(pos_k):
        hk = pos_scr[k:k + t1, :]                                  # rows h[t + k - 1]
        pos = pos + _mm(hk, pos_w_ref[k])                          # block-diag grouped conv
    pos = _GELU(pos + pos_b_ref[...])
    x = h + pos                                                    # encoder input (T1, D)

    # ---------------- transformer encoder (post-LN) + final LN + aux head -----
    # TODO(synk): at real depth / sequence length: lax.fori_loop over layers,
    # flash-style KV tiling, M tiling, explicit vmem_limit_bytes (v7x 64 MiB).
    for l in range(n_layers):
        # fused QKV projection (scale folded into the Q weights at pack time)
        qkv_scr[...] = _mm(x, qkv_w_ref[l]) + qkv_b_ref[l]         # (T1, 3D)
        ow = o_w_ref[l]                                            # (D, D) bf16

        # per-head attention; head merge fused into the output projection
        attn = jnp.zeros_like(x)
        for hh in range(n_heads):
            lo = hh * head_dim
            q = qkv_scr[:, lo:lo + head_dim]
            kk = qkv_scr[:, d + lo:d + lo + head_dim]
            v = qkv_scr[:, 2 * d + lo:2 * d + lo + head_dim]
            s = jax.lax.dot_general(
                _bf(q), _bf(kk), (((1,), (1,)), ((), ())),
                preferred_element_type=jnp.float32)                # (T1, T1)
            s = s - jnp.max(s, axis=-1, keepdims=True)
            p = jnp.exp(s)
            p = p * pl.reciprocal(jnp.sum(p, axis=-1, keepdims=True), approx=True)
            oh = _mm(p, v)                                         # (T1, Dh)
            attn = attn + _mm(oh, ow[lo:lo + head_dim, :])         # (T1, D)
        attn = attn + o_b_ref[l]

        # post-LN transformer layer (layer_norm_first=False)
        x = _ln(x + attn, ln1_g_ref[l], ln1_b_ref[l])
        ff = _GELU(_mm(x, ff1_w_ref[l]) + ff1_b_ref[l])
        ff = _mm(ff, ff2_w_ref[l]) + ff2_b_ref[l]
        x = _ln(x + ff, ln2_g_ref[l], ln2_b_ref[l])

    # final encoder LayerNorm + fused aux head (lane-padded to 128)
    x = _ln(x, enc_g_ref[...], enc_b_ref[...])
    logits = _mm(x, aux_w_ref[...]) + aux_b_ref[...]               # (T1, AUX_PAD)
    out_ref[0] = logits.astype(out_ref.dtype)


# --------------------------------------------------------------------------- #
# Wrapper
# --------------------------------------------------------------------------- #
def _full_spec(arr):
    """Broadcast an (untiled) operand to every grid step."""
    zeros = (0,) * arr.ndim
    return pl.BlockSpec(arr.shape, lambda b, _z=zeros: _z)


_WEIGHT_NAMES = ["w0", "gn_g", "gn_b", "w1", "fp_ln_g", "fp_ln_b", "fp_w",
                 "fp_b", "pos_w", "pos_b", "qkv_w", "qkv_b", "o_w", "o_b",
                 "ln1_g", "ln1_b", "ff1_w", "ff1_b", "ff2_w", "ff2_b",
                 "ln2_g", "ln2_b", "enc_ln_g", "enc_ln_b", "aux_w", "aux_b"]


def _forward_impl(kp, waveforms):
    B, T_wav = waveforms.shape
    C0, K0, S0 = CONV_CFG[0]
    C1, K1, S1 = CONV_CFG[1]
    T0 = (T_wav - K0) // S0 + 1
    T1 = (T0 - K1) // S1 + 1

    # im2col of the raw waveform for conv0 (per-sample LN affine applied in-kernel);
    # tap axis lane-padded to K0_PAD (zero rows in w0 make the pad contribution exact 0).
    idx = jnp.arange(T0)[:, None] * S0 + jnp.arange(K0)[None, :]
    patches = waveforms[:, idx].astype(jnp.float32)                # (B, T0, K0)
    patches = jnp.pad(patches, ((0, 0), (0, 0), (0, K0_PAD - K0)))
    wave3 = waveforms.reshape(B, 1, T_wav).astype(jnp.float32)

    weights = [kp[n] for n in _WEIGHT_NAMES]
    kernel = functools.partial(
        _w2v2_kernel, t1=T1, conv1_k=K1, conv1_stride=S1, pos_k=POS_KERNEL,
        n_layers=N_LAYERS, n_heads=HEADS, head_dim=HEAD_DIM)

    logits_pad = pl.pallas_call(
        kernel,
        grid=(B,),
        in_specs=[pl.BlockSpec((1, 1, T_wav), lambda b: (b, 0, 0)),
                  pl.BlockSpec((1, T0, K0_PAD), lambda b: (b, 0, 0))]
                 + [_full_spec(w) for w in weights],
        out_specs=pl.BlockSpec((1, T1, AUX_PAD), lambda b: (b, 0, 0)),
        out_shape=jax.ShapeDtypeStruct((B, T1, AUX_PAD), jnp.float32),
        scratch_shapes=[pltpu.VMEM((T0, C0), jnp.float32),          # staged conv0 output
                        pltpu.VMEM((T1 + 2, HIDDEN), jnp.float32),  # zero-padded pos-conv input
                        pltpu.VMEM((T1, 3 * HIDDEN), jnp.float32)], # fused QKV activation
        compiler_params=pltpu.CompilerParams(dimension_semantics=("parallel",)),
    )(wave3, patches, *weights)

    logits = logits_pad[:, :, :N_LABELS]
    # lengths=None in this call -> no attention mask / no output lengths.
    return logits, None


wav2vec2_forward = jax.jit(_forward_impl)


# --------------------------------------------------------------------------- #
# Parameters (PyTorch-style synthetic init) + kernel-layout packing (run ONCE)
# --------------------------------------------------------------------------- #
def init_params(key):
    keys = iter(jax.random.split(key, 64))

    def nrm(shape, scale=0.05):
        return (scale * jax.random.normal(next(keys), shape)).astype(jnp.float32)

    p = {}
    p["conv0_w"] = nrm((CONV_CFG[0][0], 1, CONV_CFG[0][1]))
    p["gn_g"] = jnp.ones((CONV_CFG[0][0],), jnp.float32)
    p["gn_b"] = jnp.zeros((CONV_CFG[0][0],), jnp.float32)
    p["conv1_w"] = nrm((CONV_CFG[1][0], CONV_CFG[0][0], CONV_CFG[1][1]))
    p["fp_ln_g"] = jnp.ones((CONV_CFG[1][0],), jnp.float32)
    p["fp_ln_b"] = jnp.zeros((CONV_CFG[1][0],), jnp.float32)
    p["fp_w"] = nrm((CONV_CFG[1][0], HIDDEN))
    p["fp_b"] = jnp.zeros((HIDDEN,), jnp.float32)
    p["pos_w"] = nrm((HIDDEN, HIDDEN // POS_GROUPS, POS_KERNEL))
    p["pos_b"] = jnp.zeros((HIDDEN,), jnp.float32)
    layers = []
    for _ in range(N_LAYERS):
        layers.append({
            "q_w": nrm((HIDDEN, HIDDEN)), "q_b": jnp.zeros((HIDDEN,), jnp.float32),
            "k_w": nrm((HIDDEN, HIDDEN)), "k_b": jnp.zeros((HIDDEN,), jnp.float32),
            "v_w": nrm((HIDDEN, HIDDEN)), "v_b": jnp.zeros((HIDDEN,), jnp.float32),
            "o_w": nrm((HIDDEN, HIDDEN)), "o_b": jnp.zeros((HIDDEN,), jnp.float32),
            "ln1_g": jnp.ones((HIDDEN,), jnp.float32), "ln1_b": jnp.zeros((HIDDEN,), jnp.float32),
            "ff1_w": nrm((HIDDEN, FFN)), "ff1_b": jnp.zeros((FFN,), jnp.float32),
            "ff2_w": nrm((FFN, HIDDEN)), "ff2_b": jnp.zeros((HIDDEN,), jnp.float32),
            "ln2_g": jnp.ones((HIDDEN,), jnp.float32), "ln2_b": jnp.zeros((HIDDEN,), jnp.float32),
        })
    p["layers"] = layers
    p["enc_ln_g"] = jnp.ones((HIDDEN,), jnp.float32)
    p["enc_ln_b"] = jnp.zeros((HIDDEN,), jnp.float32)
    p["aux_w"] = nrm((HIDDEN, N_LABELS))
    p["aux_b"] = jnp.zeros((N_LABELS,), jnp.float32)
    return p


def pack_params(p):
    """Repack into kernel-friendly channels-last operands. Called once, outside jit.
    Matmul weights pre-cast to bf16; LN/GN scale/bias stay f32."""
    C0, K0, _ = CONV_CFG[0]
    C1, K1, _ = CONV_CFG[1]
    L = len(p["layers"])
    scale = 1.0 / (HEAD_DIM ** 0.5)
    kp = {}
    # conv0: (C_out, 1, K) -> (K, C_out), tap axis zero-padded to K0_PAD
    w0 = p["conv0_w"][:, 0, :].T
    kp["w0"] = jnp.zeros((K0_PAD, C0), jnp.float32).at[:K0].set(w0).astype(jnp.bfloat16)
    kp["gn_g"] = p["gn_g"].reshape(1, C0)
    kp["gn_b"] = p["gn_b"].reshape(1, C0)
    # conv1: (C_out, C_in, K) -> (K, C_in, C_out), tap-major
    kp["w1"] = jnp.transpose(p["conv1_w"], (2, 1, 0)).astype(jnp.bfloat16)
    kp["fp_ln_g"] = p["fp_ln_g"].reshape(1, C1)
    kp["fp_ln_b"] = p["fp_ln_b"].reshape(1, C1)
    kp["fp_w"] = p["fp_w"].astype(jnp.bfloat16)
    kp["fp_b"] = p["fp_b"].reshape(1, HIDDEN)
    # grouped positional conv -> per-tap block-diagonal (in, out) weight
    cpg = HIDDEN // POS_GROUPS
    pw = jnp.zeros((POS_KERNEL, HIDDEN, HIDDEN), jnp.float32)
    for k in range(POS_KERNEL):
        for g in range(POS_GROUPS):
            blk = p["pos_w"][g * cpg:(g + 1) * cpg, :, k]          # (out_g, in_g)
            pw = pw.at[k, g * cpg:(g + 1) * cpg, g * cpg:(g + 1) * cpg].set(blk.T)
    kp["pos_w"] = pw.astype(jnp.bfloat16)
    kp["pos_b"] = p["pos_b"].reshape(1, HIDDEN)
    # stacked transformer layer weights; attention scale folded into Q weight/bias
    st = lambda name: jnp.stack([lyr[name] for lyr in p["layers"]])
    kp["qkv_w"] = jnp.concatenate([st("q_w") * scale, st("k_w"), st("v_w")],
                                  axis=-1).astype(jnp.bfloat16)
    kp["qkv_b"] = jnp.concatenate([st("q_b") * scale, st("k_b"), st("v_b")],
                                  axis=-1).reshape(L, 1, 3 * HIDDEN)
    kp["o_w"] = st("o_w").astype(jnp.bfloat16)
    kp["o_b"] = st("o_b").reshape(L, 1, HIDDEN)
    kp["ln1_g"] = st("ln1_g").reshape(L, 1, HIDDEN)
    kp["ln1_b"] = st("ln1_b").reshape(L, 1, HIDDEN)
    kp["ff1_w"] = st("ff1_w").astype(jnp.bfloat16)
    kp["ff1_b"] = st("ff1_b").reshape(L, 1, FFN)
    kp["ff2_w"] = st("ff2_w").astype(jnp.bfloat16)
    kp["ff2_b"] = st("ff2_b").reshape(L, 1, HIDDEN)
    kp["ln2_g"] = st("ln2_g").reshape(L, 1, HIDDEN)
    kp["ln2_b"] = st("ln2_b").reshape(L, 1, HIDDEN)
    kp["enc_ln_g"] = p["enc_ln_g"].reshape(1, HIDDEN)
    kp["enc_ln_b"] = p["enc_ln_b"].reshape(1, HIDDEN)
    # aux head padded to 128 output lanes (lane-dense stores); sliced in wrapper
    kp["aux_w"] = jnp.zeros((HIDDEN, AUX_PAD), jnp.float32).at[:, :N_LABELS].set(
        p["aux_w"]).astype(jnp.bfloat16)
    kp["aux_b"] = jnp.zeros((1, AUX_PAD), jnp.float32).at[:, :N_LABELS].set(
        p["aux_b"].reshape(1, N_LABELS))
    return kp


# --------------------------------------------------------------------------- #
if __name__ == "__main__":
    key = jax.random.PRNGKey(0)
    pkey, wkey = jax.random.split(key)
    params = init_params(pkey)
    kp = pack_params(params)                      # packed + bf16-cast ONCE, outside jit

    waveforms = jax.random.normal(wkey, (2, 480), jnp.float32)     # (batch, frames)

    logits, lengths = wav2vec2_forward(kp, waveforms)
    logits = jax.block_until_ready(logits)

    # T0 = (480-10)//5+1 = 95 ; T1 = (95-3)//2+1 = 47
    assert logits.shape == (2, 47, N_LABELS), logits.shape
    assert lengths is None
    assert bool(jnp.all(jnp.isfinite(logits)))
    print("KERNEL_OK")
</pallas_src>

<mosaic_0001>
module attributes {stable_mosaic.version = 11 : i64} {
  func.func @_w2v2_kernel(%arg0: i32, %arg1: memref<1x1x480xf32, #tpu.memory_space<vmem>>, %arg2: memref<1x95x16xf32, #tpu.memory_space<vmem>>, %arg3: memref<16x32xbf16, #tpu.memory_space<vmem>>, %arg4: memref<1x32xf32, #tpu.memory_space<vmem>>, %arg5: memref<1x32xf32, #tpu.memory_space<vmem>>, %arg6: memref<3x32x32xbf16, #tpu.memory_space<vmem>>, %arg7: memref<1x32xf32, #tpu.memory_space<vmem>>, %arg8: memref<1x32xf32, #tpu.memory_space<vmem>>, %arg9: memref<32x64xbf16, #tpu.memory_space<vmem>>, %arg10: memref<1x64xf32, #tpu.memory_space<vmem>>, %arg11: memref<3x64x64xbf16, #tpu.memory_space<vmem>>, %arg12: memref<1x64xf32, #tpu.memory_space<vmem>>, %arg13: memref<2x64x192xbf16, #tpu.memory_space<vmem>>, %arg14: memref<2x1x192xf32, #tpu.memory_space<vmem>>, %arg15: memref<2x64x64xbf16, #tpu.memory_space<vmem>>, %arg16: memref<2x1x64xf32, #tpu.memory_space<vmem>>, %arg17: memref<2x1x64xf32, #tpu.memory_space<vmem>>, %arg18: memref<2x1x64xf32, #tpu.memory_space<vmem>>, %arg19: memref<2x64x128xbf16, #tpu.memory_space<vmem>>, %arg20: memref<2x1x128xf32, #tpu.memory_space<vmem>>, %arg21: memref<2x128x64xbf16, #tpu.memory_space<vmem>>, %arg22: memref<2x1x64xf32, #tpu.memory_space<vmem>>, %arg23: memref<2x1x64xf32, #tpu.memory_space<vmem>>, %arg24: memref<2x1x64xf32, #tpu.memory_space<vmem>>, %arg25: memref<1x64xf32, #tpu.memory_space<vmem>>, %arg26: memref<1x64xf32, #tpu.memory_space<vmem>>, %arg27: memref<64x128xbf16, #tpu.memory_space<vmem>>, %arg28: memref<1x128xf32, #tpu.memory_space<vmem>>, %arg29: memref<1x47x128xf32, #tpu.memory_space<vmem>>, %arg30: memref<95x32xf32, #tpu.memory_space<vmem>>, %arg31: memref<49x64xf32, #tpu.memory_space<vmem>>, %arg32: memref<47x192xf32, #tpu.memory_space<vmem>>) attributes {dimension_semantics = [#tpu.dimension_semantics<parallel>], iteration_bounds = array<i64: 2>, scalar_prefetch = 0 : i64, scratch_operands = 3 : i64, tpu.core_type = #tpu.core_type<tc>, window_params = [{transform_indices = @transform_0, window_bounds = array<i64: 1, 1, 480>}, {transform_indices = @transform_1, window_bounds = array<i64: 1, 95, 16>}, {pipeline_mode = #tpu.pipeline_mode<synchronous>, transform_indices = @transform_2, window_bounds = array<i64: 16, 32>}, {pipeline_mode = #tpu.pipeline_mode<synchronous>, transform_indices = @transform_3, window_bounds = array<i64: 1, 32>}, {pipeline_mode = #tpu.pipeline_mode<synchronous>, transform_indices = @transform_4, window_bounds = array<i64: 1, 32>}, {pipeline_mode = #tpu.pipeline_mode<synchronous>, transform_indices = @transform_5, window_bounds = array<i64: 3, 32, 32>}, {pipeline_mode = #tpu.pipeline_mode<synchronous>, transform_indices = @transform_6, window_bounds = array<i64: 1, 32>}, {pipeline_mode = #tpu.pipeline_mode<synchronous>, transform_indices = @transform_7, window_bounds = array<i64: 1, 32>}, {pipeline_mode = #tpu.pipeline_mode<synchronous>, transform_indices = @transform_8, window_bounds = array<i64: 32, 64>}, {pipeline_mode = #tpu.pipeline_mode<synchronous>, transform_indices = @transform_9, window_bounds = array<i64: 1, 64>}, {pipeline_mode = #tpu.pipeline_mode<synchronous>, transform_indices = @transform_10, window_bounds = array<i64: 3, 64, 64>}, {pipeline_mode = #tpu.pipeline_mode<synchronous>, transform_indices = @transform_11, window_bounds = array<i64: 1, 64>}, {pipeline_mode = #tpu.pipeline_mode<synchronous>, transform_indices = @transform_12, window_bounds = array<i64: 2, 64, 192>}, {pipeline_mode = #tpu.pipeline_mode<synchronous>, transform_indices = @transform_13, window_bounds = array<i64: 2, 1, 192>}, {pipeline_mode = #tpu.pipeline_mode<synchronous>, transform_indices = @transform_14, window_bounds = array<i64: 2, 64, 64>}, {pipeline_mode = #tpu.pipeline_mode<synchronous>, transform_indices = @transform_15, window_bounds = array<i64: 2, 1, 64>}, {pipeline_mode = #tpu.pipeline_mode<synchronous>, transform_indices = @transform_16, window_bounds = array<i64: 2, 1, 64>}, {pipeline_mode = #tpu.pipeline_mode<synchronous>, transform_indices = @transform_17, window_bounds = array<i64: 2, 1, 64>}, {pipeline_mode = #tpu.pipeline_mode<synchronous>, transform_indices = @transform_18, window_bounds = array<i64: 2, 64, 128>}, {pipeline_mode = #tpu.pipeline_mode<synchronous>, transform_indices = @transform_19, window_bounds = array<i64: 2, 1, 128>}, {pipeline_mode = #tpu.pipeline_mode<synchronous>, transform_indices = @transform_20, window_bounds = array<i64: 2, 128, 64>}, {pipeline_mode = #tpu.pipeline_mode<synchronous>, transform_indices = @transform_21, window_bounds = array<i64: 2, 1, 64>}, {pipeline_mode = #tpu.pipeline_mode<synchronous>, transform_indices = @transform_22, window_bounds = array<i64: 2, 1, 64>}, {pipeline_mode = #tpu.pipeline_mode<synchronous>, transform_indices = @transform_23, window_bounds = array<i64: 2, 1, 64>}, {pipeline_mode = #tpu.pipeline_mode<synchronous>, transform_indices = @transform_24, window_bounds = array<i64: 1, 64>}, {pipeline_mode = #tpu.pipeline_mode<synchronous>, transform_indices = @transform_25, window_bounds = array<i64: 1, 64>}, {pipeline_mode = #tpu.pipeline_mode<synchronous>, transform_indices = @transform_26, window_bounds = array<i64: 64, 128>}, {pipeline_mode = #tpu.pipeline_mode<synchronous>, transform_indices = @transform_27, window_bounds = array<i64: 1, 128>}, {transform_indices = @transform_28, window_bounds = array<i64: 1, 47, 128>}]} {
    %c0 = arith.constant 0 : index
    %c0_0 = arith.constant 0 : index
    %c0_1 = arith.constant 0 : index
    %0 = vector.load %arg1[%c0, %c0_0, %c0_1] : memref<1x1x480xf32, #tpu.memory_space<vmem>>, vector<1x1x480xf32>
    %1 = vector.shape_cast %0 : vector<1x1x480xf32> to vector<1x480xf32>
    %cst = arith.constant dense<0.000000e+00> : vector<1xf32>
    %2 = vector.multi_reduction <add>, %1, %cst [1] : vector<1x480xf32> to vector<1xf32>
    %3 = vector.shape_cast %2 : vector<1xf32> to vector<1x1xf32>
    %cst_2 = arith.constant 4.800000e+02 : f32
    %4 = vector.broadcast %cst_2 : f32 to vector<1x1xf32>
    %5 = arith.divf %3, %4 : vector<1x1xf32>
    %6 = vector.broadcast %5 : vector<1x1xf32> to vector<1x480xf32>
    %7 = arith.subf %1, %6 : vector<1x480xf32>
    %8 = arith.mulf %7, %7 : vector<1x480xf32>
    %cst_3 = arith.constant dense<0.000000e+00> : vector<1xf32>
    %9 = vector.multi_reduction <add>, %8, %cst_3 [1] : vector<1x480xf32> to vector<1xf32>
    %10 = vector.shape_cast %9 : vector<1xf32> to vector<1x1xf32>
    %cst_4 = arith.constant 4.800000e+02 : f32
    %11 = vector.broadcast %cst_4 : f32 to vector<1x1xf32>
    %12 = arith.divf %10, %11 : vector<1x1xf32>
    %cst_5 = arith.constant 9.99999974E-6 : f32
    %13 = vector.broadcast %cst_5 : f32 to vector<1x1xf32>
    %14 = arith.addf %12, %13 : vector<1x1xf32>
    %15 = math.rsqrt %14 : vector<1x1xf32>
    %c0_6 = arith.constant 0 : index
    %c0_7 = arith.constant 0 : index
    %c0_8 = arith.constant 0 : index
    %16 = vector.load %arg2[%c0_6, %c0_7, %c0_8] : memref<1x95x16xf32, #tpu.memory_space<vmem>>, vector<1x95x16xf32>
    %17 = vector.shape_cast %16 : vector<1x95x16xf32> to vector<95x16xf32>
    %18 = vector.broadcast %5 : vector<1x1xf32> to vector<95x16xf32>
    %19 = arith.subf %17, %18 : vector<95x16xf32>
    %20 = vector.broadcast %15 : vector<1x1xf32> to vector<95x16xf32>
    %21 = arith.mulf %19, %20 : vector<95x16xf32>
    %c0_9 = arith.constant 0 : index
    %c0_10 = arith.constant 0 : index
    %22 = vector.load %arg3[%c0_9, %c0_10] : memref<16x32xbf16, #tpu.memory_space<vmem>>, vector<16x32xbf16>
    %23 = arith.truncf %21 : vector<95x16xf32> to vector<95x16xbf16>
    %cst_11 = arith.constant dense<0.000000e+00> : vector<95x32xf32>
    %24 = tpu.matmul %23, %22, %cst_11 {dimension_numbers = #tpu.dot_dimension_numbers<[1], [0], [0], [1], [0, 0, 1, 1], [], []>} : vector<95x16xbf16>, vector<16x32xbf16>, vector<95x32xf32> -> vector<95x32xf32>
    %cst_12 = arith.constant dense<0.000000e+00> : vector<32xf32>
    %25 = vector.multi_reduction <add>, %24, %cst_12 [0] : vector<95x32xf32> to vector<32xf32>
    %26 = vector.shape_cast %25 : vector<32xf32> to vector<1x32xf32>
    %cst_13 = arith.constant 9.500000e+01 : f32
    %27 = vector.broadcast %cst_13 : f32 to vector<1x32xf32>
    %28 = arith.divf %26, %27 : vector<1x32xf32>
    %29 = vector.broadcast %28 : vector<1x32xf32> to vector<95x32xf32>
    %30 = arith.subf %24, %29 : vector<95x32xf32>
    %31 = arith.mulf %30, %30 : vector<95x32xf32>
    %cst_14 = arith.constant dense<0.000000e+00> : vector<32xf32>
    %32 = vector.multi_reduction <add>, %31, %cst_14 [0] : vector<95x32xf32> to vector<32xf32>
    %33 = vector.shape_cast %32 : vector<32xf32> to vector<1x32xf32>
    %cst_15 = arith.constant 9.500000e+01 : f32
    %34 = vector.broadcast %cst_15 : f32 to vector<1x32xf32>
    %35 = arith.divf %33, %34 : vector<1x32xf32>
    %36 = vector.broadcast %28 : vector<1x32xf32> to vector<95x32xf32>
    %37 = arith.subf %24, %36 : vector<95x32xf32>
    %cst_16 = arith.constant 9.99999974E-6 : f32
    %38 = vector.broadcast %cst_16 : f32 to vector<1x32xf32>
    %39 = arith.addf %35, %38 : vector<1x32xf32>
    %40 = math.rsqrt %39 : vector<1x32xf32>
    %41 = vector.broadcast %40 : vector<1x32xf32> to vector<95x32xf32>
    %42 = arith.mulf %37, %41 : vector<95x32xf32>
    %c0_17 = arith.constant 0 : index
    %c0_18 = arith.constant 0 : index
    %43 = vector.load %arg4[%c0_17, %c0_18] : memref<1x32xf32, #tpu.memory_space<vmem>>, vector<1x32xf32>
    %44 = vector.broadcast %43 : vector<1x32xf32> to vector<95x32xf32>
    %45 = arith.mulf %42, %44 : vector<95x32xf32>
    %c0_19 = arith.constant 0 : index
    %c0_20 = arith.constant 0 : index
    %46 = vector.load %arg5[%c0_19, %c0_20] : memref<1x32xf32, #tpu.memory_space<vmem>>, vector<1x32xf32>
    %47 = vector.broadcast %46 : vector<1x32xf32> to vector<95x32xf32>
    %48 = arith.addf %45, %47 : vector<95x32xf32>
    %49 = arith.mulf %48, %48 : vector<95x32xf32>
    %50 = arith.mulf %48, %49 : vector<95x32xf32>
    %cst_21 = arith.constant 4.471500e-02 : f32
    %51 = vector.broadcast %cst_21 : f32 to vector<95x32xf32>
    %52 = arith.mulf %51, %50 : vector<95x32xf32>
    %53 = arith.addf %48, %52 : vector<95x32xf32>
    %cst_22 = arith.constant 0.797884583 : f32
    %54 = vector.broadcast %cst_22 : f32 to vector<95x32xf32>
    %55 = arith.mulf %54, %53 : vector<95x32xf32>
    %56 = math.tanh %55 : vector<95x32xf32>
    %cst_23 = arith.constant 1.000000e+00 : f32
    %57 = vector.broadcast %cst_23 : f32 to vector<95x32xf32>
    %58 = arith.addf %57, %56 : vector<95x32xf32>
    %cst_24 = arith.constant 5.000000e-01 : f32
    %59 = vector.broadcast %cst_24 : f32 to vector<95x32xf32>
    %60 = arith.mulf %59, %58 : vector<95x32xf32>
    %61 = arith.mulf %48, %60 : vector<95x32xf32>
    %c0_25 = arith.constant 0 : index
    %c0_26 = arith.constant 0 : index
    %62 = vector.load %arg30[%c0_25, %c0_26] : memref<95x32xf32, #tpu.memory_space<vmem>>, vector<95x32xf32>
    tpu.vector_store %arg30[%c0_25, %c0_26], %61 {strides = array<i32>} : memref<95x32xf32, #tpu.memory_space<vmem>>, vector<95x32xf32>,
    %cst_27 = arith.constant 0.000000e+00 : f32
    %63 = vector.broadcast %cst_27 : f32 to vector<47x32xf32>
    %c0_28 = arith.constant 0 : index
    %c0_29 = arith.constant 0 : index
    %64 = tpu.strided_load %arg30[%c0_28, %c0_29] {strides = array<i32: 2, 1>} : memref<95x32xf32, #tpu.memory_space<vmem>>, vector<47x32xf32>
    %c0_30 = arith.constant 0 : index
    %c0_31 = arith.constant 0 : index
    %c0_32 = arith.constant 0 : index
    %65 = vector.load %arg6[%c0_30, %c0_31, %c0_32] : memref<3x32x32xbf16, #tpu.memory_space<vmem>>, vector<1x32x32xbf16>
    %66 = vector.shape_cast %65 : vector<1x32x32xbf16> to vector<32x32xbf16>
    %67 = arith.truncf %64 : vector<47x32xf32> to vector<47x32xbf16>
    %cst_33 = arith.constant dense<0.000000e+00> : vector<47x32xf32>
    %68 = tpu.matmul %67, %66, %cst_33 {dimension_numbers = #tpu.dot_dimension_numbers<[1], [0], [0], [1], [0, 0, 1, 1], [], []>} : vector<47x32xbf16>, vector<32x32xbf16>, vector<47x32xf32> -> vector<47x32xf32>
    %69 = arith.addf %63, %68 : vector<47x32xf32>
    %c1 = arith.constant 1 : index
    %c0_34 = arith.constant 0 : index
    %70 = tpu.strided_load %arg30[%c1, %c0_34] {strides = array<i32: 2, 1>} : memref<95x32xf32, #tpu.memory_space<vmem>>, vector<47x32xf32>
    %c1_35 = arith.constant 1 : index
    %c0_36 = arith.constant 0 : index
    %c0_37 = arith.constant 0 : index
    %71 = vector.load %arg6[%c1_35, %c0_36, %c0_37] : memref<3x32x32xbf16, #tpu.memory_space<vmem>>, vector<1x32x32xbf16>
    %72 = vector.shape_cast %71 : vector<1x32x32xbf16> to vector<32x32xbf16>
    %73 = arith.truncf %70 : vector<47x32xf32> to vector<47x32xbf16>
    %cst_38 = arith.constant dense<0.000000e+00> : vector<47x32xf32>
    %74 = tpu.matmul %73, %72, %cst_38 {dimension_numbers = #tpu.dot_dimension_numbers<[1], [0], [0], [1], [0, 0, 1, 1], [], []>} : vector<47x32xbf16>, vector<32x32xbf16>, vector<47x32xf32> -> vector<47x32xf32>
    %75 = arith.addf %69, %74 : vector<47x32xf32>
    %c2 = arith.constant 2 : index
    %c0_39 = arith.constant 0 : index
    %76 = tpu.strided_load %arg30[%c2, %c0_39] {strides = array<i32: 2, 1>} : memref<95x32xf32, #tpu.memory_space<vmem>>, vector<47x32xf32>
    %c2_40 = arith.constant 2 : index
    %c0_41 = arith.constant 0 : index
    %c0_42 = arith.constant 0 : index
    %77 = vector.load %arg6[%c2_40, %c0_41, %c0_42] : memref<3x32x32xbf16, #tpu.memory_space<vmem>>, vector<1x32x32xbf16>
    %78 = vector.shape_cast %77 : vector<1x32x32xbf16> to vector<32x32xbf16>
    %79 = arith.truncf %76 : vector<47x32xf32> to vector<47x32xbf16>
    %cst_43 = arith.constant dense<0.000000e+00> : vector<47x32xf32>
    %80 = tpu.matmul %79, %78, %cst_43 {dimension_numbers = #tpu.dot_dimension_numbers<[1], [0], [0], [1], [0, 0, 1, 1], [], []>} : vector<47x32xbf16>, vector<32x32xbf16>, vector<47x32xf32> -> vector<47x32xf32>
    %81 = arith.addf %75, %80 : vector<47x32xf32>
    %82 = arith.mulf %81, %81 : vector<47x32xf32>
    %83 = arith.mulf %81, %82 : vector<47x32xf32>
    %cst_44 = arith.constant 4.471500e-02 : f32
    %84 = vector.broadcast %cst_44 : f32 to vector<47x32xf32>
    %85 = arith.mulf %84, %83 : vector<47x32xf32>
    %86 = arith.addf %81, %85 : vector<47x32xf32>
    %cst_45 = arith.constant 0.797884583 : f32
    %87 = vector.broadcast %cst_45 : f32 to vector<47x32xf32>
    %88 = arith.mulf %87, %86 : vector<47x32xf32>
    %89 = math.tanh %88 : vector<47x32xf32>
    %cst_46 = arith.constant 1.000000e+00 : f32
    %90 = vector.broadcast %cst_46 : f32 to vector<47x32xf32>
    %91 = arith.addf %90, %89 : vector<47x32xf32>
    %cst_47 = arith.constant 5.000000e-01 : f32
    %92 = vector.broadcast %cst_47 : f32 to vector<47x32xf32>
    %93 = arith.mulf %92, %91 : vector<47x32xf32>
    %94 = arith.mulf %81, %93 : vector<47x32xf32>
    %c0_48 = arith.constant 0 : index
    %c0_49 = arith.constant 0 : index
    %95 = vector.load %arg7[%c0_48, %c0_49] : memref<1x32xf32, #tpu.memory_space<vmem>>, vector<1x32xf32>
    %c0_50 = arith.constant 0 : index
    %c0_51 = arith.constant 0 : index
    %96 = vector.load %arg8[%c0_50, %c0_51] : memref<1x32xf32, #tpu.memory_space<vmem>>, vector<1x32xf32>
    %cst_52 = arith.constant dense<0.000000e+00> : vector<47xf32>
    %97 = vector.multi_reduction <add>, %94, %cst_52 [1] : vector<47x32xf32> to vector<47xf32>
    %98 = vector.shape_cast %97 : vector<47xf32> to vector<47x1xf32>
    %cst_53 = arith.constant 3.200000e+01 : f32
    %99 = vector.broadcast %cst_53 : f32 to vector<47x1xf32>
    %100 = arith.divf %98, %99 : vector<47x1xf32>
    %101 = vector.broadcast %100 : vector<47x1xf32> to vector<47x32xf32>
    %102 = arith.subf %94, %101 : vector<47x32xf32>
    %103 = arith.mulf %102, %102 : vector<47x32xf32>
    %cst_54 = arith.constant dense<0.000000e+00> : vector<47xf32>
    %104 = vector.multi_reduction <add>, %103, %cst_54 [1] : vector<47x32xf32> to vector<47xf32>
    %105 = vector.shape_cast %104 : vector<47xf32> to vector<47x1xf32>
    %cst_55 = arith.constant 3.200000e+01 : f32
    %106 = vector.broadcast %cst_55 : f32 to vector<47x1xf32>
    %107 = arith.divf %105, %106 : vector<47x1xf32>
    %108 = vector.broadcast %100 : vector<47x1xf32> to vector<47x32xf32>
    %109 = arith.subf %94, %108 : vector<47x32xf32>
    %cst_56 = arith.constant 9.99999974E-6 : f32
    %110 = vector.broadcast %cst_56 : f32 to vector<47x1xf32>
    %111 = arith.addf %107, %110 : vector<47x1xf32>
    %112 = math.rsqrt %111 : vector<47x1xf32>
    %113 = vector.broadcast %112 : vector<47x1xf32> to vector<47x32xf32>
    %114 = arith.mulf %109, %113 : vector<47x32xf32>
    %115 = vector.broadcast %95 : vector<1x32xf32> to vector<47x32xf32>
    %116 = arith.mulf %114, %115 : vector<47x32xf32>
    %117 = vector.broadcast %96 : vector<1x32xf32> to vector<47x32xf32>
    %118 = arith.addf %116, %117 : vector<47x32xf32>
    %c0_57 = arith.constant 0 : index
    %c0_58 = arith.constant 0 : index
    %119 = vector.load %arg9[%c0_57, %c0_58] : memref<32x64xbf16, #tpu.memory_space<vmem>>, vector<32x64xbf16>
    %120 = arith.truncf %118 : vector<47x32xf32> to vector<47x32xbf16>
    %cst_59 = arith.constant dense<0.000000e+00> : vector<47x64xf32>
    %121 = tpu.matmul %120, %119, %cst_59 {dimension_numbers = #tpu.dot_dimension_numbers<[1], [0], [0], [1], [0, 0, 1, 1], [], []>} : vector<47x32xbf16>, vector<32x64xbf16>, vector<47x64xf32> -> vector<47x64xf32>
    %c0_60 = arith.constant 0 : index
    %c0_61 = arith.constant 0 : index
    %122 = vector.load %arg10[%c0_60, %c0_61] : memref<1x64xf32, #tpu.memory_space<vmem>>, vector<1x64xf32>
    %123 = vector.broadcast %122 : vector<1x64xf32> to vector<47x64xf32>
    %124 = arith.addf %121, %123 : vector<47x64xf32>
    %cst_62 = arith.constant 0.000000e+00 : f32
    %125 = vector.broadcast %cst_62 : f32 to vector<49x64xf32>
    %c0_63 = arith.constant 0 : index
    %c0_64 = arith.constant 0 : index
    %126 = vector.load %arg31[%c0_63, %c0_64] : memref<49x64xf32, #tpu.memory_space<vmem>>, vector<49x64xf32>
    tpu.vector_store %arg31[%c0_63, %c0_64], %125 {strides = array<i32>} : memref<49x64xf32, #tpu.memory_space<vmem>>, vector<49x64xf32>,
    %c1_65 = arith.constant 1 : index
    %c0_66 = arith.constant 0 : index
    %127 = vector.load %arg31[%c1_65, %c0_66] : memref<49x64xf32, #tpu.memory_space<vmem>>, vector<47x64xf32>
    tpu.vector_store %arg31[%c1_65, %c0_66], %124 {strides = array<i32>} : memref<49x64xf32, #tpu.memory_space<vmem>>, vector<47x64xf32>,
    %cst_67 = arith.constant 0.000000e+00 : f32
    %128 = vector.broadcast %cst_67 : f32 to vector<47x64xf32>
    %c0_68 = arith.constant 0 : index
    %c0_69 = arith.constant 0 : index
    %129 = vector.load %arg31[%c0_68, %c0_69] : memref<49x64xf32, #tpu.memory_space<vmem>>, vector<47x64xf32>
    %c0_70 = arith.constant 0 : index
    %c0_71 = arith.constant 0 : index
    %c0_72 = arith.constant 0 : index
    %130 = vector.load %arg11[%c0_70, %c0_71, %c0_72] : memref<3x64x64xbf16, #tpu.memory_space<vmem>>, vector<1x64x64xbf16>
    %131 = vector.shape_cast %130 : vector<1x64x64xbf16> to vector<64x64xbf16>
    %132 = arith.truncf %129 : vector<47x64xf32> to vector<47x64xbf16>
    %cst_73 = arith.constant dense<0.000000e+00> : vector<47x64xf32>
    %133 = tpu.matmul %132, %131, %cst_73 {dimension_numbers = #tpu.dot_dimension_numbers<[1], [0], [0], [1], [0, 0, 1, 1], [], []>} : vector<47x64xbf16>, vector<64x64xbf16>, vector<47x64xf32> -> vector<47x64xf32>
    %134 = arith.addf %128, %133 : vector<47x64xf32>
    %c1_74 = arith.constant 1 : index
    %c0_75 = arith.constant 0 : index
    %135 = vector.load %arg31[%c1_74, %c0_75] : memref<49x64xf32, #tpu.memory_space<vmem>>, vector<47x64xf32>
    %c1_76 = arith.constant 1 : index
    %c0_77 = arith.constant 0 : index
    %c0_78 = arith.constant 0 : index
    %136 = vector.load %arg11[%c1_76, %c0_77, %c0_78] : memref<3x64x64xbf16, #tpu.memory_space<vmem>>, vector<1x64x64xbf16>
    %137 = vector.shape_cast %136 : vector<1x64x64xbf16> to vector<64x64xbf16>
    %138 = arith.truncf %135 : vector<47x64xf32> to vector<47x64xbf16>
    %cst_79 = arith.constant dense<0.000000e+00> : vector<47x64xf32>
    %139 = tpu.matmul %138, %137, %cst_79 {dimension_numbers = #tpu.dot_dimension_numbers<[1], [0], [0], [1], [0, 0, 1, 1], [], []>} : vector<47x64xbf16>, vector<64x64xbf16>, vector<47x64xf32> -> vector<47x64xf32>
    %140 = arith.addf %134, %139 : vector<47x64xf32>
    %c2_80 = arith.constant 2 : index
    %c0_81 = arith.constant 0 : index
    %141 = vector.load %arg31[%c2_80, %c0_81] : memref<49x64xf32, #tpu.memory_space<vmem>>, vector<47x64xf32>
    %c2_82 = arith.constant 2 : index
    %c0_83 = arith.constant 0 : index
    %c0_84 = arith.constant 0 : index
    %142 = vector.load %arg11[%c2_82, %c0_83, %c0_84] : memref<3x64x64xbf16, #tpu.memory_space<vmem>>, vector<1x64x64xbf16>
    %143 = vector.shape_cast %142 : vector<1x64x64xbf16> to vector<64x64xbf16>
    %144 = arith.truncf %141 : vector<47x64xf32> to vector<47x64xbf16>
    %cst_85 = arith.constant dense<0.000000e+00> : vector<47x64xf32>
    %145 = tpu.matmul %144, %143, %cst_85 {dimension_numbers = #tpu.dot_dimension_numbers<[1], [0], [0], [1], [0, 0, 1, 1], [], []>} : vector<47x64xbf16>, vector<64x64xbf16>, vector<47x64xf32> -> vector<47x64xf32>
    %146 = arith.addf %140, %145 : vector<47x64xf32>
    %c0_86 = arith.constant 0 : index
    %c0_87 = arith.constant 0 : index
    %147 = vector.load %arg12[%c0_86, %c0_87] : memref<1x64xf32, #tpu.memory_space<vmem>>, vector<1x64xf32>
    %148 = vector.broadcast %147 : vector<1x64xf32> to vector<47x64xf32>
    %149 = arith.addf %146, %148 : vector<47x64xf32>
    %150 = arith.mulf %149, %149 : vector<47x64xf32>
    %151 = arith.mulf %149, %150 : vector<47x64xf32>
    %cst_88 = arith.constant 4.471500e-02 : f32
    %152 = vector.broadcast %cst_88 : f32 to vector<47x64xf32>
    %153 = arith.mulf %152, %151 : vector<47x64xf32>
    %154 = arith.addf %149, %153 : vector<47x64xf32>
    %cst_89 = arith.constant 0.797884583 : f32
    %155 = vector.broadcast %cst_89 : f32 to vector<47x64xf32>
    %156 = arith.mulf %155, %154 : vector<47x64xf32>
    %157 = math.tanh %156 : vector<47x64xf32>
    %cst_90 = arith.constant 1.000000e+00 : f32
    %158 = vector.broadcast %cst_90 : f32 to vector<47x64xf32>
    %159 = arith.addf %158, %157 : vector<47x64xf32>
    %cst_91 = arith.constant 5.000000e-01 : f32
    %160 = vector.broadcast %cst_91 : f32 to vector<47x64xf32>
    %161 = arith.mulf %160, %159 : vector<47x64xf32>
    %162 = arith.mulf %149, %161 : vector<47x64xf32>
    %163 = arith.addf %124, %162 : vector<47x64xf32>
    %c0_92 = arith.constant 0 : index
    %c0_93 = arith.constant 0 : index
    %c0_94 = arith.constant 0 : index
    %164 = vector.load %arg13[%c0_92, %c0_93, %c0_94] : memref<2x64x192xbf16, #tpu.memory_space<vmem>>, vector<1x64x192xbf16>
    %165 = vector.shape_cast %164 : vector<1x64x192xbf16> to vector<64x192xbf16>
    %166 = arith.truncf %163 : vector<47x64xf32> to vector<47x64xbf16>
    %cst_95 = arith.constant dense<0.000000e+00> : vector<47x192xf32>
    %167 = tpu.matmul %166, %165, %cst_95 {dimension_numbers = #tpu.dot_dimension_numbers<[1], [0], [0], [1], [0, 0, 1, 1], [], []>} : vector<47x64xbf16>, vector<64x192xbf16>, vector<47x192xf32> -> vector<47x192xf32>
    %c0_96 = arith.constant 0 : index
    %c0_97 = arith.constant 0 : index
    %c0_98 = arith.constant 0 : index
    %168 = vector.load %arg14[%c0_96, %c0_97, %c0_98] : memref<2x1x192xf32, #tpu.memory_space<vmem>>, vector<1x1x192xf32>
    %169 = vector.shape_cast %168 : vector<1x1x192xf32> to vector<1x192xf32>
    %170 = vector.broadcast %169 : vector<1x192xf32> to vector<47x192xf32>
    %171 = arith.addf %167, %170 : vector<47x192xf32>
    %c0_99 = arith.constant 0 : index
    %c0_100 = arith.constant 0 : index
    %172 = vector.load %arg32[%c0_99, %c0_100] : memref<47x192xf32, #tpu.memory_space<vmem>>, vector<47x192xf32>
    tpu.vector_store %arg32[%c0_99, %c0_100], %171 {strides = array<i32>} : memref<47x192xf32, #tpu.memory_space<vmem>>, vector<47x192xf32>,
    %c0_101 = arith.constant 0 : index
    %c0_102 = arith.constant 0 : index
    %c0_103 = arith.constant 0 : index
    %173 = vector.load %arg15[%c0_101, %c0_102, %c0_103] : memref<2x64x64xbf16, #tpu.memory_space<vmem>>, vector<1x64x64xbf16>
    %174 = vector.shape_cast %173 : vector<1x64x64xbf16> to vector<64x64xbf16>
    %cst_104 = arith.constant 0.000000e+00 : f32
    %175 = vector.broadcast %cst_104 : f32 to vector<47x64xf32>
    %c0_105 = arith.constant 0 : index
    %c0_106 = arith.constant 0 : index
    %176 = vector.load %arg32[%c0_105, %c0_106] : memref<47x192xf32, #tpu.memory_space<vmem>>, vector<47x16xf32>
    %c0_107 = arith.constant 0 : index
    %c64 = arith.constant 64 : index
    %177 = vector.load %arg32[%c0_107, %c64] : memref<47x192xf32, #tpu.memory_space<vmem>>, vector<47x16xf32>
    %c0_108 = arith.constant 0 : index
    %c128 = arith.constant 128 : index
    %178 = vector.load %arg32[%c0_108, %c128] : memref<47x192xf32, #tpu.memory_space<vmem>>, vector<47x16xf32>
    %179 = arith.truncf %176 : vector<47x16xf32> to vector<47x16xbf16>
    %180 = arith.truncf %177 : vector<47x16xf32> to vector<47x16xbf16>
    %cst_109 = arith.constant dense<0.000000e+00> : vector<47x47xf32>
    %181 = tpu.matmul %179, %180, %cst_109 {dimension_numbers = #tpu.dot_dimension_numbers<[1], [1], [0], [0], [0, 0, 1, 0], [], []>} : vector<47x16xbf16>, vector<47x16xbf16>, vector<47x47xf32> -> vector<47x47xf32>
    %cst_110 = arith.constant dense<0xFF800000> : vector<47xf32>
    %182 = vector.multi_reduction <maximumf>, %181, %cst_110 [1] : vector<47x47xf32> to vector<47xf32>
    %183 = vector.shape_cast %182 : vector<47xf32> to vector<47x1xf32>
    %184 = vector.broadcast %183 : vector<47x1xf32> to vector<47x47xf32>
    %185 = arith.subf %181, %184 : vector<47x47xf32>
    %186 = math.exp %185 : vector<47x47xf32>
    %cst_111 = arith.constant dense<0.000000e+00> : vector<47xf32>
    %187 = vector.multi_reduction <add>, %186, %cst_111 [1] : vector<47x47xf32> to vector<47xf32>
    %188 = vector.shape_cast %187 : vector<47xf32> to vector<47x1xf32>
    %189 = tpu.reciprocal %188 {approx = true} : vector<47x1xf32> -> vector<47x1xf32>
    %190 = vector.broadcast %189 : vector<47x1xf32> to vector<47x47xf32>
    %191 = arith.mulf %186, %190 : vector<47x47xf32>
    %192 = arith.truncf %191 : vector<47x47xf32> to vector<47x47xbf16>
    %193 = arith.truncf %178 : vector<47x16xf32> to vector<47x16xbf16>
    %cst_112 = arith.constant dense<0.000000e+00> : vector<47x16xf32>
    %194 = tpu.matmul %192, %193, %cst_112 {dimension_numbers = #tpu.dot_dimension_numbers<[1], [0], [0], [1], [0, 0, 1, 1], [], []>} : vector<47x47xbf16>, vector<47x16xbf16>, vector<47x16xf32> -> vector<47x16xf32>
    %195 = vector.extract_strided_slice %174 {offsets = [0, 0], sizes = [16, 64], strides = [1, 1]} : vector<64x64xbf16> to vector<16x64xbf16>
    %196 = arith.truncf %194 : vector<47x16xf32> to vector<47x16xbf16>
    %cst_113 = arith.constant dense<0.000000e+00> : vector<47x64xf32>
    %197 = tpu.matmul %196, %195, %cst_113 {dimension_numbers = #tpu.dot_dimension_numbers<[1], [0], [0], [1], [0, 0, 1, 1], [], []>} : vector<47x16xbf16>, vector<16x64xbf16>, vector<47x64xf32> -> vector<47x64xf32>
    %198 = arith.addf %175, %197 : vector<47x64xf32>
    %c0_114 = arith.constant 0 : index
    %c16 = arith.constant 16 : index
    %199 = vector.load %arg32[%c0_114, %c16] : memref<47x192xf32, #tpu.memory_space<vmem>>, vector<47x16xf32>
    %c0_115 = arith.constant 0 : index
    %c80 = arith.constant 80 : index
    %200 = vector.load %arg32[%c0_115, %c80] : memref<47x192xf32, #tpu.memory_space<vmem>>, vector<47x16xf32>
    %c0_116 = arith.constant 0 : index
    %c144 = arith.constant 144 : index
    %201 = vector.load %arg32[%c0_116, %c144] : memref<47x192xf32, #tpu.memory_space<vmem>>, vector<47x16xf32>
    %202 = arith.truncf %199 : vector<47x16xf32> to vector<47x16xbf16>
    %203 = arith.truncf %200 : vector<47x16xf32> to vector<47x16xbf16>
    %cst_117 = arith.constant dense<0.000000e+00> : vector<47x47xf32>
    %204 = tpu.matmul %202, %203, %cst_117 {dimension_numbers = #tpu.dot_dimension_numbers<[1], [1], [0], [0], [0, 0, 1, 0], [], []>} : vector<47x16xbf16>, vector<47x16xbf16>, vector<47x47xf32> -> vector<47x47xf32>
    %cst_118 = arith.constant dense<0xFF800000> : vector<47xf32>
    %205 = vector.multi_reduction <maximumf>, %204, %cst_118 [1] : vector<47x47xf32> to vector<47xf32>
    %206 = vector.shape_cast %205 : vector<47xf32> to vector<47x1xf32>
    %207 = vector.broadcast %206 : vector<47x1xf32> to vector<47x47xf32>
    %208 = arith.subf %204, %207 : vector<47x47xf32>
    %209 = math.exp %208 : vector<47x47xf32>
    %cst_119 = arith.constant dense<0.000000e+00> : vector<47xf32>
    %210 = vector.multi_reduction <add>, %209, %cst_119 [1] : vector<47x47xf32> to vector<47xf32>
    %211 = vector.shape_cast %210 : vector<47xf32> to vector<47x1xf32>
    %212 = tpu.reciprocal %211 {approx = true} : vector<47x1xf32> -> vector<47x1xf32>
    %213 = vector.broadcast %212 : vector<47x1xf32> to vector<47x47xf32>
    %214 = arith.mulf %209, %213 : vector<47x47xf32>
    %215 = arith.truncf %214 : vector<47x47xf32> to vector<47x47xbf16>
    %216 = arith.truncf %201 : vector<47x16xf32> to vector<47x16xbf16>
    %cst_120 = arith.constant dense<0.000000e+00> : vector<47x16xf32>
    %217 = tpu.matmul %215, %216, %cst_120 {dimension_numbers = #tpu.dot_dimension_numbers<[1], [0], [0], [1], [0, 0, 1, 1], [], []>} : vector<47x47xbf16>, vector<47x16xbf16>, vector<47x16xf32> -> vector<47x16xf32>
    %218 = vector.extract_strided_slice %174 {offsets = [16, 0], sizes = [16, 64], strides = [1, 1]} : vector<64x64xbf16> to vector<16x64xbf16>
    %219 = arith.truncf %217 : vector<47x16xf32> to vector<47x16xbf16>
    %cst_121 = arith.constant dense<0.000000e+00> : vector<47x64xf32>
    %220 = tpu.matmul %219, %218, %cst_121 {dimension_numbers = #tpu.dot_dimension_numbers<[1], [0], [0], [1], [0, 0, 1, 1], [], []>} : vector<47x16xbf16>, vector<16x64xbf16>, vector<47x64xf32> -> vector<47x64xf32>
    %221 = arith.addf %198, %220 : vector<47x64xf32>
    %c0_122 = arith.constant 0 : index
    %c32 = arith.constant 32 : index
    %222 = vector.load %arg32[%c0_122, %c32] : memref<47x192xf32, #tpu.memory_space<vmem>>, vector<47x16xf32>
    %c0_123 = arith.constant 0 : index
    %c96 = arith.constant 96 : index
    %223 = vector.load %arg32[%c0_123, %c96] : memref<47x192xf32, #tpu.memory_space<vmem>>, vector<47x16xf32>
    %c0_124 = arith.constant 0 : index
    %c160 = arith.constant 160 : index
    %224 = vector.load %arg32[%c0_124, %c160] : memref<47x192xf32, #tpu.memory_space<vmem>>, vector<47x16xf32>
    %225 = arith.truncf %222 : vector<47x16xf32> to vector<47x16xbf16>
    %226 = arith.truncf %223 : vector<47x16xf32> to vector<47x16xbf16>
    %cst_125 = arith.constant dense<0.000000e+00> : vector<47x47xf32>
    %227 = tpu.matmul %225, %226, %cst_125 {dimension_numbers = #tpu.dot_dimension_numbers<[1], [1], [0], [0], [0, 0, 1, 0], [], []>} : vector<47x16xbf16>, vector<47x16xbf16>, vector<47x47xf32> -> vector<47x47xf32>
    %cst_126 = arith.constant dense<0xFF800000> : vector<47xf32>
    %228 = vector.multi_reduction <maximumf>, %227, %cst_126 [1] : vector<47x47xf32> to vector<47xf32>
    %229 = vector.shape_cast %228 : vector<47xf32> to vector<47x1xf32>
    %230 = vector.broadcast %229 : vector<47x1xf32> to vector<47x47xf32>
    %231 = arith.subf %227, %230 : vector<47x47xf32>
    %232 = math.exp %231 : vector<47x47xf32>
    %cst_127 = arith.constant dense<0.000000e+00> : vector<47xf32>
    %233 = vector.multi_reduction <add>, %232, %cst_127 [1] : vector<47x47xf32> to vector<47xf32>
    %234 = vector.shape_cast %233 : vector<47xf32> to vector<47x1xf32>
    %235 = tpu.reciprocal %234 {approx = true} : vector<47x1xf32> -> vector<47x1xf32>
    %236 = vector.broadcast %235 : vector<47x1xf32> to vector<47x47xf32>
    %237 = arith.mulf %232, %236 : vector<47x47xf32>
    %238 = arith.truncf %237 : vector<47x47xf32> to vector<47x47xbf16>
    %239 = arith.truncf %224 : vector<47x16xf32> to vector<47x16xbf16>
    %cst_128 = arith.constant dense<0.000000e+00> : vector<47x16xf32>
    %240 = tpu.matmul %238, %239, %cst_128 {dimension_numbers = #tpu.dot_dimension_numbers<[1], [0], [0], [1], [0, 0, 1, 1], [], []>} : vector<47x47xbf16>, vector<47x16xbf16>, vector<47x16xf32> -> vector<47x16xf32>
    %241 = vector.extract_strided_slice %174 {offsets = [32, 0], sizes = [16, 64], strides = [1, 1]} : vector<64x64xbf16> to vector<16x64xbf16>
    %242 = arith.truncf %240 : vector<47x16xf32> to vector<47x16xbf16>
    %cst_129 = arith.constant dense<0.000000e+00> : vector<47x64xf32>
    %243 = tpu.matmul %242, %241, %cst_129 {dimension_numbers = #tpu.dot_dimension_numbers<[1], [0], [0], [1], [0, 0, 1, 1], [], []>} : vector<47x16xbf16>, vector<16x64xbf16>, vector<47x64xf32> -> vector<47x64xf32>
    %244 = arith.addf %221, %243 : vector<47x64xf32>
    %c0_130 = arith.constant 0 : index
    %c48 = arith.constant 48 : index
    %245 = vector.load %arg32[%c0_130, %c48] : memref<47x192xf32, #tpu.memory_space<vmem>>, vector<47x16xf32>
    %c0_131 = arith.constant 0 : index
    %c112 = arith.constant 112 : index
    %246 = vector.load %arg32[%c0_131, %c112] : memref<47x192xf32, #tpu.memory_space<vmem>>, vector<47x16xf32>
    %c0_132 = arith.constant 0 : index
    %c176 = arith.constant 176 : index
    %247 = vector.load %arg32[%c0_132, %c176] : memref<47x192xf32, #tpu.memory_space<vmem>>, vector<47x16xf32>
    %248 = arith.truncf %245 : vector<47x16xf32> to vector<47x16xbf16>
    %249 = arith.truncf %246 : vector<47x16xf32> to vector<47x16xbf16>
    %cst_133 = arith.constant dense<0.000000e+00> : vector<47x47xf32>
    %250 = tpu.matmul %248, %249, %cst_133 {dimension_numbers = #tpu.dot_dimension_numbers<[1], [1], [0], [0], [0, 0, 1, 0], [], []>} : vector<47x16xbf16>, vector<47x16xbf16>, vector<47x47xf32> -> vector<47x47xf32>
    %cst_134 = arith.constant dense<0xFF800000> : vector<47xf32>
    %251 = vector.multi_reduction <maximumf>, %250, %cst_134 [1] : vector<47x47xf32> to vector<47xf32>
    %252 = vector.shape_cast %251 : vector<47xf32> to vector<47x1xf32>
    %253 = vector.broadcast %252 : vector<47x1xf32> to vector<47x47xf32>
    %254 = arith.subf %250, %253 : vector<47x47xf32>
    %255 = math.exp %254 : vector<47x47xf32>
    %cst_135 = arith.constant dense<0.000000e+00> : vector<47xf32>
    %256 = vector.multi_reduction <add>, %255, %cst_135 [1] : vector<47x47xf32> to vector<47xf32>
    %257 = vector.shape_cast %256 : vector<47xf32> to vector<47x1xf32>
    %258 = tpu.reciprocal %257 {approx = true} : vector<47x1xf32> -> vector<47x1xf32>
    %259 = vector.broadcast %258 : vector<47x1xf32> to vector<47x47xf32>
    %260 = arith.mulf %255, %259 : vector<47x47xf32>
    %261 = arith.truncf %260 : vector<47x47xf32> to vector<47x47xbf16>
    %262 = arith.truncf %247 : vector<47x16xf32> to vector<47x16xbf16>
    %cst_136 = arith.constant dense<0.000000e+00> : vector<47x16xf32>
    %263 = tpu.matmul %261, %262, %cst_136 {dimension_numbers = #tpu.dot_dimension_numbers<[1], [0], [0], [1], [0, 0, 1, 1], [], []>} : vector<47x47xbf16>, vector<47x16xbf16>, vector<47x16xf32> -> vector<47x16xf32>
    %264 = vector.extract_strided_slice %174 {offsets = [48, 0], sizes = [16, 64], strides = [1, 1]} : vector<64x64xbf16> to vector<16x64xbf16>
    %265 = arith.truncf %263 : vector<47x16xf32> to vector<47x16xbf16>
    %cst_137 = arith.constant dense<0.000000e+00> : vector<47x64xf32>
    %266 = tpu.matmul %265, %264, %cst_137 {dimension_numbers = #tpu.dot_dimension_numbers<[1], [0], [0], [1], [0, 0, 1, 1], [], []>} : vector<47x16xbf16>, vector<16x64xbf16>, vector<47x64xf32> -> vector<47x64xf32>
    %267 = arith.addf %244, %266 : vector<47x64xf32>
    %c0_138 = arith.constant 0 : index
    %c0_139 = arith.constant 0 : index
    %c0_140 = arith.constant 0 : index
    %268 = vector.load %arg16[%c0_138, %c0_139, %c0_140] : memref<2x1x64xf32, #tpu.memory_space<vmem>>, vector<1x1x64xf32>
    %269 = vector.shape_cast %268 : vector<1x1x64xf32> to vector<1x64xf32>
    %270 = vector.broadcast %269 : vector<1x64xf32> to vector<47x64xf32>
    %271 = arith.addf %267, %270 : vector<47x64xf32>
    %272 = arith.addf %163, %271 : vector<47x64xf32>
    %c0_141 = arith.constant 0 : index
    %c0_142 = arith.constant 0 : index
    %c0_143 = arith.constant 0 : index
    %273 = vector.load %arg17[%c0_141, %c0_142, %c0_143] : memref<2x1x64xf32, #tpu.memory_space<vmem>>, vector<1x1x64xf32>
    %274 = vector.shape_cast %273 : vector<1x1x64xf32> to vector<1x64xf32>
    %c0_144 = arith.constant 0 : index
    %c0_145 = arith.constant 0 : index
    %c0_146 = arith.constant 0 : index
    %275 = vector.load %arg18[%c0_144, %c0_145, %c0_146] : memref<2x1x64xf32, #tpu.memory_space<vmem>>, vector<1x1x64xf32>
    %276 = vector.shape_cast %275 : vector<1x1x64xf32> to vector<1x64xf32>
    %cst_147 = arith.constant dense<0.000000e+00> : vector<47xf32>
    %277 = vector.multi_reduction <add>, %272, %cst_147 [1] : vector<47x64xf32> to vector<47xf32>
    %278 = vector.shape_cast %277 : vector<47xf32> to vector<47x1xf32>
    %cst_148 = arith.constant 6.400000e+01 : f32
    %279 = vector.broadcast %cst_148 : f32 to vector<47x1xf32>
    %280 = arith.divf %278, %279 : vector<47x1xf32>
    %281 = vector.broadcast %280 : vector<47x1xf32> to vector<47x64xf32>
    %282 = arith.subf %272, %281 : vector<47x64xf32>
    %283 = arith.mulf %282, %282 : vector<47x64xf32>
    %cst_149 = arith.constant dense<0.000000e+00> : vector<47xf32>
    %284 = vector.multi_reduction <add>, %283, %cst_149 [1] : vector<47x64xf32> to vector<47xf32>
    %285 = vector.shape_cast %284 : vector<47xf32> to vector<47x1xf32>
    %cst_150 = arith.constant 6.400000e+01 : f32
    %286 = vector.broadcast %cst_150 : f32 to vector<47x1xf32>
    %287 = arith.divf %285, %286 : vector<47x1xf32>
    %288 = vector.broadcast %280 : vector<47x1xf32> to vector<47x64xf32>
    %289 = arith.subf %272, %288 : vector<47x64xf32>
    %cst_151 = arith.constant 9.99999974E-6 : f32
    %290 = vector.broadcast %cst_151 : f32 to vector<47x1xf32>
    %291 = arith.addf %287, %290 : vector<47x1xf32>
    %292 = math.rsqrt %291 : vector<47x1xf32>
    %293 = vector.broadcast %292 : vector<47x1xf32> to vector<47x64xf32>
    %294 = arith.mulf %289, %293 : vector<47x64xf32>
    %295 = vector.broadcast %274 : vector<1x64xf32> to vector<47x64xf32>
    %296 = arith.mulf %294, %295 : vector<47x64xf32>
    %297 = vector.broadcast %276 : vector<1x64xf32> to vector<47x64xf32>
    %298 = arith.addf %296, %297 : vector<47x64xf32>
    %c0_152 = arith.constant 0 : index
    %c0_153 = arith.constant 0 : index
    %c0_154 = arith.constant 0 : index
    %299 = vector.load %arg19[%c0_152, %c0_153, %c0_154] : memref<2x64x128xbf16, #tpu.memory_space<vmem>>, vector<1x64x128xbf16>
    %300 = vector.shape_cast %299 : vector<1x64x128xbf16> to vector<64x128xbf16>
    %301 = arith.truncf %298 : vector<47x64xf32> to vector<47x64xbf16>
    %cst_155 = arith.constant dense<0.000000e+00> : vector<47x128xf32>
    %302 = tpu.matmul %301, %300, %cst_155 {dimension_numbers = #tpu.dot_dimension_numbers<[1], [0], [0], [1], [0, 0, 1, 1], [], []>} : vector<47x64xbf16>, vector<64x128xbf16>, vector<47x128xf32> -> vector<47x128xf32>
    %c0_156 = arith.constant 0 : index
    %c0_157 = arith.constant 0 : index
    %c0_158 = arith.constant 0 : index
    %303 = vector.load %arg20[%c0_156, %c0_157, %c0_158] : memref<2x1x128xf32, #tpu.memory_space<vmem>>, vector<1x1x128xf32>
    %304 = vector.shape_cast %303 : vector<1x1x128xf32> to vector<1x128xf32>
    %305 = vector.broadcast %304 : vector<1x128xf32> to vector<47x128xf32>
    %306 = arith.addf %302, %305 : vector<47x128xf32>
    %307 = arith.mulf %306, %306 : vector<47x128xf32>
    %308 = arith.mulf %306, %307 : vector<47x128xf32>
    %cst_159 = arith.constant 4.471500e-02 : f32
    %309 = vector.broadcast %cst_159 : f32 to vector<47x128xf32>
    %310 = arith.mulf %309, %308 : vector<47x128xf32>
    %311 = arith.addf %306, %310 : vector<47x128xf32>
    %cst_160 = arith.constant 0.797884583 : f32
    %312 = vector.broadcast %cst_160 : f32 to vector<47x128xf32>
    %313 = arith.mulf %312, %311 : vector<47x128xf32>
    %314 = math.tanh %313 : vector<47x128xf32>
    %cst_161 = arith.constant 1.000000e+00 : f32
    %315 = vector.broadcast %cst_161 : f32 to vector<47x128xf32>
    %316 = arith.addf %315, %314 : vector<47x128xf32>
    %cst_162 = arith.constant 5.000000e-01 : f32
    %317 = vector.broadcast %cst_162 : f32 to vector<47x128xf32>
    %318 = arith.mulf %317, %316 : vector<47x128xf32>
    %319 = arith.mulf %306, %318 : vector<47x128xf32>
    %c0_163 = arith.constant 0 : index
    %c0_164 = arith.constant 0 : index
    %c0_165 = arith.constant 0 : index
    %320 = vector.load %arg21[%c0_163, %c0_164, %c0_165] : memref<2x128x64xbf16, #tpu.memory_space<vmem>>, vector<1x128x64xbf16>
    %321 = vector.shape_cast %320 : vector<1x128x64xbf16> to vector<128x64xbf16>
    %322 = arith.truncf %319 : vector<47x128xf32> to vector<47x128xbf16>
    %cst_166 = arith.constant dense<0.000000e+00> : vector<47x64xf32>
    %323 = tpu.matmul %322, %321, %cst_166 {dimension_numbers = #tpu.dot_dimension_numbers<[1], [0], [0], [1], [0, 0, 1, 1], [], []>} : vector<47x128xbf16>, vector<128x64xbf16>, vector<47x64xf32> -> vector<47x64xf32>
    %c0_167 = arith.constant 0 : index
    %c0_168 = arith.constant 0 : index
    %c0_169 = arith.constant 0 : index
    %324 = vector.load %arg22[%c0_167, %c0_168, %c0_169] : memref<2x1x64xf32, #tpu.memory_space<vmem>>, vector<1x1x64xf32>
    %325 = vector.shape_cast %324 : vector<1x1x64xf32> to vector<1x64xf32>
    %326 = vector.broadcast %325 : vector<1x64xf32> to vector<47x64xf32>
    %327 = arith.addf %323, %326 : vector<47x64xf32>
    %328 = arith.addf %298, %327 : vector<47x64xf32>
    %c0_170 = arith.constant 0 : index
    %c0_171 = arith.constant 0 : index
    %c0_172 = arith.constant 0 : index
    %329 = vector.load %arg23[%c0_170, %c0_171, %c0_172] : memref<2x1x64xf32, #tpu.memory_space<vmem>>, vector<1x1x64xf32>
    %330 = vector.shape_cast %329 : vector<1x1x64xf32> to vector<1x64xf32>
    %c0_173 = arith.constant 0 : index
    %c0_174 = arith.constant 0 : index
    %c0_175 = arith.constant 0 : index
    %331 = vector.load %arg24[%c0_173, %c0_174, %c0_175] : memref<2x1x64xf32, #tpu.memory_space<vmem>>, vector<1x1x64xf32>
    %332 = vector.shape_cast %331 : vector<1x1x64xf32> to vector<1x64xf32>
    %cst_176 = arith.constant dense<0.000000e+00> : vector<47xf32>
    %333 = vector.multi_reduction <add>, %328, %cst_176 [1] : vector<47x64xf32> to vector<47xf32>
    %334 = vector.shape_cast %333 : vector<47xf32> to vector<47x1xf32>
    %cst_177 = arith.constant 6.400000e+01 : f32
    %335 = vector.broadcast %cst_177 : f32 to vector<47x1xf32>
    %336 = arith.divf %334, %335 : vector<47x1xf32>
    %337 = vector.broadcast %336 : vector<47x1xf32> to vector<47x64xf32>
    %338 = arith.subf %328, %337 : vector<47x64xf32>
    %339 = arith.mulf %338, %338 : vector<47x64xf32>
    %cst_178 = arith.constant dense<0.000000e+00> : vector<47xf32>
    %340 = vector.multi_reduction <add>, %339, %cst_178 [1] : vector<47x64xf32> to vector<47xf32>
    %341 = vector.shape_cast %340 : vector<47xf32> to vector<47x1xf32>
    %cst_179 = arith.constant 6.400000e+01 : f32
    %342 = vector.broadcast %cst_179 : f32 to vector<47x1xf32>
    %343 = arith.divf %341, %342 : vector<47x1xf32>
    %344 = vector.broadcast %336 : vector<47x1xf32> to vector<47x64xf32>
    %345 = arith.subf %328, %344 : vector<47x64xf32>
    %cst_180 = arith.constant 9.99999974E-6 : f32
    %346 = vector.broadcast %cst_180 : f32 to vector<47x1xf32>
    %347 = arith.addf %343, %346 : vector<47x1xf32>
    %348 = math.rsqrt %347 : vector<47x1xf32>
    %349 = vector.broadcast %348 : vector<47x1xf32> to vector<47x64xf32>
    %350 = arith.mulf %345, %349 : vector<47x64xf32>
    %351 = vector.broadcast %330 : vector<1x64xf32> to vector<47x64xf32>
    %352 = arith.mulf %350, %351 : vector<47x64xf32>
    %353 = vector.broadcast %332 : vector<1x64xf32> to vector<47x64xf32>
    %354 = arith.addf %352, %353 : vector<47x64xf32>
    %c1_181 = arith.constant 1 : index
    %c0_182 = arith.constant 0 : index
    %c0_183 = arith.constant 0 : index
    %355 = vector.load %arg13[%c1_181, %c0_182, %c0_183] : memref<2x64x192xbf16, #tpu.memory_space<vmem>>, vector<1x64x192xbf16>
    %356 = vector.shape_cast %355 : vector<1x64x192xbf16> to vector<64x192xbf16>
    %357 = arith.truncf %354 : vector<47x64xf32> to vector<47x64xbf16>
    %cst_184 = arith.constant dense<0.000000e+00> : vector<47x192xf32>
    %358 = tpu.matmul %357, %356, %cst_184 {dimension_numbers = #tpu.dot_dimension_numbers<[1], [0], [0], [1], [0, 0, 1, 1], [], []>} : vector<47x64xbf16>, vector<64x192xbf16>, vector<47x192xf32> -> vector<47x192xf32>
    %c1_185 = arith.constant 1 : index
    %c0_186 = arith.constant 0 : index
    %c0_187 = arith.constant 0 : index
    %359 = vector.load %arg14[%c1_185, %c0_186, %c0_187] : memref<2x1x192xf32, #tpu.memory_space<vmem>>, vector<1x1x192xf32>
    %360 = vector.shape_cast %359 : vector<1x1x192xf32> to vector<1x192xf32>
    %361 = vector.broadcast %360 : vector<1x192xf32> to vector<47x192xf32>
    %362 = arith.addf %358, %361 : vector<47x192xf32>
    %c0_188 = arith.constant 0 : index
    %c0_189 = arith.constant 0 : index
    %363 = vector.load %arg32[%c0_188, %c0_189] : memref<47x192xf32, #tpu.memory_space<vmem>>, vector<47x192xf32>
    tpu.vector_store %arg32[%c0_188, %c0_189], %362 {strides = array<i32>} : memref<47x192xf32, #tpu.memory_space<vmem>>, vector<47x192xf32>,
    %c1_190 = arith.constant 1 : index
    %c0_191 = arith.constant 0 : index
    %c0_192 = arith.constant 0 : index
    %364 = vector.load %arg15[%c1_190, %c0_191, %c0_192] : memref<2x64x64xbf16, #tpu.memory_space<vmem>>, vector<1x64x64xbf16>
    %365 = vector.shape_cast %364 : vector<1x64x64xbf16> to vector<64x64xbf16>
    %cst_193 = arith.constant 0.000000e+00 : f32
    %366 = vector.broadcast %cst_193 : f32 to vector<47x64xf32>
    %c0_194 = arith.constant 0 : index
    %c0_195 = arith.constant 0 : index
    %367 = vector.load %arg32[%c0_194, %c0_195] : memref<47x192xf32, #tpu.memory_space<vmem>>, vector<47x16xf32>
    %c0_196 = arith.constant 0 : index
    %c64_197 = arith.constant 64 : index
    %368 = vector.load %arg32[%c0_196, %c64_197] : memref<47x192xf32, #tpu.memory_space<vmem>>, vector<47x16xf32>
    %c0_198 = arith.constant 0 : index
    %c128_199 = arith.constant 128 : index
    %369 = vector.load %arg32[%c0_198, %c128_199] : memref<47x192xf32, #tpu.memory_space<vmem>>, vector<47x16xf32>
    %370 = arith.truncf %367 : vector<47x16xf32> to vector<47x16xbf16>
    %371 = arith.truncf %368 : vector<47x16xf32> to vector<47x16xbf16>
    %cst_200 = arith.constant dense<0.000000e+00> : vector<47x47xf32>
    %372 = tpu.matmul %370, %371, %cst_200 {dimension_numbers = #tpu.dot_dimension_numbers<[1], [1], [0], [0], [0, 0, 1, 0], [], []>} : vector<47x16xbf16>, vector<47x16xbf16>, vector<47x47xf32> -> vector<47x47xf32>
    %cst_201 = arith.constant dense<0xFF800000> : vector<47xf32>
    %373 = vector.multi_reduction <maximumf>, %372, %cst_201 [1] : vector<47x47xf32> to vector<47xf32>
    %374 = vector.shape_cast %373 : vector<47xf32> to vector<47x1xf32>
    %375 = vector.broadcast %374 : vector<47x1xf32> to vector<47x47xf32>
    %376 = arith.subf %372, %375 : vector<47x47xf32>
    %377 = math.exp %376 : vector<47x47xf32>
    %cst_202 = arith.constant dense<0.000000e+00> : vector<47xf32>
    %378 = vector.multi_reduction <add>, %377, %cst_202 [1] : vector<47x47xf32> to vector<47xf32>
    %379 = vector.shape_cast %378 : vector<47xf32> to vector<47x1xf32>
    %380 = tpu.reciprocal %379 {approx = true} : vector<47x1xf32> -> vector<47x1xf32>
    %381 = vector.broadcast %380 : vector<47x1xf32> to vector<47x47xf32>
    %382 = arith.mulf %377, %381 : vector<47x47xf32>
    %383 = arith.truncf %382 : vector<47x47xf32> to vector<47x47xbf16>
    %384 = arith.truncf %369 : vector<47x16xf32> to vector<47x16xbf16>
    %cst_203 = arith.constant dense<0.000000e+00> : vector<47x16xf32>
    %385 = tpu.matmul %383, %384, %cst_203 {dimension_numbers = #tpu.dot_dimension_numbers<[1], [0], [0], [1], [0, 0, 1, 1], [], []>} : vector<47x47xbf16>, vector<47x16xbf16>, vector<47x16xf32> -> vector<47x16xf32>
    %386 = vector.extract_strided_slice %365 {offsets = [0, 0], sizes = [16, 64], strides = [1, 1]} : vector<64x64xbf16> to vector<16x64xbf16>
    %387 = arith.truncf %385 : vector<47x16xf32> to vector<47x16xbf16>
    %cst_204 = arith.constant dense<0.000000e+00> : vector<47x64xf32>
    %388 = tpu.matmul %387, %386, %cst_204 {dimension_numbers = #tpu.dot_dimension_numbers<[1], [0], [0], [1], [0, 0, 1, 1], [], []>} : vector<47x16xbf16>, vector<16x64xbf16>, vector<47x64xf32> -> vector<47x64xf32>
    %389 = arith.addf %366, %388 : vector<47x64xf32>
    %c0_205 = arith.constant 0 : index
    %c16_206 = arith.constant 16 : index
    %390 = vector.load %arg32[%c0_205, %c16_206] : memref<47x192xf32, #tpu.memory_space<vmem>>, vector<47x16xf32>
    %c0_207 = arith.constant 0 : index
    %c80_208 = arith.constant 80 : index
    %391 = vector.load %arg32[%c0_207, %c80_208] : memref<47x192xf32, #tpu.memory_space<vmem>>, vector<47x16xf32>
    %c0_209 = arith.constant 0 : index
    %c144_210 = arith.constant 144 : index
    %392 = vector.load %arg32[%c0_209, %c144_210] : memref<47x192xf32, #tpu.memory_space<vmem>>, vector<47x16xf32>
    %393 = arith.truncf %390 : vector<47x16xf32> to vector<47x16xbf16>
    %394 = arith.truncf %391 : vector<47x16xf32> to vector<47x16xbf16>
    %cst_211 = arith.constant dense<0.000000e+00> : vector<47x47xf32>
    %395 = tpu.matmul %393, %394, %cst_211 {dimension_numbers = #tpu.dot_dimension_numbers<[1], [1], [0], [0], [0, 0, 1, 0], [], []>} : vector<47x16xbf16>, vector<47x16xbf16>, vector<47x47xf32> -> vector<47x47xf32>
    %cst_212 = arith.constant dense<0xFF800000> : vector<47xf32>
    %396 = vector.multi_reduction <maximumf>, %395, %cst_212 [1] : vector<47x47xf32> to vector<47xf32>
    %397 = vector.shape_cast %396 : vector<47xf32> to vector<47x1xf32>
    %398 = vector.broadcast %397 : vector<47x1xf32> to vector<47x47xf32>
    %399 = arith.subf %395, %398 : vector<47x47xf32>
    %400 = math.exp %399 : vector<47x47xf32>
    %cst_213 = arith.constant dense<0.000000e+00> : vector<47xf32>
    %401 = vector.multi_reduction <add>, %400, %cst_213 [1] : vector<47x47xf32> to vector<47xf32>
    %402 = vector.shape_cast %401 : vector<47xf32> to vector<47x1xf32>
    %403 = tpu.reciprocal %402 {approx = true} : vector<47x1xf32> -> vector<47x1xf32>
    %404 = vector.broadcast %403 : vector<47x1xf32> to vector<47x47xf32>
    %405 = arith.mulf %400, %404 : vector<47x47xf32>
    %406 = arith.truncf %405 : vector<47x47xf32> to vector<47x47xbf16>
    %407 = arith.truncf %392 : vector<47x16xf32> to vector<47x16xbf16>
    %cst_214 = arith.constant dense<0.000000e+00> : vector<47x16xf32>
    %408 = tpu.matmul %406, %407, %cst_214 {dimension_numbers = #tpu.dot_dimension_numbers<[1], [0], [0], [1], [0, 0, 1, 1], [], []>} : vector<47x47xbf16>, vector<47x16xbf16>, vector<47x16xf32> -> vector<47x16xf32>
    %409 = vector.extract_strided_slice %365 {offsets = [16, 0], sizes = [16, 64], strides = [1, 1]} : vector<64x64xbf16> to vector<16x64xbf16>
    %410 = arith.truncf %408 : vector<47x16xf32> to vector<47x16xbf16>
    %cst_215 = arith.constant dense<0.000000e+00> : vector<47x64xf32>
    %411 = tpu.matmul %410, %409, %cst_215 {dimension_numbers = #tpu.dot_dimension_numbers<[1], [0], [0], [1], [0, 0, 1, 1], [], []>} : vector<47x16xbf16>, vector<16x64xbf16>, vector<47x64xf32> -> vector<47x64xf32>
    %412 = arith.addf %389, %411 : vector<47x64xf32>
    %c0_216 = arith.constant 0 : index
    %c32_217 = arith.constant 32 : index
    %413 = vector.load %arg32[%c0_216, %c32_217] : memref<47x192xf32, #tpu.memory_space<vmem>>, vector<47x16xf32>
    %c0_218 = arith.constant 0 : index
    %c96_219 = arith.constant 96 : index
    %414 = vector.load %arg32[%c0_218, %c96_219] : memref<47x192xf32, #tpu.memory_space<vmem>>, vector<47x16xf32>
    %c0_220 = arith.constant 0 : index
    %c160_221 = arith.constant 160 : index
    %415 = vector.load %arg32[%c0_220, %c160_221] : memref<47x192xf32, #tpu.memory_space<vmem>>, vector<47x16xf32>
    %416 = arith.truncf %413 : vector<47x16xf32> to vector<47x16xbf16>
    %417 = arith.truncf %414 : vector<47x16xf32> to vector<47x16xbf16>
    %cst_222 = arith.constant dense<0.000000e+00> : vector<47x47xf32>
    %418 = tpu.matmul %416, %417, %cst_222 {dimension_numbers = #tpu.dot_dimension_numbers<[1], [1], [0], [0], [0, 0, 1, 0], [], []>} : vector<47x16xbf16>, vector<47x16xbf16>, vector<47x47xf32> -> vector<47x47xf32>
    %cst_223 = arith.constant dense<0xFF800000> : vector<47xf32>
    %419 = vector.multi_reduction <maximumf>, %418, %cst_223 [1] : vector<47x47xf32> to vector<47xf32>
    %420 = vector.shape_cast %419 : vector<47xf32> to vector<47x1xf32>
    %421 = vector.broadcast %420 : vector<47x1xf32> to vector<47x47xf32>
    %422 = arith.subf %418, %421 : vector<47x47xf32>
    %423 = math.exp %422 : vector<47x47xf32>
    %cst_224 = arith.constant dense<0.000000e+00> : vector<47xf32>
    %424 = vector.multi_reduction <add>, %423, %cst_224 [1] : vector<47x47xf32> to vector<47xf32>
    %425 = vector.shape_cast %424 : vector<47xf32> to vector<47x1xf32>
    %426 = tpu.reciprocal %425 {approx = true} : vector<47x1xf32> -> vector<47x1xf32>
    %427 = vector.broadcast %426 : vector<47x1xf32> to vector<47x47xf32>
    %428 = arith.mulf %423, %427 : vector<47x47xf32>
    %429 = arith.truncf %428 : vector<47x47xf32> to vector<47x47xbf16>
    %430 = arith.truncf %415 : vector<47x16xf32> to vector<47x16xbf16>
    %cst_225 = arith.constant dense<0.000000e+00> : vector<47x16xf32>
    %431 = tpu.matmul %429, %430, %cst_225 {dimension_numbers = #tpu.dot_dimension_numbers<[1], [0], [0], [1], [0, 0, 1, 1], [], []>} : vector<47x47xbf16>, vector<47x16xbf16>, vector<47x16xf32> -> vector<47x16xf32>
    %432 = vector.extract_strided_slice %365 {offsets = [32, 0], sizes = [16, 64], strides = [1, 1]} : vector<64x64xbf16> to vector<16x64xbf16>
    %433 = arith.truncf %431 : vector<47x16xf32> to vector<47x16xbf16>
    %cst_226 = arith.constant dense<0.000000e+00> : vector<47x64xf32>
    %434 = tpu.matmul %433, %432, %cst_226 {dimension_numbers = #tpu.dot_dimension_numbers<[1], [0], [0], [1], [0, 0, 1, 1], [], []>} : vector<47x16xbf16>, vector<16x64xbf16>, vector<47x64xf32> -> vector<47x64xf32>
    %435 = arith.addf %412, %434 : vector<47x64xf32>
    %c0_227 = arith.constant 0 : index
    %c48_228 = arith.constant 48 : index
    %436 = vector.load %arg32[%c0_227, %c48_228] : memref<47x192xf32, #tpu.memory_space<vmem>>, vector<47x16xf32>
    %c0_229 = arith.constant 0 : index
    %c112_230 = arith.constant 112 : index
    %437 = vector.load %arg32[%c0_229, %c112_230] : memref<47x192xf32, #tpu.memory_space<vmem>>, vector<47x16xf32>
    %c0_231 = arith.constant 0 : index
    %c176_232 = arith.constant 176 : index
    %438 = vector.load %arg32[%c0_231, %c176_232] : memref<47x192xf32, #tpu.memory_space<vmem>>, vector<47x16xf32>
    %439 = arith.truncf %436 : vector<47x16xf32> to vector<47x16xbf16>
    %440 = arith.truncf %437 : vector<47x16xf32> to vector<47x16xbf16>
    %cst_233 = arith.constant dense<0.000000e+00> : vector<47x47xf32>
    %441 = tpu.matmul %439, %440, %cst_233 {dimension_numbers = #tpu.dot_dimension_numbers<[1], [1], [0], [0], [0, 0, 1, 0], [], []>} : vector<47x16xbf16>, vector<47x16xbf16>, vector<47x47xf32> -> vector<47x47xf32>
    %cst_234 = arith.constant dense<0xFF800000> : vector<47xf32>
    %442 = vector.multi_reduction <maximumf>, %441, %cst_234 [1] : vector<47x47xf32> to vector<47xf32>
    %443 = vector.shape_cast %442 : vector<47xf32> to vector<47x1xf32>
    %444 = vector.broadcast %443 : vector<47x1xf32> to vector<47x47xf32>
    %445 = arith.subf %441, %444 : vector<47x47xf32>
    %446 = math.exp %445 : vector<47x47xf32>
    %cst_235 = arith.constant dense<0.000000e+00> : vector<47xf32>
    %447 = vector.multi_reduction <add>, %446, %cst_235 [1] : vector<47x47xf32> to vector<47xf32>
    %448 = vector.shape_cast %447 : vector<47xf32> to vector<47x1xf32>
    %449 = tpu.reciprocal %448 {approx = true} : vector<47x1xf32> -> vector<47x1xf32>
    %450 = vector.broadcast %449 : vector<47x1xf32> to vector<47x47xf32>
    %451 = arith.mulf %446, %450 : vector<47x47xf32>
    %452 = arith.truncf %451 : vector<47x47xf32> to vector<47x47xbf16>
    %453 = arith.truncf %438 : vector<47x16xf32> to vector<47x16xbf16>
    %cst_236 = arith.constant dense<0.000000e+00> : vector<47x16xf32>
    %454 = tpu.matmul %452, %453, %cst_236 {dimension_numbers = #tpu.dot_dimension_numbers<[1], [0], [0], [1], [0, 0, 1, 1], [], []>} : vector<47x47xbf16>, vector<47x16xbf16>, vector<47x16xf32> -> vector<47x16xf32>
    %455 = vector.extract_strided_slice %365 {offsets = [48, 0], sizes = [16, 64], strides = [1, 1]} : vector<64x64xbf16> to vector<16x64xbf16>
    %456 = arith.truncf %454 : vector<47x16xf32> to vector<47x16xbf16>
    %cst_237 = arith.constant dense<0.000000e+00> : vector<47x64xf32>
    %457 = tpu.matmul %456, %455, %cst_237 {dimension_numbers = #tpu.dot_dimension_numbers<[1], [0], [0], [1], [0, 0, 1, 1], [], []>} : vector<47x16xbf16>, vector<16x64xbf16>, vector<47x64xf32> -> vector<47x64xf32>
    %458 = arith.addf %435, %457 : vector<47x64xf32>
    %c1_238 = arith.constant 1 : index
    %c0_239 = arith.constant 0 : index
    %c0_240 = arith.constant 0 : index
    %459 = vector.load %arg16[%c1_238, %c0_239, %c0_240] : memref<2x1x64xf32, #tpu.memory_space<vmem>>, vector<1x1x64xf32>
    %460 = vector.shape_cast %459 : vector<1x1x64xf32> to vector<1x64xf32>
    %461 = vector.broadcast %460 : vector<1x64xf32> to vector<47x64xf32>
    %462 = arith.addf %458, %461 : vector<47x64xf32>
    %463 = arith.addf %354, %462 : vector<47x64xf32>
    %c1_241 = arith.constant 1 : index
    %c0_242 = arith.constant 0 : index
    %c0_243 = arith.constant 0 : index
    %464 = vector.load %arg17[%c1_241, %c0_242, %c0_243] : memref<2x1x64xf32, #tpu.memory_space<vmem>>, vector<1x1x64xf32>
    %465 = vector.shape_cast %464 : vector<1x1x64xf32> to vector<1x64xf32>
    %c1_244 = arith.constant 1 : index
    %c0_245 = arith.constant 0 : index
    %c0_246 = arith.constant 0 : index
    %466 = vector.load %arg18[%c1_244, %c0_245, %c0_246] : memref<2x1x64xf32, #tpu.memory_space<vmem>>, vector<1x1x64xf32>
    %467 = vector.shape_cast %466 : vector<1x1x64xf32> to vector<1x64xf32>
    %cst_247 = arith.constant dense<0.000000e+00> : vector<47xf32>
    %468 = vector.multi_reduction <add>, %463, %cst_247 [1] : vector<47x64xf32> to vector<47xf32>
    %469 = vector.shape_cast %468 : vector<47xf32> to vector<47x1xf32>
    %cst_248 = arith.constant 6.400000e+01 : f32
    %470 = vector.broadcast %cst_248 : f32 to vector<47x1xf32>
    %471 = arith.divf %469, %470 : vector<47x1xf32>
    %472 = vector.broadcast %471 : vector<47x1xf32> to vector<47x64xf32>
    %473 = arith.subf %463, %472 : vector<47x64xf32>
    %474 = arith.mulf %473, %473 : vector<47x64xf32>
    %cst_249 = arith.constant dense<0.000000e+00> : vector<47xf32>
    %475 = vector.multi_reduction <add>, %474, %cst_249 [1] : vector<47x64xf32> to vector<47xf32>
    %476 = vector.shape_cast %475 : vector<47xf32> to vector<47x1xf32>
    %cst_250 = arith.constant 6.400000e+01 : f32
    %477 = vector.broadcast %cst_250 : f32 to vector<47x1xf32>
    %478 = arith.divf %476, %477 : vector<47x1xf32>
    %479 = vector.broadcast %471 : vector<47x1xf32> to vector<47x64xf32>
    %480 = arith.subf %463, %479 : vector<47x64xf32>
    %cst_251 = arith.constant 9.99999974E-6 : f32
    %481 = vector.broadcast %cst_251 : f32 to vector<47x1xf32>
    %482 = arith.addf %478, %481 : vector<47x1xf32>
    %483 = math.rsqrt %482 : vector<47x1xf32>
    %484 = vector.broadcast %483 : vector<47x1xf32> to vector<47x64xf32>
    %485 = arith.mulf %480, %484 : vector<47x64xf32>
    %486 = vector.broadcast %465 : vector<1x64xf32> to vector<47x64xf32>
    %487 = arith.mulf %485, %486 : vector<47x64xf32>
    %488 = vector.broadcast %467 : vector<1x64xf32> to vector<47x64xf32>
    %489 = arith.addf %487, %488 : vector<47x64xf32>
    %c1_252 = arith.constant 1 : index
    %c0_253 = arith.constant 0 : index
    %c0_254 = arith.constant 0 : index
    %490 = vector.load %arg19[%c1_252, %c0_253, %c0_254] : memref<2x64x128xbf16, #tpu.memory_space<vmem>>, vector<1x64x128xbf16>
    %491 = vector.shape_cast %490 : vector<1x64x128xbf16> to vector<64x128xbf16>
    %492 = arith.truncf %489 : vector<47x64xf32> to vector<47x64xbf16>
    %cst_255 = arith.constant dense<0.000000e+00> : vector<47x128xf32>
    %493 = tpu.matmul %492, %491, %cst_255 {dimension_numbers = #tpu.dot_dimension_numbers<[1], [0], [0], [1], [0, 0, 1, 1], [], []>} : vector<47x64xbf16>, vector<64x128xbf16>, vector<47x128xf32> -> vector<47x128xf32>
    %c1_256 = arith.constant 1 : index
    %c0_257 = arith.constant 0 : index
    %c0_258 = arith.constant 0 : index
    %494 = vector.load %arg20[%c1_256, %c0_257, %c0_258] : memref<2x1x128xf32, #tpu.memory_space<vmem>>, vector<1x1x128xf32>
    %495 = vector.shape_cast %494 : vector<1x1x128xf32> to vector<1x128xf32>
    %496 = vector.broadcast %495 : vector<1x128xf32> to vector<47x128xf32>
    %497 = arith.addf %493, %496 : vector<47x128xf32>
    %498 = arith.mulf %497, %497 : vector<47x128xf32>
    %499 = arith.mulf %497, %498 : vector<47x128xf32>
    %cst_259 = arith.constant 4.471500e-02 : f32
    %500 = vector.broadcast %cst_259 : f32 to vector<47x128xf32>
    %501 = arith.mulf %500, %499 : vector<47x128xf32>
    %502 = arith.addf %497, %501 : vector<47x128xf32>
    %cst_260 = arith.constant 0.797884583 : f32
    %503 = vector.broadcast %cst_260 : f32 to vector<47x128xf32>
    %504 = arith.mulf %503, %502 : vector<47x128xf32>
    %505 = math.tanh %504 : vector<47x128xf32>
    %cst_261 = arith.constant 1.000000e+00 : f32
    %506 = vector.broadcast %cst_261 : f32 to vector<47x128xf32>
    %507 = arith.addf %506, %505 : vector<47x128xf32>
    %cst_262 = arith.constant 5.000000e-01 : f32
    %508 = vector.broadcast %cst_262 : f32 to vector<47x128xf32>
    %509 = arith.mulf %508, %507 : vector<47x128xf32>
    %510 = arith.mulf %497, %509 : vector<47x128xf32>
    %c1_263 = arith.constant 1 : index
    %c0_264 = arith.constant 0 : index
    %c0_265 = arith.constant 0 : index
    %511 = vector.load %arg21[%c1_263, %c0_264, %c0_265] : memref<2x128x64xbf16, #tpu.memory_space<vmem>>, vector<1x128x64xbf16>
    %512 = vector.shape_cast %511 : vector<1x128x64xbf16> to vector<128x64xbf16>
    %513 = arith.truncf %510 : vector<47x128xf32> to vector<47x128xbf16>
    %cst_266 = arith.constant dense<0.000000e+00> : vector<47x64xf32>
    %514 = tpu.matmul %513, %512, %cst_266 {dimension_numbers = #tpu.dot_dimension_numbers<[1], [0], [0], [1], [0, 0, 1, 1], [], []>} : vector<47x128xbf16>, vector<128x64xbf16>, vector<47x64xf32> -> vector<47x64xf32>
    %c1_267 = arith.constant 1 : index
    %c0_268 = arith.constant 0 : index
    %c0_269 = arith.constant 0 : index
    %515 = vector.load %arg22[%c1_267, %c0_268, %c0_269] : memref<2x1x64xf32, #tpu.memory_space<vmem>>, vector<1x1x64xf32>
    %516 = vector.shape_cast %515 : vector<1x1x64xf32> to vector<1x64xf32>
    %517 = vector.broadcast %516 : vector<1x64xf32> to vector<47x64xf32>
    %518 = arith.addf %514, %517 : vector<47x64xf32>
    %519 = arith.addf %489, %518 : vector<47x64xf32>
    %c1_270 = arith.constant 1 : index
    %c0_271 = arith.constant 0 : index
    %c0_272 = arith.constant 0 : index
    %520 = vector.load %arg23[%c1_270, %c0_271, %c0_272] : memref<2x1x64xf32, #tpu.memory_space<vmem>>, vector<1x1x64xf32>
    %521 = vector.shape_cast %520 : vector<1x1x64xf32> to vector<1x64xf32>
    %c1_273 = arith.constant 1 : index
    %c0_274 = arith.constant 0 : index
    %c0_275 = arith.constant 0 : index
    %522 = vector.load %arg24[%c1_273, %c0_274, %c0_275] : memref<2x1x64xf32, #tpu.memory_space<vmem>>, vector<1x1x64xf32>
    %523 = vector.shape_cast %522 : vector<1x1x64xf32> to vector<1x64xf32>
    %cst_276 = arith.constant dense<0.000000e+00> : vector<47xf32>
    %524 = vector.multi_reduction <add>, %519, %cst_276 [1] : vector<47x64xf32> to vector<47xf32>
    %525 = vector.shape_cast %524 : vector<47xf32> to vector<47x1xf32>
    %cst_277 = arith.constant 6.400000e+01 : f32
    %526 = vector.broadcast %cst_277 : f32 to vector<47x1xf32>
    %527 = arith.divf %525, %526 : vector<47x1xf32>
    %528 = vector.broadcast %527 : vector<47x1xf32> to vector<47x64xf32>
    %529 = arith.subf %519, %528 : vector<47x64xf32>
    %530 = arith.mulf %529, %529 : vector<47x64xf32>
    %cst_278 = arith.constant dense<0.000000e+00> : vector<47xf32>
    %531 = vector.multi_reduction <add>, %530, %cst_278 [1] : vector<47x64xf32> to vector<47xf32>
    %532 = vector.shape_cast %531 : vector<47xf32> to vector<47x1xf32>
    %cst_279 = arith.constant 6.400000e+01 : f32
    %533 = vector.broadcast %cst_279 : f32 to vector<47x1xf32>
    %534 = arith.divf %532, %533 : vector<47x1xf32>
    %535 = vector.broadcast %527 : vector<47x1xf32> to vector<47x64xf32>
    %536 = arith.subf %519, %535 : vector<47x64xf32>
    %cst_280 = arith.constant 9.99999974E-6 : f32
    %537 = vector.broadcast %cst_280 : f32 to vector<47x1xf32>
    %538 = arith.addf %534, %537 : vector<47x1xf32>
    %539 = math.rsqrt %538 : vector<47x1xf32>
    %540 = vector.broadcast %539 : vector<47x1xf32> to vector<47x64xf32>
    %541 = arith.mulf %536, %540 : vector<47x64xf32>
    %542 = vector.broadcast %521 : vector<1x64xf32> to vector<47x64xf32>
    %543 = arith.mulf %541, %542 : vector<47x64xf32>
    %544 = vector.broadcast %523 : vector<1x64xf32> to vector<47x64xf32>
    %545 = arith.addf %543, %544 : vector<47x64xf32>
    %c0_281 = arith.constant 0 : index
    %c0_282 = arith.constant 0 : index
    %546 = vector.load %arg25[%c0_281, %c0_282] : memref<1x64xf32, #tpu.memory_space<vmem>>, vector<1x64xf32>
    %c0_283 = arith.constant 0 : index
    %c0_284 = arith.constant 0 : index
    %547 = vector.load %arg26[%c0_283, %c0_284] : memref<1x64xf32, #tpu.memory_space<vmem>>, vector<1x64xf32>
    %cst_285 = arith.constant dense<0.000000e+00> : vector<47xf32>
    %548 = vector.multi_reduction <add>, %545, %cst_285 [1] : vector<47x64xf32> to vector<47xf32>
    %549 = vector.shape_cast %548 : vector<47xf32> to vector<47x1xf32>
    %cst_286 = arith.constant 6.400000e+01 : f32
    %550 = vector.broadcast %cst_286 : f32 to vector<47x1xf32>
    %551 = arith.divf %549, %550 : vector<47x1xf32>
    %552 = vector.broadcast %551 : vector<47x1xf32> to vector<47x64xf32>
    %553 = arith.subf %545, %552 : vector<47x64xf32>
    %554 = arith.mulf %553, %553 : vector<47x64xf32>
    %cst_287 = arith.constant dense<0.000000e+00> : vector<47xf32>
    %555 = vector.multi_reduction <add>, %554, %cst_287 [1] : vector<47x64xf32> to vector<47xf32>
    %556 = vector.shape_cast %555 : vector<47xf32> to vector<47x1xf32>
    %cst_288 = arith.constant 6.400000e+01 : f32
    %557 = vector.broadcast %cst_288 : f32 to vector<47x1xf32>
    %558 = arith.divf %556, %557 : vector<47x1xf32>
    %559 = vector.broadcast %551 : vector<47x1xf32> to vector<47x64xf32>
    %560 = arith.subf %545, %559 : vector<47x64xf32>
    %cst_289 = arith.constant 9.99999974E-6 : f32
    %561 = vector.broadcast %cst_289 : f32 to vector<47x1xf32>
    %562 = arith.addf %558, %561 : vector<47x1xf32>
    %563 = math.rsqrt %562 : vector<47x1xf32>
    %564 = vector.broadcast %563 : vector<47x1xf32> to vector<47x64xf32>
    %565 = arith.mulf %560, %564 : vector<47x64xf32>
    %566 = vector.broadcast %546 : vector<1x64xf32> to vector<47x64xf32>
    %567 = arith.mulf %565, %566 : vector<47x64xf32>
    %568 = vector.broadcast %547 : vector<1x64xf32> to vector<47x64xf32>
    %569 = arith.addf %567, %568 : vector<47x64xf32>
    %c0_290 = arith.constant 0 : index
    %c0_291 = arith.constant 0 : index
    %570 = vector.load %arg27[%c0_290, %c0_291] : memref<64x128xbf16, #tpu.memory_space<vmem>>, vector<64x128xbf16>
    %571 = arith.truncf %569 : vector<47x64xf32> to vector<47x64xbf16>
    %cst_292 = arith.constant dense<0.000000e+00> : vector<47x128xf32>
    %572 = tpu.matmul %571, %570, %cst_292 {dimension_numbers = #tpu.dot_dimension_numbers<[1], [0], [0], [1], [0, 0, 1, 1], [], []>} : vector<47x64xbf16>, vector<64x128xbf16>, vector<47x128xf32> -> vector<47x128xf32>
    %c0_293 = arith.constant 0 : index
    %c0_294 = arith.constant 0 : index
    %573 = vector.load %arg28[%c0_293, %c0_294] : memref<1x128xf32, #tpu.memory_space<vmem>>, vector<1x128xf32>
    %574 = vector.broadcast %573 : vector<1x128xf32> to vector<47x128xf32>
    %575 = arith.addf %572, %574 : vector<47x128xf32>
    %c0_295 = arith.constant 0 : index
    %c0_296 = arith.constant 0 : index
    %c0_297 = arith.constant 0 : index
    %576 = vector.load %arg29[%c0_295, %c0_296, %c0_297] : memref<1x47x128xf32, #tpu.memory_space<vmem>>, vector<1x47x128xf32>
    %577 = vector.shape_cast %576 : vector<1x47x128xf32> to vector<47x128xf32>
    %578 = vector.shape_cast %575 : vector<47x128xf32> to vector<1x47x128xf32>
    tpu.vector_store %arg29[%c0_295, %c0_296, %c0_297], %578 {strides = array<i32>} : memref<1x47x128xf32, #tpu.memory_space<vmem>>, vector<1x47x128xf32>,
    return
  }
  func.func @transform_0(%arg0: i32) -> (i32, i32, i32) {
    %c0_i32 = arith.constant 0 : i32
    %c0_i32_0 = arith.constant 0 : i32
    %c0_i32_1 = arith.constant 0 : i32
    return %arg0, %c0_i32, %c0_i32_0 : i32, i32, i32
  }
  func.func @transform_1(%arg0: i32) -> (i32, i32, i32) {
    %c0_i32 = arith.constant 0 : i32
    %c0_i32_0 = arith.constant 0 : i32
    %c0_i32_1 = arith.constant 0 : i32
    return %arg0, %c0_i32, %c0_i32_0 : i32, i32, i32
  }
  func.func @transform_2(%arg0: i32) -> (i32, i32) {
    %c0_i32 = arith.constant 0 : i32
    %c0_i32_0 = arith.constant 0 : i32
    %c0_i32_1 = arith.constant 0 : i32
    return %c0_i32, %c0_i32_0 : i32, i32
  }
  func.func @transform_3(%arg0: i32) -> (i32, i32) {
    %c0_i32 = arith.constant 0 : i32
    %c0_i32_0 = arith.constant 0 : i32
    %c0_i32_1 = arith.constant 0 : i32
    return %c0_i32, %c0_i32_0 : i32, i32
  }
  func.func @transform_4(%arg0: i32) -> (i32, i32) {
    %c0_i32 = arith.constant 0 : i32
    %c0_i32_0 = arith.constant 0 : i32
    %c0_i32_1 = arith.constant 0 : i32
    return %c0_i32, %c0_i32_0 : i32, i32
  }
  func.func @transform_5(%arg0: i32) -> (i32, i32, i32) {
    %c0_i32 = arith.constant 0 : i32
    %c0_i32_0 = arith.constant 0 : i32
    %c0_i32_1 = arith.constant 0 : i32
    %c0_i32_2 = arith.constant 0 : i32
    return %c0_i32, %c0_i32_0, %c0_i32_1 : i32, i32, i32
  }
  func.func @transform_6(%arg0: i32) -> (i32, i32) {
    %c0_i32 = arith.constant 0 : i32
    %c0_i32_0 = arith.constant 0 : i32
    %c0_i32_1 = arith.constant 0 : i32
    return %c0_i32, %c0_i32_0 : i32, i32
  }
  func.func @transform_7(%arg0: i32) -> (i32, i32) {
    %c0_i32 = arith.constant 0 : i32
    %c0_i32_0 = arith.constant 0 : i32
    %c0_i32_1 = arith.constant 0 : i32
    return %c0_i32, %c0_i32_0 : i32, i32
  }
  func.func @transform_8(%arg0: i32) -> (i32, i32) {
    %c0_i32 = arith.constant 0 : i32
    %c0_i32_0 = arith.constant 0 : i32
    %c0_i32_1 = arith.constant 0 : i32
    return %c0_i32, %c0_i32_0 : i32, i32
  }
  func.func @transform_9(%arg0: i32) -> (i32, i32) {
    %c0_i32 = arith.constant 0 : i32
    %c0_i32_0 = arith.constant 0 : i32
    %c0_i32_1 = arith.constant 0 : i32
    return %c0_i32, %c0_i32_0 : i32, i32
  }
  func.func @transform_10(%arg0: i32) -> (i32, i32, i32) {
    %c0_i32 = arith.constant 0 : i32
    %c0_i32_0 = arith.constant 0 : i32
    %c0_i32_1 = arith.constant 0 : i32
    %c0_i32_2 = arith.constant 0 : i32
    return %c0_i32, %c0_i32_0, %c0_i32_1 : i32, i32, i32
  }
  func.func @transform_11(%arg0: i32) -> (i32, i32) {
    %c0_i32 = arith.constant 0 : i32
    %c0_i32_0 = arith.constant 0 : i32
    %c0_i32_1 = arith.constant 0 : i32
    return %c0_i32, %c0_i32_0 : i32, i32
  }
  func.func @transform_12(%arg0: i32) -> (i32, i32, i32) {
    %c0_i32 = arith.constant 0 : i32
    %c0_i32_0 = arith.constant 0 : i32
    %c0_i32_1 = arith.constant 0 : i32
    %c0_i32_2 = arith.constant 0 : i32
    return %c0_i32, %c0_i32_0, %c0_i32_1 : i32, i32, i32
  }
  func.func @transform_13(%arg0: i32) -> (i32, i32, i32) {
    %c0_i32 = arith.constant 0 : i32
    %c0_i32_0 = arith.constant 0 : i32
    %c0_i32_1 = arith.constant 0 : i32
    %c0_i32_2 = arith.constant 0 : i32
    return %c0_i32, %c0_i32_0, %c0_i32_1 : i32, i32, i32
  }
  func.func @transform_14(%arg0: i32) -> (i32, i32, i32) {
    %c0_i32 = arith.constant 0 : i32
    %c0_i32_0 = arith.constant 0 : i32
    %c0_i32_1 = arith.constant 0 : i32
    %c0_i32_2 = arith.constant 0 : i32
    return %c0_i32, %c0_i32_0, %c0_i32_1 : i32, i32, i32
  }
  func.func @transform_15(%arg0: i32) -> (i32, i32, i32) {
    %c0_i32 = arith.constant 0 : i32
    %c0_i32_0 = arith.constant 0 : i32
    %c0_i32_1 = arith.constant 0 : i32
    %c0_i32_2 = arith.constant 0 : i32
    return %c0_i32, %c0_i32_0, %c0_i32_1 : i32, i32, i32
  }
  func.func @transform_16(%arg0: i32) -> (i32, i32, i32) {
    %c0_i32 = arith.constant 0 : i32
    %c0_i32_0 = arith.constant 0 : i32
    %c0_i32_1 = arith.constant 0 : i32
    %c0_i32_2 = arith.constant 0 : i32
    return %c0_i32, %c0_i32_0, %c0_i32_1 : i32, i32, i32
  }
  func.func @transform_17(%arg0: i32) -> (i32, i32, i32) {
    %c0_i32 = arith.constant 0 : i32
    %c0_i32_0 = arith.constant 0 : i32
    %c0_i32_1 = arith.constant 0 : i32
    %c0_i32_2 = arith.constant 0 : i32
    return %c0_i32, %c0_i32_0, %c0_i32_1 : i32, i32, i32
  }
  func.func @transform_18(%arg0: i32) -> (i32, i32, i32) {
    %c0_i32 = arith.constant 0 : i32
    %c0_i32_0 = arith.constant 0 : i32
    %c0_i32_1 = arith.constant 0 : i32
    %c0_i32_2 = arith.constant 0 : i32
    return %c0_i32, %c0_i32_0, %c0_i32_1 : i32, i32, i32
  }
  func.func @transform_19(%arg0: i32) -> (i32, i32, i32) {
    %c0_i32 = arith.constant 0 : i32
    %c0_i32_0 = arith.constant 0 : i32
    %c0_i32_1 = arith.constant 0 : i32
    %c0_i32_2 = arith.constant 0 : i32
    return %c0_i32, %c0_i32_0, %c0_i32_1 : i32, i32, i32
  }
  func.func @transform_20(%arg0: i32) -> (i32, i32, i32) {
    %c0_i32 = arith.constant 0 : i32
    %c0_i32_0 = arith.constant 0 : i32
    %c0_i32_1 = arith.constant 0 : i32
    %c0_i32_2 = arith.constant 0 : i32
    return %c0_i32, %c0_i32_0, %c0_i32_1 : i32, i32, i32
  }
  func.func @transform_21(%arg0: i32) -> (i32, i32, i32) {
    %c0_i32 = arith.constant 0 : i32
    %c0_i32_0 = arith.constant 0 : i32
    %c0_i32_1 = arith.constant 0 : i32
    %c0_i32_2 = arith.constant 0 : i32
    return %c0_i32, %c0_i32_0, %c0_i32_1 : i32, i32, i32
  }
  func.func @transform_22(%arg0: i32) -> (i32, i32, i32) {
    %c0_i32 = arith.constant 0 : i32
    %c0_i32_0 = arith.constant 0 : i32
    %c0_i32_1 = arith.constant 0 : i32
    %c0_i32_2 = arith.constant 0 : i32
    return %c0_i32, %c0_i32_0, %c0_i32_1 : i32, i32, i32
  }
  func.func @transform_23(%arg0: i32) -> (i32, i32, i32) {
    %c0_i32 = arith.constant 0 : i32
    %c0_i32_0 = arith.constant 0 : i32
    %c0_i32_1 = arith.constant 0 : i32
    %c0_i32_2 = arith.constant 0 : i32
    return %c0_i32, %c0_i32_0, %c0_i32_1 : i32, i32, i32
  }
  func.func @transform_24(%arg0: i32) -> (i32, i32) {
    %c0_i32 = arith.constant 0 : i32
    %c0_i32_0 = arith.constant 0 : i32
    %c0_i32_1 = arith.constant 0 : i32
    return %c0_i32, %c0_i32_0 : i32, i32
  }
  func.func @transform_25(%arg0: i32) -> (i32, i32) {
    %c0_i32 = arith.constant 0 : i32
    %c0_i32_0 = arith.constant 0 : i32
    %c0_i32_1 = arith.constant 0 : i32
    return %c0_i32, %c0_i32_0 : i32, i32
  }
  func.func @transform_26(%arg0: i32) -> (i32, i32) {
    %c0_i32 = arith.constant 0 : i32
    %c0_i32_0 = arith.constant 0 : i32
    %c0_i32_1 = arith.constant 0 : i32
    return %c0_i32, %c0_i32_0 : i32, i32
  }
  func.func @transform_27(%arg0: i32) -> (i32, i32) {
    %c0_i32 = arith.constant 0 : i32
    %c0_i32_0 = arith.constant 0 : i32
    %c0_i32_1 = arith.constant 0 : i32
    return %c0_i32, %c0_i32_0 : i32, i32
  }
  func.func @transform_28(%arg0: i32) -> (i32, i32, i32) {
    %c0_i32 = arith.constant 0 : i32
    %c0_i32_0 = arith.constant 0 : i32
    %c0_i32_1 = arith.constant 0 : i32
    return %arg0, %c0_i32, %c0_i32_0 : i32, i32, i32
  }
}

</mosaic_0001>

<bundles_post_ra>
// kernel: _forward_impl.1
= control target key start
LH: loop header
LB: loop body
LE: loop exit
PB: predicated region body
PF: predicated region fallthrough
CT: control target
= control target key end

     0   :  { %s8488_s0 = inlined_call_operand.vmem [shape: f32[2,1,480], index: 0, kind: input, shape index: {}]   ;;  %s8489_s1 = inlined_call_operand.vmem [shape: f32[2,95,16], index: 1, kind: input, shape index: {}]   ;;  %s8490_s2 = inlined_call_operand.vmem [shape: bf16[16,32], index: 2, kind: input, shape index: {}]   ;;  %s8491_s3 = inlined_call_operand.vmem [shape: f32[1,32], index: 3, kind: input, shape index: {}]   ;;  %s8492_s4 = inlined_call_operand.vmem [shape: f32[1,32], index: 4, kind: input, shape index: {}]   ;;  %s8493_s5 = inlined_call_operand.vmem [shape: bf16[3,32,32], index: 5, kind: input, shape index: {}]   ;;  %s8494_s6 = inlined_call_operand.vmem [shape: f32[1,32], index: 6, kind: input, shape index: {}]   ;;  %s8495_s7 = inlined_call_operand.vmem [shape: f32[1,32], index: 7, kind: input, shape index: {}]   ;;  %s8496_s8 = inlined_call_operand.vmem [shape: bf16[32,64], index: 8, kind: input, shape index: {}]   ;;  %s8497_s9 = inlined_call_operand.vmem [shape: f32[1,64], index: 9, kind: input, shape index: {}]   ;;  %s8498_s10 = inlined_call_operand.vmem [shape: bf16[3,64,64], index: 10, kind: input, shape index: {}]   ;;  %s8499_s11 = inlined_call_operand.vmem [shape: f32[1,64], index: 11, kind: input, shape index: {}]   ;;  %s8500_s12 = inlined_call_operand.vmem [shape: bf16[2,64,192], index: 12, kind: input, shape index: {}]   ;;  %s8501_s13 = inlined_call_operand.vmem [shape: f32[2,1,192], index: 13, kind: input, shape index: {}]   ;;  %s8502_s14 = inlined_call_operand.vmem [shape: bf16[2,64,64], index: 14, kind: input, shape index: {}]   ;;  %s8503_s15 = inlined_call_operand.vmem [shape: f32[2,1,64], index: 15, kind: input, shape index: {}]   ;;  %s8504_s16 = inlined_call_operand.vmem [shape: f32[2,1,64], index: 16, kind: input, shape index: {}]   ;;  %s8505_s17 = inlined_call_operand.vmem [shape: f32[2,1,64], index: 17, kind: input, shape index: {}]   ;;  %s8506_s18 = inlined_call_operand.vmem [shape: bf16[2,64,128], index: 18, kind: input, shape index: {}]   ;;  %s8507_s19 = inlined_call_operand.vmem [shape: f32[2,1,128], index: 19, kind: input, shape index: {}]   ;;  %s8508_s20 = inlined_call_operand.vmem [shape: bf16[2,128,64], index: 20, kind: input, shape index: {}]   ;;  %s8509_s21 = inlined_call_operand.vmem [shape: f32[2,1,64], index: 21, kind: input, shape index: {}]   ;;  %s8510_s22 = inlined_call_operand.vmem [shape: f32[2,1,64], index: 22, kind: input, shape index: {}]   ;;  %s8511_s23 = inlined_call_operand.vmem [shape: f32[2,1,64], index: 23, kind: input, shape index: {}]   ;;  %s8512_s24 = inlined_call_operand.vmem [shape: f32[1,64], index: 24, kind: input, shape index: {}]   ;;  %s8513_s25 = inlined_call_operand.vmem [shape: f32[1,64], index: 25, kind: input, shape index: {}]   ;;  %s8514_s26 = inlined_call_operand.vmem [shape: bf16[64,128], index: 26, kind: input, shape index: {}]   ;;  %s8515_s27 = inlined_call_operand.vmem [shape: f32[1,128], index: 27, kind: input, shape index: {}]   ;;  %s8516_s28 = inlined_call_operand.vmem [shape: f32[2,47,128], index: 28, kind: output, shape index: {}]  }
   0x1   :  { %8535 = sst [smem:[#allocation5_spill]] %s8488_s0 }
   0x2   :  { %8536 = sst [smem:[#allocation6_spill]] %s8489_s1 }
   0x3   :  { %8537 = sst [smem:[#allocation7_spill]] %s8490_s2 }
   0x4   :  { %8538 = sst [smem:[#allocation8_spill]] %s8491_s3 }
   0x5   :  { %8539 = sst [smem:[#allocation9_spill]] %s8492_s4 }
   0x6   :  { %8540 = sst [smem:[#allocation10_spill]] %s8493_s5 }
   0x7   :  { %8541 = sst [smem:[#allocation11_spill]] %s8494_s6 }
   0x8   :  { %8542 = sst [smem:[#allocation12_spill]] %s8495_s7 }
   0x9   :  { %8543 = sst [smem:[#allocation13_spill]] %s8496_s8  ;;  %s6622_s8 = smov 0  }
   0xa   :  { %8544 = sst [smem:[#allocation14_spill]] %s8497_s9 }
   0xb   :  { %8545 = sst [smem:[#allocation15_spill]] %s8498_s10 }
   0xc   :  { %8546 = sst [smem:[#allocation16_spill]] %s8499_s11 }
   0xd   :  { %8547 = sst [smem:[#allocation17_spill]] %s8500_s12 }
   0xe LB: > { %s5490_s5 = sadd.s32 4294967295, %s6462_s8   ;;  %p5494_p0 = scmp.ge.s32.totalorder %s6462_s8, 1  ;;  %s6462_s8 = sphi %s6622_s8, %s38_s8  }
   0xf   : > { %p771_p1 = scmp.lt.s32.totalorder %s6462_s8, 3 }
  0x11   : > { %p772_p2 = pnand %p5494_p0, %p771_p1 }
  0x12   : > { %p849_p3 = scmp.lt.s32.totalorder (!%p772_p2), %s5490_s5, 1  ;;  %s8548_s6 = sld [smem:[#allocation5_spill]] (!%p772_p2) }
  0x13   : > { %775 = sbr.rel (%p772_p2) target bundleno = 6902 (0x1af6), region = 132  ;;  %s8549_s2 = sld [smem:[#allocation6_spill]] (!%p772_p2) }
  0x14   : > { %s8550_s4 = sld [smem:[#allocation7_spill]] (!%p772_p2)  ;;  %s8533_s1 = smov (!%p772_p2), 48  }
  0x15   : > { %s8551_s3 = sld [smem:[#allocation8_spill]] (!%p772_p2)  ;;  %s8566_s12 = smov (!%p772_p2), 16  }
  0x16   : > { %s8555_s30 = sld [smem:[#allocation11_spill]] (!%p772_p2) }
  0x17   : > { %s8559_s29 = sld [smem:[#allocation15_spill]] (!%p772_p2) }
  0x18   : > { %s8570_s5 = smov (!%p849_p3, %s5490_s5), 1  ;;  %vm874_vm0 = vcmask 1040384   ;;  %vm880_vm1 = vcmask 778240   ;;  %v6464_v12 = vmov 480.0   ;;  %vm980_vm6 = vcmask 130048  }
  0x19   : > { %s5495_s9 = sshll.u32 %s8570_s5, 2  ;;  %6108 = vrcp.f32 %v6464_v12  ;;  %s6062_s0 = smul.u32 96, %s8570_s5  ;;  %vm1038_vm7 = vcmask 261120   ;;  %vm1060_vm8 = vcmask 260096  }
  0x1a   : > { %s852_s10 = scalar_lea.vmem %s8548_s6, %s5495_s9  ;;  %v5984_v39 = vld [vmem:[%s8550_s4] sm:$0xff]  ;;  %s8562_s9 = sld [smem:[#allocation16_spill]] }
  0x1b   : > { %v864_v0 = vld [vmem:[%s852_s10] sm:$0xf]  ;;  %s6644_s7 = scalar_lea.vmem %s8549_s2, %s6062_s0  ;;  %1006 = vmatpush.bf16.msra.mxu0 %v5984_v39  ;;  %6057 = vmatpush.bf16.msra.mxu3 %v5984_v39  ;;  %s8552_s0 = sld [smem:[#allocation9_spill]] }
  0x1c   : > { %v866_v1 = vperm.slane %v864_v0, 0  ;;  %v867_v2 = vperm.slane %v864_v0, 1  ;;  %v868_v3 = vperm.slane %v864_v0, 2  ;;  %v869_v4 = vperm.slane %v864_v0, 3  ;;  %v936_v23 = vld [vmem:[%s6644_s7 + $0x40] sm:$0xff]  ;;  %v937_v24 = vld [vmem:[%s6644_s7 + $0x48] sm:$0xff] }
  0x1d   : > { %v928_v48 = vld [vmem:[%s6644_s7] sm:$0xff]  ;;  %v929_v50 = vld [vmem:[%s6644_s7 + $0x8] sm:$0xff]  ;;  %v938_v51 = vld [vmem:[%s6644_s7 + $0x50] sm:$0xff]  ;;  %s8553_s2 = sld [smem:[#allocation10_spill]]  ;;  %s8531_s4 = smov 112  }
  0x1e   : > { %v875_v5 = vsel %vm874_vm0, %v866_v1, 0.0  ;;  %v876_v6 = vsel %vm874_vm0, %v867_v2, 0.0  ;;  %v878_v7 = vsel %vm874_vm0, %v868_v3, 0.0  ;;  %v881_v9 = vsel %vm880_vm1, %v869_v4, 0.0  ;;  %v939_v52 = vld [vmem:[%s6644_s7 + $0x58] sm:$0x7f] }
  0x1f   : > { %v877_v8 = vadd.f32 %v876_v6, %v875_v5  ;;  %v6109_v13 = vpop.eup %6108  ;;  %v930_v4 = vld [vmem:[%s6644_s7 + $0x10] sm:$0xff]  ;;  %v931_v5 = vld [vmem:[%s6644_s7 + $0x18] sm:$0xff]  ;;  %v933_v12 = vld [vmem:[%s6644_s7 + $0x28] sm:$0xff]  ;;  %s8556_s10 = sld [smem:[#allocation12_spill]]  ;;  %s8525_s6 = smov 96  }
  0x20   : > { %v886_v14 = vmul.f32 480.0, %v6109_v13  ;;  %vm890_vm2 = vweird.f32 %v6109_v13 }
  0x21   : > { %v879_v10 = vadd.f32 %v878_v7, %v877_v8 }
  0x22   : > { %v887_v15 = vsub.f32 1.0, %v886_v14 }
  0x23   : > { %v882_v11 = vadd.f32 %v881_v9, %v879_v10 }
  0x24   : > { %v888_v16 = vmul.f32 %v6109_v13, %v887_v15 }
  0x25   : > { %883 = vadd.xlane.f32.xlu0 %v882_v11  ;;  %v932_v11 = vld [vmem:[%s6644_s7 + $0x20] sm:$0xff] }
  0x26   : > { %v889_v17 = vadd.f32 %v6109_v13, %v888_v16 }
  0x28   : > { %v891_v18 = vsel %vm890_vm2, %v6109_v13, %v889_v17 }
  0x98   : > { %v884_v19 = vpop.xlane.xlu0 %883 }
  0x99   : > { %v892_v20 = vmul.f32 %v891_v18, %v884_v19  ;;  %v935_v19 = vld [vmem:[%s6644_s7 + $0x38] sm:$0xff] }
  0x9b   : > { %v6646_v21 = vperm.slane %v892_v20, 0 }
  0x9d   : > { %v896_v22 = vsub.f32 %v864_v0, %v6646_v21  ;;  %v949_v26 = vsub.f32 %v936_v23, %v6646_v21  ;;  %v950_v27 = vsub.f32 %v937_v24, %v6646_v21  ;;  %v941_v54 = vsub.f32 %v928_v48, %v6646_v21 }
  0x9e   : > { %v942_v56 = vsub.f32 %v929_v50, %v6646_v21  ;;  %v951_v57 = vsub.f32 %v938_v51, %v6646_v21  ;;  %v952_v58 = vsub.f32 %v939_v52, %v6646_v21  ;;  %v943_v6 = vsub.f32 %v930_v4, %v6646_v21 }
  0x9f   : > { %v897_v25 = vmul.f32 %v896_v22, %v896_v22  ;;  %v944_v7 = vsub.f32 %v931_v5, %v6646_v21  ;;  %v945_v13 = vsub.f32 %v932_v11, %v6646_v21  ;;  %v946_v14 = vsub.f32 %v933_v12, %v6646_v21 }
  0xa0   : > { %v948_v22 = vsub.f32 %v935_v19, %v6646_v21 }
  0xa1   : > { %v899_v28 = vperm.slane %v897_v25, 0  ;;  %v900_v29 = vperm.slane %v897_v25, 1  ;;  %v901_v30 = vperm.slane %v897_v25, 2  ;;  %v902_v31 = vperm.slane %v897_v25, 3 }
  0xa3   : > { %v907_v32 = vsel %vm874_vm0, %v899_v28, 0.0  ;;  %v908_v33 = vsel %vm874_vm0, %v900_v29, 0.0  ;;  %v910_v35 = vsel %vm874_vm0, %v901_v30, 0.0  ;;  %v912_v37 = vsel %vm880_vm1, %v902_v31, 0.0 }
  0xa4   : > { %v909_v34 = vadd.f32 %v908_v33, %v907_v32 }
  0xa6   : > { %v911_v36 = vadd.f32 %v910_v35, %v909_v34 }
  0xa8   : > { %v913_v38 = vadd.f32 %v912_v37, %v911_v36 }
  0xaa   : > { %914 = vadd.xlane.f32.xlu0 %v913_v38 }
 0x11d   : > { %v915_v40 = vpop.xlane.xlu0 %914 }
 0x11e   : > { %v916_v41 = vmul.f32 %v915_v40, %v891_v18  ;;  %v934_v18 = vld [vmem:[%s6644_s7 + $0x30] sm:$0xff]  ;;  %s8554_s7 = sld [smem:[#allocation13_spill]] }
 0x11f   : > { %v947_v20 = vsub.f32 %v934_v18, %v6646_v21 }
 0x120   : > { %v917_v42 = vadd.f32 1e-05, %v916_v41 }
 0x122   : > { %6110 = vrsqrt.f32 %v917_v42  ;;  %vm924_vm4 = vweird.f32 %v917_v42 }
 0x128   : > { %v6111_v43 = vpop.eup %6110 }
 0x129   : > { %v919_v44 = vmul.f32 %v6111_v43, %v917_v42  ;;  %vm925_vm3 = vweird.f32 %v6111_v43 }
 0x12a   : > { %vm926_vm5 = vmor %vm924_vm4, %vm925_vm3 }
 0x12b   : > { %v920_v45 = vmul.f32 %v6111_v43, %v919_v44 }
 0x12d   : > { %v921_v46 = vmul.f32 0.5, %v920_v45  ;;  %v6465_v45 = vmov 95.0  }
 0x12e   : > { %6112 = vrcp.f32 %v6465_v45 }
 0x12f   : > { %v922_v47 = vsub.f32 1.5, %v921_v46 }
 0x131   : > { %v923_v49 = vmul.f32 %v6111_v43, %v922_v47 }
 0x133   : > { %v927_v53 = vsel %vm926_vm5, %v6111_v43, %v923_v49 }
 0x134   : > { %v953_v55 = vperm.slane %v927_v53, 0  ;;  %v6113_v51 = vpop.eup %6112 }
 0x135   : > { %vm1074_vm9 = vweird.f32 %v6113_v51 }
 0x136   : > { %v954_v59 = vmul.f32 %v953_v55, %v941_v54  ;;  %v955_v60 = vmul.f32 %v953_v55, %v942_v56  ;;  %v964_v61 = vmul.f32 %v953_v55, %v951_v57  ;;  %v965_v62 = vmul.f32 %v953_v55, %v952_v58 }
 0x137   : > { %v962_v1 = vmul.f32 %v953_v55, %v949_v26  ;;  %v963_v2 = vmul.f32 %v953_v55, %v950_v27  ;;  %v956_v8 = vmul.f32 %v953_v55, %v943_v6  ;;  %v957_v9 = vmul.f32 %v953_v55, %v944_v7 }
 0x138   : > { %v968_v63 = vpack.c.bf16 %v955_v60, %v954_v59  ;;  %v973_v0 = vpack.c.bf16 %v965_v62, %v964_v61  ;;  %v958_v15 = vmul.f32 %v953_v55, %v945_v13  ;;  %v959_v16 = vmul.f32 %v953_v55, %v946_v14 }
 0x139   : > { %v972_v3 = vpack.c.bf16 %v963_v2, %v962_v1  ;;  %v969_v10 = vpack.c.bf16 %v957_v9, %v956_v8  ;;  %v960_v23 = vmul.f32 %v953_v55, %v947_v20  ;;  %v961_v24 = vmul.f32 %v953_v55, %v948_v22 }
 0x13a   : > { %5502 = vmatmul.msk.bf16.vlgmr.msra.gmra.mxu0 %vm980_vm6, %v968_v63  ;;  %5507 = vmatmul.msk.bf16.vlgmr.msra.gmra.mxu3 %vm980_vm6, %v973_v0  ;;  %v970_v17 = vpack.c.bf16 %v959_v16, %v958_v15  ;;  %v1070_v56 = vmul.f32 95.0, %v6113_v51 }
 0x13b   : > { %v971_v25 = vpack.c.bf16 %v961_v24, %v960_v23 }
 0x13c   : > { %v1071_v62 = vsub.f32 1.0, %v1070_v56 }
 0x13e   : > { %v1072_v1 = vmul.f32 %v6113_v51, %v1071_v62 }
 0x140   : > { %v1073_v4 = vadd.f32 %v6113_v51, %v1072_v1 }
 0x142   : > { %v1075_v7 = vsel %vm1074_vm9, %v6113_v51, %v1073_v4 }
 0x14a   : > { %5503 = vmatmul.msk.bf16.gmra.mxu0 %vm980_vm6, %v969_v10 }
 0x15a   : > { %5504 = vmatmul.msk.bf16.gmra.mxu0 %vm980_vm6, %v970_v17 }
 0x16a   : > { %5505 = vmatmul.msk.bf16.gmra.mxu0 %vm980_vm6, %v971_v25 }
 0x17a   : > { %5506 = vmatmul.msk.bf16.gmra.mxu0 %vm980_vm6, %v972_v3 }
 0x1b7   : > { %v1008_v26 = vpop.f32.mrf.mxu0 }
 0x1b8   : > { %v1039_v21 = vsel %vm1038_vm7, %v1008_v26, 0.0 }
 0x1bd   : > { %v6692_v42 = vpop.f32.mrf.mxu3 }
 0x1be   : > { %v1058_v59 = vsel %vm1038_vm7, %v6692_v42, 0.0 }
 0x1bf   : > { %v1010_v27 = vpop.f32.mrf.mxu0 }
 0x1c0   : > { %v1040_v33 = vsel %vm1038_vm7, %v1010_v27, 0.0 }
 0x1c1   : > { %v1041_v36 = vadd.f32 %v1040_v33, %v1039_v21 }
 0x1c5   : > { %v1035_v57 = vpop.f32.mrf.mxu3 }
 0x1c6   : > { %v1061_v61 = vsel %vm1060_vm8, %v1035_v57, 0.0 }
 0x1c7   : > { %v1013_v28 = vpop.f32.mrf.mxu0 }
 0x1c8   : > { %v1042_v35 = vsel %vm1038_vm7, %v1013_v28, 0.0 }
 0x1c9   : > { %v1043_v38 = vadd.f32 %v1042_v35, %v1041_v36 }
 0x1cf   : > { %v1015_v29 = vpop.f32.mrf.mxu0 }
 0x1d0   : > { %v1044_v37 = vsel %vm1038_vm7, %v1015_v29, 0.0 }
 0x1d1   : > { %v1045_v40 = vadd.f32 %v1044_v37, %v1043_v38 }
 0x1d7   : > { %v1018_v30 = vpop.f32.mrf.mxu0 }
 0x1d8   : > { %v1046_v39 = vsel %vm1038_vm7, %v1018_v30, 0.0 }
 0x1d9   : > { %v1047_v43 = vadd.f32 %v1046_v39, %v1045_v40 }
 0x1df   : > { %v1020_v31 = vpop.f32.mrf.mxu0 }
 0x1e0   : > { %v1048_v41 = vsel %vm1038_vm7, %v1020_v31, 0.0 }
 0x1e1   : > { %v1049_v47 = vadd.f32 %v1048_v41, %v1047_v43 }
 0x1e7   : > { %v1023_v32 = vpop.f32.mrf.mxu0 }
 0x1e8   : > { %v1050_v46 = vsel %vm1038_vm7, %v1023_v32, 0.0 }
 0x1e9   : > { %v1051_v49 = vadd.f32 %v1050_v46, %v1049_v47 }
 0x1ef   : > { %v1025_v34 = vpop.f32.mrf.mxu0 }
 0x1f0   : > { %v1052_v48 = vsel %vm1038_vm7, %v1025_v34, 0.0 }
 0x1f1   : > { %v1053_v52 = vadd.f32 %v1052_v48, %v1051_v49 }
 0x1f7   : > { %v1028_v44 = vpop.f32.mrf.mxu0 }
 0x1f8   : > { %v1054_v50 = vsel %vm1038_vm7, %v1028_v44, 0.0 }
 0x1f9   : > { %v1055_v53 = vadd.f32 %v1054_v50, %v1053_v52 }
 0x1ff   : > { %v1030_v54 = vpop.f32.mrf.mxu0 }
 0x200   : > { %v1056_v55 = vsel %vm1038_vm7, %v1030_v54, 0.0 }
 0x201   : > { %v1057_v58 = vadd.f32 %v1056_v55, %v1055_v53 }
 0x203   : > { %v1059_v60 = vadd.f32 %v1058_v59, %v1057_v58 }
 0x205   : > { %v1062_v63 = vadd.f32 %v1061_v61, %v1059_v60 }
 0x207   : > { %v1063_v0 = vrot.slane %v1062_v63, 4 }
 0x209   : > { %v1064_v2 = vadd.f32 %v1063_v0, %v1062_v63 }
 0x20b   : > { %v1065_v3 = vrot.slane %v1064_v2, 2 }
 0x20d   : > { %v1066_v5 = vadd.f32 %v1065_v3, %v1064_v2 }
 0x20f   : > { %v1067_v6 = vrot.slane %v1066_v5, 1 }
 0x211   : > { %v1068_v8 = vadd.f32 %v1067_v6, %v1066_v5 }
 0x213   : > { %v1076_v9 = vmul.f32 %v1075_v7, %v1068_v8 }
 0x215   : > { %v6701_v10 = vsub.f32 %v1008_v26, %v1076_v9  ;;  %v6703_v11 = vsub.f32 %v1010_v27, %v1076_v9  ;;  %v6705_v12 = vsub.f32 %v1013_v28, %v1076_v9  ;;  %v6707_v13 = vsub.f32 %v1015_v29, %v1076_v9 }
 0x216   : > { %v6713_v16 = vsub.f32 %v1018_v30, %v1076_v9  ;;  %v6717_v18 = vsub.f32 %v1020_v31, %v1076_v9  ;;  %v1083_v24 = vsub.f32 %v1023_v32, %v1076_v9  ;;  %v1084_v28 = vsub.f32 %v1025_v34, %v1076_v9 }
 0x217   : > { %v1089_v14 = vmul.f32 %v6701_v10, %v6701_v10  ;;  %v1090_v15 = vmul.f32 %v6703_v11, %v6703_v11  ;;  %v1091_v17 = vmul.f32 %v6705_v12, %v6705_v12  ;;  %v1092_v19 = vmul.f32 %v6707_v13, %v6707_v13 }
 0x218   : > { %v1093_v25 = vmul.f32 %v6713_v16, %v6713_v16  ;;  %v1094_v29 = vmul.f32 %v6717_v18, %v6717_v18  ;;  %v1085_v33 = vsub.f32 %v1028_v44, %v1076_v9  ;;  %v1095_v21 = vmul.f32 %v1083_v24, %v1083_v24 }
 0x219   : > { %v1101_v20 = vsel %vm1038_vm7, %v1089_v14, 0.0  ;;  %v1102_v22 = vsel %vm1038_vm7, %v1090_v15, 0.0  ;;  %v1104_v26 = vsel %vm1038_vm7, %v1091_v17, 0.0  ;;  %v1106_v30 = vsel %vm1038_vm7, %v1092_v19, 0.0 }
 0x21a   : > { %v1103_v23 = vadd.f32 %v1102_v22, %v1101_v20  ;;  %v1108_v35 = vsel %vm1038_vm7, %v1093_v25, 0.0  ;;  %v1086_v37 = vsub.f32 %v1030_v54, %v1076_v9  ;;  %v1096_v32 = vmul.f32 %v1084_v28, %v1084_v28 }
 0x21b   : > { %v1110_v38 = vsel %vm1038_vm7, %v1094_v29, 0.0  ;;  %v1087_v40 = vsub.f32 %v6692_v42, %v1076_v9  ;;  %v1097_v41 = vmul.f32 %v1085_v33, %v1085_v33  ;;  %v1112_v34 = vsel %vm1038_vm7, %v1095_v21, 0.0 }
 0x21c   : > { %v1105_v27 = vadd.f32 %v1104_v26, %v1103_v23  ;;  %v1088_v45 = vsub.f32 %v1035_v57, %v1076_v9  ;;  %v1098_v46 = vmul.f32 %v1086_v37, %v1086_v37  ;;  %v1114_v47 = vsel %vm1038_vm7, %v1096_v32, 0.0  ;;  %v6085_v9 = vld [vmem:[%s8551_s3] ss:$0 sm:$0xff]  ;;  %s8523_s3 = smov 80  }
 0x21d   : > { %v1099_v48 = vmul.f32 %v1087_v40, %v1087_v40  ;;  %v1116_v49 = vsel %vm1038_vm7, %v1097_v41, 0.0 }
 0x21e   : > { %v1107_v31 = vadd.f32 %v1106_v30, %v1105_v27  ;;  %v1100_v51 = vmul.f32 %v1088_v45, %v1088_v45  ;;  %v1118_v52 = vsel %vm1038_vm7, %v1098_v46, 0.0 }
 0x21f   : > { %v1120_v54 = vsel %vm1038_vm7, %v1099_v48, 0.0 }
 0x220   : > { %v1109_v36 = vadd.f32 %v1108_v35, %v1107_v31  ;;  %v1122_v55 = vsel %vm1060_vm8, %v1100_v51, 0.0 }
 0x222   : > { %v1111_v39 = vadd.f32 %v1110_v38, %v1109_v36 }
 0x224   : > { %v1113_v43 = vadd.f32 %v1112_v34, %v1111_v39 }
 0x226   : > { %v1115_v44 = vadd.f32 %v1114_v47, %v1113_v43 }
 0x228   : > { %v1117_v50 = vadd.f32 %v1116_v49, %v1115_v44 }
 0x22a   : > { %v1119_v53 = vadd.f32 %v1118_v52, %v1117_v50 }
 0x22c   : > { %v1121_v42 = vadd.f32 %v1120_v54, %v1119_v53 }
 0x22e   : > { %v1123_v56 = vadd.f32 %v1122_v55, %v1121_v42 }
 0x230   : > { %v1124_v58 = vrot.slane %v1123_v56, 4 }
 0x232   : > { %v1125_v57 = vadd.f32 %v1124_v58, %v1123_v56 }
 0x234   : > { %v1126_v59 = vrot.slane %v1125_v57, 2 }
 0x236   : > { %v1127_v60 = vadd.f32 %v1126_v59, %v1125_v57 }
 0x238   : > { %v1128_v61 = vrot.slane %v1127_v60, 1 }
 0x23a   : > { %v1129_v62 = vadd.f32 %v1128_v61, %v1127_v60 }
 0x23c   : > { %v1130_v63 = vmul.f32 %v1129_v62, %v1075_v7 }
 0x23e   : > { %v1131_v0 = vadd.f32 1e-05, %v1130_v63  ;;  %v5988_v63 = vld [vmem:[%s8553_s2 + $0x18] sm:$0xff] }
 0x23f   : > { %1371 = vmatpush.bf16.msra.mxu1 %v5988_v63  ;;  %6058 = vmatpush.bf16.msra.mxu2 %v5988_v63 }
 0x240   : > { %6114 = vrsqrt.f32 %v1131_v0  ;;  %vm1138_vm11 = vweird.f32 %v1131_v0  ;;  %6059 = vmatpush.bf16.msrb.mxu3 %v5988_v63 }
 0x246   : > { %v6115_v1 = vpop.eup %6114 }
 0x247   : > { %v1133_v2 = vmul.f32 %v6115_v1, %v1131_v0  ;;  %vm1139_vm10 = vweird.f32 %v6115_v1 }
 0x248   : > { %vm1140_vm12 = vmor %vm1138_vm11, %vm1139_vm10 }
 0x249   : > { %v1134_v3 = vmul.f32 %v6115_v1, %v1133_v2 }
 0x24b   : > { %v1135_v4 = vmul.f32 0.5, %v1134_v3 }
 0x24d   : > { %v1136_v5 = vsub.f32 1.5, %v1135_v4 }
 0x24f   : > { %v1137_v6 = vmul.f32 %v6115_v1, %v1136_v5  ;;  %v5987_v5 = vld [vmem:[%s8553_s2 + $0x10] sm:$0xff] }
 0x250   : > { %1372 = vmatpush.bf16.msra.mxu1 %v5987_v5  ;;  %6060 = vmatpush.bf16.msra.mxu2 %v5987_v5 }
 0x251   : > { %v1141_v8 = vsel %vm1140_vm12, %v6115_v1, %v1137_v6  ;;  %6061 = vmatpush.bf16.msrb.mxu3 %v5987_v5 }
 0x252   : > { %v1142_v14 = vmul.f32 %v1141_v8, %v6701_v10  ;;  %v1143_v7 = vmul.f32 %v1141_v8, %v6703_v11  ;;  %v1144_v15 = vmul.f32 %v1141_v8, %v6705_v12  ;;  %v1145_v17 = vmul.f32 %v1141_v8, %v6707_v13  ;;  %v6086_v10 = vld [vmem:[%s8552_s0] ss:$0 sm:$0xff]  ;;  %s8568_s0 = smov 80  }
 0x253   : > { %v1146_v19 = vmul.f32 %v1141_v8, %v6713_v16  ;;  %v1147_v20 = vmul.f32 %v1141_v8, %v6717_v18  ;;  %v1148_v22 = vmul.f32 %v1141_v8, %v1083_v24  ;;  %v1149_v23 = vmul.f32 %v1141_v8, %v1084_v28 }
 0x254   : > { %v1150_v25 = vmul.f32 %v1141_v8, %v1085_v33  ;;  %v1151_v26 = vmul.f32 %v1141_v8, %v1086_v37  ;;  %v1152_v27 = vmul.f32 %v1141_v8, %v1087_v40  ;;  %v1153_v29 = vmul.f32 %v1141_v8, %v1088_v45 }
 0x255   : > { %v1158_v30 = vmul.f32 %v6085_v9, %v1142_v14  ;;  %v1159_v11 = vmul.f32 %v6085_v9, %v1143_v7  ;;  %v1160_v31 = vmul.f32 %v6085_v9, %v1144_v15  ;;  %v1161_v12 = vmul.f32 %v6085_v9, %v1145_v17 }
 0x256   : > { %v1162_v21 = vmul.f32 %v6085_v9, %v1146_v19  ;;  %v1163_v13 = vmul.f32 %v6085_v9, %v1147_v20  ;;  %v1164_v35 = vmul.f32 %v6085_v9, %v1148_v22  ;;  %v1165_v16 = vmul.f32 %v6085_v9, %v1149_v23 }
 0x257   : > { %v1166_v36 = vmul.f32 %v6085_v9, %v1150_v25  ;;  %v1167_v18 = vmul.f32 %v6085_v9, %v1151_v26  ;;  %v1168_v24 = vmul.f32 %v6085_v9, %v1152_v27  ;;  %v1169_v28 = vmul.f32 %v6085_v9, %v1153_v29 }
 0x258   : > { %v6750_v33 = vadd.f32 %v6086_v10, %v1158_v30  ;;  %v6752_v37 = vadd.f32 %v6086_v10, %v1160_v31  ;;  %v6754_v32 = vadd.f32 %v6086_v10, %v1161_v12  ;;  %v6756_v38 = vadd.f32 %v6086_v10, %v1162_v21 }
 0x259   : > { %v6758_v39 = vadd.f32 %v6086_v10, %v1163_v13  ;;  %v6760_v40 = vadd.f32 %v6086_v10, %v1164_v35  ;;  %v6762_v41 = vadd.f32 %v6086_v10, %v1165_v16  ;;  %v6764_v34 = vadd.f32 %v6086_v10, %v1166_v36 }
 0x25a   : > { %v6766_v43 = vadd.f32 %v6086_v10, %v1167_v18  ;;  %v6768_v45 = vadd.f32 %v6086_v10, %v1168_v24  ;;  %v6770_v46 = vadd.f32 %v6086_v10, %v1169_v28  ;;  %v6772_v47 = vadd.f32 %v6086_v10, %v1159_v11 }
 0x25b   : > { %v1188_v44 = vmul.f32 %v6752_v37, %v6752_v37  ;;  %v1189_v48 = vmul.f32 %v6754_v32, %v6754_v32  ;;  %v1190_v49 = vmul.f32 %v6756_v38, %v6756_v38  ;;  %v1191_v50 = vmul.f32 %v6758_v39, %v6758_v39 }
 0x25c   : > { %v1192_v51 = vmul.f32 %v6760_v40, %v6760_v40  ;;  %v1193_v52 = vmul.f32 %v6762_v41, %v6762_v41  ;;  %v1194_v53 = vmul.f32 %v6764_v34, %v6764_v34  ;;  %v1195_v54 = vmul.f32 %v6766_v43, %v6766_v43 }
 0x25d   : > { %v1196_v42 = vmul.f32 %v6768_v45, %v6768_v45  ;;  %v1186_v55 = vmul.f32 %v6750_v33, %v6750_v33  ;;  %v1197_v56 = vmul.f32 %v6770_v46, %v6770_v46  ;;  %v1200_v58 = vmul.f32 %v1188_v44, %v6752_v37 }
 0x25e   : > { %v1201_v57 = vmul.f32 %v1189_v48, %v6754_v32  ;;  %v1202_v59 = vmul.f32 %v1190_v49, %v6756_v38  ;;  %v1203_v60 = vmul.f32 %v1191_v50, %v6758_v39  ;;  %v1204_v61 = vmul.f32 %v1192_v51, %v6760_v40  ;;  %v5986_v51 = vld [vmem:[%s8553_s2 + $0x8] sm:$0xff] }
 0x25f   : > { %v1205_v62 = vmul.f32 %v1193_v52, %v6762_v41  ;;  %v1187_v0 = vmul.f32 %v6772_v47, %v6772_v47  ;;  %v1206_v1 = vmul.f32 %v1194_v53, %v6764_v34  ;;  %v1207_v2 = vmul.f32 %v1195_v54, %v6766_v43  ;;  %v5990_v52 = vld [vmem:[%s8553_s2 + $0x28] sm:$0xff]  ;;  %1416 = vmatpush.bf16.msrb.mxu2 %v5986_v51 }
 0x260   : > { %v1208_v3 = vmul.f32 %v1196_v42, %v6768_v45  ;;  %v1212_v4 = vmul.f32 0.044715, %v1200_v58  ;;  %v1209_v6 = vmul.f32 %v1197_v56, %v6770_v46  ;;  %v1213_v8 = vmul.f32 0.044715, %v1201_v57  ;;  %1481 = vmatpush.bf16.msra.mxu3 %v5990_v52  ;;  %v5989_v56 = vld [vmem:[%s8553_s2 + $0x20] sm:$0xff] }
 0x261   : > { %v1214_v9 = vmul.f32 0.044715, %v1202_v59  ;;  %v1215_v14 = vmul.f32 0.044715, %v1203_v60  ;;  %v1198_v7 = vmul.f32 %v1186_v55, %v6750_v33  ;;  %v1216_v15 = vmul.f32 0.044715, %v1204_v61 }
 0x262   : > { %v1217_v17 = vmul.f32 0.044715, %v1205_v62  ;;  %v1218_v19 = vmul.f32 0.044715, %v1206_v1  ;;  %v1199_v20 = vmul.f32 %v1187_v0, %v6772_v47  ;;  %v1219_v22 = vmul.f32 0.044715, %v1207_v2 }
 0x263   : > { %v1220_v23 = vmul.f32 0.044715, %v1208_v3  ;;  %v1224_v25 = vadd.f32 %v1212_v4, %v6752_v37  ;;  %v1225_v26 = vadd.f32 %v1213_v8, %v6754_v32  ;;  %v1226_v27 = vadd.f32 %v1214_v9, %v6756_v38  ;;  %v5985_v55 = vld [vmem:[%s8553_s2] sm:$0xff]  ;;  %s8567_s2 = smov 96  }
 0x264   : > { %v1227_v29 = vadd.f32 %v1215_v14, %v6758_v39  ;;  %v1221_v10 = vmul.f32 0.044715, %v1209_v6  ;;  %v1228_v30 = vadd.f32 %v1216_v15, %v6760_v40  ;;  %v1229_v11 = vadd.f32 %v1217_v17, %v6762_v41  ;;  %1417 = vmatpush.bf16.msrb.mxu2 %v5985_v55  ;;  %1482 = vmatpush.bf16.msra.mxu3 %v5989_v56 }
 0x265   : > { %v1210_v31 = vmul.f32 0.044715, %v1198_v7  ;;  %v1230_v12 = vadd.f32 %v1218_v19, %v6764_v34  ;;  %v1236_v21 = vmul.f32 0.7978846, %v1224_v25  ;;  %v1237_v13 = vmul.f32 0.7978846, %v1225_v26 }
 0x266   : > { %v1211_v35 = vmul.f32 0.044715, %v1199_v20  ;;  %v1231_v16 = vadd.f32 %v1219_v22, %v6766_v43  ;;  %v1238_v36 = vmul.f32 0.7978846, %v1226_v27  ;;  %v1239_v18 = vmul.f32 0.7978846, %v1227_v29 }
 0x267   : > { %v1232_v24 = vadd.f32 %v1220_v23, %v6768_v45  ;;  %v1240_v28 = vmul.f32 0.7978846, %v1228_v30  ;;  %6116 = vtanh.f32 %v1236_v21  ;;  %v1233_v44 = vadd.f32 %v1221_v10, %v6770_v46 }
 0x268   : > { %v1241_v48 = vmul.f32 0.7978846, %v1229_v11  ;;  %6118 = vtanh.f32 %v1237_v13  ;;  %v1222_v49 = vadd.f32 %v1210_v31, %v6750_v33  ;;  %v1242_v50 = vmul.f32 0.7978846, %v1230_v12 }
 0x269   : > { %6120 = vtanh.f32 %v1238_v36  ;;  %v1223_v53 = vadd.f32 %v1211_v35, %v6772_v47  ;;  %v1243_v54 = vmul.f32 0.7978846, %v1231_v16  ;;  %v1244_v42 = vmul.f32 0.7978846, %v1232_v24 }
 0x26a   : > { %6122 = vtanh.f32 %v1239_v18  ;;  %v1245_v58 = vmul.f32 0.7978846, %v1233_v44  ;;  %v1234_v59 = vmul.f32 0.7978846, %v1222_v49 }
 0x26b   : > { %6124 = vtanh.f32 %v1240_v28  ;;  %v1235_v61 = vmul.f32 0.7978846, %v1223_v53 }
 0x26c   : > { %6126 = vtanh.f32 %v1241_v48 }
 0x26d   : > { %v6117_v57 = vpop.eup %6116  ;;  %6128 = vtanh.f32 %v1242_v50 }
 0x26e   : > { %v6119_v60 = vpop.eup %6118  ;;  %6130 = vtanh.f32 %v1243_v54  ;;  %v1260_v62 = vadd.f32 1.0, %v6117_v57 }
 0x26f   : > { %v6121_v63 = vpop.eup %6120  ;;  %6132 = vtanh.f32 %v1244_v42  ;;  %v1261_v0 = vadd.f32 1.0, %v6119_v60 }
 0x270   : > { %v6123_v1 = vpop.eup %6122  ;;  %6134 = vtanh.f32 %v1245_v58  ;;  %v1262_v2 = vadd.f32 1.0, %v6121_v63  ;;  %v1272_v3 = vmul.f32 0.5, %v1260_v62 }
 0x271   : > { %v6125_v4 = vpop.eup %6124  ;;  %v1263_v5 = vadd.f32 1.0, %v6123_v1  ;;  %6136 = vtanh.f32 %v1234_v59  ;;  %v1273_v6 = vmul.f32 0.5, %v1261_v0 }
 0x272   : > { %v6127_v8 = vpop.eup %6126  ;;  %v1264_v9 = vadd.f32 1.0, %v6125_v4  ;;  %v1274_v14 = vmul.f32 0.5, %v1262_v2  ;;  %6138 = vtanh.f32 %v1235_v61  ;;  %v1284_v7 = vmul.f32 %v1272_v3, %v6752_v37 }
 0x273   : > { %v6129_v15 = vpop.eup %6128  ;;  %v1265_v17 = vadd.f32 1.0, %v6127_v8  ;;  %v1275_v19 = vmul.f32 0.5, %v1263_v5  ;;  %v1285_v20 = vmul.f32 %v1273_v6, %v6754_v32 }
 0x274   : > { %v6131_v22 = vpop.eup %6130  ;;  %v1266_v23 = vadd.f32 1.0, %v6129_v15  ;;  %v1276_v25 = vmul.f32 0.5, %v1264_v9  ;;  %v1286_v26 = vmul.f32 %v1274_v14, %v6756_v38  ;;  %1296 = vst.msk [vmem:[#allocation2 + $0x10] sm:$0xff] %vm1038_vm7, %v1284_v7 }
 0x275   : > { %v6133_v27 = vpop.eup %6132  ;;  %v1267_v29 = vadd.f32 1.0, %v6131_v22  ;;  %v1277_v10 = vmul.f32 0.5, %v1265_v17  ;;  %v1287_v30 = vmul.f32 %v1275_v19, %v6758_v39  ;;  %1297 = vst.msk [vmem:[#allocation2 + $0x18] sm:$0xff] %vm1038_vm7, %v1285_v20 }
 0x276   : > { %v6135_v37 = vpop.eup %6134  ;;  %v1268_v11 = vadd.f32 1.0, %v6133_v27  ;;  %v1278_v31 = vmul.f32 0.5, %v1266_v23  ;;  %v1288_v12 = vmul.f32 %v1276_v25, %v6760_v40  ;;  %1298 = vst.msk [vmem:[#allocation2 + $0x20] sm:$0xff] %vm1038_vm7, %v1286_v26 }
 0x277   : > { %v6137_v32 = vpop.eup %6136  ;;  %v1269_v21 = vadd.f32 1.0, %v6135_v37  ;;  %v1279_v13 = vmul.f32 0.5, %v1267_v29  ;;  %v1289_v38 = vmul.f32 %v1277_v10, %v6762_v41  ;;  %1299 = vst.msk [vmem:[#allocation2 + $0x28] sm:$0xff] %vm1038_vm7, %v1287_v30 }
 0x278   : > { %v6139_v35 = vpop.eup %6138  ;;  %v1280_v16 = vmul.f32 0.5, %v1268_v11  ;;  %v1290_v39 = vmul.f32 %v1278_v31, %v6764_v34  ;;  %1300 = vst.msk [vmem:[#allocation2 + $0x30] sm:$0xff] %vm1038_vm7, %v1288_v12  ;;  %v1258_v36 = vadd.f32 1.0, %v6137_v32 }
 0x279   : > { %v1281_v18 = vmul.f32 0.5, %v1269_v21  ;;  %v1291_v24 = vmul.f32 %v1279_v13, %v6766_v43  ;;  %1301 = vst.msk [vmem:[#allocation2 + $0x38] sm:$0xff] %vm1038_vm7, %v1289_v38  ;;  %v1259_v40 = vadd.f32 1.0, %v6139_v35 }
 0x27a   : > { %v1292_v28 = vmul.f32 %v1280_v16, %v6768_v45  ;;  %1302 = vst.msk [vmem:[#allocation2 + $0x40] sm:$0xff] %vm1038_vm7, %v1290_v39  ;;  %v1270_v41 = vmul.f32 0.5, %v1258_v36 }
 0x27b   : > { %v1293_v44 = vmul.f32 %v1281_v18, %v6770_v46  ;;  %1303 = vst.msk [vmem:[#allocation2 + $0x48] sm:$0xff] %vm1038_vm7, %v1291_v24  ;;  %v1271_v48 = vmul.f32 0.5, %v1259_v40 }
 0x27c   : > { %1304 = vst.msk [vmem:[#allocation2 + $0x50] sm:$0xff] %vm1038_vm7, %v1292_v28  ;;  %v1282_v34 = vmul.f32 %v1270_v41, %v6750_v33  ;;  %v1327_v46 = vld [vmem:[#allocation2 + $0x11] ss:$2 sm:$0xff] }
 0x27d   : > { %1305 = vst.msk [vmem:[#allocation2 + $0x58] sm:$0x7f] %vm1060_vm8, %v1293_v44  ;;  %v1283_v43 = vmul.f32 %v1271_v48, %v6772_v47  ;;  %v1308_v47 = vld [vmem:[#allocation2 + $0x10] ss:$2 sm:$0xff] }
 0x27e   : > { %1294 = vst.msk [vmem:[#allocation2] sm:$0xff] %vm1038_vm7, %v1282_v34  ;;  %v1329_v49 = vld [vmem:[#allocation2 + $0x21] ss:$2 sm:$0xff]  ;;  %v1437_v58 = vld [vmem:[#allocation2 + $0x12] ss:$2 sm:$0xff] }
 0x27f   : > { %1295 = vst.msk [vmem:[#allocation2 + $0x8] sm:$0xff] %vm1038_vm7, %v1283_v43  ;;  %v1310_v59 = vld [vmem:[#allocation2 + $0x20] ss:$2 sm:$0xff] }
 0x280   : > { %v1331_v45 = vld [vmem:[#allocation2 + $0x31] ss:$2 sm:$0xff]  ;;  %v1312_v60 = vld [vmem:[#allocation2 + $0x30] ss:$2 sm:$0xff] }
 0x281   : > { %v1342_v50 = vpack.c.bf16 %v1331_v45, %v1329_v49  ;;  %v1322_v61 = vpack.c.bf16 %v1312_v60, %v1310_v59  ;;  %v1439_v62 = vld [vmem:[#allocation2 + $0x22] ss:$2 sm:$0xff]  ;;  %v1441_v63 = vld [vmem:[#allocation2 + $0x32] ss:$2 sm:$0xff] }
 0x282   : > { %v1333_v51 = vld [vmem:[#allocation2 + $0x41] ss:$2 sm:$0xff]  ;;  %v1452_v0 = vpack.c.bf16 %v1441_v63, %v1439_v62  ;;  %v1314_v1 = vld [vmem:[#allocation2 + $0x40] ss:$2 sm:$0xff] }
 0x283   : > { %5521 = vmatmul.msk.bf16.vlgmr.msra.gmra.mxu2 %vm1038_vm7, %v1342_v50  ;;  %v1443_v4 = vld [vmem:[#allocation2 + $0x42] ss:$2 sm:$0xff] }
 0x284   : > { %v1335_v52 = vld [vmem:[#allocation2 + $0x51] ss:$2 sm:$0x7f]  ;;  %v1316_v2 = vld [vmem:[#allocation2 + $0x50] ss:$2 sm:$0x7f] }
 0x285   : > { %v1343_v53 = vpack.c.bf16 %v1335_v52, %v1333_v51  ;;  %v1323_v3 = vpack.c.bf16 %v1316_v2, %v1314_v1  ;;  %v1445_v5 = vld [vmem:[#allocation2 + $0x52] ss:$2 sm:$0x7f] }
 0x286   : > { %v1325_v54 = vld [vmem:[#allocation2 + $0x1] ss:$2 sm:$0xff]  ;;  %v1306_v33 = vld [vmem:[#allocation2] ss:$2 sm:$0xff]  ;;  %v1453_v6 = vpack.c.bf16 %v1445_v5, %v1443_v4 }
 0x287   : > { %v1341_v42 = vpack.c.bf16 %v1327_v46, %v1325_v54  ;;  %5522 = vmatmul.msk.bf16.vlgmr.msrb.gmra.mxu3 %vm1038_vm7, %v1343_v53  ;;  %v1321_v55 = vpack.c.bf16 %v1308_v47, %v1306_v33  ;;  %v1435_v56 = vld [vmem:[#allocation2 + $0x2] ss:$2 sm:$0xff] }
 0x288   : > { %v1451_v57 = vpack.c.bf16 %v1437_v58, %v1435_v56 }
 0x289   : > { %5520 = vmatmul.msk.bf16.vlgmr.msra.gmra.mxu1 %vm1038_vm7, %v1341_v42 }
 0x293   : > { %5531 = vmatmul.msk.bf16.vlgmr.msrb.gmra.mxu2 %vm1038_vm7, %v1321_v55 }
 0x297   : > { %5546 = vmatmul.msk.bf16.vlgmr.msra.gmra.mxu3 %vm1038_vm7, %v1451_v57 }
 0x2a3   : > { %5532 = vmatmul.msk.bf16.gmra.mxu2 %vm1038_vm7, %v1322_v61 }
 0x2a7   : > { %5547 = vmatmul.msk.bf16.gmra.mxu3 %vm1038_vm7, %v1452_v0 }
 0x2b3   : > { %5533 = vmatmul.msk.bf16.gmra.mxu2 %vm1038_vm7, %v1323_v3 }
 0x2b7   : > { %5548 = vmatmul.msk.bf16.gmra.mxu3 %vm1038_vm7, %v1453_v6 }
 0x306   : > { %v1379_v8 = vpop.f32.mrf.mxu2  ;;  %v1374_v15 = vpop.f32.mrf.mxu1 }
 0x30a   : > { %v1384_v9 = vpop.f32.mrf.mxu3 }
 0x30e   : > { %v1381_v14 = vpop.f32.mrf.mxu2  ;;  %v1376_v25 = vpop.f32.mrf.mxu1 }
 0x312   : > { %v6873_v7 = vpop.f32.mrf.mxu3 }
 0x316   : > { %v1419_v17 = vpop.f32.mrf.mxu2 }
 0x317   : > { %v1420_v19 = vadd.f32 %v1419_v17, %v1374_v15 }
 0x31a   : > { %v1484_v20 = vpop.f32.mrf.mxu3 }
 0x31b   : > { %v1499_v22 = vadd.f32 %v1484_v20, %v1420_v19 }
 0x31d   : > { %v1505_v23 = vmul.f32 %v1499_v22, %v1499_v22 }
 0x31e   : > { %v1421_v26 = vpop.f32.mrf.mxu2 }
 0x31f   : > { %v1511_v27 = vmul.f32 %v1505_v23, %v1499_v22  ;;  %v1422_v29 = vadd.f32 %v1421_v26, %v1376_v25 }
 0x321   : > { %v1517_v10 = vmul.f32 0.044715, %v1511_v27 }
 0x322   : > { %v1486_v30 = vpop.f32.mrf.mxu3 }
 0x323   : > { %v1500_v37 = vadd.f32 %v1486_v30, %v1422_v29  ;;  %v1523_v11 = vadd.f32 %v1517_v10, %v1499_v22 }
 0x325   : > { %v1506_v31 = vmul.f32 %v1500_v37, %v1500_v37  ;;  %v1529_v12 = vmul.f32 0.7978846, %v1523_v11 }
 0x326   : > { %v1424_v32 = vpop.f32.mrf.mxu2 }
 0x327   : > { %v1512_v21 = vmul.f32 %v1506_v31, %v1500_v37  ;;  %v1425_v13 = vadd.f32 %v1424_v32, %v1379_v8  ;;  %6140 = vtanh.f32 %v1529_v12 }
 0x329   : > { %v1518_v38 = vmul.f32 0.044715, %v1512_v21 }
 0x32a   : > { %v1489_v35 = vpop.f32.mrf.mxu3 }
 0x32b   : > { %v1501_v16 = vadd.f32 %v1489_v35, %v1425_v13  ;;  %v1524_v39 = vadd.f32 %v1518_v38, %v1500_v37 }
 0x32d   : > { %v6141_v36 = vpop.eup %6140  ;;  %v1507_v18 = vmul.f32 %v1501_v16, %v1501_v16  ;;  %v1530_v24 = vmul.f32 0.7978846, %v1524_v39  ;;  %v6466_v39 = vmov 32.0  }
 0x32e   : > { %v1426_v40 = vpop.f32.mrf.mxu2  ;;  %v1541_v28 = vadd.f32 1.0, %v6141_v36 }
 0x32f   : > { %v1513_v41 = vmul.f32 %v1507_v18, %v1501_v16  ;;  %v1427_v44 = vadd.f32 %v1426_v40, %v1381_v14  ;;  %6142 = vtanh.f32 %v1530_v24 }
 0x330   : > { %v1547_v48 = vmul.f32 0.5, %v1541_v28 }
 0x331   : > { %v1519_v34 = vmul.f32 0.044715, %v1513_v41 }
 0x332   : > { %v1491_v43 = vpop.f32.mrf.mxu3  ;;  %v6875_v49 = vmul.f32 %v1547_v48, %v1499_v22 }
 0x333   : > { %v1502_v45 = vadd.f32 %v1491_v43, %v1427_v44  ;;  %v1525_v50 = vadd.f32 %v1519_v34, %v1501_v16 }
 0x334   : > { %v1561_v51 = vsel %vm1038_vm7, %v6875_v49, 0.0 }
 0x335   : > { %v6143_v46 = vpop.eup %6142  ;;  %v1508_v52 = vmul.f32 %v1502_v45, %v1502_v45  ;;  %1562 = vadd.xlane.f32.xlu1 %v1561_v51  ;;  %v1531_v53 = vmul.f32 0.7978846, %v1525_v50 }
 0x336   : > { %v1429_v54 = vpop.f32.mrf.mxu2  ;;  %v1542_v42 = vadd.f32 1.0, %v6143_v46 }
 0x337   : > { %v1514_v33 = vmul.f32 %v1508_v52, %v1502_v45  ;;  %v1430_v47 = vadd.f32 %v1429_v54, %v1384_v9  ;;  %6144 = vtanh.f32 %v1531_v53 }
 0x338   : > { %v1548_v55 = vmul.f32 0.5, %v1542_v42 }
 0x339   : > { %v1520_v56 = vmul.f32 0.044715, %v1514_v33 }
 0x33a   : > { %v1494_v58 = vpop.f32.mrf.mxu3  ;;  %v6879_v57 = vmul.f32 %v1548_v55, %v1500_v37 }
 0x33b   : > { %v1503_v59 = vadd.f32 %v1494_v58, %v1430_v47  ;;  %v1526_v60 = vadd.f32 %v1520_v56, %v1502_v45 }
 0x33c   : > { %v1564_v61 = vsel %vm1038_vm7, %v6879_v57, 0.0 }
 0x33d   : > { %v6145_v62 = vpop.eup %6144  ;;  %v1509_v63 = vmul.f32 %v1503_v59, %v1503_v59  ;;  %1565 = vadd.xlane.f32.xlu1 %v1564_v61  ;;  %v1532_v0 = vmul.f32 0.7978846, %v1526_v60 }
 0x33e   : > { %v1431_v1 = vpop.f32.mrf.mxu2  ;;  %v1543_v2 = vadd.f32 1.0, %v6145_v62 }
 0x33f   : > { %v1515_v3 = vmul.f32 %v1509_v63, %v1503_v59  ;;  %v1432_v4 = vadd.f32 %v1431_v1, %v6873_v7  ;;  %6146 = vtanh.f32 %v1532_v0 }
 0x340   : > { %v1549_v5 = vmul.f32 0.5, %v1543_v2 }
 0x341   : > { %v1521_v6 = vmul.f32 0.044715, %v1515_v3 }
 0x342   : > { %v1496_v8 = vpop.f32.mrf.mxu3  ;;  %v1555_v9 = vmul.f32 %v1549_v5, %v1501_v16 }
 0x343   : > { %v1504_v14 = vadd.f32 %v1496_v8, %v1432_v4  ;;  %v1527_v15 = vadd.f32 %v1521_v6, %v1503_v59 }
 0x344   : > { %v1567_v17 = vsel %vm1038_vm7, %v1555_v9, 0.0 }
 0x345   : > { %v6147_v19 = vpop.eup %6146  ;;  %v1510_v20 = vmul.f32 %v1504_v14, %v1504_v14  ;;  %1568 = vadd.xlane.f32.xlu2 %v1567_v17  ;;  %v1533_v22 = vmul.f32 0.7978846, %v1527_v15  ;;  %v5991_v15 = vld [vmem:[%s8554_s7] sm:$0xff] }
 0x346   : > { %v1544_v23 = vadd.f32 1.0, %v6147_v19 }
 0x347   : > { %v1516_v25 = vmul.f32 %v1510_v20, %v1504_v14  ;;  %6148 = vtanh.f32 %v1533_v22 }
 0x348   : > { %v1550_v26 = vmul.f32 0.5, %v1544_v23 }
 0x349   : > { %v1522_v27 = vmul.f32 0.044715, %v1516_v25 }
 0x34a   : > { %v1556_v29 = vmul.f32 %v1550_v26, %v1502_v45 }
 0x34b   : > { %v1528_v7 = vadd.f32 %v1522_v27, %v1504_v14 }
 0x34c   : > { %v1570_v10 = vsel %vm1038_vm7, %v1556_v29, 0.0 }
 0x34d   : > { %v6149_v30 = vpop.eup %6148  ;;  %1571 = vadd.xlane.f32.xlu2 %v1570_v10  ;;  %v1534_v37 = vmul.f32 0.7978846, %v1528_v7 }
 0x34e   : > { %v1545_v11 = vadd.f32 1.0, %v6149_v30 }
 0x34f   : > { %6150 = vtanh.f32 %v1534_v37 }
 0x350   : > { %v1551_v31 = vmul.f32 0.5, %v1545_v11  ;;  %6152 = vrcp.f32 %v6466_v39 }
 0x352   : > { %v1557_v12 = vmul.f32 %v1551_v31, %v1503_v59 }
 0x354   : > { %v1573_v32 = vsel %vm1038_vm7, %v1557_v12, 0.0 }
 0x355   : > { %v6151_v21 = vpop.eup %6150  ;;  %1574 = vadd.xlane.f32.xlu0 %v1573_v32 }
 0x356   : > { %v1546_v13 = vadd.f32 1.0, %v6151_v21  ;;  %v6153_v36 = vpop.eup %6152 }
 0x357   : > { %v1580_v18 = vmul.f32 32.0, %v6153_v36  ;;  %vm1584_vm13 = vweird.f32 %v6153_v36 }
 0x358   : > { %v1552_v38 = vmul.f32 0.5, %v1546_v13 }
 0x359   : > { %v1581_v24 = vsub.f32 1.0, %v1580_v18 }
 0x35a   : > { %v1558_v35 = vmul.f32 %v1552_v38, %v1504_v14 }
 0x35b   : > { %v1582_v40 = vmul.f32 %v6153_v36, %v1581_v24 }
 0x35c   : > { %v1576_v16 = vsel %vm1060_vm8, %v1558_v35, 0.0 }
 0x35d   : > { %1577 = vadd.xlane.f32.xlu1 %v1576_v16  ;;  %v1583_v28 = vadd.f32 %v6153_v36, %v1582_v40 }
 0x35f   : > { %v6888_v41 = vsel %vm1584_vm13, %v6153_v36, %v1583_v28  ;;  %v6942_v36 = vld [vmem:[%s8555_s30] ss:$0 sm:$0xff]  ;;  %s8560_s30 = sld [smem:[#allocation14_spill]] }
 0x3a8   : > { %v1563_v44 = vpop.xlane.xlu1 %1562 }
 0x3a9   : > { %v1586_v48 = vmul.f32 %v6888_v41, %v1563_v44 }
 0x3ab   : > { %v6892_v34 = vsub.f32 %v6875_v49, %v1586_v48 }
 0x3ad   : > { %v1598_v43 = vmul.f32 %v6892_v34, %v6892_v34 }
 0x3af   : > { %v1604_v45 = vsel %vm1038_vm7, %v1598_v43, 0.0 }
 0x3b0   : > { %1605 = vadd.xlane.f32.xlu2 %v1604_v45  ;;  %v1566_v50 = vpop.xlane.xlu1 %1565 }
 0x3b1   : > { %v1587_v51 = vmul.f32 %v6888_v41, %v1566_v50 }
 0x3b3   : > { %v6899_v46 = vsub.f32 %v6879_v57, %v1587_v51 }
 0x3b5   : > { %v1599_v52 = vmul.f32 %v6899_v46, %v6899_v46 }
 0x3b7   : > { %v1607_v53 = vsel %vm1038_vm7, %v1599_v52, 0.0 }
 0x3b8   : > { %v1569_v54 = vpop.xlane.xlu2 %1568  ;;  %1608 = vadd.xlane.f32.xlu0 %v1607_v53 }
 0x3b9   : > { %v1588_v49 = vmul.f32 %v6888_v41, %v1569_v54 }
 0x3bb   : > { %v6905_v42 = vsub.f32 %v1555_v9, %v1588_v49  ;;  %v5992_v9 = vld [vmem:[%s8554_s7 + $0x8] sm:$0xff]  ;;  %s6468_s7 = smov 64  }
 0x3bc   : > { %1756 = vmatpush.bf16.msrb.mxu1 %v5992_v9 }
 0x3bd   : > { %v1600_v33 = vmul.f32 %v6905_v42, %v6905_v42 }
 0x3bf   : > { %v1610_v47 = vsel %vm1038_vm7, %v1600_v33, 0.0 }
 0x3c0   : > { %v1572_v55 = vpop.xlane.xlu2 %1571  ;;  %1611 = vadd.xlane.f32.xlu1 %v1610_v47  ;;  %1757 = vmatpush.bf16.msrb.mxu1 %v5991_v15 }
 0x3c1   : > { %v1589_v56 = vmul.f32 %v6888_v41, %v1572_v55 }
 0x3c3   : > { %v6911_v58 = vsub.f32 %v1556_v29, %v1589_v56 }
 0x3c5   : > { %v1601_v57 = vmul.f32 %v6911_v58, %v6911_v58 }
 0x3c7   : > { %v1613_v59 = vsel %vm1038_vm7, %v1601_v57, 0.0 }
 0x3c8   : > { %v1575_v60 = vpop.xlane.xlu0 %1574  ;;  %1614 = vadd.xlane.f32.xlu2 %v1613_v59  ;;  %v6004_v59 = vld [vmem:[%s8559_s29 + $0x58] sm:$0xff] }
 0x3c9   : > { %v1590_v61 = vmul.f32 %v6888_v41, %v1575_v60  ;;  %v6000_v60 = vld [vmem:[%s8559_s29 + $0x38] sm:$0xff]  ;;  %1994 = vmatpush.bf16.msrb.mxu0 %v6004_v59 }
 0x3ca   : > { %1862 = vmatpush.bf16.msra.mxu2 %v6000_v60 }
 0x3cb   : > { %v6917_v62 = vsub.f32 %v1557_v12, %v1590_v61 }
 0x3cd   : > { %v1602_v63 = vmul.f32 %v6917_v62, %v6917_v62 }
 0x3cf   : > { %v1616_v0 = vsel %vm1038_vm7, %v1602_v63, 0.0 }
 0x3d0   : > { %1617 = vadd.xlane.f32.xlu0 %v1616_v0  ;;  %v1578_v1 = vpop.xlane.xlu1 %1577 }
 0x3d1   : > { %v1591_v2 = vmul.f32 %v6888_v41, %v1578_v1  ;;  %v5996_v1 = vld [vmem:[%s8559_s29 + $0x18] sm:$0xff] }
 0x3d2   : > { %1919 = vmatpush.bf16.msrb.mxu3 %v5996_v1 }
 0x3d3   : > { %v6923_v3 = vsub.f32 %v1558_v35, %v1591_v2 }
 0x3d5   : > { %v1603_v4 = vmul.f32 %v6923_v3, %v6923_v3 }
 0x3d7   : > { %v1619_v5 = vsel %vm1060_vm8, %v1603_v4, 0.0  ;;  %v6003_v4 = vld [vmem:[%s8559_s29 + $0x50] sm:$0xff] }
 0x3d8   : > { %1620 = vadd.xlane.f32.xlu1 %v1619_v5  ;;  %1995 = vmatpush.bf16.msrb.mxu0 %v6003_v4 }
 0x423   : > { %v1606_v6 = vpop.xlane.xlu2 %1605 }
 0x424   : > { %v1622_v8 = vmul.f32 %v1606_v6, %v6888_v41 }
 0x426   : > { %v1628_v14 = vadd.f32 1e-05, %v1622_v8 }
 0x428   : > { %6154 = vrsqrt.f32 %v1628_v14  ;;  %vm1640_vm15 = vweird.f32 %v1628_v14 }
 0x42b   : > { %v1609_v17 = vpop.xlane.xlu0 %1608 }
 0x42c   : > { %v1623_v19 = vmul.f32 %v1609_v17, %v6888_v41 }
 0x42e   : > { %v6155_v20 = vpop.eup %6154  ;;  %v1629_v22 = vadd.f32 1e-05, %v1623_v19 }
 0x42f   : > { %v1635_v23 = vmul.f32 %v6155_v20, %v1628_v14  ;;  %vm1641_vm14 = vweird.f32 %v6155_v20 }
 0x430   : > { %6156 = vrsqrt.f32 %v1629_v22  ;;  %vm1642_vm0 = vmor %vm1640_vm15, %vm1641_vm14  ;;  %vm1650_vm2 = vweird.f32 %v1629_v22 }
 0x431   : > { %v1636_v25 = vmul.f32 %v6155_v20, %v1635_v23 }
 0x433   : > { %v1637_v26 = vmul.f32 0.5, %v1636_v25  ;;  %v1612_v27 = vpop.xlane.xlu1 %1611 }
 0x434   : > { %v1624_v29 = vmul.f32 %v1612_v27, %v6888_v41 }
 0x435   : > { %v1638_v7 = vsub.f32 1.5, %v1637_v26 }
 0x436   : > { %v6157_v10 = vpop.eup %6156  ;;  %v1630_v30 = vadd.f32 1e-05, %v1624_v29 }
 0x437   : > { %v1639_v37 = vmul.f32 %v6155_v20, %v1638_v7  ;;  %v1645_v11 = vmul.f32 %v6157_v10, %v1629_v22  ;;  %vm1651_vm1 = vweird.f32 %v6157_v10 }
 0x438   : > { %6158 = vrsqrt.f32 %v1630_v30  ;;  %vm1652_vm3 = vmor %vm1650_vm2, %vm1651_vm1  ;;  %vm1660_vm5 = vweird.f32 %v1630_v30  ;;  %vm1774_vm2 = vcmask 523264  }
 0x439   : > { %v1646_v31 = vmul.f32 %v6157_v10, %v1645_v11  ;;  %v1643_v12 = vsel %vm1642_vm0, %v6155_v20, %v1639_v37 }
 0x43a   : > { %v1694_v16 = vmul.f32 %v1643_v12, %v6892_v34  ;;  %v6949_v34 = vld [vmem:[%s8556_s10] ss:$0 sm:$0xff]  ;;  %s8561_s10 = sld [smem:[#allocation17_spill]] }
 0x43b   : > { %v1647_v32 = vmul.f32 0.5, %v1646_v31  ;;  %v1615_v21 = vpop.xlane.xlu2 %1614 }
 0x43c   : > { %v1625_v13 = vmul.f32 %v1615_v21, %v6888_v41  ;;  %v1703_v48 = vmul.f32 %v6942_v36, %v1694_v16 }
 0x43d   : > { %v1648_v38 = vsub.f32 1.5, %v1647_v32 }
 0x43e   : > { %v6159_v35 = vpop.eup %6158  ;;  %v1631_v39 = vadd.f32 1e-05, %v1625_v13  ;;  %v1712_v49 = vadd.f32 %v6949_v34, %v1703_v48  ;;  %v6001_v48 = vld [vmem:[%s8559_s29 + $0x40] sm:$0xff] }
 0x43f   : > { %v1649_v18 = vmul.f32 %v6157_v10, %v1648_v38  ;;  %v1655_v24 = vmul.f32 %v6159_v35, %v1630_v30  ;;  %vm1661_vm4 = vweird.f32 %v6159_v35 }
 0x440   : > { %6160 = vrsqrt.f32 %v1631_v39  ;;  %vm6955_vm8 = vmor %vm1660_vm5, %vm1661_vm4  ;;  %vm1670_vm10 = vweird.f32 %v1631_v39  ;;  %vm2373_vm4 = vcmask 1046528   ;;  %vm2374_vm5 = vcmask 1047552  }
 0x441   : > { %v1653_v40 = vsel %vm1652_vm3, %v6157_v10, %v1649_v18  ;;  %v1656_v28 = vmul.f32 %v6159_v35, %v1655_v24  ;;  %v6467_v18 = vmov 0.0   ;;  %v5998_v24 = vld [vmem:[%s8559_s29 + $0x28] sm:$0xff]  ;;  %vm1788_vm3 = vcmask 522240  }
 0x442   : > { %v1695_v44 = vmul.f32 %v1653_v40, %v6899_v46  ;;  %1775 = vst.msk [vmem:[#allocation3] sm:$0xff] %vm1774_vm2, %v6467_v18  ;;  %v5994_v40 = vld [vmem:[%s8559_s29 + $0x8] sm:$0xff] }
 0x443   : > { %v1657_v43 = vmul.f32 0.5, %v1656_v28  ;;  %v1618_v45 = vpop.xlane.xlu0 %1617  ;;  %1776 = vst.msk [vmem:[#allocation3 + $0x8] sm:$0xff] %vm1774_vm2, %v6467_v18  ;;  %v5997_v28 = vld [vmem:[%s8559_s29 + $0x20] sm:$0xff] }
 0x444   : > { %v1626_v50 = vmul.f32 %v1618_v45, %v6888_v41  ;;  %v1704_v51 = vmul.f32 %v6942_v36, %v1695_v44  ;;  %1777 = vst.msk [vmem:[#allocation3 + $0x10] sm:$0xff] %vm1774_vm2, %v6467_v18  ;;  %v5993_v44 = vld [vmem:[%s8559_s29] sm:$0xff] }
 0x445   : > { %v1658_v52 = vsub.f32 1.5, %v1657_v43  ;;  %1778 = vst.msk [vmem:[#allocation3 + $0x18] sm:$0xff] %vm1774_vm2, %v6467_v18 }
 0x446   : > { %v6161_v53 = vpop.eup %6160  ;;  %v1632_v54 = vadd.f32 1e-05, %v1626_v50  ;;  %v1713_v46 = vadd.f32 %v6949_v34, %v1704_v51  ;;  %1779 = vst.msk [vmem:[#allocation3 + $0x20] sm:$0xff] %vm1774_vm2, %v6467_v18 }
 0x447   : > { %v1659_v33 = vmul.f32 %v6159_v35, %v1658_v52  ;;  %v1665_v47 = vmul.f32 %v6161_v53, %v1631_v39  ;;  %vm1671_vm9 = vweird.f32 %v6161_v53  ;;  %1780 = vst.msk [vmem:[#allocation3 + $0x28] sm:$0xff] %vm1774_vm2, %v6467_v18 }
 0x448   : > { %6162 = vrsqrt.f32 %v1632_v54  ;;  %v1722_v55 = vpack.c.bf16 %v1713_v46, %v1712_v49  ;;  %vm1672_vm11 = vmor %vm1670_vm10, %vm1671_vm9  ;;  %vm1680_vm13 = vweird.f32 %v1632_v54  ;;  %vm2306_vm9 = vcmask 382976  }
 0x449   : > { %v1666_v56 = vmul.f32 %v6161_v53, %v1665_v47  ;;  %v1663_v61 = vsel %vm6955_vm8, %v6159_v35, %v1659_v33  ;;  %vm2290_vm8 = vcmask 384000  }
 0x44a   : > { %5557 = vmatmul.msk.bf16.vlgmr.msrb.gmra.mxu1 %vm1038_vm7, %v1722_v55  ;;  %v1696_v9 = vmul.f32 %v1663_v61, %v6905_v42 }
 0x44b   : > { %v1667_v63 = vmul.f32 0.5, %v1666_v56  ;;  %v1621_v0 = vpop.xlane.xlu1 %1620 }
 0x44c   : > { %v1627_v2 = vmul.f32 %v1621_v0, %v6888_v41  ;;  %v1705_v20 = vmul.f32 %v6942_v36, %v1696_v9 }
 0x44d   : > { %v1668_v5 = vsub.f32 1.5, %v1667_v63 }
 0x44e   : > { %v6163_v6 = vpop.eup %6162  ;;  %v1633_v8 = vadd.f32 1e-05, %v1627_v2  ;;  %v1714_v27 = vadd.f32 %v6949_v34, %v1705_v20 }
 0x44f   : > { %v1669_v14 = vmul.f32 %v6161_v53, %v1668_v5  ;;  %v1675_v15 = vmul.f32 %v6163_v6, %v1632_v54  ;;  %vm1681_vm12 = vweird.f32 %v6163_v6 }
 0x450   : > { %6164 = vrsqrt.f32 %v1633_v8  ;;  %vm1682_vm14 = vmor %vm1680_vm13, %vm1681_vm12  ;;  %vm1690_vm0 = vweird.f32 %v1633_v8 }
 0x451   : > { %v1673_v41 = vsel %vm1672_vm11, %v6161_v53, %v1669_v14  ;;  %v1676_v17 = vmul.f32 %v6163_v6, %v1675_v15 }
 0x452   : > { %v1697_v19 = vmul.f32 %v1673_v41, %v6911_v58 }
 0x453   : > { %v1677_v22 = vmul.f32 0.5, %v1676_v17 }
 0x454   : > { %v1706_v23 = vmul.f32 %v6942_v36, %v1697_v19 }
 0x455   : > { %v1678_v25 = vsub.f32 1.5, %v1677_v22 }
 0x456   : > { %v6165_v26 = vpop.eup %6164  ;;  %v1715_v42 = vadd.f32 %v6949_v34, %v1706_v23 }
 0x457   : > { %v1679_v29 = vmul.f32 %v6163_v6, %v1678_v25  ;;  %v1685_v7 = vmul.f32 %v6165_v26, %v1633_v8  ;;  %vm1691_vm15 = vweird.f32 %v6165_v26 }
 0x458   : > { %v1723_v10 = vpack.c.bf16 %v1715_v42, %v1714_v27  ;;  %vm1692_vm1 = vmor %vm1690_vm0, %vm1691_vm15 }
 0x459   : > { %v1686_v30 = vmul.f32 %v6165_v26, %v1685_v7  ;;  %v1683_v58 = vsel %vm1682_vm14, %v6163_v6, %v1679_v29  ;;  %v5659_v7 = vld [vmem:[%s8561_s10 + $0x30] sm:$0xf] }
 0x45a   : > { %5558 = vmatmul.msk.bf16.gmra.mxu1 %vm1038_vm7, %v1723_v10  ;;  %v1698_v31 = vmul.f32 %v1683_v58, %v6917_v62  ;;  %v5999_v62 = vld [vmem:[%s8559_s29 + $0x30] sm:$0xff]  ;;  %v6012_v10 = vld [vmem:[%s8561_s10 + $0x34] sm:$0xf0] }
 0x45b   : > { %v1687_v37 = vmul.f32 0.5, %v1686_v30  ;;  %1863 = vmatpush.bf16.msra.mxu2 %v5999_v62  ;;  %v6011_v30 = vld [vmem:[%s8561_s10 + $0x34] sm:$0xf]  ;;  %v5660_v58 = vor.u32 %v6012_v10, %v5659_v7 }
 0x45c   : > { %v1707_v13 = vmul.f32 %v6942_v36, %v1698_v31 }
 0x45d   : > { %v1688_v11 = vsub.f32 1.5, %v1687_v37  ;;  %v5661_v37 = vld [vmem:[%s8561_s10 + $0x38] sm:$0xf0]  ;;  %2160 = vmatpush.bf16.msra.mxu1 %v5660_v58 }
 0x45e   : > { %v1716_v35 = vadd.f32 %v6949_v34, %v1707_v13  ;;  %v6009_v13 = vld [vmem:[%s8561_s10 + $0x24] sm:$0xf] }
 0x45f   : > { %v1689_v12 = vmul.f32 %v6165_v26, %v1688_v11  ;;  %1864 = vmatpush.bf16.msra.mxu2 %v5998_v24  ;;  %v5664_v11 = vor.u32 %v6011_v30, %v5661_v37  ;;  %v6008_v24 = vld [vmem:[%s8561_s10 + $0x14] sm:$0xf0] }
 0x461   : > { %v1693_v32 = vsel %vm1692_vm1, %v6165_v26, %v1689_v12 }
 0x462   : > { %v1699_v21 = vmul.f32 %v1693_v32, %v6923_v3  ;;  %v5995_v3 = vld [vmem:[%s8559_s29 + $0x10] sm:$0xff]  ;;  %v5651_v32 = vld [vmem:[%s8561_s10 + $0x20] sm:$0xf] }
 0x463   : > { %1920 = vmatpush.bf16.msrb.mxu3 %v5995_v3  ;;  %1865 = vmatpush.bf16.msra.mxu2 %v5997_v28 }
 0x464   : > { %v1708_v38 = vmul.f32 %v6942_v36, %v1699_v21  ;;  %v6002_v36 = vld [vmem:[%s8559_s29 + $0x48] sm:$0xff] }
 0x465   : > { %1996 = vmatpush.bf16.msrb.mxu0 %v6002_v36  ;;  %v6010_v21 = vld [vmem:[%s8561_s10 + $0x24] sm:$0xf0]  ;;  %v5643_v36 = vld [vmem:[%s8561_s10 + $0x10] sm:$0xf] }
 0x466   : > { %v1717_v16 = vadd.f32 %v6949_v34, %v1708_v38  ;;  %v6089_v34 = vld [vmem:[%s8560_s30] ss:$0 sm:$0xff]  ;;  %s8527_s30 = smov 16  }
 0x467   : > { %1921 = vmatpush.bf16.msrb.mxu3 %v5994_v40  ;;  %2184 = vmatpush.bf16.msrb.mxu2 %v5664_v11  ;;  %v6007_v40 = vld [vmem:[%s8561_s10 + $0x14] sm:$0xf] }
 0x468   : > { %v1724_v39 = vpack.c.bf16 %v1717_v16, %v1716_v35  ;;  %v7079_v35 = vld [vmem:[%s8562_s9] ss:$0 sm:$0xff]  ;;  %v5652_v16 = vor.u32 %v6010_v21, %v5651_v32  ;;  %s8529_s9 = smov 32  }
 0x469   : > { %1997 = vmatpush.bf16.msrb.mxu0 %v6001_v48  ;;  %v5645_v48 = vld [vmem:[%s8561_s10 + $0x18] sm:$0xf0] }
 0x46a   : > { %5559 = vmatmul.msk.bf16.gmra.mxu1 %vm1038_vm7, %v1724_v39  ;;  %vm1781_vm7 = vcmask 516096   ;;  %v5653_v39 = vld [vmem:[%s8561_s10 + $0x28] sm:$0xf0] }
 0x46b   : > { %1922 = vmatpush.bf16.msrb.mxu3 %v5993_v44  ;;  %1782 = vst.msk [vmem:[#allocation3 + $0x30] sm:$0x1] %vm1781_vm7, %v6467_v18  ;;  %v5656_v62 = vor.u32 %v6009_v13, %v5653_v39  ;;  %2161 = vmatpush.bf16.msra.mxu1 %v5652_v16  ;;  %v5644_v44 = vor.u32 %v6008_v24, %v5643_v36 }
 0x46d   : > { %2185 = vmatpush.bf16.msrb.mxu2 %v5656_v62 }
 0x46f   : > { %2162 = vmatpush.bf16.msra.mxu1 %v5644_v44 }
 0x4c7   : > { %v1759_v43 = vpop.f32.mrf.mxu1 }
 0x4c8   : > { %v7022_v45 = vadd.f32 %v6089_v34, %v1759_v43 }
 0x4ca   : > { %1783 = vst.msk [vmem:[#allocation3 + $0x1] sm:$0xff] %vm1774_vm2, %v7022_v45 }
 0x4cf   : > { %v1761_v50 = vpop.f32.mrf.mxu1 }
 0x4d0   : > { %v7026_v51 = vadd.f32 %v6089_v34, %v1761_v50 }
 0x4d1   : > { %v1807_v54 = vld [vmem:[#allocation3 + $0x1] sm:$0xff] }
 0x4d2   : > { %1784 = vst.msk [vmem:[#allocation3 + $0x9] sm:$0xff] %vm1774_vm2, %v7026_v51  ;;  %v1790_v46 = vld [vmem:[#allocation3] sm:$0xff] }
 0x4d7   : > { %v1764_v52 = vpop.f32.mrf.mxu1 }
 0x4d8   : > { %v7030_v53 = vadd.f32 %v6089_v34, %v1764_v52 }
 0x4d9   : > { %v1808_v49 = vld [vmem:[#allocation3 + $0x9] sm:$0xff] }
 0x4da   : > { %v1791_v33 = vld [vmem:[#allocation3 + $0x8] sm:$0xff]  ;;  %1785 = vst.msk [vmem:[#allocation3 + $0x11] sm:$0xff] %vm1774_vm2, %v7030_v53  ;;  %v1822_v47 = vpack.c.bf16 %v1808_v49, %v1807_v54  ;;  %v5635_v54 = vld [vmem:[%s8561_s10] sm:$0xf] }
 0x4db   : > { %v1804_v55 = vpack.c.bf16 %v1791_v33, %v1790_v46  ;;  %v1939_v59 = vld [vmem:[#allocation3 + $0x2] sm:$0xff] }
 0x4dc   : > { %5584 = vmatmul.msk.bf16.vlgmr.msra.gmra.mxu2 %vm1774_vm2, %v1822_v47  ;;  %v6006_v49 = vld [vmem:[%s8561_s10 + $0x4] sm:$0xf0]  ;;  %v6005_v46 = vld [vmem:[%s8561_s10 + $0x4] sm:$0xf] }
 0x4dd   : > { %5603 = vmatmul.msk.bf16.vlgmr.msrb.gmra.mxu3 %vm1774_vm2, %v1804_v55  ;;  %v5636_v55 = vor.u32 %v6006_v49, %v5635_v54 }
 0x4df   : > { %v1766_v56 = vpop.f32.mrf.mxu1  ;;  %2163 = vmatpush.bf16.msra.mxu1 %v5636_v55 }
 0x4e0   : > { %v7036_v57 = vadd.f32 %v6089_v34, %v1766_v56  ;;  %v5637_v56 = vld [vmem:[%s8561_s10 + $0x8] sm:$0xf0] }
 0x4e1   : > { %v1940_v60 = vld [vmem:[#allocation3 + $0xa] sm:$0xff] }
 0x4e2   : > { %1786 = vst.msk [vmem:[#allocation3 + $0x19] sm:$0xff] %vm1774_vm2, %v7036_v57  ;;  %v1954_v61 = vpack.c.bf16 %v1940_v60, %v1939_v59  ;;  %v1809_v1 = vld [vmem:[#allocation3 + $0x11] sm:$0xff]  ;;  %v5640_v60 = vor.u32 %v6005_v46, %v5637_v56 }
 0x4e3   : > { %v1792_v4 = vld [vmem:[#allocation3 + $0x10] sm:$0xff] }
 0x4e4   : > { %5630 = vmatmul.msk.bf16.vlgmr.msrb.gmra.mxu0 %vm1774_vm2, %v1954_v61 }
 0x4e7   : > { %v1769_v63 = vpop.f32.mrf.mxu1 }
 0x4e8   : > { %v7041_v0 = vadd.f32 %v6089_v34, %v1769_v63 }
 0x4e9   : > { %v1810_v2 = vld [vmem:[#allocation3 + $0x19] sm:$0xff] }
 0x4ea   : > { %v1793_v5 = vld [vmem:[#allocation3 + $0x18] sm:$0xff]  ;;  %1787 = vst.msk [vmem:[#allocation3 + $0x21] sm:$0xff] %vm1774_vm2, %v7041_v0  ;;  %v1823_v6 = vpack.c.bf16 %v1810_v2, %v1809_v1 }
 0x4eb   : > { %v1805_v8 = vpack.c.bf16 %v1793_v5, %v1792_v4  ;;  %v1941_v15 = vld [vmem:[#allocation3 + $0x12] sm:$0xff] }
 0x4ec   : > { %5585 = vmatmul.msk.bf16.gmra.mxu2 %vm1774_vm2, %v1823_v6 }
 0x4ed   : > { %5604 = vmatmul.msk.bf16.gmra.mxu3 %vm1774_vm2, %v1805_v8 }
 0x4ef   : > { %v1771_v9 = vpop.f32.mrf.mxu1 }
 0x4f0   : > { %v7047_v14 = vadd.f32 %v6089_v34, %v1771_v9  ;;  %v5648_v34 = vor.u32 %v6007_v40, %v5645_v48 }
 0x4f1   : > { %v1942_v41 = vld [vmem:[#allocation3 + $0x1a] sm:$0xff] }
 0x4f2   : > { %1789 = vst.msk [vmem:[#allocation3 + $0x29] sm:$0x7f] %vm1788_vm3, %v7047_v14  ;;  %v1955_v17 = vpack.c.bf16 %v1942_v41, %v1941_v15  ;;  %v1811_v19 = vld [vmem:[#allocation3 + $0x21] sm:$0xff]  ;;  %2186 = vmatpush.bf16.msrb.mxu2 %v5648_v34 }
 0x4f3   : > { %v1794_v22 = vld [vmem:[#allocation3 + $0x20] sm:$0xff] }
 0x4f4   : > { %5631 = vmatmul.msk.bf16.gmra.mxu0 %vm1774_vm2, %v1955_v17 }
 0x4f6   : > { %2187 = vmatpush.bf16.msrb.mxu2 %v5640_v60 }
 0x4f9   : > { %v1812_v20 = vld [vmem:[#allocation3 + $0x29] sm:$0x7f] }
 0x4fa   : > { %v1795_v23 = vld [vmem:[#allocation3 + $0x28] sm:$0x7f]  ;;  %v1824_v25 = vpack.c.bf16 %v1812_v20, %v1811_v19 }
 0x4fb   : > { %v1806_v26 = vpack.c.bf16 %v1795_v23, %v1794_v22  ;;  %v1943_v27 = vld [vmem:[#allocation3 + $0x22] sm:$0xff]  ;;  %v1944_v42 = vld [vmem:[#allocation3 + $0x2a] sm:$0x7f] }
 0x4fc   : > { %5586 = vmatmul.msk.bf16.gmra.mxu2 %vm1774_vm2, %v1824_v25  ;;  %v1956_v29 = vpack.c.bf16 %v1944_v42, %v1943_v27 }
 0x4fd   : > { %5605 = vmatmul.msk.bf16.gmra.mxu3 %vm1774_vm2, %v1806_v26 }
 0x504   : > { %5632 = vmatmul.msk.bf16.gmra.mxu0 %vm1774_vm2, %v1956_v29 }
 0x55f   : > { %v1867_v31 = vpop.f32.mrf.mxu2 }
 0x560   : > { %v1924_v12 = vpop.f32.mrf.mxu3 }
 0x561   : > { %v1925_v38 = vadd.f32 %v1924_v12, %v1867_v31  ;;  %v1999_v18 = vpop.f32.mrf.mxu0 }
 0x563   : > { %v2014_v3 = vadd.f32 %v1999_v18, %v1925_v38 }
 0x565   : > { %v2024_v28 = vadd.f32 %v7079_v35, %v2014_v3 }
 0x567   : > { %v2030_v43 = vmul.f32 %v2024_v28, %v2024_v28  ;;  %v1869_v50 = vpop.f32.mrf.mxu2 }
 0x568   : > { %v1926_v52 = vpop.f32.mrf.mxu3 }
 0x569   : > { %v2036_v33 = vmul.f32 %v2030_v43, %v2024_v28  ;;  %v1927_v47 = vadd.f32 %v1926_v52, %v1869_v50  ;;  %v2001_v59 = vpop.f32.mrf.mxu0 }
 0x56b   : > { %v2042_v61 = vmul.f32 0.044715, %v2036_v33  ;;  %v2015_v63 = vadd.f32 %v2001_v59, %v1927_v47 }
 0x56d   : > { %v2048_v1 = vadd.f32 %v2042_v61, %v2024_v28  ;;  %v2025_v2 = vadd.f32 %v7079_v35, %v2015_v63 }
 0x56f   : > { %v2054_v4 = vmul.f32 0.7978846, %v2048_v1  ;;  %v2031_v5 = vmul.f32 %v2025_v2, %v2025_v2  ;;  %v1872_v6 = vpop.f32.mrf.mxu2 }
 0x570   : > { %v1929_v8 = vpop.f32.mrf.mxu3 }
 0x571   : > { %6166 = vtanh.f32 %v2054_v4  ;;  %v2037_v9 = vmul.f32 %v2031_v5, %v2025_v2  ;;  %v1930_v15 = vadd.f32 %v1929_v8, %v1872_v6  ;;  %v2004_v41 = vpop.f32.mrf.mxu0 }
 0x573   : > { %v2043_v17 = vmul.f32 0.044715, %v2037_v9  ;;  %v2016_v19 = vadd.f32 %v2004_v41, %v1930_v15 }
 0x575   : > { %v2049_v20 = vadd.f32 %v2043_v17, %v2025_v2  ;;  %v2026_v22 = vadd.f32 %v7079_v35, %v2016_v19 }
 0x577   : > { %v6167_v23 = vpop.eup %6166  ;;  %v2055_v25 = vmul.f32 0.7978846, %v2049_v20  ;;  %v2032_v26 = vmul.f32 %v2026_v22, %v2026_v22  ;;  %v1874_v27 = vpop.f32.mrf.mxu2 }
 0x578   : > { %v1931_v42 = vpop.f32.mrf.mxu3  ;;  %v2066_v10 = vadd.f32 1.0, %v6167_v23 }
 0x579   : > { %6168 = vtanh.f32 %v2055_v25  ;;  %v2038_v29 = vmul.f32 %v2032_v26, %v2026_v22  ;;  %v1932_v7 = vadd.f32 %v1931_v42, %v1874_v27  ;;  %v2006_v30 = vpop.f32.mrf.mxu0 }
 0x57a   : > { %v2072_v12 = vmul.f32 0.5, %v2066_v10 }
 0x57b   : > { %v2044_v58 = vmul.f32 0.044715, %v2038_v29  ;;  %v2017_v37 = vadd.f32 %v2006_v30, %v1932_v7 }
 0x57c   : > { %v2078_v3 = vmul.f32 %v2072_v12, %v2024_v28 }
 0x57d   : > { %v2050_v11 = vadd.f32 %v2044_v58, %v2026_v22  ;;  %v2027_v31 = vadd.f32 %v7079_v35, %v2017_v37 }
 0x57e   : > { %v7114_v50 = vadd.f32 %v2078_v3, %v7022_v45 }
 0x57f   : > { %v6169_v32 = vpop.eup %6168  ;;  %v2056_v21 = vmul.f32 0.7978846, %v2050_v11  ;;  %v2033_v13 = vmul.f32 %v2027_v31, %v2027_v31  ;;  %v1877_v16 = vpop.f32.mrf.mxu2  ;;  %v2101_v11 = vld [vmem:[%s8501_s13] sm:$0x3] }
 0x580   : > { %v2067_v38 = vadd.f32 1.0, %v6169_v32  ;;  %v1934_v39 = vpop.f32.mrf.mxu3  ;;  %v2103_v12 = vperm.slane %v2101_v11, 0 }
 0x581   : > { %6170 = vtanh.f32 %v2056_v21  ;;  %v2039_v18 = vmul.f32 %v2033_v13, %v2027_v31  ;;  %v1935_v62 = vadd.f32 %v1934_v39, %v1877_v16  ;;  %v2009_v24 = vpop.f32.mrf.mxu0 }
 0x582   : > { %v2073_v36 = vmul.f32 0.5, %v2067_v38 }
 0x583   : > { %v2045_v40 = vmul.f32 0.044715, %v2039_v18  ;;  %v2018_v44 = vadd.f32 %v2009_v24, %v1935_v62 }
 0x584   : > { %v2079_v48 = vmul.f32 %v2073_v36, %v2025_v2 }
 0x585   : > { %v2051_v34 = vadd.f32 %v2045_v40, %v2027_v31  ;;  %v2028_v43 = vadd.f32 %v7079_v35, %v2018_v44 }
 0x586   : > { %v7117_v52 = vadd.f32 %v2079_v48, %v7026_v51 }
 0x587   : > { %v6171_v54 = vpop.eup %6170  ;;  %v2057_v49 = vmul.f32 0.7978846, %v2051_v34  ;;  %v2034_v46 = vmul.f32 %v2028_v43, %v2028_v43  ;;  %v1879_v33 = vpop.f32.mrf.mxu2 }
 0x588   : > { %v1936_v47 = vpop.f32.mrf.mxu3  ;;  %v2098_v28 = vpack.c.bf16 %v7117_v52, %v7114_v50  ;;  %v2068_v45 = vadd.f32 1.0, %v6171_v54 }
 0x589   : > { %v2040_v55 = vmul.f32 %v2034_v46, %v2028_v43  ;;  %v1937_v56 = vadd.f32 %v1936_v47, %v1879_v33  ;;  %6172 = vtanh.f32 %v2057_v49  ;;  %v2011_v59 = vpop.f32.mrf.mxu0 }
 0x58a   : > { %5665 = vmatmul.msk.bf16.vlgmr.msra.gmra.mxu1 %vm1774_vm2, %v2098_v28  ;;  %5668 = vmatmul.msk.bf16.vlgmr.msrb.gmra.mxu2 %vm1774_vm2, %v2098_v28  ;;  %v2074_v1 = vmul.f32 0.5, %v2068_v45  ;;  %v6469_v45 = vmov 65535  }
 0x58b   : > { %v2046_v60 = vmul.f32 0.044715, %v2040_v55  ;;  %v2019_v51 = vadd.f32 %v2011_v59, %v1937_v56 }
 0x58c   : > { %v2080_v15 = vmul.f32 %v2074_v1, %v2026_v22 }
 0x58d   : > { %v2052_v61 = vadd.f32 %v2046_v60, %v2028_v43  ;;  %v2029_v63 = vadd.f32 %v7079_v35, %v2019_v51  ;;  %v2375_v60 = vsel %vm2373_vm4, 4294967295, %v6469_v45 }
 0x58e   : > { %v7125_v20 = vadd.f32 %v2080_v15, %v7030_v53 }
 0x58f   : > { %v6173_v2 = vpop.eup %6172  ;;  %v2058_v4 = vmul.f32 0.7978846, %v2052_v61  ;;  %v2035_v5 = vmul.f32 %v2029_v63, %v2029_v63 }
 0x590   : > { %v2069_v6 = vadd.f32 1.0, %v6173_v2 }
 0x591   : > { %6174 = vtanh.f32 %v2058_v4  ;;  %v2041_v8 = vmul.f32 %v2035_v5, %v2029_v63 }
 0x592   : > { %v2075_v9 = vmul.f32 0.5, %v2069_v6 }
 0x593   : > { %v2047_v41 = vmul.f32 0.044715, %v2041_v8 }
 0x594   : > { %v2081_v17 = vmul.f32 %v2075_v9, %v2027_v31  ;;  %v2104_v31 = vperm.slane %v2101_v11, 1 }
 0x595   : > { %v2053_v19 = vadd.f32 %v2047_v41, %v2029_v63 }
 0x596   : > { %v7128_v23 = vadd.f32 %v2081_v17, %v7036_v57 }
 0x597   : > { %v6175_v25 = vpop.eup %6174  ;;  %v2059_v35 = vmul.f32 0.7978846, %v2053_v19 }
 0x598   : > { %v2099_v26 = vpack.c.bf16 %v7128_v23, %v7125_v20  ;;  %v2070_v22 = vadd.f32 1.0, %v6175_v25 }
 0x599   : > { %6176 = vtanh.f32 %v2059_v35 }
 0x59a   : > { %5666 = vmatmul.msk.bf16.gmra.mxu1 %vm1774_vm2, %v2099_v26  ;;  %5669 = vmatmul.msk.bf16.gmra.mxu2 %vm1774_vm2, %v2099_v26  ;;  %v2076_v27 = vmul.f32 0.5, %v2070_v22 }
 0x59c   : > { %v2082_v53 = vmul.f32 %v2076_v27, %v2028_v43 }
 0x59e   : > { %v7135_v57 = vadd.f32 %v2082_v53, %v7041_v0 }
 0x59f   : > { %v6177_v42 = vpop.eup %6176 }
 0x5a0   : > { %v2071_v29 = vadd.f32 1.0, %v6177_v42 }
 0x5a2   : > { %v2077_v7 = vmul.f32 0.5, %v2071_v29 }
 0x5a4   : > { %v2083_v10 = vmul.f32 %v2077_v7, %v2029_v63  ;;  %v7165_v63 = vsel %vm2374_vm5, %v2375_v60, 0 }
 0x5a6   : > { %v7138_v30 = vadd.f32 %v2083_v10, %v7047_v14 }
 0x5a8   : > { %v2100_v58 = vpack.c.bf16 %v7138_v30, %v7135_v57 }
 0x5aa   : > { %5667 = vmatmul.msk.bf16.gmra.mxu1 %vm1774_vm2, %v2100_v58  ;;  %5670 = vmatmul.msk.bf16.gmra.mxu2 %vm1774_vm2, %v2100_v58 }
 0x607   : > { %v2165_v37 = vpop.f32.mrf.mxu1 }
 0x608   : > { %v2166_v13 = vadd.f32 %v2165_v37, %v2103_v12 }
 0x60d   : > { %v2189_v32 = vpop.f32.mrf.mxu2 }
 0x60e   : > { %v2190_v0 = vadd.f32 %v2189_v32, %v2104_v31 }
 0x60f   : > { %v2167_v21 = vpop.f32.mrf.mxu1 }
 0x610   : > { %2205 = vst.msk [vmem:[#allocation4 + $0x8] sm:$0xff] %vm1774_vm2, %v2190_v0  ;;  %v2168_v14 = vadd.f32 %v2167_v21, %v2103_v12 }
 0x612   : > { %v7148_v38 = vpack.c.bf16 %v2168_v14, %v2166_v13 }
 0x614   : > { %2242 = vrot.lane.b32.xlu1 %v7148_v38, %s6468_s7 }
 0x615   : > { %v2191_v16 = vpop.f32.mrf.mxu2 }
 0x616   : > { %v2192_v39 = vadd.f32 %v2191_v16, %v2104_v31 }
 0x617   : > { %v2170_v18 = vpop.f32.mrf.mxu1  ;;  %v2230_v9 = vld [vmem:[#allocation4 + $0x8] sm:$0xff] }
 0x618   : > { %2207 = vst.msk [vmem:[#allocation4 + $0x18] sm:$0xff] %vm1774_vm2, %v2192_v39  ;;  %v2171_v24 = vadd.f32 %v2170_v18, %v2103_v12 }
 0x61d   : > { %v2194_v62 = vpop.f32.mrf.mxu2 }
 0x61e   : > { %v2195_v3 = vadd.f32 %v2194_v62, %v2104_v31 }
 0x61f   : > { %v2172_v36 = vpop.f32.mrf.mxu1  ;;  %v2231_v8 = vld [vmem:[#allocation4 + $0x18] sm:$0xff] }
 0x620   : > { %2209 = vst.msk [vmem:[#allocation4 + $0x28] sm:$0xff] %vm1774_vm2, %v2195_v3  ;;  %v2173_v40 = vadd.f32 %v2172_v36, %v2103_v12  ;;  %v7174_v15 = vpack.c.bf16 %v2231_v8, %v2230_v9 }
 0x622   : > { %v7154_v44 = vpack.c.bf16 %v2173_v40, %v2171_v24 }
 0x624   : > { %2244 = vrot.lane.b32.xlu0 %v7154_v44, %s6468_s7 }
 0x625   : > { %v2196_v48 = vpop.f32.mrf.mxu2 }
 0x626   : > { %v2197_v34 = vadd.f32 %v2196_v48, %v2104_v31 }
 0x627   : > { %v2175_v43 = vpop.f32.mrf.mxu1  ;;  %v2232_v5 = vld [vmem:[#allocation4 + $0x28] sm:$0xff] }
 0x628   : > { %2211 = vst.msk [vmem:[#allocation4 + $0x38] sm:$0xff] %vm1774_vm2, %v2197_v34  ;;  %v2176_v55 = vadd.f32 %v2175_v43, %v2103_v12 }
 0x62d   : > { %v2199_v54 = vpop.f32.mrf.mxu2 }
 0x62e   : > { %v2200_v49 = vadd.f32 %v2199_v54, %v2104_v31 }
 0x62f   : > { %v2177_v46 = vpop.f32.mrf.mxu1  ;;  %v2233_v4 = vld [vmem:[#allocation4 + $0x38] sm:$0xff] }
 0x630   : > { %2213 = vst.msk [vmem:[#allocation4 + $0x48] sm:$0xff] %vm1774_vm2, %v2200_v49  ;;  %v2178_v33 = vadd.f32 %v2177_v46, %v2103_v12  ;;  %v7171_v6 = vpack.c.bf16 %v2233_v4, %v2232_v5 }
 0x632   : > { %2214 = vst [vmem:[#allocation4 + $0x50] sm:$0x7f] %v2178_v33 }
 0x635   : > { %v2201_v47 = vpop.f32.mrf.mxu2 }
 0x636   : > { %v2202_v28 = vadd.f32 %v2201_v47, %v2104_v31 }
 0x637   : > { %v2234_v51 = vld [vmem:[#allocation4 + $0x48] sm:$0xff] }
 0x638   : > { %2215 = vst.msk [vmem:[#allocation4 + $0x58] sm:$0x7f] %vm1788_vm3, %v2202_v28 }
 0x639   : > { %v2229_v56 = vld [vmem:[#allocation4 + $0x50] sm:$0x7f] }
 0x63a   : > { %v7161_v59 = vpack.c.bf16 %v2229_v56, %v2176_v55 }
 0x63c   : > { %2246 = vrot.lane.b32.xlu2 %v7161_v59, %s6468_s7 }
 0x63f   : > { %v2235_v61 = vld [vmem:[#allocation4 + $0x58] sm:$0x7f] }
 0x640   : > { %v7167_v1 = vpack.c.bf16 %v2235_v61, %v2234_v51 }
 0x642   : > { %v2378_v2 = vand.u32 %v7165_v63, %v7167_v1 }
 0x644   : > { %2385 = vmatpush.bf16.msra.mxu0 %v2378_v2 }
 0x648   : > { %2386 = vmatpush.bf16.msra.mxu0 %v7171_v6 }
 0x64c   : > { %2387 = vmatpush.bf16.msra.mxu0 %v7174_v15 }
 0x686   : > { %v2243_v35 = vpop.permute.xlu1 %2242 }
 0x687   : > { %v2258_v26 = vsel %vm980_vm6, %v2243_v35, 0 }
 0x696   : > { %v2247_v41 = vpop.permute.xlu2 %2246  ;;  %v2245_v19 = vpop.permute.xlu0 %2244 }
 0x697   : > { %v2264_v17 = vsel %vm980_vm6, %v2247_v41, 0  ;;  %v2261_v25 = vsel %vm980_vm6, %v2245_v19, 0 }
 0x698   : > { %2271 = vmatpush.bf16.xpose.msra.mxu3 %v2264_v17 }
 0x6a0   : > { %2272 = vmatpush.bf16.xpose.msra.mxu3 %v2261_v25 }
 0x6a8   : > { %2273 = vmatpush.bf16.xpose.msra.mxu3 %v2258_v26 }
 0x6af   : > { %5671 = vmatmul.msk.bf16.vlgmr.msra.gmra.mxu3 %vm980_vm6, %v7148_v38 }
 0x6bf   : > { %5672 = vmatmul.msk.bf16.gmra.mxu3 %vm980_vm6, %v7154_v44 }
 0x6cf   : > { %5673 = vmatmul.msk.bf16.gmra.mxu3 %vm980_vm6, %v7161_v59 }
 0x732   : > { %v2275_v22 = vpop.f32.mrf.mxu3 }
 0x733   : > { %v2291_v27 = vsel %vm2290_vm8, %v2275_v22, -inf }
 0x734   : > { %2292 = vmax.xlane.f32.xlu2 %v2291_v27  ;;  %v6013_v27 = vld [vmem:[%s8502_s14] sm:$0xff] }
 0x735   : > { %2641 = vmatpush.bf16.msrb.mxu0 %v6013_v27 }
 0x73a   : > { %v2277_v42 = vpop.f32.mrf.mxu3 }
 0x73b   : > { %v2294_v29 = vsel %vm2290_vm8, %v2277_v42, -inf }
 0x73c   : > { %2295 = vmax.xlane.f32.xlu0 %v2294_v29 }
 0x742   : > { %v2280_v7 = vpop.f32.mrf.mxu3 }
 0x743   : > { %v2297_v53 = vsel %vm2290_vm8, %v2280_v7, -inf }
 0x744   : > { %2298 = vmax.xlane.f32.xlu1 %v2297_v53 }
 0x74a   : > { %v2282_v10 = vpop.f32.mrf.mxu3 }
 0x74b   : > { %v2300_v58 = vsel %vm2290_vm8, %v2282_v10, -inf }
 0x74c   : > { %2301 = vmax.xlane.f32.xlu2 %v2300_v58 }
 0x752   : > { %v2285_v37 = vpop.f32.mrf.mxu3 }
 0x753   : > { %v2303_v11 = vsel %vm2290_vm8, %v2285_v37, -inf }
 0x754   : > { %2304 = vmax.xlane.f32.xlu0 %v2303_v11 }
 0x75a   : > { %v2287_v31 = vpop.f32.mrf.mxu3 }
 0x75b   : > { %v2307_v12 = vsel %vm2306_vm9, %v2287_v31, -inf }
 0x75c   : > { %2308 = vmax.xlane.f32.xlu2 %v2307_v12 }
 0x7a7   : > { %v2293_v32 = vpop.xlane.xlu2 %2292 }
 0x7a8   : > { %v2310_v0 = vsub.f32 %v2275_v22, %v2293_v32 }
 0x7aa   : > { %v2316_v21 = vmul.f32 1.442695, %v2310_v0 }
 0x7ac   : > { %6178 = vpow2.f32 %v2316_v21 }
 0x7af   : > { %v2296_v13 = vpop.xlane.xlu0 %2295 }
 0x7b0   : > { %v2311_v14 = vsub.f32 %v2277_v42, %v2296_v13 }
 0x7b2   : > { %v7192_v16 = vpop.eup %6178  ;;  %v2318_v39 = vmul.f32 1.442695, %v2311_v14 }
 0x7b3   : > { %v2328_v18 = vsel %vm2290_vm8, %v7192_v16, 0.0 }
 0x7b4   : > { %6180 = vpow2.f32 %v2318_v39  ;;  %2329 = vadd.xlane.f32.xlu1 %v2328_v18 }
 0x7b7   : > { %v2299_v62 = vpop.xlane.xlu1 %2298 }
 0x7b8   : > { %v2312_v3 = vsub.f32 %v2280_v7, %v2299_v62 }
 0x7ba   : > { %v6181_v36 = vpop.eup %6180  ;;  %v2320_v24 = vmul.f32 1.442695, %v2312_v3 }
 0x7bb   : > { %v2331_v40 = vsel %vm2290_vm8, %v6181_v36, 0.0 }
 0x7bc   : > { %6182 = vpow2.f32 %v2320_v24  ;;  %2332 = vadd.xlane.f32.xlu0 %v2331_v40 }
 0x7bf   : > { %v2302_v48 = vpop.xlane.xlu2 %2301 }
 0x7c0   : > { %v2313_v34 = vsub.f32 %v2282_v10, %v2302_v48 }
 0x7c2   : > { %v6183_v43 = vpop.eup %6182  ;;  %v2322_v54 = vmul.f32 1.442695, %v2313_v34 }
 0x7c3   : > { %v2334_v49 = vsel %vm2290_vm8, %v6183_v43, 0.0 }
 0x7c4   : > { %6184 = vpow2.f32 %v2322_v54  ;;  %2335 = vadd.xlane.f32.xlu2 %v2334_v49 }
 0x7c7   : > { %v2305_v46 = vpop.xlane.xlu0 %2304 }
 0x7c8   : > { %v2314_v33 = vsub.f32 %v2285_v37, %v2305_v46 }
 0x7ca   : > { %v6185_v47 = vpop.eup %6184  ;;  %v2324_v28 = vmul.f32 1.442695, %v2314_v33 }
 0x7cb   : > { %v2337_v55 = vsel %vm2290_vm8, %v6185_v47, 0.0 }
 0x7cc   : > { %6186 = vpow2.f32 %v2324_v28  ;;  %2338 = vadd.xlane.f32.xlu1 %v2337_v55 }
 0x7cf   : > { %v2309_v56 = vpop.xlane.xlu2 %2308 }
 0x7d0   : > { %v2315_v45 = vsub.f32 %v2287_v31, %v2309_v56 }
 0x7d2   : > { %v6187_v60 = vpop.eup %6186  ;;  %v2326_v51 = vmul.f32 1.442695, %v2315_v45 }
 0x7d3   : > { %v2340_v61 = vsel %vm2290_vm8, %v6187_v60, 0.0 }
 0x7d4   : > { %6188 = vpow2.f32 %v2326_v51  ;;  %2341 = vadd.xlane.f32.xlu0 %v2340_v61 }
 0x7da   : > { %v6189_v2 = vpop.eup %6188 }
 0x7db   : > { %v2343_v4 = vsel %vm2306_vm9, %v6189_v2, 0.0 }
 0x7dc   : > { %2344 = vadd.xlane.f32.xlu2 %v2343_v4 }
 0x7e5   : > { %2417 = vrot.lane.b32.xlu1 %v7161_v59, %s8533_s1 }
 0x7e8   : > { %2415 = vrot.lane.b32.xlu0 %v7154_v44, %s8533_s1 }
 0x7ed   : > { %2409 = vrot.lane.b32.xlu1 %v7154_v44, %s8531_s4 }
 0x7f0   : > { %2407 = vrot.lane.b32.xlu0 %v7148_v38, %s8531_s4 }
 0x7f4   : > { %2413 = vrot.lane.b32.xlu2 %v7148_v38, %s8533_s1  ;;  %s6063_s1 = smul.u32 48, %s8570_s5 }
 0x7f5   : > { %2666 = vrot.lane.b32.xlu1 %v7154_v44, %s8529_s9 }
 0x7f8   : > { %2411 = vrot.lane.b32.xlu0 %v7161_v59, %s8531_s4 }
 0x7fc   : > { %2668 = vrot.lane.b32.xlu2 %v7161_v59, %s8529_s9 }
 0x7fd   : > { %2881 = vrot.lane.b32.xlu1 %v7154_v44, %s8527_s30 }
 0x800   : > { %2664 = vrot.lane.b32.xlu0 %v7148_v38, %s8529_s9 }
 0x804   : > { %2883 = vrot.lane.b32.xlu2 %v7161_v59, %s8527_s30 }
 0x805   : > { %2873 = vrot.lane.b32.xlu1 %v7148_v38, %s8523_s3 }
 0x808   : > { %2879 = vrot.lane.b32.xlu0 %v7148_v38, %s8527_s30 }
 0x80c   : > { %2658 = vrot.lane.b32.xlu2 %v7148_v38, %s8525_s6 }
 0x80d   : > { %2662 = vrot.lane.b32.xlu1 %v7161_v59, %s8525_s6 }
 0x810   : > { %2875 = vrot.lane.b32.xlu0 %v7154_v44, %s8523_s3 }
 0x814   : > { %2660 = vrot.lane.b32.xlu2 %v7154_v44, %s8525_s6 }
 0x81c   : > { %2877 = vrot.lane.b32.xlu2 %v7161_v59, %s8523_s3 }
 0x827   : > { %v2330_v5 = vpop.xlane.xlu1 %2329 }
 0x828   : > { %6190 = vrcp.f32 %v2330_v5 }
 0x82e   : > { %v6191_v9 = vpop.eup %6190 }
 0x82f   : > { %v2333_v8 = vpop.xlane.xlu0 %2332  ;;  %v2352_v38 = vmul.f32 %v6191_v9, %v7192_v16 }
 0x830   : > { %6192 = vrcp.f32 %v2333_v8 }
 0x836   : > { %v6193_v41 = vpop.eup %6192 }
 0x837   : > { %v2353_v17 = vmul.f32 %v6193_v41, %v6181_v36  ;;  %v2336_v25 = vpop.xlane.xlu2 %2335 }
 0x838   : > { %6194 = vrcp.f32 %v2336_v25 }
 0x839   : > { %v2358_v19 = vpack.c.bf16 %v2353_v17, %v2352_v38 }
 0x83b   : > { %5674 = vmatmul.msk.bf16.vlgmr.msra.gmra.mxu0 %vm2290_vm8, %v2358_v19 }
 0x83e   : > { %v6195_v44 = vpop.eup %6194 }
 0x83f   : > { %v2339_v35 = vpop.xlane.xlu1 %2338  ;;  %v2354_v22 = vmul.f32 %v6195_v44, %v6183_v43 }
 0x840   : > { %6196 = vrcp.f32 %v2339_v35 }
 0x846   : > { %v6197_v26 = vpop.eup %6196 }
 0x847   : > { %v2355_v59 = vmul.f32 %v6197_v26, %v6185_v47  ;;  %v2342_v29 = vpop.xlane.xlu0 %2341 }
 0x848   : > { %6198 = vrcp.f32 %v2342_v29 }
 0x849   : > { %v2359_v42 = vpack.c.bf16 %v2355_v59, %v2354_v22 }
 0x84b   : > { %5675 = vmatmul.msk.bf16.gmra.mxu0 %vm2290_vm8, %v2359_v42 }
 0x84e   : > { %v6199_v53 = vpop.eup %6198 }
 0x84f   : > { %v2345_v7 = vpop.xlane.xlu2 %2344  ;;  %v2356_v11 = vmul.f32 %v6199_v53, %v6187_v60 }
 0x850   : > { %6200 = vrcp.f32 %v2345_v7 }
 0x856   : > { %v6201_v10 = vpop.eup %6200 }
 0x857   : > { %v2418_v58 = vpop.permute.xlu1 %2417  ;;  %v2414_v37 = vpop.permute.xlu2 %2413  ;;  %v2357_v31 = vmul.f32 %v6201_v10, %v6189_v2 }
 0x858   : > { %v2435_v12 = vsel %vm980_vm6, %v2418_v58, 0  ;;  %v2429_v3 = vsel %vm980_vm6, %v2414_v37, 0 }
 0x859   : > { %2442 = vmatpush.bf16.xpose.msrb.mxu1 %v2435_v12  ;;  %v2360_v32 = vpack.c.bf16 %v2357_v31, %v2356_v11 }
 0x85a   : > { %v2416_v0 = vpop.permute.xlu0 %2415 }
 0x85b   : > { %5676 = vmatmul.msk.bf16.gmra.mxu0 %vm2290_vm8, %v2360_v32  ;;  %v2432_v14 = vsel %vm980_vm6, %v2416_v0, 0 }
 0x85f   : > { %v2410_v21 = vpop.permute.xlu1 %2409  ;;  %v2669_v13 = vpop.permute.xlu2 %2668 }
 0x860   : > { %v2686_v36 = vsel %vm980_vm6, %v2669_v13, 0 }
 0x861   : > { %2443 = vmatpush.bf16.xpose.msrb.mxu1 %v2432_v14 }
 0x862   : > { %v2408_v16 = vpop.permute.xlu0 %2407 }
 0x867   : > { %v2667_v39 = vpop.permute.xlu1 %2666  ;;  %v2884_v18 = vpop.permute.xlu2 %2883 }
 0x868   : > { %v2901_v62 = vsel %vm980_vm6, %v2884_v18, 0  ;;  %v2683_v34 = vsel %vm980_vm6, %v2667_v39, 0 }
 0x869   : > { %2444 = vmatpush.bf16.xpose.msrb.mxu1 %v2429_v3  ;;  %2908 = vmatpush.bf16.xpose.msra.mxu0 %v2901_v62 }
 0x86a   : > { %v2412_v24 = vpop.permute.xlu0 %2411 }
 0x86f   : > { %v2882_v40 = vpop.permute.xlu1 %2881  ;;  %v2659_v33 = vpop.permute.xlu2 %2658 }
 0x870   : > { %5677 = vmatmul.msk.bf16.vlgmr.msrb.gmra.mxu1 %vm980_vm6, %v2408_v16  ;;  %v2898_v48 = vsel %vm980_vm6, %v2882_v40, 0 }
 0x871   : > { %2693 = vmatpush.bf16.xpose.msra.mxu1 %v2686_v36  ;;  %2909 = vmatpush.bf16.xpose.msra.mxu0 %v2898_v48 }
 0x872   : > { %v2665_v43 = vpop.permute.xlu0 %2664 }
 0x873   : > { %v2680_v54 = vsel %vm980_vm6, %v2665_v43, 0 }
 0x877   : > { %v2661_v47 = vpop.permute.xlu2 %2660  ;;  %v2874_v28 = vpop.permute.xlu1 %2873 }
 0x879   : > { %2694 = vmatpush.bf16.xpose.msra.mxu1 %v2683_v34 }
 0x87a   : > { %v2880_v49 = vpop.permute.xlu0 %2879 }
 0x87b   : > { %v2895_v46 = vsel %vm980_vm6, %v2880_v49, 0 }
 0x87c   : > { %2910 = vmatpush.bf16.xpose.msra.mxu0 %v2895_v46 }
 0x87f   : > { %v2663_v56 = vpop.permute.xlu1 %2662  ;;  %v2878_v27 = vpop.permute.xlu2 %2877 }
 0x880   : > { %5678 = vmatmul.msk.bf16.gmra.mxu1 %vm980_vm6, %v2410_v21 }
 0x881   : > { %2695 = vmatpush.bf16.xpose.msra.mxu1 %v2680_v54 }
 0x882   : > { %v2876_v35 = vpop.permute.xlu0 %2875 }
 0x890   : > { %5679 = vmatmul.msk.bf16.gmra.mxu1 %vm980_vm6, %v2412_v24 }
 0x8a0   : > { %5697 = vmatmul.msk.bf16.vlgmr.msra.gmra.mxu1 %vm980_vm6, %v2659_v33 }
 0x8b0   : > { %5698 = vmatmul.msk.bf16.gmra.mxu1 %vm980_vm6, %v2661_v47 }
 0x8b8   : > { %v2389_v55 = vpop.f32.mrf.mxu0 }
 0x8c0   : > { %v2391_v45 = vpop.f32.mrf.mxu0  ;;  %5699 = vmatmul.msk.bf16.gmra.mxu1 %vm980_vm6, %v2663_v56 }
 0x8c1   : > { %v2404_v60 = vpack.c.bf16 %v2391_v45, %v2389_v55 }
 0x8c3   : > { %5694 = vmatmul.msk.bf16.vlgmr.msrb.gmra.mxu0 %vm980_vm6, %v2404_v60 }
 0x8c8   : > { %v2394_v51 = vpop.f32.mrf.mxu0 }
 0x8d0   : > { %v2396_v61 = vpop.f32.mrf.mxu0 }
 0x8d1   : > { %v2405_v2 = vpack.c.bf16 %v2396_v61, %v2394_v51 }
 0x8d3   : > { %5695 = vmatmul.msk.bf16.gmra.mxu0 %vm980_vm6, %v2405_v2 }
 0x8d8   : > { %v2399_v4 = vpop.f32.mrf.mxu0 }
 0x8e0   : > { %v2401_v5 = vpop.f32.mrf.mxu0 }
 0x8e1   : > { %v2406_v8 = vpack.c.bf16 %v2401_v5, %v2399_v4 }
 0x8e3   : > { %5696 = vmatmul.msk.bf16.gmra.mxu0 %vm980_vm6, %v2406_v8 }
 0x8ed   : > { %v2446_v9 = vpop.f32.mrf.mxu1 }
 0x8ee   : > { %v2461_v41 = vsel %vm2290_vm8, %v2446_v9, -inf }
 0x8ef   : > { %2462 = vmax.xlane.f32.xlu0 %v2461_v41 }
 0x8f3   : > { %5710 = vmatmul.msk.bf16.vlgmr.msra.gmra.mxu0 %vm980_vm6, %v2874_v28 }
 0x8f5   : > { %v2448_v38 = vpop.f32.mrf.mxu1 }
 0x8f6   : > { %v2464_v17 = vsel %vm2290_vm8, %v2448_v38, -inf }
 0x8f7   : > { %2465 = vmax.xlane.f32.xlu1 %v2464_v17 }
 0x8fd   : > { %v7265_v19 = vpop.f32.mrf.mxu1 }
 0x8fe   : > { %v2467_v25 = vsel %vm2290_vm8, %v7265_v19, -inf }
 0x8ff   : > { %2468 = vmax.xlane.f32.xlu2 %v2467_v25 }
 0x903   : > { %5711 = vmatmul.msk.bf16.gmra.mxu0 %vm980_vm6, %v2876_v35 }
 0x905   : > { %v2453_v44 = vpop.f32.mrf.mxu1 }
 0x906   : > { %v2470_v26 = vsel %vm2290_vm8, %v2453_v44, -inf }
 0x907   : > { %2471 = vmax.xlane.f32.xlu0 %v2470_v26 }
 0x90d   : > { %v7271_v22 = vpop.f32.mrf.mxu1 }
 0x90e   : > { %v2473_v59 = vsel %vm2290_vm8, %v7271_v22, -inf }
 0x90f   : > { %2474 = vmax.xlane.f32.xlu1 %v2473_v59 }
 0x913   : > { %5712 = vmatmul.msk.bf16.gmra.mxu0 %vm980_vm6, %v2878_v27 }
 0x915   : > { %v2458_v42 = vpop.f32.mrf.mxu1 }
 0x916   : > { %v2476_v29 = vsel %vm2306_vm9, %v2458_v42, -inf }
 0x917   : > { %2477 = vmax.xlane.f32.xlu2 %v2476_v29 }
 0x91d   : > { %v7277_v7 = vpop.f32.mrf.mxu1 }
 0x91e   : > { %v2712_v53 = vsel %vm2290_vm8, %v7277_v7, -inf }
 0x91f   : > { %2713 = vmax.xlane.f32.xlu0 %v2712_v53 }
 0x925   : > { %v7281_v10 = vpop.f32.mrf.mxu1 }
 0x926   : > { %v2715_v58 = vsel %vm2290_vm8, %v7281_v10, -inf }
 0x927   : > { %2716 = vmax.xlane.f32.xlu1 %v2715_v58 }
 0x92d   : > { %v7287_v37 = vpop.f32.mrf.mxu1 }
 0x92e   : > { %v2718_v11 = vsel %vm2290_vm8, %v7287_v37, -inf }
 0x92f   : > { %2537 = vrot.lane.b32.xlu2 %v7167_v1, %s8531_s4 }
 0x935   : > { %v7305_v34 = vpop.f32.mrf.mxu1 }
 0x936   : > { %v2721_v26 = vsel %vm2290_vm8, %v7305_v34, -inf }
 0x93d   : > { %v7315_v47 = vpop.f32.mrf.mxu1 }
 0x93e   : > { %v2724_v45 = vsel %vm2290_vm8, %v7315_v47, -inf }
 0x940   : > { %v7291_v12 = vpop.f32.mrf.mxu0 }
 0x948   : > { %v7295_v16 = vpop.f32.mrf.mxu0 }
 0x950   : > { %v7303_v36 = vpop.f32.mrf.mxu0 }
 0x958   : > { %2719 = vmax.xlane.f32.xlu2 %v2718_v11  ;;  %v7307_v43 = vpop.f32.mrf.mxu0  ;;  %v7357_v11 = vpop.f32.mrf.mxu1 }
 0x960   : > { %v7317_v28 = vpop.f32.mrf.mxu0 }
 0x962   : > { %v2463_v31 = vpop.xlane.xlu0 %2462 }
 0x963   : > { %v2479_v32 = vsub.f32 %v2446_v9, %v2463_v31  ;;  %v2727_v31 = vsel %vm2306_vm9, %v7357_v11, -inf }
 0x965   : > { %v2485_v0 = vmul.f32 1.442695, %v2479_v32 }
 0x967   : > { %6202 = vpow2.f32 %v2485_v0 }
 0x968   : > { %v7326_v2 = vpop.f32.mrf.mxu0 }
 0x96a   : > { %v2466_v21 = vpop.xlane.xlu1 %2465 }
 0x96b   : > { %v2480_v13 = vsub.f32 %v2448_v38, %v2466_v21 }
 0x96d   : > { %v7293_v14 = vpop.eup %6202  ;;  %v2487_v39 = vmul.f32 1.442695, %v2480_v13 }
 0x96e   : > { %v2497_v18 = vsel %vm2290_vm8, %v7293_v14, 0.0 }
 0x96f   : > { %6204 = vpow2.f32 %v2487_v39  ;;  %2498 = vadd.xlane.f32.xlu0 %v2497_v18 }
 0x970   : > { %v7330_v5 = vpop.f32.mrf.mxu0 }
 0x971   : > { %v2927_v32 = vsel %vm2290_vm8, %v7330_v5, -inf }
 0x972   : > { %v2469_v54 = vpop.xlane.xlu2 %2468 }
 0x973   : > { %v2481_v38 = vsub.f32 %v7265_v19, %v2469_v54 }
 0x975   : > { %v7299_v62 = vpop.eup %6204 }
 0x976   : > { %v2500_v3 = vsel %vm2290_vm8, %v7299_v62, 0.0 }
 0x977   : > { %2501 = vadd.xlane.f32.xlu1 %v2500_v3 }
 0x978   : > { %v7334_v25 = vpop.f32.mrf.mxu0 }
 0x97a   : > { %v2472_v24 = vpop.xlane.xlu0 %2471 }
 0x97b   : > { %v2482_v40 = vsub.f32 %v2453_v44, %v2472_v24  ;;  %v2489_v44 = vmul.f32 1.442695, %v2481_v38  ;;  %v2930_v38 = vsel %vm2290_vm8, %v7334_v25, -inf }
 0x97d   : > { %v2491_v48 = vmul.f32 1.442695, %v2482_v40 }
 0x97f   : > { %6206 = vpow2.f32 %v2491_v48 }
 0x980   : > { %v7343_v27 = vpop.f32.mrf.mxu0 }
 0x981   : > { %v2933_v18 = vsel %vm2290_vm8, %v7343_v27, -inf }
 0x982   : > { %v2475_v8 = vpop.xlane.xlu1 %2474 }
 0x983   : > { %2535 = vrot.lane.b32.xlu0 %v7171_v6, %s8531_s4  ;;  %v2483_v9 = vsub.f32 %v7271_v22, %v2475_v8 }
 0x985   : > { %v7311_v49 = vpop.eup %6206  ;;  %v2493_v41 = vmul.f32 1.442695, %v2483_v9 }
 0x986   : > { %v2506_v46 = vsel %vm2290_vm8, %v7311_v49, 0.0 }
 0x987   : > { %2507 = vadd.xlane.f32.xlu2 %v2506_v46 }
 0x988   : > { %v7355_v58 = vpop.f32.mrf.mxu0 }
 0x989   : > { %v2936_v21 = vsel %vm2290_vm8, %v7355_v58, -inf }
 0x98a   : > { %v2478_v33 = vpop.xlane.xlu2 %2477 }
 0x98b   : > { %v2484_v55 = vsub.f32 %v2458_v42, %v2478_v33 }
 0x98d   : > { %v2495_v56 = vmul.f32 1.442695, %v2484_v55 }
 0x98f   : > { %6208 = vpow2.f32 %v2495_v56  ;;  %2725 = vmax.xlane.f32.xlu2 %v2724_v45 }
 0x990   : > { %2533 = vrot.lane.b32.xlu1 %v7174_v15, %s8531_s4  ;;  %6210 = vpow2.f32 %v2493_v41  ;;  %v7363_v0 = vpop.f32.mrf.mxu0 }
 0x991   : > { %6212 = vpow2.f32 %v2489_v44 }
 0x992   : > { %v2538_v60 = vpop.permute.xlu2 %2537  ;;  %v2714_v3 = vpop.xlane.xlu0 %2713 }
 0x993   : > { %v2551_v51 = vand.u32 %v2538_v60, %v7165_v63  ;;  %v2730_v48 = vsub.f32 %v7277_v7, %v2714_v3 }
 0x995   : > { %v7324_v61 = vpop.eup %6208  ;;  %2558 = vmatpush.bf16.msra.mxu2 %v2551_v51  ;;  %v2736_v33 = vmul.f32 1.442695, %v2730_v48 }
 0x996   : > { %v2512_v4 = vsel %vm2306_vm9, %v7324_v61, 0.0  ;;  %v7341_v22 = vpop.eup %6210 }
 0x997   : > { %2513 = vadd.xlane.f32.xlu2 %v2512_v4  ;;  %v2509_v19 = vsel %vm2290_vm8, %v7341_v22, 0.0  ;;  %v7347_v42 = vpop.eup %6212 }
 0x998   : > { %v2503_v53 = vsel %vm2290_vm8, %v7347_v42, 0.0  ;;  %v7367_v13 = vpop.f32.mrf.mxu0 }
 0x999   : > { %v2942_v39 = vsel %vm2306_vm9, %v7367_v13, -inf }
 0x99a   : > { %v2717_v17 = vpop.xlane.xlu1 %2716 }
 0x99b   : > { %v2731_v35 = vsub.f32 %v7281_v10, %v2717_v17 }
 0x99d   : > { %v2738_v59 = vmul.f32 1.442695, %v2731_v35 }
 0x99f   : > { %6214 = vpow2.f32 %v2738_v59 }
 0x9a5   : > { %v7349_v29 = vpop.eup %6214 }
 0x9a6   : > { %v2751_v10 = vsel %vm2290_vm8, %v7349_v29, 0.0 }
 0x9ad   : > { %2722 = vmax.xlane.f32.xlu0 %v2721_v26 }
 0x9af   : > { %2785 = vrot.lane.b32.xlu2 %v7167_v1, %s8525_s6 }
 0x9b5   : > { %2510 = vadd.xlane.f32.xlu0 %v2509_v19 }
 0x9ba   : > { %2504 = vadd.xlane.f32.xlu1 %v2503_v53 }
 0x9bd   : > { %2752 = vadd.xlane.f32.xlu0 %v2751_v10 }
 0x9c2   : > { %2728 = vmax.xlane.f32.xlu1 %v2727_v31 }
 0x9c5   : > { %2928 = vmax.xlane.f32.xlu0 %v2927_v32 }
 0x9cb   : > { %v7377_v40 = vpop.xlane.xlu2 %2719 }
 0x9cd   : > { %2937 = vmax.xlane.f32.xlu0 %v2936_v21 }
 0x9d5   : > { %2943 = vmax.xlane.f32.xlu0 %v2942_v39 }
 0x9d8   : > { %2934 = vmax.xlane.f32.xlu2 %v2933_v18 }
 0x9db   : > { %2783 = vrot.lane.b32.xlu1 %v7171_v6, %s8525_s6 }
 0x9e2   : > { %v2499_v24 = vpop.xlane.xlu0 %2498 }
 0x9e9   : > { %3000 = vrot.lane.b32.xlu0 %v7167_v1, %s8523_s3 }
 0x9ea   : > { %v2502_v54 = vpop.xlane.xlu1 %2501 }
 0x9eb   : > { %6216 = vrcp.f32 %v2502_v54 }
 0x9ec   : > { %6218 = vrcp.f32 %v2499_v24 }
 0x9ed   : > { %6220 = vpow2.f32 %v2736_v33 }
 0x9f1   : > { %v6217_v56 = vpop.eup %6216 }
 0x9f2   : > { %v6219_v45 = vpop.eup %6218  ;;  %v2522_v60 = vmul.f32 %v6217_v56, %v7299_v62 }
 0x9f3   : > { %v7381_v51 = vpop.eup %6220  ;;  %v2521_v1 = vmul.f32 %v6219_v45, %v7293_v14  ;;  %v2939_v14 = vsel %vm2290_vm8, %v7363_v0, -inf }
 0x9f4   : > { %v2748_v9 = vsel %vm2290_vm8, %v7381_v51, 0.0 }
 0x9f5   : > { %v2536_v46 = vpop.permute.xlu0 %2535  ;;  %v2527_v7 = vpack.c.bf16 %v2522_v60, %v2521_v1  ;;  %v2732_v60 = vsub.f32 %v7287_v37, %v7377_v40 }
 0x9f6   : > { %2559 = vmatpush.bf16.msra.mxu2 %v2536_v46 }
 0x9f7   : > { %v2740_v1 = vmul.f32 1.442695, %v2732_v60 }
 0x9fa   : > { %v2508_v55 = vpop.xlane.xlu2 %2507 }
 0xa02   : > { %v2534_v4 = vpop.permute.xlu1 %2533  ;;  %v7384_v8 = vpop.xlane.xlu2 %2725 }
 0xa03   : > { %2560 = vmatpush.bf16.msra.mxu2 %v2534_v4 }
 0xa05   : > { %2749 = vadd.xlane.f32.xlu1 %v2748_v9 }
 0xa06   : > { %5680 = vmatmul.msk.bf16.vlgmr.msra.gmra.mxu2 %vm2290_vm8, %v2527_v7 }
 0xa0a   : > { %v2514_v41 = vpop.xlane.xlu2 %2513 }
 0xa0d   : > { %2931 = vmax.xlane.f32.xlu1 %v2930_v38  ;;  %v6014_v38 = vld [vmem:[%s8502_s14 + $0x8] sm:$0xff] }
 0xa0e   : > { %2602 = vmatpush.bf16.msrb.mxu3 %v6014_v38 }
 0xa12   : > { %v2786_v62 = vpop.permute.xlu2 %2785 }
 0xa13   : > { %v2799_v17 = vand.u32 %v2786_v62, %v7165_v63 }
 0xa15   : > { %2940 = vmax.xlane.f32.xlu1 %v2939_v14  ;;  %2806 = vmatpush.bf16.msrb.mxu2 %v2799_v17 }
 0xa20   : > { %v2723_v35 = vpop.xlane.xlu0 %2722 }
 0xa21   : > { %v2733_v44 = vsub.f32 %v7305_v34, %v2723_v35 }
 0xa23   : > { %v2742_v26 = vmul.f32 1.442695, %v2733_v44 }
 0xa25   : > { %6222 = vpow2.f32 %v2742_v26 }
 0xa26   : > { %6224 = vrcp.f32 %v2508_v55 }
 0xa28   : > { %v2511_v59 = vpop.xlane.xlu0 %2510 }
 0xa2b   : > { %v7395_v19 = vpop.eup %6222 }
 0xa2c   : > { %v2757_v53 = vsel %vm2290_vm8, %v7395_v19, 0.0  ;;  %v6225_v32 = vpop.eup %6224 }
 0xa2d   : > { %v2505_v10 = vpop.xlane.xlu1 %2504  ;;  %2758 = vadd.xlane.f32.xlu2 %v2757_v53  ;;  %v2524_v39 = vmul.f32 %v6225_v32, %v7311_v49 }
 0xa2e   : > { %6226 = vrcp.f32 %v2505_v10  ;;  %2781 = vrot.lane.b32.xlu1 %v7174_v15, %s8525_s6  ;;  %s8565_s6 = smov 32  }
 0xa2f   : > { %6228 = vrcp.f32 %v2511_v59 }
 0xa30   : > { %v7401_v31 = vpop.xlane.xlu0 %2752  ;;  %6230 = vrcp.f32 %v2514_v41 }
 0xa34   : > { %v6227_v21 = vpop.eup %6226 }
 0xa35   : > { %v2523_v34 = vmul.f32 %v6227_v21, %v7347_v42  ;;  %v6229_v54 = vpop.eup %6228  ;;  %v2729_v55 = vpop.xlane.xlu1 %2728 }
 0xa36   : > { %2998 = vrot.lane.b32.xlu1 %v7171_v6, %s8523_s3  ;;  %v6231_v46 = vpop.eup %6230  ;;  %v2525_v42 = vmul.f32 %v6229_v54, %v7341_v22  ;;  %v2735_v22 = vsub.f32 %v7357_v11, %v2729_v55 }
 0xa37   : > { %v2528_v18 = vpack.c.bf16 %v2524_v39, %v2523_v34  ;;  %v2526_v6 = vmul.f32 %v6231_v46, %v7324_v61 }
 0xa38   : > { %v2929_v3 = vpop.xlane.xlu0 %2928  ;;  %v2746_v7 = vmul.f32 1.442695, %v2735_v22 }
 0xa39   : > { %v2945_v24 = vsub.f32 %v7330_v5, %v2929_v3  ;;  %5681 = vmatmul.msk.bf16.gmra.mxu2 %vm2290_vm8, %v2528_v18  ;;  %v2529_v5 = vpack.c.bf16 %v2526_v6, %v2525_v42 }
 0xa3b   : > { %v2951_v48 = vmul.f32 1.442695, %v2945_v24 }
 0xa3d   : > { %6232 = vpow2.f32 %v2951_v48 }
 0xa3e   : > { %6234 = vpow2.f32 %v2740_v1 }
 0xa3f   : > { %6236 = vpow2.f32 %v2746_v7 }
 0xa40   : > { %v2938_v56 = vpop.xlane.xlu0 %2937 }
 0xa41   : > { %v2948_v21 = vsub.f32 %v7355_v58, %v2938_v56 }
 0xa43   : > { %v7409_v33 = vpop.eup %6232 }
 0xa44   : > { %v2963_v49 = vsel %vm2290_vm8, %v7409_v33, 0.0  ;;  %v7419_v41 = vpop.eup %6234 }
 0xa45   : > { %2964 = vadd.xlane.f32.xlu2 %v2963_v49  ;;  %v2754_v37 = vsel %vm2290_vm8, %v7419_v41, 0.0  ;;  %v7426_v40 = vpop.eup %6236 }
 0xa46   : > { %v2763_v11 = vsel %vm2306_vm9, %v7426_v40, 0.0 }
 0xa48   : > { %v2944_v4 = vpop.xlane.xlu0 %2943 }
 0xa49   : > { %5682 = vmatmul.msk.bf16.gmra.mxu2 %vm2290_vm8, %v2529_v5 }
 0xa4b   : > { %v2935_v17 = vpop.xlane.xlu2 %2934 }
 0xa4c   : > { %v2947_v35 = vsub.f32 %v7343_v27, %v2935_v17 }
 0xa4d   : > { %v2784_v45 = vpop.permute.xlu1 %2783 }
 0xa4e   : > { %2807 = vmatpush.bf16.msrb.mxu2 %v2784_v45  ;;  %v2955_v26 = vmul.f32 1.442695, %v2947_v35 }
 0xa5b   : > { %v3001_v9 = vpop.permute.xlu0 %3000 }
 0xa5c   : > { %v3014_v61 = vand.u32 %v3001_v9, %v7165_v63 }
 0xa5d   : > { %2996 = vrot.lane.b32.xlu2 %v7174_v15, %s8523_s3  ;;  %s8564_s3 = smov 112  }
 0xa5e   : > { %3021 = vmatpush.bf16.msrb.mxu1 %v3014_v61 }
 0xa60   : > { %2755 = vadd.xlane.f32.xlu1 %v2754_v37 }
 0xa68   : > { %2764 = vadd.xlane.f32.xlu1 %v2763_v11 }
 0xa78   : > { %v2750_v62 = vpop.xlane.xlu1 %2749 }
 0xa80   : > { %v2932_v15 = vpop.xlane.xlu1 %2931 }
 0xa81   : > { %v2946_v14 = vsub.f32 %v7334_v25, %v2932_v15  ;;  %v2957_v25 = vmul.f32 1.442695, %v2948_v21 }
 0xa83   : > { %v2953_v44 = vmul.f32 1.442695, %v2946_v14 }
 0xa85   : > { %6238 = vpow2.f32 %v2953_v44 }
 0xa86   : > { %6240 = vpow2.f32 %v2955_v26 }
 0xa88   : > { %v2941_v59 = vpop.xlane.xlu1 %2940 }
 0xa89   : > { %v2949_v53 = vsub.f32 %v7363_v0, %v2941_v59  ;;  %v2562_v10 = vpop.f32.mrf.mxu2  ;;  %v2734_v0 = vsub.f32 %v7315_v47, %v7384_v8  ;;  %v2950_v47 = vsub.f32 %v7367_v13, %v2944_v4 }
 0xa8b   : > { %v7436_v32 = vpop.eup %6238  ;;  %v2959_v34 = vmul.f32 1.442695, %v2949_v53  ;;  %v2744_v54 = vmul.f32 1.442695, %v2734_v0  ;;  %v2961_v55 = vmul.f32 1.442695, %v2950_v47 }
 0xa8c   : > { %v2966_v39 = vsel %vm2290_vm8, %v7436_v32, 0.0  ;;  %v7441_v27 = vpop.eup %6240 }
 0xa8d   : > { %6242 = vpow2.f32 %v2959_v34  ;;  %2967 = vadd.xlane.f32.xlu0 %v2966_v39  ;;  %v2969_v48 = vsel %vm2290_vm8, %v7441_v27, 0.0 }
 0xa8e   : > { %6244 = vpow2.f32 %v2957_v25 }
 0xa8f   : > { %6246 = vrcp.f32 %v2750_v62 }
 0xa90   : > { %6248 = vrcp.f32 %v7401_v31 }
 0xa91   : > { %v2564_v18 = vpop.f32.mrf.mxu2  ;;  %6250 = vpow2.f32 %v2744_v54 }
 0xa92   : > { %v2577_v3 = vpack.c.bf16 %v2564_v18, %v2562_v10  ;;  %6252 = vpow2.f32 %v2961_v55 }
 0xa93   : > { %v7443_v24 = vpop.eup %6242 }
 0xa94   : > { %5687 = vmatmul.msk.bf16.vlgmr.msrb.gmra.mxu3 %vm980_vm6, %v2577_v3  ;;  %v2975_v58 = vsel %vm2290_vm8, %v7443_v24, 0.0  ;;  %v7453_v46 = vpop.eup %6244 }
 0xa95   : > { %2976 = vadd.xlane.f32.xlu2 %v2975_v58  ;;  %2970 = vadd.xlane.f32.xlu0 %v2969_v48  ;;  %v6247_v42 = vpop.eup %6246  ;;  %v2972_v8 = vsel %vm2290_vm8, %v7453_v46, 0.0 }
 0xa96   : > { %v6249_v49 = vpop.eup %6248  ;;  %v2772_v6 = vmul.f32 %v6247_v42, %v7381_v51 }
 0xa97   : > { %v2773_v5 = vmul.f32 %v6249_v49, %v7349_v29  ;;  %v7460_v45 = vpop.eup %6250 }
 0xa98   : > { %v2760_v13 = vsel %vm2290_vm8, %v7460_v45, 0.0  ;;  %v7465_v1 = vpop.eup %6252 }
 0xa99   : > { %v2778_v31 = vpack.c.bf16 %v2773_v5, %v2772_v6  ;;  %v2978_v51 = vsel %vm2306_vm9, %v7465_v1, 0.0 }
 0xa9d   : > { %2973 = vadd.xlane.f32.xlu0 %v2972_v8 }
 0xaa0   : > { %v2782_v56 = vpop.permute.xlu1 %2781  ;;  %v2759_v29 = vpop.xlane.xlu2 %2758 }
 0xaa1   : > { %2808 = vmatpush.bf16.msrb.mxu2 %v2782_v56  ;;  %6254 = vrcp.f32 %v2759_v29 }
 0xaa4   : > { %5700 = vmatmul.msk.bf16.vlgmr.msrb.gmra.mxu2 %vm2290_vm8, %v2778_v31 }
 0xaa5   : > { %2761 = vadd.xlane.f32.xlu0 %v2760_v13 }
 0xaa7   : > { %v6255_v17 = vpop.eup %6254 }
 0xaa8   : > { %v2999_v60 = vpop.permute.xlu1 %2998  ;;  %v2775_v14 = vmul.f32 %v6255_v17, %v7395_v19 }
 0xaa9   : > { %3022 = vmatpush.bf16.msrb.mxu1 %v2999_v60 }
 0xaad   : > { %2979 = vadd.xlane.f32.xlu0 %v2978_v51 }
 0xab8   : > { %v2965_v4 = vpop.xlane.xlu2 %2964 }
 0xabc   : > { %v2567_v22 = vpop.f32.mrf.mxu2 }
 0xac0   : > { %v2997_v7 = vpop.permute.xlu2 %2996 }
 0xac1   : > { %3023 = vmatpush.bf16.msrb.mxu1 %v2997_v7 }
 0xac4   : > { %v2569_v9 = vpop.f32.mrf.mxu2 }
 0xac5   : > { %v2578_v61 = vpack.c.bf16 %v2569_v9, %v2567_v22 }
 0xac7   : > { %5688 = vmatmul.msk.bf16.gmra.mxu3 %vm980_vm6, %v2578_v61 }
 0xacc   : > { %v2572_v37 = vpop.f32.mrf.mxu2 }
 0xad3   : > { %v2756_v11 = vpop.xlane.xlu1 %2755 }
 0xad4   : > { %6256 = vrcp.f32 %v2756_v11  ;;  %v2574_v38 = vpop.f32.mrf.mxu2 }
 0xad5   : > { %v2579_v62 = vpack.c.bf16 %v2574_v38, %v2572_v37  ;;  %6258 = vrcp.f32 %v2965_v4 }
 0xad7   : > { %5689 = vmatmul.msk.bf16.gmra.mxu3 %vm980_vm6, %v2579_v62 }
 0xada   : > { %v6257_v15 = vpop.eup %6256 }
 0xadb   : > { %v2774_v35 = vmul.f32 %v6257_v15, %v7419_v41  ;;  %v6259_v59 = vpop.eup %6258  ;;  %v6015_v41 = vld [vmem:[%s8502_s14 + $0x10] sm:$0xff]  ;;  %v2765_v25 = vpop.xlane.xlu1 %2764 }
 0xadc   : > { %v2987_v10 = vmul.f32 %v6259_v59, %v7409_v33  ;;  %2850 = vmatpush.bf16.msra.mxu3 %v6015_v41 }
 0xadd   : > { %v2779_v44 = vpack.c.bf16 %v2775_v14, %v2774_v35 }
 0xadf   : > { %5701 = vmatmul.msk.bf16.gmra.mxu2 %vm2290_vm8, %v2779_v44 }
 0xb00   : > { %v2968_v26 = vpop.xlane.xlu0 %2967 }
 0xb01   : > { %6260 = vrcp.f32 %v2968_v26 }
 0xb07   : > { %v6261_v53 = vpop.eup %6260 }
 0xb08   : > { %v2988_v21 = vmul.f32 %v6261_v53, %v7436_v32  ;;  %v2971_v34 = vpop.xlane.xlu0 %2970  ;;  %v2977_v48 = vpop.xlane.xlu2 %2976 }
 0xb09   : > { %6262 = vrcp.f32 %v2971_v34  ;;  %v6091_v34 = vld [vmem:[%s8503_s15] ss:$0 sm:$0xff] }
 0xb0a   : > { %v2993_v39 = vpack.c.bf16 %v2988_v21, %v2987_v10 }
 0xb0c   : > { %5713 = vmatmul.msk.bf16.vlgmr.msrb.gmra.mxu1 %vm2290_vm8, %v2993_v39 }
 0xb0f   : > { %v6263_v18 = vpop.eup %6262 }
 0xb10   : > { %v2974_v19 = vpop.xlane.xlu0 %2973  ;;  %v2989_v33 = vmul.f32 %v6263_v18, %v7441_v27 }
 0xb11   : > { %6264 = vrcp.f32 %v2974_v19 }
 0xb12   : > { %6266 = vrcp.f32 %v2765_v25 }
 0xb17   : > { %v6265_v3 = vpop.eup %6264  ;;  %v2604_v15 = vpop.f32.mrf.mxu3 }
 0xb18   : > { %v2990_v32 = vmul.f32 %v6265_v3, %v7453_v46  ;;  %v2762_v0 = vpop.xlane.xlu0 %2761  ;;  %v6267_v54 = vpop.eup %6266  ;;  %v2644_v10 = vadd.f32 %v7291_v12, %v2604_v15 }
 0xb19   : > { %6268 = vrcp.f32 %v2762_v0  ;;  %v2777_v47 = vmul.f32 %v6267_v54, %v7426_v40  ;;  %v6016_v40 = vld [vmem:[%s8502_s14 + $0x18] sm:$0xff] }
 0xb1a   : > { %v2994_v58 = vpack.c.bf16 %v2990_v32, %v2989_v33  ;;  %6270 = vrcp.f32 %v2977_v48  ;;  %3065 = vmatpush.bf16.msra.mxu2 %v6016_v40 }
 0xb1c   : > { %5714 = vmatmul.msk.bf16.gmra.mxu1 %vm2290_vm8, %v2994_v58 }
 0xb1f   : > { %v6269_v42 = vpop.eup %6268  ;;  %v2606_v14 = vpop.f32.mrf.mxu3 }
 0xb20   : > { %v2776_v8 = vmul.f32 %v6269_v42, %v7460_v45  ;;  %v2980_v49 = vpop.xlane.xlu0 %2979  ;;  %v6271_v27 = vpop.eup %6270  ;;  %v2646_v18 = vadd.f32 %v7295_v16, %v2606_v14 }
 0xb21   : > { %6272 = vrcp.f32 %v2980_v49  ;;  %v2991_v5 = vmul.f32 %v6271_v27, %v7443_v24 }
 0xb22   : > { %v2780_v6 = vpack.c.bf16 %v2777_v47, %v2776_v8 }
 0xb24   : > { %5702 = vmatmul.msk.bf16.gmra.mxu2 %vm2290_vm8, %v2780_v6 }
 0xb27   : > { %v6273_v46 = vpop.eup %6272  ;;  %v2810_v55 = vpop.f32.mrf.mxu2 }
 0xb28   : > { %v2992_v56 = vmul.f32 %v6273_v46, %v7465_v1 }
 0xb2a   : > { %v2995_v31 = vpack.c.bf16 %v2992_v56, %v2991_v5 }
 0xb2c   : > { %5715 = vmatmul.msk.bf16.gmra.mxu1 %vm2290_vm8, %v2995_v31 }
 0xb2f   : > { %v2812_v13 = vpop.f32.mrf.mxu2 }
 0xb30   : > { %v2825_v60 = vpack.c.bf16 %v2812_v13, %v2810_v55 }
 0xb32   : > { %5707 = vmatmul.msk.bf16.vlgmr.msra.gmra.mxu3 %vm980_vm6, %v2825_v60 }
 0xb4a   : > { %v2609_v35 = vpop.f32.mrf.mxu3 }
 0xb4b   : > { %v2649_v54 = vadd.f32 %v7303_v36, %v2609_v35 }
 0xb52   : > { %v2611_v44 = vpop.f32.mrf.mxu3 }
 0xb53   : > { %v2651_v27 = vadd.f32 %v7307_v43, %v2611_v44 }
 0xb5a   : > { %v2614_v26 = vpop.f32.mrf.mxu3 }
 0xb62   : > { %v2815_v45 = vpop.f32.mrf.mxu2  ;;  %v2616_v59 = vpop.f32.mrf.mxu3 }
 0xb6a   : > { %v2817_v51 = vpop.f32.mrf.mxu2 }
 0xb6b   : > { %v2826_v29 = vpack.c.bf16 %v2817_v51, %v2815_v45 }
 0xb6d   : > { %5708 = vmatmul.msk.bf16.gmra.mxu3 %vm980_vm6, %v2826_v29 }
 0xb89   : > { %v3025_v24 = vpop.f32.mrf.mxu1 }
 0xb91   : > { %v3027_v4 = vpop.f32.mrf.mxu1 }
 0xb92   : > { %v3040_v1 = vpack.c.bf16 %v3027_v4, %v3025_v24 }
 0xb94   : > { %5720 = vmatmul.msk.bf16.vlgmr.msra.gmra.mxu2 %vm980_vm6, %v3040_v1 }
 0xb99   : > { %v3030_v22 = vpop.f32.mrf.mxu1 }
 0xba1   : > { %v3032_v7 = vpop.f32.mrf.mxu1 }
 0xba2   : > { %v3041_v9 = vpack.c.bf16 %v3032_v7, %v3030_v22 }
 0xba4   : > { %5721 = vmatmul.msk.bf16.gmra.mxu2 %vm980_vm6, %v3041_v9 }
 0xba7   : > { %v2820_v61 = vpop.f32.mrf.mxu2 }
 0xba9   : > { %v3035_v37 = vpop.f32.mrf.mxu1 }
 0xbaf   : > { %v2822_v11 = vpop.f32.mrf.mxu2 }
 0xbb0   : > { %v2827_v38 = vpack.c.bf16 %v2822_v11, %v2820_v61 }
 0xbb1   : > { %v3037_v62 = vpop.f32.mrf.mxu1 }
 0xbb2   : > { %v3042_v17 = vpack.c.bf16 %v3037_v62, %v3035_v37  ;;  %5709 = vmatmul.msk.bf16.gmra.mxu3 %vm980_vm6, %v2827_v38  ;;  %v6476_v37 = vmov 64.0  }
 0xbb3   : > { %6274 = vrcp.f32 %v6476_v37 }
 0xbb4   : > { %5722 = vmatmul.msk.bf16.gmra.mxu2 %vm980_vm6, %v3042_v17 }
 0xbb5   : > { %v2852_v53 = vpop.f32.mrf.mxu3 }
 0xbb6   : > { %v2867_v21 = vadd.f32 %v2852_v53, %v2644_v10 }
 0xbb9   : > { %v6275_v11 = vpop.eup %6274 }
 0xbba   : > { %v3125_v38 = vmul.f32 64.0, %v6275_v11  ;;  %vm3129_vm10 = vweird.f32 %v6275_v11 }
 0xbbd   : > { %v2854_v41 = vpop.f32.mrf.mxu3 }
 0xbbe   : > { %v2868_v33 = vadd.f32 %v2854_v41, %v2646_v18 }
 0xbf0   : > { %v2857_v12 = vpop.f32.mrf.mxu3 }
 0xbf1   : > { %v2869_v47 = vadd.f32 %v2857_v12, %v2649_v54 }
 0xc17   : > { %v3067_v39 = vpop.f32.mrf.mxu2 }
 0xc18   : > { %v3082_v19 = vadd.f32 %v3067_v39, %v2867_v21 }
 0xc1a   : > { %v3092_v25 = vadd.f32 %v6091_v34, %v3082_v19 }
 0xc1c   : > { %v3098_v3 = vadd.f32 %v3092_v25, %v7114_v50  ;;  %v2859_v50 = vpop.f32.mrf.mxu3 }
 0xc1d   : > { %v2870_v55 = vadd.f32 %v2859_v50, %v2651_v27  ;;  %v6020_v50 = vld [vmem:[%s8506_s18 + $0x18] sm:$0xff]  ;;  %v6019_v27 = vld [vmem:[%s8506_s18 + $0x10] sm:$0xff] }
 0xc1e   : > { %v3106_v32 = vsel %vm1774_vm2, %v3098_v3, 0.0  ;;  %3315 = vmatpush.bf16.msrb.mxu3 %v6020_v50 }
 0xc1f   : > { %3107 = vadd.xlane.f32.xlu1 %v3106_v32  ;;  %v3069_v0 = vpop.f32.mrf.mxu2 }
 0xc20   : > { %v3083_v58 = vadd.f32 %v3069_v0, %v2868_v33 }
 0xc22   : > { %v3093_v48 = vadd.f32 %v6091_v34, %v3083_v58  ;;  %3316 = vmatpush.bf16.msrb.mxu3 %v6019_v27 }
 0xc24   : > { %v3099_v42 = vadd.f32 %v3093_v48, %v7117_v52  ;;  %v2654_v52 = vadd.f32 %v7317_v28, %v2614_v26 }
 0xc26   : > { %v3109_v8 = vsel %vm1774_vm2, %v3099_v42, 0.0 }
 0xc27   : > { %3110 = vadd.xlane.f32.xlu0 %v3109_v8  ;;  %v3072_v49 = vpop.f32.mrf.mxu2 }
 0xc28   : > { %v3084_v16 = vadd.f32 %v3072_v49, %v2869_v47 }
 0xc2a   : > { %v3094_v6 = vadd.f32 %v6091_v34, %v3084_v16 }
 0xc2c   : > { %v3100_v46 = vadd.f32 %v3094_v6, %v7125_v20  ;;  %v2656_v20 = vadd.f32 %v7326_v2, %v2616_v59  ;;  %v3126_v2 = vsub.f32 1.0, %v3125_v38  ;;  %v7576_v38 = vld [vmem:[%s8504_s16] ss:$0 sm:$0xff] }
 0xc2e   : > { %v3112_v5 = vsel %vm1774_vm2, %v3100_v46, 0.0  ;;  %v3127_v62 = vmul.f32 %v6275_v11, %v3126_v2 }
 0xc2f   : > { %3113 = vadd.xlane.f32.xlu1 %v3112_v5  ;;  %v3074_v56 = vpop.f32.mrf.mxu2  ;;  %v6018_v5 = vld [vmem:[%s8506_s18 + $0x8] sm:$0xff] }
 0xc30   : > { %v3085_v36 = vadd.f32 %v3074_v56, %v2870_v55  ;;  %3317 = vmatpush.bf16.msrb.mxu3 %v6018_v5 }
 0xc32   : > { %v3095_v31 = vadd.f32 %v6091_v34, %v3085_v36  ;;  %v6017_v36 = vld [vmem:[%s8506_s18] sm:$0xff] }
 0xc34   : > { %v3101_v13 = vadd.f32 %v3095_v31, %v7128_v23  ;;  %3318 = vmatpush.bf16.msrb.mxu3 %v6017_v36 }
 0xc35   : > { %v2862_v60 = vpop.f32.mrf.mxu3 }
 0xc36   : > { %v2871_v40 = vadd.f32 %v2862_v60, %v2654_v52  ;;  %v3115_v45 = vsel %vm1774_vm2, %v3101_v13, 0.0 }
 0xc37   : > { %3116 = vadd.xlane.f32.xlu0 %v3115_v45  ;;  %v3077_v51 = vpop.f32.mrf.mxu2 }
 0xc38   : > { %v3086_v43 = vadd.f32 %v3077_v51, %v2871_v40 }
 0xc3a   : > { %v3096_v29 = vadd.f32 %v6091_v34, %v3086_v43 }
 0xc3c   : > { %v3102_v24 = vadd.f32 %v3096_v29, %v7135_v57  ;;  %v3128_v57 = vadd.f32 %v6275_v11, %v3127_v62 }
 0xc3d   : > { %v2864_v4 = vpop.f32.mrf.mxu3 }
 0xc3e   : > { %v2872_v1 = vadd.f32 %v2864_v4, %v2656_v20  ;;  %v3118_v22 = vsel %vm1774_vm2, %v3102_v24, 0.0  ;;  %v7519_v17 = vsel %vm3129_vm10, %v6275_v11, %v3128_v57 }
 0xc3f   : > { %3119 = vadd.xlane.f32.xlu1 %v3118_v22  ;;  %v3079_v28 = vpop.f32.mrf.mxu2 }
 0xc40   : > { %v3087_v7 = vadd.f32 %v3079_v28, %v2872_v1 }
 0xc42   : > { %v3097_v23 = vadd.f32 %v6091_v34, %v3087_v7 }
 0xc44   : > { %v3103_v9 = vadd.f32 %v3097_v23, %v7138_v30 }
 0xc46   : > { %v3121_v61 = vsel %vm1788_vm3, %v3103_v9, 0.0 }
 0xc47   : > { %3122 = vadd.xlane.f32.xlu0 %v3121_v61 }
 0xc92   : > { %v3108_v15 = vpop.xlane.xlu1 %3107 }
 0xc93   : > { %v3131_v14 = vmul.f32 %v7519_v17, %v3108_v15 }
 0xc95   : > { %v7522_v35 = vsub.f32 %v3098_v3, %v3131_v14 }
 0xc97   : > { %v3143_v30 = vmul.f32 %v7522_v35, %v7522_v35 }
 0xc99   : > { %v3149_v44 = vsel %vm1774_vm2, %v3143_v30, 0.0 }
 0xc9a   : > { %v3111_v26 = vpop.xlane.xlu0 %3110  ;;  %3150 = vadd.xlane.f32.xlu1 %v3149_v44  ;;  %v7582_v44 = vld [vmem:[%s8505_s17] ss:$0 sm:$0xff] }
 0xc9b   : > { %v3132_v59 = vmul.f32 %v7519_v17, %v3111_v26 }
 0xc9d   : > { %v7528_v53 = vsub.f32 %v3099_v42, %v3132_v59 }
 0xc9f   : > { %v3144_v10 = vmul.f32 %v7528_v53, %v7528_v53 }
 0xca1   : > { %v3152_v21 = vsel %vm1774_vm2, %v3144_v10, 0.0 }
 0xca2   : > { %v3114_v34 = vpop.xlane.xlu1 %3113  ;;  %3153 = vadd.xlane.f32.xlu0 %v3152_v21 }
 0xca3   : > { %v3133_v39 = vmul.f32 %v7519_v17, %v3114_v34 }
 0xca5   : > { %v7534_v19 = vsub.f32 %v3100_v46, %v3133_v39 }
 0xca7   : > { %v3145_v41 = vmul.f32 %v7534_v19, %v7534_v19 }
 0xca9   : > { %v3155_v25 = vsel %vm1774_vm2, %v3145_v41, 0.0 }
 0xcaa   : > { %v3117_v18 = vpop.xlane.xlu0 %3116  ;;  %3156 = vadd.xlane.f32.xlu1 %v3155_v25 }
 0xcab   : > { %v3134_v3 = vmul.f32 %v7519_v17, %v3117_v18 }
 0xcad   : > { %v7540_v33 = vsub.f32 %v3101_v13, %v3134_v3 }
 0xcaf   : > { %v3146_v32 = vmul.f32 %v7540_v33, %v7540_v33 }
 0xcb1   : > { %v3158_v0 = vsel %vm1774_vm2, %v3146_v32, 0.0 }
 0xcb2   : > { %3159 = vadd.xlane.f32.xlu2 %v3158_v0  ;;  %v3120_v58 = vpop.xlane.xlu1 %3119 }
 0xcb3   : > { %v3135_v12 = vmul.f32 %v7519_v17, %v3120_v58 }
 0xcb5   : > { %v7546_v48 = vsub.f32 %v3102_v24, %v3135_v12 }
 0xcb7   : > { %v3147_v54 = vmul.f32 %v7546_v48, %v7546_v48 }
 0xcb9   : > { %v3161_v42 = vsel %vm1774_vm2, %v3147_v54, 0.0 }
 0xcba   : > { %3162 = vadd.xlane.f32.xlu0 %v3161_v42  ;;  %v3123_v47 = vpop.xlane.xlu0 %3122 }
 0xcbb   : > { %v3136_v8 = vmul.f32 %v7519_v17, %v3123_v47 }
 0xcbd   : > { %v7552_v49 = vsub.f32 %v3103_v9, %v3136_v8 }
 0xcbf   : > { %v3148_v16 = vmul.f32 %v7552_v49, %v7552_v49 }
 0xcc1   : > { %v3164_v6 = vsel %vm1788_vm3, %v3148_v16, 0.0 }
 0xcc2   : > { %3165 = vadd.xlane.f32.xlu1 %v3164_v6 }
 0xd0d   : > { %v3151_v46 = vpop.xlane.xlu1 %3150 }
 0xd0e   : > { %v3167_v55 = vmul.f32 %v3151_v46, %v7519_v17 }
 0xd10   : > { %v3173_v56 = vadd.f32 1e-05, %v3167_v55 }
 0xd12   : > { %6276 = vrsqrt.f32 %v3173_v56  ;;  %vm3185_vm12 = vweird.f32 %v3173_v56 }
 0xd15   : > { %v3154_v31 = vpop.xlane.xlu0 %3153 }
 0xd16   : > { %v3168_v52 = vmul.f32 %v3154_v31, %v7519_v17 }
 0xd18   : > { %v6277_v13 = vpop.eup %6276  ;;  %v3174_v60 = vadd.f32 1e-05, %v3168_v52 }
 0xd19   : > { %v3180_v40 = vmul.f32 %v6277_v13, %v3173_v56  ;;  %vm3186_vm11 = vweird.f32 %v6277_v13 }
 0xd1a   : > { %6278 = vrsqrt.f32 %v3174_v60  ;;  %vm3187_vm13 = vmor %vm3185_vm12, %vm3186_vm11  ;;  %vm3195_vm15 = vweird.f32 %v3174_v60 }
 0xd1b   : > { %v3181_v45 = vmul.f32 %v6277_v13, %v3180_v40 }
 0xd1d   : > { %v3182_v51 = vmul.f32 0.5, %v3181_v45  ;;  %v3157_v43 = vpop.xlane.xlu1 %3156 }
 0xd1e   : > { %v3169_v29 = vmul.f32 %v3157_v43, %v7519_v17 }
 0xd1f   : > { %v3183_v20 = vsub.f32 1.5, %v3182_v51 }
 0xd20   : > { %v6279_v24 = vpop.eup %6278  ;;  %v3175_v4 = vadd.f32 1e-05, %v3169_v29 }
 0xd21   : > { %v3184_v1 = vmul.f32 %v6277_v13, %v3183_v20  ;;  %v3190_v22 = vmul.f32 %v6279_v24, %v3174_v60  ;;  %vm3196_vm14 = vweird.f32 %v6279_v24 }
 0xd22   : > { %6280 = vrsqrt.f32 %v3175_v4  ;;  %vm3197_vm0 = vmor %vm3195_vm15, %vm3196_vm14  ;;  %vm3205_vm7 = vweird.f32 %v3175_v4 }
 0xd23   : > { %v3191_v28 = vmul.f32 %v6279_v24, %v3190_v22  ;;  %v3188_v7 = vsel %vm3187_vm13, %v6277_v13, %v3184_v1 }
 0xd24   : > { %v3239_v2 = vmul.f32 %v3188_v7, %v7522_v35 }
 0xd25   : > { %v3192_v23 = vmul.f32 0.5, %v3191_v28  ;;  %v3160_v9 = vpop.xlane.xlu2 %3159 }
 0xd26   : > { %v3170_v61 = vmul.f32 %v3160_v9, %v7519_v17  ;;  %v3248_v26 = vmul.f32 %v7576_v38, %v3239_v2  ;;  %v6024_v2 = vld [vmem:[%s8508_s20 + $0x18] sm:$0xff] }
 0xd27   : > { %v3193_v37 = vsub.f32 1.5, %v3192_v23 }
 0xd28   : > { %v6281_v11 = vpop.eup %6280  ;;  %v3176_v62 = vadd.f32 1e-05, %v3170_v61  ;;  %v7589_v25 = vadd.f32 %v7582_v44, %v3248_v26  ;;  %v6021_v26 = vld [vmem:[%s8508_s20] sm:$0xff] }
 0xd29   : > { %v3194_v57 = vmul.f32 %v6279_v24, %v3193_v37  ;;  %v3200_v15 = vmul.f32 %v6281_v11, %v3175_v4  ;;  %vm3206_vm1 = vweird.f32 %v6281_v11 }
 0xd2a   : > { %6282 = vrsqrt.f32 %v3176_v62  ;;  %vm3207_vm4 = vmor %vm3205_vm7, %vm3206_vm1  ;;  %vm3215_vm10 = vweird.f32 %v3176_v62 }
 0xd2b   : > { %v3198_v14 = vsel %vm3197_vm0, %v6279_v24, %v3194_v57  ;;  %v3201_v30 = vmul.f32 %v6281_v11, %v3200_v15  ;;  %v6094_v57 = vld [vmem:[%s8507_s19] ss:$0 sm:$0xff]  ;;  %v6022_v15 = vld [vmem:[%s8508_s20 + $0x8] sm:$0xff] }
 0xd2c   : > { %v3240_v59 = vmul.f32 %v3198_v14, %v7528_v53 }
 0xd2d   : > { %v3202_v10 = vmul.f32 0.5, %v3201_v30  ;;  %v3163_v21 = vpop.xlane.xlu0 %3162 }
 0xd2e   : > { %v3249_v35 = vmul.f32 %v7576_v38, %v3240_v59  ;;  %v3171_v34 = vmul.f32 %v3163_v21, %v7519_v17 }
 0xd2f   : > { %v3203_v39 = vsub.f32 1.5, %v3202_v10 }
 0xd30   : > { %v6283_v41 = vpop.eup %6282  ;;  %v7592_v18 = vadd.f32 %v7582_v44, %v3249_v35  ;;  %v3177_v3 = vadd.f32 1e-05, %v3171_v34 }
 0xd31   : > { %v3204_v32 = vmul.f32 %v6281_v11, %v3203_v39  ;;  %v3210_v0 = vmul.f32 %v6283_v41, %v3176_v62  ;;  %vm3216_vm5 = vweird.f32 %v6283_v41  ;;  %v6023_v62 = vld [vmem:[%s8508_s20 + $0x10] sm:$0xff] }
 0xd32   : > { %v3271_v53 = vpack.c.bf16 %v7592_v18, %v7589_v25  ;;  %6284 = vrsqrt.f32 %v3177_v3  ;;  %vm3217_vm11 = vmor %vm3215_vm10, %vm3216_vm5  ;;  %vm3225_vm13 = vweird.f32 %v3177_v3 }
 0xd33   : > { %v3211_v58 = vmul.f32 %v6283_v41, %v3210_v0  ;;  %v3208_v12 = vsel %vm3207_vm4, %v6281_v11, %v3204_v32  ;;  %v6026_v11 = vld [vmem:[%s8508_s20 + $0x28] sm:$0xff] }
 0xd34   : > { %5739 = vmatmul.msk.bf16.vlgmr.msrb.gmra.mxu3 %vm1774_vm2, %v3271_v53  ;;  %v3241_v6 = vmul.f32 %v3208_v12, %v7534_v19 }
 0xd35   : > { %v3212_v54 = vmul.f32 0.5, %v3211_v58  ;;  %v3166_v42 = vpop.xlane.xlu1 %3165 }
 0xd36   : > { %v3172_v47 = vmul.f32 %v3166_v42, %v7519_v17  ;;  %v3250_v36 = vmul.f32 %v7576_v38, %v3241_v6 }
 0xd37   : > { %v3213_v8 = vsub.f32 1.5, %v3212_v54 }
 0xd38   : > { %v6285_v16 = vpop.eup %6284  ;;  %v3178_v50 = vadd.f32 1e-05, %v3172_v47  ;;  %v7603_v40 = vadd.f32 %v7582_v44, %v3250_v36 }
 0xd39   : > { %v3214_v27 = vmul.f32 %v6283_v41, %v3213_v8  ;;  %v3220_v46 = vmul.f32 %v6285_v16, %v3177_v3  ;;  %vm3226_vm12 = vweird.f32 %v6285_v16 }
 0xd3a   : > { %6286 = vrsqrt.f32 %v3178_v50  ;;  %vm3227_vm14 = vmor %vm3225_vm13, %vm3226_vm12  ;;  %vm3235_vm0 = vweird.f32 %v3178_v50 }
 0xd3b   : > { %v3218_v55 = vsel %vm3217_vm11, %v6283_v41, %v3214_v27  ;;  %v3221_v5 = vmul.f32 %v6285_v16, %v3220_v46 }
 0xd3c   : > { %v3242_v56 = vmul.f32 %v3218_v55, %v7540_v33 }
 0xd3d   : > { %v3222_v31 = vmul.f32 0.5, %v3221_v5 }
 0xd3e   : > { %v3251_v52 = vmul.f32 %v7576_v38, %v3242_v56 }
 0xd3f   : > { %v3223_v13 = vsub.f32 1.5, %v3222_v31 }
 0xd40   : > { %v6287_v60 = vpop.eup %6286  ;;  %v7606_v19 = vadd.f32 %v7582_v44, %v3251_v52 }
 0xd41   : > { %v3224_v45 = vmul.f32 %v6285_v16, %v3223_v13  ;;  %v3230_v51 = vmul.f32 %v6287_v60, %v3178_v50  ;;  %vm3236_vm15 = vweird.f32 %v6287_v60 }
 0xd42   : > { %v3272_v43 = vpack.c.bf16 %v7606_v19, %v7603_v40  ;;  %vm3237_vm1 = vmor %vm3235_vm0, %vm3236_vm15 }
 0xd43   : > { %v3231_v33 = vmul.f32 %v6287_v60, %v3230_v51  ;;  %v3228_v29 = vsel %vm3227_vm14, %v6285_v16, %v3224_v45 }
 0xd44   : > { %5740 = vmatmul.msk.bf16.gmra.mxu3 %vm1774_vm2, %v3272_v43  ;;  %v3243_v4 = vmul.f32 %v3228_v29, %v7546_v48  ;;  %v6028_v48 = vld [vmem:[%s8508_s20 + $0x38] sm:$0xff] }
 0xd45   : > { %v3232_v20 = vmul.f32 0.5, %v3231_v33  ;;  %3460 = vmatpush.bf16.msrb.mxu0 %v6028_v48 }
 0xd46   : > { %v3252_v7 = vmul.f32 %v7576_v38, %v3243_v4 }
 0xd47   : > { %v3233_v24 = vsub.f32 1.5, %v3232_v20 }
 0xd48   : > { %v7616_v9 = vadd.f32 %v7582_v44, %v3252_v7 }
 0xd49   : > { %v3234_v1 = vmul.f32 %v6287_v60, %v3233_v24 }
 0xd4b   : > { %v3238_v22 = vsel %vm3237_vm1, %v6287_v60, %v3234_v1 }
 0xd4c   : > { %v3244_v28 = vmul.f32 %v3238_v22, %v7552_v49  ;;  %v6027_v49 = vld [vmem:[%s8508_s20 + $0x30] sm:$0xff] }
 0xd4d   : > { %3461 = vmatpush.bf16.msrb.mxu0 %v6027_v49 }
 0xd4e   : > { %v3253_v23 = vmul.f32 %v7576_v38, %v3244_v28  ;;  %v6025_v38 = vld [vmem:[%s8508_s20 + $0x20] sm:$0xff] }
 0xd50   : > { %v7619_v61 = vadd.f32 %v7582_v44, %v3253_v23 }
 0xd51   : > { %3462 = vmatpush.bf16.msrb.mxu0 %v6026_v11 }
 0xd52   : > { %v3273_v37 = vpack.c.bf16 %v7619_v61, %v7616_v9 }
 0xd54   : > { %5741 = vmatmul.msk.bf16.gmra.mxu3 %vm1774_vm2, %v3273_v37 }
 0xd55   : > { %3463 = vmatpush.bf16.msrb.mxu0 %v6025_v38 }
 0xd59   : > { %3464 = vmatpush.bf16.msrb.mxu0 %v6024_v2 }
 0xd5d   : > { %3465 = vmatpush.bf16.msrb.mxu0 %v6023_v62 }
 0xd61   : > { %3466 = vmatpush.bf16.msrb.mxu0 %v6022_v15 }
 0xd65   : > { %3467 = vmatpush.bf16.msrb.mxu0 %v6021_v26 }
 0xdb7   : > { %v3320_v14 = vpop.f32.mrf.mxu3 }
 0xdb8   : > { %v3321_v30 = vadd.f32 %v6094_v57, %v3320_v14 }
 0xdba   : > { %v3335_v44 = vmul.f32 %v3321_v30, %v3321_v30 }
 0xdbc   : > { %v3341_v59 = vmul.f32 %v3335_v44, %v3321_v30 }
 0xdbe   : > { %v3347_v10 = vmul.f32 0.044715, %v3341_v59 }
 0xdbf   : > { %v3322_v21 = vpop.f32.mrf.mxu3 }
 0xdc0   : > { %v3353_v35 = vadd.f32 %v3347_v10, %v3321_v30  ;;  %v3323_v34 = vadd.f32 %v6094_v57, %v3322_v21 }
 0xdc2   : > { %v3359_v39 = vmul.f32 0.7978846, %v3353_v35  ;;  %v3336_v41 = vmul.f32 %v3323_v34, %v3323_v34 }
 0xdc4   : > { %v3342_v3 = vmul.f32 %v3336_v41, %v3323_v34  ;;  %6288 = vtanh.f32 %v3359_v39 }
 0xdc6   : > { %v3348_v32 = vmul.f32 0.044715, %v3342_v3 }
 0xdc7   : > { %v3325_v0 = vpop.f32.mrf.mxu3 }
 0xdc8   : > { %v3354_v53 = vadd.f32 %v3348_v32, %v3323_v34  ;;  %v3326_v58 = vadd.f32 %v6094_v57, %v3325_v0 }
 0xdca   : > { %v3360_v12 = vmul.f32 0.7978846, %v3354_v53  ;;  %v3337_v54 = vmul.f32 %v3326_v58, %v3326_v58  ;;  %v6289_v42 = vpop.eup %6288  ;;  %v6095_v53 = vld [vmem:[%s8509_s21] ss:$0 sm:$0xff] }
 0xdcb   : > { %v3371_v16 = vadd.f32 1.0, %v6289_v42 }
 0xdcc   : > { %6290 = vtanh.f32 %v3360_v12  ;;  %v3343_v47 = vmul.f32 %v3337_v54, %v3326_v58 }
 0xdcd   : > { %v3377_v56 = vmul.f32 0.5, %v3371_v16 }
 0xdce   : > { %v3349_v8 = vmul.f32 0.044715, %v3343_v47 }
 0xdcf   : > { %v3327_v6 = vpop.f32.mrf.mxu3  ;;  %v3383_v60 = vmul.f32 %v3377_v56, %v3321_v30 }
 0xdd0   : > { %v3355_v50 = vadd.f32 %v3349_v8, %v3326_v58  ;;  %v3328_v27 = vadd.f32 %v6094_v57, %v3327_v6 }
 0xdd2   : > { %v6291_v46 = vpop.eup %6290  ;;  %v3361_v55 = vmul.f32 0.7978846, %v3355_v50  ;;  %v3338_v5 = vmul.f32 %v3328_v27, %v3328_v27 }
 0xdd3   : > { %v3372_v36 = vadd.f32 1.0, %v6291_v46 }
 0xdd4   : > { %v3344_v31 = vmul.f32 %v3338_v5, %v3328_v27  ;;  %6292 = vtanh.f32 %v3361_v55 }
 0xdd5   : > { %v3378_v52 = vmul.f32 0.5, %v3372_v36 }
 0xdd6   : > { %v3350_v13 = vmul.f32 0.044715, %v3344_v31 }
 0xdd7   : > { %v3384_v45 = vmul.f32 %v3378_v52, %v3323_v34  ;;  %v3330_v51 = vpop.f32.mrf.mxu3 }
 0xdd8   : > { %v3356_v43 = vadd.f32 %v3350_v13, %v3328_v27  ;;  %v3331_v33 = vadd.f32 %v6094_v57, %v3330_v51 }
 0xdd9   : > { %v3405_v29 = vpack.c.bf16 %v3384_v45, %v3383_v60 }
 0xdda   : > { %v3362_v20 = vmul.f32 0.7978846, %v3356_v43  ;;  %v3339_v24 = vmul.f32 %v3331_v33, %v3331_v33  ;;  %v6293_v4 = vpop.eup %6292 }
 0xddb   : > { %3468 = vmatmul.bf16.vlgmr.msrb.gmra.mxu0 %v3405_v29  ;;  %v3373_v7 = vadd.f32 1.0, %v6293_v4 }
 0xddc   : > { %v3345_v1 = vmul.f32 %v3339_v24, %v3331_v33  ;;  %6294 = vtanh.f32 %v3362_v20 }
 0xddd   : > { %v3379_v2 = vmul.f32 0.5, %v3373_v7 }
 0xdde   : > { %v3351_v22 = vmul.f32 0.044715, %v3345_v1 }
 0xddf   : > { %v3332_v28 = vpop.f32.mrf.mxu3  ;;  %v3385_v30 = vmul.f32 %v3379_v2, %v3326_v58 }
 0xde0   : > { %v3357_v23 = vadd.f32 %v3351_v22, %v3331_v33  ;;  %v3333_v37 = vadd.f32 %v6094_v57, %v3332_v28 }
 0xde2   : > { %v6295_v48 = vpop.eup %6294  ;;  %v3363_v49 = vmul.f32 0.7978846, %v3357_v23  ;;  %v3340_v11 = vmul.f32 %v3333_v37, %v3333_v37 }
 0xde3   : > { %v3374_v38 = vadd.f32 1.0, %v6295_v48 }
 0xde4   : > { %v3346_v62 = vmul.f32 %v3340_v11, %v3333_v37  ;;  %6296 = vtanh.f32 %v3363_v49 }
 0xde5   : > { %v3380_v15 = vmul.f32 0.5, %v3374_v38 }
 0xde6   : > { %v3352_v14 = vmul.f32 0.044715, %v3346_v62 }
 0xde7   : > { %v3386_v44 = vmul.f32 %v3380_v15, %v3328_v27 }
 0xde8   : > { %v3358_v26 = vadd.f32 %v3352_v14, %v3333_v37 }
 0xde9   : > { %v3406_v59 = vpack.c.bf16 %v3386_v44, %v3385_v30 }
 0xdea   : > { %v3364_v10 = vmul.f32 0.7978846, %v3358_v26  ;;  %v6297_v21 = vpop.eup %6296 }
 0xdeb   : > { %3473 = vmatmul.bf16.gmra.mxu0 %v3406_v59  ;;  %v3375_v35 = vadd.f32 1.0, %v6297_v21 }
 0xdec   : > { %6298 = vtanh.f32 %v3364_v10 }
 0xded   : > { %v3381_v39 = vmul.f32 0.5, %v3375_v35 }
 0xdef   : > { %v3387_v3 = vmul.f32 %v3381_v39, %v3331_v33  ;;  %v6035_v39 = vld [vmem:[%s8561_s10 + $0x74] sm:$0xf] }
 0xdf2   : > { %v6299_v34 = vpop.eup %6298 }
 0xdf3   : > { %v3376_v57 = vadd.f32 1.0, %v6299_v34  ;;  %v5809_v34 = vld [vmem:[%s8561_s10 + $0x70] sm:$0xf] }
 0xdf5   : > { %v3382_v41 = vmul.f32 0.5, %v3376_v57  ;;  %v6036_v57 = vld [vmem:[%s8561_s10 + $0x74] sm:$0xf0] }
 0xdf7   : > { %v3388_v32 = vmul.f32 %v3382_v41, %v3333_v37  ;;  %v5810_v41 = vor.u32 %v6036_v57, %v5809_v34 }
 0xdf9   : > { %v3407_v0 = vpack.c.bf16 %v3388_v32, %v3387_v3  ;;  %v5811_v3 = vld [vmem:[%s8561_s10 + $0x78] sm:$0xf0]  ;;  %3714 = vmatpush.bf16.msra.mxu1 %v5810_v41 }
 0xdfa   : > { %v5814_v32 = vor.u32 %v6035_v39, %v5811_v3 }
 0xdfb   : > { %3478 = vmatmul.bf16.gmra.mxu0 %v3407_v0  ;;  %v5801_v0 = vld [vmem:[%s8561_s10 + $0x60] sm:$0xf] }
 0xdfc   : > { %3738 = vmatpush.bf16.msrb.mxu2 %v5814_v32 }
 0xe58   : > { %v3469_v58 = vpop.f32.mrf.mxu0 }
 0xe59   : > { %v3470_v12 = vadd.f32 %v6095_v53, %v3469_v58  ;;  %v6033_v58 = vld [vmem:[%s8561_s10 + $0x64] sm:$0xf] }
 0xe5b   : > { %v3484_v54 = vadd.f32 %v3470_v12, %v7589_v25 }
 0xe5d   : > { %v3492_v42 = vsel %vm1774_vm2, %v3484_v54, 0.0 }
 0xe5e   : > { %3493 = vadd.xlane.f32.xlu2 %v3492_v42 }
 0xe60   : > { %v3471_v47 = vpop.f32.mrf.mxu0 }
 0xe61   : > { %v3472_v8 = vadd.f32 %v6095_v53, %v3471_v47 }
 0xe63   : > { %v3485_v16 = vadd.f32 %v3472_v8, %v7592_v18 }
 0xe65   : > { %v3495_v6 = vsel %vm1774_vm2, %v3485_v16, 0.0 }
 0xe66   : > { %3496 = vadd.xlane.f32.xlu0 %v3495_v6  ;;  %v6032_v6 = vld [vmem:[%s8561_s10 + $0x54] sm:$0xf0] }
 0xe68   : > { %v3474_v50 = vpop.f32.mrf.mxu0 }
 0xe69   : > { %v3475_v27 = vadd.f32 %v6095_v53, %v3474_v50  ;;  %v6031_v50 = vld [vmem:[%s8561_s10 + $0x54] sm:$0xf] }
 0xe6b   : > { %v3486_v46 = vadd.f32 %v3475_v27, %v7603_v40 }
 0xe6d   : > { %v3498_v55 = vsel %vm1774_vm2, %v3486_v46, 0.0 }
 0xe6e   : > { %3499 = vadd.xlane.f32.xlu1 %v3498_v55 }
 0xe70   : > { %v3476_v5 = vpop.f32.mrf.mxu0 }
 0xe71   : > { %v3477_v56 = vadd.f32 %v6095_v53, %v3476_v5 }
 0xe73   : > { %v3487_v25 = vadd.f32 %v3477_v56, %v7606_v19  ;;  %v5785_v56 = vld [vmem:[%s8561_s10 + $0x40] sm:$0xf] }
 0xe75   : > { %v3501_v36 = vsel %vm1774_vm2, %v3487_v25, 0.0 }
 0xe76   : > { %3502 = vadd.xlane.f32.xlu2 %v3501_v36  ;;  %v6029_v36 = vld [vmem:[%s8561_s10 + $0x44] sm:$0xf] }
 0xe78   : > { %v3479_v31 = vpop.f32.mrf.mxu0 }
 0xe79   : > { %v3480_v52 = vadd.f32 %v6095_v53, %v3479_v31 }
 0xe7b   : > { %v3488_v18 = vadd.f32 %v3480_v52, %v7616_v9  ;;  %v5787_v52 = vld [vmem:[%s8561_s10 + $0x48] sm:$0xf0] }
 0xe7d   : > { %v3504_v13 = vsel %vm1774_vm2, %v3488_v18, 0.0 }
 0xe7e   : > { %3505 = vadd.xlane.f32.xlu0 %v3504_v13 }
 0xe80   : > { %v3481_v60 = vpop.f32.mrf.mxu0 }
 0xe81   : > { %v3482_v45 = vadd.f32 %v6095_v53, %v3481_v60  ;;  %v6034_v53 = vld [vmem:[%s8561_s10 + $0x64] sm:$0xf0] }
 0xe82   : > { %v5802_v12 = vor.u32 %v6034_v53, %v5801_v0 }
 0xe83   : > { %v3489_v40 = vadd.f32 %v3482_v45, %v7619_v61 }
 0xe84   : > { %3715 = vmatpush.bf16.msra.mxu1 %v5802_v12 }
 0xe85   : > { %v3507_v51 = vsel %vm1788_vm3, %v3489_v40, 0.0 }
 0xe86   : > { %3508 = vadd.xlane.f32.xlu1 %v3507_v51 }
 0xed1   : > { %v3494_v43 = vpop.xlane.xlu2 %3493 }
 0xed2   : > { %v3510_v19 = vmul.f32 %v3494_v43, %v7519_v17 }
 0xed4   : > { %v7667_v33 = vsub.f32 %v3484_v54, %v3510_v19  ;;  %v5803_v54 = vld [vmem:[%s8561_s10 + $0x68] sm:$0xf0] }
 0xed5   : > { %v5806_v42 = vor.u32 %v6033_v58, %v5803_v54 }
 0xed6   : > { %v3522_v29 = vmul.f32 %v7667_v33, %v7667_v33 }
 0xed7   : > { %3739 = vmatpush.bf16.msrb.mxu2 %v5806_v42 }
 0xed8   : > { %v3528_v9 = vsel %vm1774_vm2, %v3522_v29, 0.0 }
 0xed9   : > { %v3497_v20 = vpop.xlane.xlu0 %3496  ;;  %3529 = vadd.xlane.f32.xlu2 %v3528_v9 }
 0xeda   : > { %v3511_v24 = vmul.f32 %v3497_v20, %v7519_v17 }
 0xedc   : > { %v7673_v4 = vsub.f32 %v3485_v16, %v3511_v24  ;;  %v5793_v16 = vld [vmem:[%s8561_s10 + $0x50] sm:$0xf] }
 0xedd   : > { %v5794_v27 = vor.u32 %v6032_v6, %v5793_v16 }
 0xede   : > { %v3523_v61 = vmul.f32 %v7673_v4, %v7673_v4 }
 0xedf   : > { %3716 = vmatpush.bf16.msra.mxu1 %v5794_v27 }
 0xee0   : > { %v3531_v1 = vsel %vm1774_vm2, %v3523_v61, 0.0 }
 0xee1   : > { %3532 = vadd.xlane.f32.xlu0 %v3531_v1  ;;  %v3500_v22 = vpop.xlane.xlu1 %3499 }
 0xee2   : > { %v3512_v28 = vmul.f32 %v3500_v22, %v7519_v17 }
 0xee4   : > { %v7679_v7 = vsub.f32 %v3486_v46, %v3512_v28  ;;  %v5795_v46 = vld [vmem:[%s8561_s10 + $0x58] sm:$0xf0] }
 0xee5   : > { %v5798_v5 = vor.u32 %v6031_v50, %v5795_v46 }
 0xee6   : > { %v3524_v23 = vmul.f32 %v7679_v7, %v7679_v7 }
 0xee7   : > { %3740 = vmatpush.bf16.msrb.mxu2 %v5798_v5 }
 0xee8   : > { %v3534_v37 = vsel %vm1774_vm2, %v3524_v23, 0.0 }
 0xee9   : > { %3535 = vadd.xlane.f32.xlu1 %v3534_v37  ;;  %v3503_v48 = vpop.xlane.xlu2 %3502 }
 0xeea   : > { %v3513_v49 = vmul.f32 %v3503_v48, %v7519_v17 }
 0xeec   : > { %v7685_v11 = vsub.f32 %v3487_v25, %v3513_v49  ;;  %v6030_v25 = vld [vmem:[%s8561_s10 + $0x44] sm:$0xf0] }
 0xeed   : > { %v5786_v31 = vor.u32 %v6030_v25, %v5785_v56 }
 0xeee   : > { %v3525_v38 = vmul.f32 %v7685_v11, %v7685_v11 }
 0xeef   : > { %3717 = vmatpush.bf16.msra.mxu1 %v5786_v31 }
 0xef0   : > { %v3537_v2 = vsel %vm1774_vm2, %v3525_v38, 0.0 }
 0xef1   : > { %v3506_v62 = vpop.xlane.xlu0 %3505  ;;  %3538 = vadd.xlane.f32.xlu2 %v3537_v2 }
 0xef2   : > { %v3514_v15 = vmul.f32 %v3506_v62, %v7519_v17  ;;  %v7757_v62 = vld [vmem:[%s8510_s22] ss:$0 sm:$0xff] }
 0xef4   : > { %v7691_v14 = vsub.f32 %v3488_v18, %v3514_v15  ;;  %v5790_v18 = vor.u32 %v6029_v36, %v5787_v52 }
 0xef6   : > { %v3526_v30 = vmul.f32 %v7691_v14, %v7691_v14  ;;  %3741 = vmatpush.bf16.msrb.mxu2 %v5790_v18 }
 0xef8   : > { %v3540_v44 = vsel %vm1774_vm2, %v3526_v30, 0.0 }
 0xef9   : > { %3541 = vadd.xlane.f32.xlu0 %v3540_v44  ;;  %v3509_v26 = vpop.xlane.xlu1 %3508 }
 0xefa   : > { %v3515_v59 = vmul.f32 %v3509_v26, %v7519_v17 }
 0xefc   : > { %v7697_v10 = vsub.f32 %v3489_v40, %v3515_v59 }
 0xefe   : > { %v3527_v21 = vmul.f32 %v7697_v10, %v7697_v10 }
 0xf00   : > { %v3543_v35 = vsel %vm1788_vm3, %v3527_v21, 0.0 }
 0xf01   : > { %3544 = vadd.xlane.f32.xlu1 %v3543_v35  ;;  %v7763_v35 = vld [vmem:[%s8511_s23] ss:$0 sm:$0xff] }
 0xf4c   : > { %v3530_v47 = vpop.xlane.xlu2 %3529 }
 0xf4d   : > { %v3546_v8 = vmul.f32 %v3530_v47, %v7519_v17 }
 0xf4f   : > { %v3552_v55 = vadd.f32 1e-05, %v3546_v8 }
 0xf51   : > { %6300 = vrsqrt.f32 %v3552_v55  ;;  %vm3564_vm4 = vweird.f32 %v3552_v55 }
 0xf54   : > { %v3533_v13 = vpop.xlane.xlu0 %3532 }
 0xf55   : > { %v3547_v60 = vmul.f32 %v3533_v13, %v7519_v17 }
 0xf57   : > { %v6301_v45 = vpop.eup %6300  ;;  %v3553_v40 = vadd.f32 1e-05, %v3547_v60 }
 0xf58   : > { %v3559_v51 = vmul.f32 %v6301_v45, %v3552_v55  ;;  %vm3565_vm7 = vweird.f32 %v6301_v45 }
 0xf59   : > { %6302 = vrsqrt.f32 %v3553_v40  ;;  %vm3566_vm5 = vmor %vm3564_vm4, %vm3565_vm7  ;;  %vm3574_vm11 = vweird.f32 %v3553_v40 }
 0xf5a   : > { %v3560_v43 = vmul.f32 %v6301_v45, %v3559_v51 }
 0xf5c   : > { %v3561_v19 = vmul.f32 0.5, %v3560_v43  ;;  %v3536_v29 = vpop.xlane.xlu1 %3535 }
 0xf5d   : > { %v3548_v9 = vmul.f32 %v3536_v29, %v7519_v17 }
 0xf5e   : > { %v3562_v20 = vsub.f32 1.5, %v3561_v19 }
 0xf5f   : > { %v6303_v24 = vpop.eup %6302  ;;  %v3554_v61 = vadd.f32 1e-05, %v3548_v9 }
 0xf60   : > { %v3563_v1 = vmul.f32 %v6301_v45, %v3562_v20  ;;  %v3569_v22 = vmul.f32 %v6303_v24, %v3553_v40  ;;  %vm3575_vm10 = vweird.f32 %v6303_v24 }
 0xf61   : > { %6304 = vrsqrt.f32 %v3554_v61  ;;  %vm3576_vm12 = vmor %vm3574_vm11, %vm3575_vm10  ;;  %vm3584_vm14 = vweird.f32 %v3554_v61 }
 0xf62   : > { %v3570_v28 = vmul.f32 %v6303_v24, %v3569_v22  ;;  %v3567_v23 = vsel %vm3566_vm5, %v6301_v45, %v3563_v1 }
 0xf63   : > { %v3618_v15 = vmul.f32 %v3567_v23, %v7667_v33 }
 0xf64   : > { %v3571_v37 = vmul.f32 0.5, %v3570_v28  ;;  %v3539_v48 = vpop.xlane.xlu2 %3538 }
 0xf65   : > { %v3549_v49 = vmul.f32 %v3539_v48, %v7519_v17  ;;  %v3627_v34 = vmul.f32 %v7757_v62, %v3618_v15 }
 0xf66   : > { %v3572_v38 = vsub.f32 1.5, %v3571_v37 }
 0xf67   : > { %v6305_v2 = vpop.eup %6304  ;;  %v3555_v30 = vadd.f32 1e-05, %v3549_v49  ;;  %v7770_v53 = vadd.f32 %v7763_v35, %v3627_v34 }
 0xf68   : > { %v3573_v44 = vmul.f32 %v6303_v24, %v3572_v38  ;;  %v3579_v26 = vmul.f32 %v6305_v2, %v3554_v61  ;;  %vm3585_vm13 = vweird.f32 %v6305_v2 }
 0xf69   : > { %6306 = vrsqrt.f32 %v3555_v30  ;;  %vm3586_vm15 = vmor %vm3584_vm14, %vm3585_vm13  ;;  %vm3594_vm1 = vweird.f32 %v3555_v30 }
 0xf6a   : > { %v3577_v59 = vsel %vm3576_vm12, %v6303_v24, %v3573_v44  ;;  %v3580_v21 = vmul.f32 %v6305_v2, %v3579_v26 }
 0xf6b   : > { %v3619_v57 = vmul.f32 %v3577_v59, %v7673_v4 }
 0xf6c   : > { %v3581_v39 = vmul.f32 0.5, %v3580_v21  ;;  %v3542_v41 = vpop.xlane.xlu0 %3541 }
 0xf6d   : > { %v3628_v33 = vmul.f32 %v7757_v62, %v3619_v57  ;;  %v3550_v3 = vmul.f32 %v3542_v41, %v7519_v17 }
 0xf6e   : > { %v3582_v32 = vsub.f32 1.5, %v3581_v39 }
 0xf6f   : > { %v6307_v0 = vpop.eup %6306  ;;  %v7773_v58 = vadd.f32 %v7763_v35, %v3628_v33  ;;  %v3556_v12 = vadd.f32 1e-05, %v3550_v3 }
 0xf70   : > { %v3583_v54 = vmul.f32 %v6305_v2, %v3582_v32  ;;  %v3589_v42 = vmul.f32 %v6307_v0, %v3555_v30  ;;  %vm3595_vm0 = vweird.f32 %v6307_v0 }
 0xf71   : > { %v3651_v4 = vpack.c.bf16 %v7773_v58, %v7770_v53  ;;  %6308 = vrsqrt.f32 %v3556_v12  ;;  %vm3596_vm7 = vmor %vm3594_vm1, %vm3595_vm0  ;;  %vm3604_vm5 = vweird.f32 %v3556_v12 }
 0xf72   : > { %v3590_v47 = vmul.f32 %v6307_v0, %v3589_v42  ;;  %v3587_v8 = vsel %vm3586_vm15, %v6305_v2, %v3583_v54 }
 0xf73   : > { %5815 = vmatmul.msk.bf16.vlgmr.msra.gmra.mxu1 %vm1774_vm2, %v3651_v4  ;;  %5818 = vmatmul.msk.bf16.vlgmr.msrb.gmra.mxu2 %vm1774_vm2, %v3651_v4  ;;  %v3620_v55 = vmul.f32 %v3587_v8, %v7679_v7 }
 0xf74   : > { %v3591_v16 = vmul.f32 0.5, %v3590_v47  ;;  %v3545_v6 = vpop.xlane.xlu1 %3544 }
 0xf75   : > { %v3551_v50 = vmul.f32 %v3545_v6, %v7519_v17  ;;  %v3629_v18 = vmul.f32 %v7757_v62, %v3620_v55 }
 0xf76   : > { %v3592_v27 = vsub.f32 1.5, %v3591_v16 }
 0xf77   : > { %v6309_v46 = vpop.eup %6308  ;;  %v3557_v5 = vadd.f32 1e-05, %v3551_v50  ;;  %v7785_v51 = vadd.f32 %v7763_v35, %v3629_v18 }
 0xf78   : > { %v3593_v56 = vmul.f32 %v6307_v0, %v3592_v27  ;;  %v3599_v25 = vmul.f32 %v6309_v46, %v3556_v12  ;;  %vm3605_vm4 = vweird.f32 %v6309_v46 }
 0xf79   : > { %6310 = vrsqrt.f32 %v3557_v5  ;;  %vm3606_vm10 = vmor %vm3604_vm5, %vm3605_vm4  ;;  %vm3614_vm12 = vweird.f32 %v3557_v5 }
 0xf7a   : > { %v3597_v36 = vsel %vm3596_vm7, %v6307_v0, %v3593_v56  ;;  %v3600_v31 = vmul.f32 %v6309_v46, %v3599_v25 }
 0xf7b   : > { %v3621_v52 = vmul.f32 %v3597_v36, %v7685_v11 }
 0xf7c   : > { %v3601_v13 = vmul.f32 0.5, %v3600_v31 }
 0xf7d   : > { %v3630_v60 = vmul.f32 %v7757_v62, %v3621_v52 }
 0xf7e   : > { %v3602_v45 = vsub.f32 1.5, %v3601_v13 }
 0xf7f   : > { %v6311_v40 = vpop.eup %6310  ;;  %v7788_v7 = vadd.f32 %v7763_v35, %v3630_v60 }
 0xf80   : > { %v3603_v43 = vmul.f32 %v6309_v46, %v3602_v45  ;;  %v3609_v19 = vmul.f32 %v6311_v40, %v3557_v5  ;;  %vm3615_vm11 = vweird.f32 %v6311_v40 }
 0xf81   : > { %v3652_v29 = vpack.c.bf16 %v7788_v7, %v7785_v51  ;;  %vm3616_vm13 = vmor %vm3614_vm12, %vm3615_vm11 }
 0xf82   : > { %v3610_v11 = vmul.f32 %v6311_v40, %v3609_v19  ;;  %v3607_v9 = vsel %vm3606_vm10, %v6309_v46, %v3603_v43 }
 0xf83   : > { %5816 = vmatmul.msk.bf16.gmra.mxu1 %vm1774_vm2, %v3652_v29  ;;  %5819 = vmatmul.msk.bf16.gmra.mxu2 %vm1774_vm2, %v3652_v29  ;;  %v3622_v61 = vmul.f32 %v3607_v9, %v7691_v14  ;;  %v5782_v14 = vld [vmem:[%s8501_s13 + $0x2] sm:$0x3] }
 0xf84   : > { %v3611_v20 = vmul.f32 0.5, %v3610_v11  ;;  %v3658_v15 = vperm.slane %v5782_v14, 1 }
 0xf85   : > { %v3631_v23 = vmul.f32 %v7757_v62, %v3622_v61 }
 0xf86   : > { %v3612_v24 = vsub.f32 1.5, %v3611_v20 }
 0xf87   : > { %v7799_v48 = vadd.f32 %v7763_v35, %v3631_v23 }
 0xf88   : > { %v3613_v1 = vmul.f32 %v6311_v40, %v3612_v24 }
 0xf8a   : > { %v3617_v22 = vsel %vm3616_vm13, %v6311_v40, %v3613_v1 }
 0xf8b   : > { %v3623_v28 = vmul.f32 %v3617_v22, %v7697_v10  ;;  %v3657_v10 = vperm.slane %v5782_v14, 0 }
 0xf8d   : > { %v3632_v37 = vmul.f32 %v7757_v62, %v3623_v28 }
 0xf8f   : > { %v7802_v49 = vadd.f32 %v7763_v35, %v3632_v37 }
 0xf91   : > { %v3653_v38 = vpack.c.bf16 %v7802_v49, %v7799_v48 }
 0xf93   : > { %5817 = vmatmul.msk.bf16.gmra.mxu1 %vm1774_vm2, %v3653_v38  ;;  %5820 = vmatmul.msk.bf16.gmra.mxu2 %vm1774_vm2, %v3653_v38 }
 0xff0   : > { %v3719_v2 = vpop.f32.mrf.mxu1 }
 0xff1   : > { %v3720_v62 = vadd.f32 %v3719_v2, %v3657_v10 }
 0xff6   : > { %v3743_v30 = vpop.f32.mrf.mxu2 }
 0xff7   : > { %v3744_v44 = vadd.f32 %v3743_v30, %v3658_v15 }
 0xff8   : > { %v3721_v26 = vpop.f32.mrf.mxu1 }
 0xff9   : > { %3759 = vst.msk [vmem:[#allocation4 + $0x8] sm:$0xff] %vm1774_vm2, %v3744_v44  ;;  %v3722_v59 = vadd.f32 %v3721_v26, %v3657_v10 }
 0xffb   : > { %v7812_v21 = vpack.c.bf16 %v3722_v59, %v3720_v62 }
 0xffd   : > { %3797 = vrot.lane.b32.xlu1 %v7812_v21, %s6468_s7 }
 0xffe   : > { %v3745_v35 = vpop.f32.mrf.mxu2 }
 0xfff   : > { %v3746_v34 = vadd.f32 %v3745_v35, %v3658_v15 }
0x1000   : > { %v3724_v57 = vpop.f32.mrf.mxu1  ;;  %v3785_v60 = vld [vmem:[#allocation4 + $0x8] sm:$0xff] }
0x1001   : > { %3761 = vst.msk [vmem:[#allocation4 + $0x18] sm:$0xff] %vm1774_vm2, %v3746_v34  ;;  %v3725_v39 = vadd.f32 %v3724_v57, %v3657_v10 }
0x1006   : > { %v3748_v41 = vpop.f32.mrf.mxu2 }
0x1007   : > { %v3749_v33 = vadd.f32 %v3748_v41, %v3658_v15 }
0x1008   : > { %v3726_v3 = vpop.f32.mrf.mxu1  ;;  %v3786_v13 = vld [vmem:[#allocation4 + $0x18] sm:$0xff] }
0x1009   : > { %3763 = vst.msk [vmem:[#allocation4 + $0x28] sm:$0xff] %vm1774_vm2, %v3749_v33  ;;  %v3727_v32 = vadd.f32 %v3726_v3, %v3657_v10  ;;  %v7836_v45 = vpack.c.bf16 %v3786_v13, %v3785_v60 }
0x100b   : > { %v7818_v0 = vpack.c.bf16 %v3727_v32, %v3725_v39 }
0x100d   : > { %3799 = vrot.lane.b32.xlu0 %v7818_v0, %s6468_s7 }
0x100e   : > { %v3750_v12 = vpop.f32.mrf.mxu2 }
0x100f   : > { %v3751_v54 = vadd.f32 %v3750_v12, %v3658_v15 }
0x1010   : > { %v3729_v42 = vpop.f32.mrf.mxu1  ;;  %v3787_v52 = vld [vmem:[#allocation4 + $0x28] sm:$0xff] }
0x1011   : > { %3765 = vst.msk [vmem:[#allocation4 + $0x38] sm:$0xff] %vm1774_vm2, %v3751_v54  ;;  %v3730_v4 = vadd.f32 %v3729_v42, %v3657_v10 }
0x1016   : > { %v3753_v47 = vpop.f32.mrf.mxu2 }
0x1017   : > { %v3754_v8 = vadd.f32 %v3753_v47, %v3658_v15 }
0x1018   : > { %v3731_v16 = vpop.f32.mrf.mxu1  ;;  %v3788_v31 = vld [vmem:[#allocation4 + $0x38] sm:$0xff] }
0x1019   : > { %3767 = vst.msk [vmem:[#allocation4 + $0x48] sm:$0xff] %vm1774_vm2, %v3754_v8  ;;  %v3732_v6 = vadd.f32 %v3731_v16, %v3657_v10  ;;  %v7833_v18 = vpack.c.bf16 %v3788_v31, %v3787_v52 }
0x101b   : > { %3768 = vst [vmem:[#allocation4 + $0x50] sm:$0x7f] %v3732_v6 }
0x101e   : > { %v3755_v50 = vpop.f32.mrf.mxu2 }
0x101f   : > { %v3756_v27 = vadd.f32 %v3755_v50, %v3658_v15 }
0x1020   : > { %v3789_v5 = vld [vmem:[#allocation4 + $0x48] sm:$0xff] }
0x1021   : > { %3769 = vst.msk [vmem:[#allocation4 + $0x58] sm:$0x7f] %vm1788_vm3, %v3756_v27 }
0x1022   : > { %v3784_v46 = vld [vmem:[#allocation4 + $0x50] sm:$0x7f] }
0x1023   : > { %v7825_v55 = vpack.c.bf16 %v3784_v46, %v3730_v4 }
0x1025   : > { %3801 = vrot.lane.b32.xlu2 %v7825_v55, %s6468_s7  ;;  %s8563_s7 = smov 48  }
0x1028   : > { %v3790_v56 = vld [vmem:[#allocation4 + $0x58] sm:$0x7f] }
0x1029   : > { %v7829_v25 = vpack.c.bf16 %v3790_v56, %v3789_v5 }
0x102b   : > { %v3927_v36 = vand.u32 %v7829_v25, %v7165_v63 }
0x102d   : > { %3934 = vmatpush.bf16.msra.mxu0 %v3927_v36 }
0x1031   : > { %3935 = vmatpush.bf16.msra.mxu0 %v7833_v18 }
0x1035   : > { %3936 = vmatpush.bf16.msra.mxu0 %v7836_v45 }
0x106f   : > { %v3798_v11 = vpop.permute.xlu1 %3797 }
0x1070   : > { %v3813_v9 = vsel %vm980_vm6, %v3798_v11, 0 }
0x107f   : > { %v3802_v40 = vpop.permute.xlu2 %3801  ;;  %v3800_v19 = vpop.permute.xlu0 %3799 }
0x1080   : > { %v3819_v43 = vsel %vm980_vm6, %v3802_v40, 0  ;;  %v3816_v29 = vsel %vm980_vm6, %v3800_v19, 0 }
0x1081   : > { %3826 = vmatpush.bf16.xpose.msra.mxu3 %v3819_v43 }
0x1089   : > { %3827 = vmatpush.bf16.xpose.msra.mxu3 %v3816_v29 }
0x1091   : > { %3828 = vmatpush.bf16.xpose.msra.mxu3 %v3813_v9 }
0x1098   : > { %5829 = vmatmul.msk.bf16.vlgmr.msra.gmra.mxu3 %vm980_vm6, %v7812_v21 }
0x10a8   : > { %5830 = vmatmul.msk.bf16.gmra.mxu3 %vm980_vm6, %v7818_v0 }
0x10b8   : > { %5831 = vmatmul.msk.bf16.gmra.mxu3 %vm980_vm6, %v7825_v55 }
0x111b   : > { %v3830_v20 = vpop.f32.mrf.mxu3 }
0x111c   : > { %v3845_v24 = vsel %vm2290_vm8, %v3830_v20, -inf }
0x111d   : > { %3846 = vmax.xlane.f32.xlu0 %v3845_v24 }
0x1123   : > { %v3832_v61 = vpop.f32.mrf.mxu3 }
0x1124   : > { %v3848_v1 = vsel %vm2290_vm8, %v3832_v61, -inf }
0x1125   : > { %3849 = vmax.xlane.f32.xlu2 %v3848_v1 }
0x112b   : > { %v3835_v22 = vpop.f32.mrf.mxu3 }
0x112c   : > { %v3851_v28 = vsel %vm2290_vm8, %v3835_v22, -inf }
0x112d   : > { %3852 = vmax.xlane.f32.xlu1 %v3851_v28 }
0x1133   : > { %v3837_v23 = vpop.f32.mrf.mxu3 }
0x1134   : > { %v3854_v37 = vsel %vm2290_vm8, %v3837_v23, -inf }
0x1135   : > { %3855 = vmax.xlane.f32.xlu0 %v3854_v37  ;;  %v6037_v37 = vld [vmem:[%s8502_s14 + $0x20] sm:$0xff] }
0x1136   : > { %4190 = vmatpush.bf16.msrb.mxu0 %v6037_v37 }
0x113b   : > { %v3840_v38 = vpop.f32.mrf.mxu3 }
0x113c   : > { %v3857_v14 = vsel %vm2290_vm8, %v3840_v38, -inf }
0x113d   : > { %3858 = vmax.xlane.f32.xlu2 %v3857_v14 }
0x1143   : > { %v3842_v10 = vpop.f32.mrf.mxu3 }
0x1144   : > { %v3860_v2 = vsel %vm2306_vm9, %v3842_v10, -inf }
0x1145   : > { %3861 = vmax.xlane.f32.xlu0 %v3860_v2 }
0x1190   : > { %v3847_v62 = vpop.xlane.xlu0 %3846 }
0x1191   : > { %v3863_v15 = vsub.f32 %v3830_v20, %v3847_v62 }
0x1193   : > { %v3869_v30 = vmul.f32 1.442695, %v3863_v15 }
0x1195   : > { %6312 = vpow2.f32 %v3869_v30 }
0x1198   : > { %v3850_v44 = vpop.xlane.xlu2 %3849 }
0x1199   : > { %v3864_v26 = vsub.f32 %v3832_v61, %v3850_v44 }
0x119b   : > { %v6313_v59 = vpop.eup %6312  ;;  %v3871_v35 = vmul.f32 1.442695, %v3864_v26 }
0x119c   : > { %v3881_v34 = vsel %vm2290_vm8, %v6313_v59, 0.0 }
0x119d   : > { %6314 = vpow2.f32 %v3871_v35  ;;  %3882 = vadd.xlane.f32.xlu2 %v3881_v34 }
0x11a0   : > { %v3853_v57 = vpop.xlane.xlu1 %3852 }
0x11a1   : > { %v3865_v39 = vsub.f32 %v3835_v22, %v3853_v57 }
0x11a3   : > { %v6315_v41 = vpop.eup %6314  ;;  %v3873_v33 = vmul.f32 1.442695, %v3865_v39 }
0x11a4   : > { %v3884_v3 = vsel %vm2290_vm8, %v6315_v41, 0.0 }
0x11a5   : > { %6316 = vpow2.f32 %v3873_v33  ;;  %3885 = vadd.xlane.f32.xlu1 %v3884_v3 }
0x11a8   : > { %v3856_v32 = vpop.xlane.xlu0 %3855 }
0x11a9   : > { %v3866_v12 = vsub.f32 %v3837_v23, %v3856_v32 }
0x11ab   : > { %v6317_v54 = vpop.eup %6316  ;;  %v3875_v42 = vmul.f32 1.442695, %v3866_v12 }
0x11ac   : > { %v3887_v4 = vsel %vm2290_vm8, %v6317_v54, 0.0 }
0x11ad   : > { %6318 = vpow2.f32 %v3875_v42  ;;  %3888 = vadd.xlane.f32.xlu0 %v3887_v4 }
0x11b0   : > { %v3859_v47 = vpop.xlane.xlu2 %3858 }
0x11b1   : > { %v3867_v8 = vsub.f32 %v3840_v38, %v3859_v47 }
0x11b3   : > { %v6319_v16 = vpop.eup %6318  ;;  %v3877_v6 = vmul.f32 1.442695, %v3867_v8 }
0x11b4   : > { %v3890_v50 = vsel %vm2290_vm8, %v6319_v16, 0.0 }
0x11b5   : > { %6320 = vpow2.f32 %v3877_v6  ;;  %3891 = vadd.xlane.f32.xlu2 %v3890_v50 }
0x11b8   : > { %v3862_v27 = vpop.xlane.xlu0 %3861 }
0x11b9   : > { %v3868_v46 = vsub.f32 %v3842_v10, %v3862_v27 }
0x11bb   : > { %v6321_v5 = vpop.eup %6320  ;;  %v3879_v56 = vmul.f32 1.442695, %v3868_v46 }
0x11bc   : > { %v3893_v36 = vsel %vm2290_vm8, %v6321_v5, 0.0 }
0x11bd   : > { %6322 = vpow2.f32 %v3879_v56  ;;  %3894 = vadd.xlane.f32.xlu1 %v3893_v36 }
0x11c3   : > { %v6323_v31 = vpop.eup %6322 }
0x11c4   : > { %v3896_v52 = vsel %vm2306_vm9, %v6323_v31, 0.0 }
0x11c5   : > { %3897 = vadd.xlane.f32.xlu0 %v3896_v52 }
0x11cd   : > { %3966 = vrot.lane.b32.xlu2 %v7825_v55, %s8563_s7 }
0x11d5   : > { %3956 = vrot.lane.b32.xlu2 %v7812_v21, %s8564_s3 }
0x11d6   : > { %3964 = vrot.lane.b32.xlu1 %v7818_v0, %s8563_s7 }
0x11d9   : > { %3962 = vrot.lane.b32.xlu0 %v7812_v21, %s8563_s7 }
0x11dd   : > { %3960 = vrot.lane.b32.xlu2 %v7825_v55, %s8564_s3 }
0x11de   : > { %3958 = vrot.lane.b32.xlu1 %v7818_v0, %s8564_s3 }
0x11e1   : > { %4217 = vrot.lane.b32.xlu0 %v7825_v55, %s8565_s6 }
0x11e5   : > { %4213 = vrot.lane.b32.xlu2 %v7812_v21, %s8565_s6 }
0x11e6   : > { %4215 = vrot.lane.b32.xlu1 %v7818_v0, %s8565_s6 }
0x11e9   : > { %4432 = vrot.lane.b32.xlu0 %v7825_v55, %s8566_s12 }
0x11ed   : > { %4428 = vrot.lane.b32.xlu2 %v7812_v21, %s8566_s12 }
0x11ee   : > { %4430 = vrot.lane.b32.xlu1 %v7818_v0, %s8566_s12  ;;  %s862_s12 = scalar_lea.vmem %s8516_s28, %s6063_s1 }
0x11f1   : > { %4207 = vrot.lane.b32.xlu0 %v7812_v21, %s8567_s2 }
0x11f5   : > { %4424 = vrot.lane.b32.xlu2 %v7818_v0, %s8568_s0 }
0x11f6   : > { %4422 = vrot.lane.b32.xlu1 %v7812_v21, %s8568_s0 }
0x11f9   : > { %4209 = vrot.lane.b32.xlu0 %v7818_v0, %s8567_s2 }
0x11fe   : > { %4211 = vrot.lane.b32.xlu1 %v7825_v55, %s8567_s2 }
0x1201   : > { %4426 = vrot.lane.b32.xlu0 %v7825_v55, %s8568_s0 }
0x1210   : > { %v3883_v13 = vpop.xlane.xlu2 %3882 }
0x1211   : > { %6324 = vrcp.f32 %v3883_v13 }
0x1217   : > { %v6325_v40 = vpop.eup %6324 }
0x1218   : > { %v3886_v60 = vpop.xlane.xlu1 %3885  ;;  %v3905_v19 = vmul.f32 %v6325_v40, %v6313_v59 }
0x1219   : > { %6326 = vrcp.f32 %v3886_v60 }
0x121f   : > { %v6327_v43 = vpop.eup %6326 }
0x1220   : > { %v3906_v29 = vmul.f32 %v6327_v43, %v6315_v41  ;;  %v3889_v9 = vpop.xlane.xlu0 %3888 }
0x1221   : > { %6328 = vrcp.f32 %v3889_v9 }
0x1222   : > { %v3911_v11 = vpack.c.bf16 %v3906_v29, %v3905_v19 }
0x1224   : > { %5832 = vmatmul.msk.bf16.vlgmr.msra.gmra.mxu0 %vm2290_vm8, %v3911_v11 }
0x1227   : > { %v6329_v0 = vpop.eup %6328 }
0x1228   : > { %v3892_v21 = vpop.xlane.xlu2 %3891  ;;  %v3907_v24 = vmul.f32 %v6329_v0, %v6317_v54 }
0x1229   : > { %6330 = vrcp.f32 %v3892_v21 }
0x122f   : > { %v6331_v20 = vpop.eup %6330 }
0x1230   : > { %v3908_v61 = vmul.f32 %v6331_v20, %v6319_v16  ;;  %v3967_v55 = vpop.permute.xlu2 %3966  ;;  %v3895_v28 = vpop.xlane.xlu1 %3894 }
0x1231   : > { %v3984_v1 = vsel %vm980_vm6, %v3967_v55, 0  ;;  %6332 = vrcp.f32 %v3895_v28 }
0x1232   : > { %3991 = vmatpush.bf16.xpose.msrb.mxu1 %v3984_v1  ;;  %v3912_v22 = vpack.c.bf16 %v3908_v61, %v3907_v24 }
0x1234   : > { %5833 = vmatmul.msk.bf16.gmra.mxu0 %vm2290_vm8, %v3912_v22 }
0x1237   : > { %v6333_v38 = vpop.eup %6332 }
0x1238   : > { %v3898_v23 = vpop.xlane.xlu0 %3897  ;;  %v3909_v10 = vmul.f32 %v6333_v38, %v6321_v5  ;;  %v3957_v44 = vpop.permute.xlu2 %3956 }
0x1239   : > { %6334 = vrcp.f32 %v3898_v23 }
0x123f   : > { %v6335_v14 = vpop.eup %6334 }
0x1240   : > { %v3910_v2 = vmul.f32 %v6335_v14, %v6323_v31  ;;  %v3961_v39 = vpop.permute.xlu2 %3960 }
0x1242   : > { %v3913_v62 = vpack.c.bf16 %v3910_v2, %v3909_v10 }
0x1244   : > { %5834 = vmatmul.msk.bf16.gmra.mxu0 %vm2290_vm8, %v3913_v62 }
0x1248   : > { %v3965_v15 = vpop.permute.xlu1 %3964  ;;  %v4214_v12 = vpop.permute.xlu2 %4213 }
0x1249   : > { %v3981_v30 = vsel %vm980_vm6, %v3965_v15, 0  ;;  %v4229_v42 = vsel %vm980_vm6, %v4214_v12, 0 }
0x124a   : > { %3992 = vmatpush.bf16.xpose.msrb.mxu1 %v3981_v30 }
0x124b   : > { %v3963_v26 = vpop.permute.xlu0 %3962 }
0x124c   : > { %v3978_v35 = vsel %vm980_vm6, %v3963_v26, 0 }
0x1250   : > { %v3959_v59 = vpop.permute.xlu1 %3958  ;;  %v4429_v47 = vpop.permute.xlu2 %4428 }
0x1251   : > { %v4444_v8 = vsel %vm980_vm6, %v4429_v47, 0 }
0x1252   : > { %3993 = vmatpush.bf16.xpose.msrb.mxu1 %v3978_v35 }
0x1253   : > { %v4218_v34 = vpop.permute.xlu0 %4217 }
0x1254   : > { %v4235_v57 = vsel %vm980_vm6, %v4218_v34, 0 }
0x1258   : > { %v4216_v41 = vpop.permute.xlu1 %4215  ;;  %v4425_v0 = vpop.permute.xlu2 %4424 }
0x1259   : > { %5835 = vmatmul.msk.bf16.vlgmr.msrb.gmra.mxu1 %vm980_vm6, %v3957_v44  ;;  %v4232_v3 = vsel %vm980_vm6, %v4216_v41, 0 }
0x125a   : > { %4242 = vmatpush.bf16.xpose.msra.mxu1 %v4235_v57 }
0x125b   : > { %v4433_v33 = vpop.permute.xlu0 %4432 }
0x125c   : > { %v4450_v32 = vsel %vm980_vm6, %v4433_v33, 0 }
0x125d   : > { %4457 = vmatpush.bf16.xpose.msra.mxu0 %v4450_v32 }
0x1260   : > { %v4431_v54 = vpop.permute.xlu1 %4430 }
0x1261   : > { %v4447_v4 = vsel %vm980_vm6, %v4431_v54, 0 }
0x1262   : > { %4243 = vmatpush.bf16.xpose.msra.mxu1 %v4232_v3 }
0x1263   : > { %v4208_v16 = vpop.permute.xlu0 %4207 }
0x1265   : > { %4458 = vmatpush.bf16.xpose.msra.mxu0 %v4447_v4 }
0x1268   : > { %v4423_v50 = vpop.permute.xlu1 %4422 }
0x1269   : > { %5836 = vmatmul.msk.bf16.gmra.mxu1 %vm980_vm6, %v3959_v59 }
0x126a   : > { %4244 = vmatpush.bf16.xpose.msra.mxu1 %v4229_v42 }
0x126b   : > { %v4210_v6 = vpop.permute.xlu0 %4209 }
0x126d   : > { %4459 = vmatpush.bf16.xpose.msra.mxu0 %v4444_v8 }
0x1270   : > { %v4212_v46 = vpop.permute.xlu1 %4211 }
0x1273   : > { %v4427_v1 = vpop.permute.xlu0 %4426 }
0x1279   : > { %5837 = vmatmul.msk.bf16.gmra.mxu1 %vm980_vm6, %v3961_v39 }
0x1289   : > { %5855 = vmatmul.msk.bf16.vlgmr.msra.gmra.mxu1 %vm980_vm6, %v4208_v16 }
0x1299   : > { %5856 = vmatmul.msk.bf16.gmra.mxu1 %vm980_vm6, %v4210_v6 }
0x12a1   : > { %v3938_v27 = vpop.f32.mrf.mxu0 }
0x12a9   : > { %v3940_v5 = vpop.f32.mrf.mxu0  ;;  %5857 = vmatmul.msk.bf16.gmra.mxu1 %vm980_vm6, %v4212_v46 }
0x12aa   : > { %v3953_v56 = vpack.c.bf16 %v3940_v5, %v3938_v27 }
0x12ac   : > { %5852 = vmatmul.msk.bf16.vlgmr.msrb.gmra.mxu0 %vm980_vm6, %v3953_v56 }
0x12b1   : > { %v3943_v36 = vpop.f32.mrf.mxu0 }
0x12b9   : > { %v3945_v31 = vpop.f32.mrf.mxu0 }
0x12ba   : > { %v3954_v52 = vpack.c.bf16 %v3945_v31, %v3943_v36 }
0x12bc   : > { %5853 = vmatmul.msk.bf16.gmra.mxu0 %vm980_vm6, %v3954_v52 }
0x12c1   : > { %v3948_v13 = vpop.f32.mrf.mxu0 }
0x12c9   : > { %v3950_v60 = vpop.f32.mrf.mxu0 }
0x12ca   : > { %v3955_v40 = vpack.c.bf16 %v3950_v60, %v3948_v13 }
0x12cc   : > { %5854 = vmatmul.msk.bf16.gmra.mxu0 %vm980_vm6, %v3955_v40 }
0x12d6   : > { %v3995_v43 = vpop.f32.mrf.mxu1 }
0x12d7   : > { %v4010_v19 = vsel %vm2290_vm8, %v3995_v43, -inf }
0x12d8   : > { %4011 = vmax.xlane.f32.xlu2 %v4010_v19 }
0x12dc   : > { %5868 = vmatmul.msk.bf16.vlgmr.msra.gmra.mxu0 %vm980_vm6, %v4423_v50 }
0x12de   : > { %v3997_v29 = vpop.f32.mrf.mxu1 }
0x12df   : > { %v4013_v11 = vsel %vm2290_vm8, %v3997_v29, -inf }
0x12e0   : > { %4014 = vmax.xlane.f32.xlu1 %v4013_v11 }
0x12e6   : > { %v4000_v9 = vpop.f32.mrf.mxu1 }
0x12e7   : > { %v4016_v21 = vsel %vm2290_vm8, %v4000_v9, -inf }
0x12e8   : > { %4017 = vmax.xlane.f32.xlu0 %v4016_v21 }
0x12ec   : > { %5869 = vmatmul.msk.bf16.gmra.mxu0 %vm980_vm6, %v4425_v0 }
0x12ee   : > { %v4002_v20 = vpop.f32.mrf.mxu1 }
0x12ef   : > { %v4019_v24 = vsel %vm2290_vm8, %v4002_v20, -inf }
0x12f0   : > { %4020 = vmax.xlane.f32.xlu2 %v4019_v24 }
0x12f6   : > { %v4005_v61 = vpop.f32.mrf.mxu1 }
0x12f7   : > { %v4022_v55 = vsel %vm2290_vm8, %v4005_v61, -inf }
0x12f8   : > { %4023 = vmax.xlane.f32.xlu1 %v4022_v55 }
0x12fc   : > { %5870 = vmatmul.msk.bf16.gmra.mxu0 %vm980_vm6, %v4427_v1 }
0x12fe   : > { %v7928_v22 = vpop.f32.mrf.mxu1 }
0x12ff   : > { %v4025_v28 = vsel %vm2306_vm9, %v7928_v22, -inf }
0x1300   : > { %4026 = vmax.xlane.f32.xlu0 %v4025_v28 }
0x1306   : > { %v4246_v23 = vpop.f32.mrf.mxu1 }
0x1307   : > { %v4261_v37 = vsel %vm2290_vm8, %v4246_v23, -inf }
0x1308   : > { %4262 = vmax.xlane.f32.xlu2 %v4261_v37 }
0x130e   : > { %v7933_v38 = vpop.f32.mrf.mxu1 }
0x130f   : > { %v4264_v14 = vsel %vm2290_vm8, %v7933_v38, -inf }
0x1310   : > { %4265 = vmax.xlane.f32.xlu1 %v4264_v14 }
0x1314   : > { %4086 = vrot.lane.b32.xlu0 %v7829_v25, %s8564_s3 }
0x1316   : > { %v7941_v10 = vpop.f32.mrf.mxu1 }
0x1317   : > { %v4267_v8 = vsel %vm2290_vm8, %v7941_v10, -inf }
0x131c   : > { %4082 = vrot.lane.b32.xlu0 %v7836_v45, %s8564_s3 }
0x131e   : > { %v7943_v2 = vpop.f32.mrf.mxu1 }
0x131f   : > { %v4270_v62 = vsel %vm2290_vm8, %v7943_v2, -inf }
0x1326   : > { %v7981_v40 = vpop.f32.mrf.mxu1 }
0x1327   : > { %v4273_v0 = vsel %vm2290_vm8, %v7981_v40, -inf }
0x1329   : > { %v7947_v44 = vpop.f32.mrf.mxu0 }
0x132e   : > { %v7988_v24 = vpop.f32.mrf.mxu1 }
0x132f   : > { %v4276_v28 = vsel %vm2306_vm9, %v7988_v24, -inf }
0x1331   : > { %v7951_v39 = vpop.f32.mrf.mxu0 }
0x1339   : > { %v7959_v54 = vpop.f32.mrf.mxu0 }
0x1341   : > { %v7963_v6 = vpop.f32.mrf.mxu0 }
0x1346   : > { %4271 = vmax.xlane.f32.xlu0 %v4270_v62 }
0x1349   : > { %v7973_v31 = vpop.f32.mrf.mxu0 }
0x134b   : > { %v4012_v15 = vpop.xlane.xlu2 %4011 }
0x134c   : > { %v4028_v30 = vsub.f32 %v3995_v43, %v4012_v15 }
0x134e   : > { %v4034_v26 = vmul.f32 1.442695, %v4028_v30 }
0x1350   : > { %6336 = vpow2.f32 %v4034_v26 }
0x1351   : > { %v7984_v21 = vpop.f32.mrf.mxu0 }
0x1353   : > { %v4015_v59 = vpop.xlane.xlu1 %4014 }
0x1354   : > { %v4029_v35 = vsub.f32 %v3997_v29, %v4015_v59 }
0x1356   : > { %v7949_v34 = vpop.eup %6336  ;;  %v4036_v57 = vmul.f32 1.442695, %v4029_v35 }
0x1357   : > { %v4046_v41 = vsel %vm2290_vm8, %v7949_v34, 0.0 }
0x1358   : > { %6338 = vpow2.f32 %v4036_v57  ;;  %4047 = vadd.xlane.f32.xlu2 %v4046_v41 }
0x135b   : > { %v4018_v33 = vpop.xlane.xlu0 %4017 }
0x135c   : > { %v4030_v32 = vsub.f32 %v4000_v9, %v4018_v33 }
0x135e   : > { %v7955_v3 = vpop.eup %6338  ;;  %v4038_v42 = vmul.f32 1.442695, %v4030_v32 }
0x135f   : > { %v4049_v12 = vsel %vm2290_vm8, %v7955_v3, 0.0 }
0x1360   : > { %4050 = vadd.xlane.f32.xlu1 %v4049_v12  ;;  %6340 = vpow2.f32 %v4038_v42 }
0x1363   : > { %v4021_v4 = vpop.xlane.xlu2 %4020 }
0x1364   : > { %v4031_v47 = vsub.f32 %v4002_v20, %v4021_v4 }
0x1366   : > { %v4040_v16 = vmul.f32 1.442695, %v4031_v47  ;;  %v7965_v27 = vpop.eup %6340 }
0x1367   : > { %v4052_v56 = vsel %vm2290_vm8, %v7965_v27, 0.0 }
0x1368   : > { %4268 = vmax.xlane.f32.xlu1 %v4267_v8  ;;  %6342 = vpow2.f32 %v4040_v16 }
0x136b   : > { %v4024_v50 = vpop.xlane.xlu1 %4023 }
0x136c   : > { %v4032_v46 = vsub.f32 %v4005_v61, %v4024_v50 }
0x136e   : > { %v4042_v5 = vmul.f32 1.442695, %v4032_v46  ;;  %v7971_v36 = vpop.eup %6342 }
0x136f   : > { %v4055_v60 = vsel %vm2290_vm8, %v7971_v36, 0.0 }
0x1370   : > { %6344 = vpow2.f32 %v4042_v5  ;;  %4084 = vrot.lane.b32.xlu2 %v7833_v18, %s8564_s3  ;;  %4053 = vadd.xlane.f32.xlu1 %v4052_v56 }
0x1373   : > { %v4027_v43 = vpop.xlane.xlu0 %4026 }
0x1374   : > { %v4033_v11 = vsub.f32 %v7928_v22, %v4027_v43 }
0x1376   : > { %v7975_v52 = vpop.eup %6344  ;;  %v4044_v20 = vmul.f32 1.442695, %v4033_v11 }
0x1377   : > { %v4058_v13 = vsel %vm2290_vm8, %v7975_v52, 0.0 }
0x1378   : > { %4059 = vadd.xlane.f32.xlu0 %v4058_v13  ;;  %4056 = vadd.xlane.f32.xlu1 %v4055_v60 }
0x137b   : > { %v4263_v19 = vpop.xlane.xlu2 %4262 }
0x137c   : > { %v4279_v29 = vsub.f32 %v4246_v23, %v4263_v19  ;;  %v7997_v23 = vpop.f32.mrf.mxu0 }
0x137d   : > { %v4476_v35 = vsel %vm2290_vm8, %v7997_v23, -inf }
0x137e   : > { %v4285_v9 = vmul.f32 1.442695, %v4279_v29 }
0x1380   : > { %6346 = vpow2.f32 %v4285_v9  ;;  %4274 = vmax.xlane.f32.xlu1 %v4273_v0 }
0x1381   : > { %6348 = vpow2.f32 %v4044_v20 }
0x1383   : > { %v4266_v37 = vpop.xlane.xlu1 %4265 }
0x1384   : > { %v4280_v62 = vsub.f32 %v7933_v38, %v4266_v37  ;;  %v8004_v26 = vpop.f32.mrf.mxu0 }
0x1385   : > { %v4479_v59 = vsel %vm2290_vm8, %v8004_v26, -inf }
0x1386   : > { %v7990_v61 = vpop.eup %6346  ;;  %v4087_v55 = vpop.permute.xlu0 %4086  ;;  %v4287_v30 = vmul.f32 1.442695, %v4280_v62 }
0x1387   : > { %v4100_v1 = vand.u32 %v4087_v55, %v7165_v63  ;;  %v4297_v22 = vsel %vm2290_vm8, %v7990_v61, 0.0  ;;  %v7999_v14 = vpop.eup %6348 }
0x1388   : > { %4298 = vadd.xlane.f32.xlu0 %v4297_v22  ;;  %4277 = vmax.xlane.f32.xlu1 %v4276_v28  ;;  %v4061_v15 = vsel %vm2306_vm9, %v7999_v14, 0.0  ;;  %6350 = vpow2.f32 %v4287_v30 }
0x1389   : > { %4107 = vmatpush.bf16.msra.mxu2 %v4100_v1 }
0x138c   : > { %v8014_v38 = vpop.f32.mrf.mxu0 }
0x138d   : > { %v4482_v33 = vsel %vm2290_vm8, %v8014_v38, -inf }
0x138e   : > { %v8010_v57 = vpop.eup %6350  ;;  %v4083_v42 = vpop.permute.xlu0 %4082 }
0x138f   : > { %v4300_v41 = vsel %vm2290_vm8, %v8010_v57, 0.0 }
0x1390   : > { %4062 = vadd.xlane.f32.xlu1 %v4061_v15 }
0x1394   : > { %v8020_v32 = vpop.f32.mrf.mxu0 }
0x1395   : > { %v4485_v9 = vsel %vm2290_vm8, %v8020_v32, -inf }
0x1398   : > { %4480 = vmax.xlane.f32.xlu1 %v4479_v59 }
0x1399   : > { %4477 = vmax.xlane.f32.xlu2 %v4476_v35 }
0x139c   : > { %4332 = vrot.lane.b32.xlu0 %v7833_v18, %s8567_s2  ;;  %v8028_v12 = vpop.f32.mrf.mxu0 }
0x139d   : > { %v4488_v4 = vsel %vm2290_vm8, %v8028_v12, -inf }
0x13a0   : > { %4301 = vadd.xlane.f32.xlu1 %v4300_v41 }
0x13a1   : > { %4483 = vmax.xlane.f32.xlu2 %v4482_v33 }
0x13b9   : > { %4334 = vrot.lane.b32.xlu2 %v7829_v25, %s8567_s2  ;;  %4549 = vrot.lane.b32.xlu1 %v7829_v25, %s8568_s0  ;;  %v4272_v8 = vpop.xlane.xlu0 %4271 }
0x13ba   : > { %v4282_v16 = vsub.f32 %v7943_v2, %v4272_v8 }
0x13bc   : > { %v4291_v5 = vmul.f32 1.442695, %v4282_v16 }
0x13c1   : > { %4330 = vrot.lane.b32.xlu1 %v7836_v45, %s8567_s2 }
0x13c6   : > { %4489 = vmax.xlane.f32.xlu0 %v4488_v4 }
0x13cb   : > { %v4048_v47 = vpop.xlane.xlu2 %4047 }
0x13cc   : > { %6352 = vrcp.f32 %v4048_v47 }
0x13d2   : > { %v6353_v25 = vpop.eup %6352 }
0x13d3   : > { %v4085_v50 = vpop.permute.xlu2 %4084  ;;  %v4051_v46 = vpop.xlane.xlu1 %4050  ;;  %v4070_v13 = vmul.f32 %v6353_v25, %v7949_v34 }
0x13d4   : > { %6354 = vrcp.f32 %v4051_v46  ;;  %4108 = vmatpush.bf16.msra.mxu2 %v4085_v50  ;;  %v8044_v34 = vpop.f32.mrf.mxu0 }
0x13d5   : > { %6356 = vpow2.f32 %v4291_v5  ;;  %v4491_v55 = vsel %vm2306_vm9, %v8044_v34, -inf }
0x13d8   : > { %4109 = vmatpush.bf16.msra.mxu2 %v4083_v42 }
0x13da   : > { %v6355_v56 = vpop.eup %6354 }
0x13db   : > { %v4071_v60 = vmul.f32 %v6355_v56, %v7955_v3  ;;  %v8035_v43 = vpop.xlane.xlu1 %4268  ;;  %v8037_v29 = vpop.eup %6356 }
0x13dc   : > { %v4306_v2 = vsel %vm2290_vm8, %v8037_v29, 0.0 }
0x13dd   : > { %v4076_v19 = vpack.c.bf16 %v4071_v60, %v4070_v13 }
0x13df   : > { %5838 = vmatmul.msk.bf16.vlgmr.msra.gmra.mxu2 %vm2290_vm8, %v4076_v19 }
0x13e2   : > { %4307 = vadd.xlane.f32.xlu2 %v4306_v2  ;;  %v4281_v2 = vsub.f32 %v7941_v10, %v8035_v43 }
0x13e3   : > { %v4054_v11 = vpop.xlane.xlu1 %4053 }
0x13e4   : > { %6358 = vrcp.f32 %v4054_v11  ;;  %v4289_v11 = vmul.f32 1.442695, %v4281_v2 }
0x13ea   : > { %v6359_v3 = vpop.eup %6358 }
0x13eb   : > { %v4057_v0 = vpop.xlane.xlu1 %4056  ;;  %4486 = vmax.xlane.f32.xlu1 %v4485_v9  ;;  %v4072_v1 = vmul.f32 %v6359_v3, %v7965_v27  ;;  %v4060_v15 = vpop.xlane.xlu0 %4059 }
0x13ec   : > { %6360 = vrcp.f32 %v4057_v0 }
0x13ed   : > { %6362 = vrcp.f32 %v4060_v15 }
0x13f2   : > { %v6361_v20 = vpop.eup %6360 }
0x13f3   : > { %v4073_v22 = vmul.f32 %v6361_v20, %v7971_v36  ;;  %v8050_v28 = vpop.xlane.xlu1 %4274  ;;  %4492 = vmax.xlane.f32.xlu1 %v4491_v55  ;;  %v6363_v59 = vpop.eup %6362 }
0x13f4   : > { %v4074_v41 = vmul.f32 %v6363_v59, %v7975_v52 }
0x13f5   : > { %v4077_v37 = vpack.c.bf16 %v4073_v22, %v4072_v1 }
0x13f7   : > { %5839 = vmatmul.msk.bf16.gmra.mxu2 %vm2290_vm8, %v4077_v37 }
0x13fb   : > { %v8053_v62 = vpop.xlane.xlu1 %4277  ;;  %v4299_v5 = vpop.xlane.xlu0 %4298 }
0x1403   : > { %v4063_v30 = vpop.xlane.xlu1 %4062 }
0x1404   : > { %6364 = vrcp.f32 %v4063_v30 }
0x140a   : > { %v6365_v35 = vpop.eup %6364 }
0x140b   : > { %v4075_v27 = vmul.f32 %v6365_v35, %v7999_v14  ;;  %v4481_v33 = vpop.xlane.xlu1 %4480  ;;  %v6038_v35 = vld [vmem:[%s8502_s14 + $0x28] sm:$0xff] }
0x140c   : > { %v4495_v36 = vsub.f32 %v8004_v26, %v4481_v33  ;;  %v4478_v42 = vpop.xlane.xlu2 %4477  ;;  %4547 = vrot.lane.b32.xlu1 %v7833_v18, %s8568_s0  ;;  %4151 = vmatpush.bf16.msrb.mxu3 %v6038_v35 }
0x140d   : > { %v4494_v4 = vsub.f32 %v7997_v23, %v4478_v42  ;;  %v4078_v47 = vpack.c.bf16 %v4075_v27, %v4074_v41 }
0x140e   : > { %v4502_v8 = vmul.f32 1.442695, %v4495_v36  ;;  %v4333_v60 = vpop.permute.xlu0 %4332 }
0x140f   : > { %v4500_v16 = vmul.f32 1.442695, %v4494_v4  ;;  %5840 = vmatmul.msk.bf16.gmra.mxu2 %vm2290_vm8, %v4078_v47 }
0x1410   : > { %6366 = vpow2.f32 %v4502_v8 }
0x1411   : > { %6368 = vpow2.f32 %v4500_v16 }
0x1413   : > { %v4302_v19 = vpop.xlane.xlu1 %4301 }
0x1414   : > { %v4484_v50 = vpop.xlane.xlu2 %4483 }
0x1415   : > { %v4496_v52 = vsub.f32 %v8014_v38, %v4484_v50 }
0x1416   : > { %v8063_v14 = vpop.eup %6366 }
0x1417   : > { %v8065_v46 = vpop.eup %6368  ;;  %v4504_v26 = vmul.f32 1.442695, %v4496_v52  ;;  %v4515_v18 = vsel %vm2290_vm8, %v8063_v14, 0.0 }
0x1418   : > { %4516 = vadd.xlane.f32.xlu0 %v4515_v18  ;;  %v4512_v23 = vsel %vm2290_vm8, %v8065_v46, 0.0 }
0x1419   : > { %6370 = vpow2.f32 %v4504_v26  ;;  %4513 = vadd.xlane.f32.xlu2 %v4512_v23 }
0x141a   : > { %6372 = vrcp.f32 %v4302_v19 }
0x141b   : > { %6374 = vrcp.f32 %v4299_v5 }
0x141c   : > { %v4335_v25 = vpop.permute.xlu2 %4334  ;;  %6376 = vpow2.f32 %v4289_v11 }
0x141d   : > { %v4348_v56 = vand.u32 %v4335_v25, %v7165_v63 }
0x141f   : > { %v8072_v13 = vpop.eup %6370  ;;  %4355 = vmatpush.bf16.msrb.mxu2 %v4348_v56 }
0x1420   : > { %v4518_v38 = vsel %vm2290_vm8, %v8072_v13, 0.0  ;;  %v6373_v3 = vpop.eup %6372 }
0x1421   : > { %4519 = vadd.xlane.f32.xlu2 %v4518_v38  ;;  %v6375_v20 = vpop.eup %6374  ;;  %v4322_v55 = vmul.f32 %v6373_v3, %v8010_v57  ;;  %v4284_v57 = vsub.f32 %v7988_v24, %v8053_v62  ;;  %v4283_v62 = vsub.f32 %v7981_v40, %v8050_v28 }
0x1422   : > { %v8082_v1 = vpop.eup %6376  ;;  %v4321_v22 = vmul.f32 %v6375_v20, %v7990_v61 }
0x1423   : > { %4356 = vmatpush.bf16.msrb.mxu2 %v4333_v60  ;;  %v4303_v37 = vsel %vm2290_vm8, %v8082_v1, 0.0  ;;  %v4295_v59 = vmul.f32 1.442695, %v4284_v57  ;;  %v4293_v42 = vmul.f32 1.442695, %v4283_v62 }
0x1424   : > { %v4327_v43 = vpack.c.bf16 %v4322_v55, %v4321_v22 }
0x142b   : > { %v4550_v9 = vpop.permute.xlu1 %4549 }
0x142c   : > { %v4563_v0 = vand.u32 %v4550_v9, %v7165_v63  ;;  %4545 = vrot.lane.b32.xlu0 %v7836_v45, %s8568_s0 }
0x142e   : > { %4570 = vmatpush.bf16.msrb.mxu1 %v4563_v0 }
0x1433   : > { %v4331_v10 = vpop.permute.xlu1 %4330 }
0x1434   : > { %4357 = vmatpush.bf16.msrb.mxu2 %v4331_v10  ;;  %v6039_v10 = vld [vmem:[%s8502_s14 + $0x30] sm:$0xff] }
0x1435   : > { %4399 = vmatpush.bf16.msra.mxu3 %v6039_v10 }
0x1436   : > { %4304 = vadd.xlane.f32.xlu1 %v4303_v37 }
0x1437   : > { %5858 = vmatmul.msk.bf16.vlgmr.msrb.gmra.mxu2 %vm2290_vm8, %v4327_v43 }
0x1439   : > { %v4490_v63 = vpop.xlane.xlu0 %4489 }
0x143a   : > { %v4498_v45 = vsub.f32 %v8028_v12, %v4490_v63 }
0x143c   : > { %v4508_v15 = vmul.f32 1.442695, %v4498_v45 }
0x143e   : > { %6378 = vpow2.f32 %v4508_v15 }
0x143f   : > { %6380 = vpow2.f32 %v4295_v59 }
0x1444   : > { %v8089_v30 = vpop.eup %6378 }
0x1445   : > { %v4524_v61 = vsel %vm2290_vm8, %v8089_v30, 0.0  ;;  %v8098_v41 = vpop.eup %6380 }
0x1446   : > { %4525 = vadd.xlane.f32.xlu1 %v4524_v61  ;;  %v4312_v12 = vsel %vm2306_vm9, %v8098_v41, 0.0 }
0x1455   : > { %v4308_v56 = vpop.xlane.xlu2 %4307 }
0x1456   : > { %4313 = vadd.xlane.f32.xlu0 %v4312_v12 }
0x145e   : > { %v4487_v27 = vpop.xlane.xlu1 %4486 }
0x145f   : > { %v4497_v24 = vsub.f32 %v8020_v32, %v4487_v27 }
0x1461   : > { %v4506_v33 = vmul.f32 1.442695, %v4497_v24 }
0x1462   : > { %v4111_v36 = vpop.f32.mrf.mxu2 }
0x1463   : > { %6382 = vpow2.f32 %v4506_v33 }
0x1464   : > { %6384 = vpow2.f32 %v4293_v42 }
0x1466   : > { %v4493_v4 = vpop.xlane.xlu1 %4492 }
0x1467   : > { %v4499_v8 = vsub.f32 %v8044_v34, %v4493_v4 }
0x1469   : > { %v8105_v47 = vpop.eup %6382  ;;  %v4510_v32 = vmul.f32 1.442695, %v4499_v8 }
0x146a   : > { %v4113_v16 = vpop.f32.mrf.mxu2  ;;  %v4521_v50 = vsel %vm2290_vm8, %v8105_v47, 0.0  ;;  %v8111_v40 = vpop.eup %6384 }
0x146b   : > { %v4126_v52 = vpack.c.bf16 %v4113_v16, %v4111_v36  ;;  %4522 = vadd.xlane.f32.xlu2 %v4521_v50  ;;  %6386 = vpow2.f32 %v4510_v32  ;;  %v4309_v28 = vsel %vm2290_vm8, %v8111_v40, 0.0 }
0x146d   : > { %5845 = vmatmul.msk.bf16.vlgmr.msrb.gmra.mxu3 %vm980_vm6, %v4126_v52 }
0x1471   : > { %v8115_v26 = vpop.eup %6386 }
0x1472   : > { %v4527_v34 = vsel %vm2306_vm9, %v8115_v26, 0.0 }
0x1473   : > { %4310 = vadd.xlane.f32.xlu2 %v4309_v28 }
0x147a   : > { %v4116_v18 = vpop.f32.mrf.mxu2 }
0x147b   : > { %4528 = vadd.xlane.f32.xlu2 %v4527_v34 }
0x147e   : > { %v4548_v23 = vpop.permute.xlu1 %4547 }
0x147f   : > { %4571 = vmatpush.bf16.msrb.mxu1 %v4548_v23 }
0x1482   : > { %v4118_v5 = vpop.f32.mrf.mxu2 }
0x1483   : > { %v4127_v25 = vpack.c.bf16 %v4118_v5, %v4116_v18 }
0x1485   : > { %5846 = vmatmul.msk.bf16.gmra.mxu3 %vm980_vm6, %v4127_v25 }
0x148b   : > { %v4517_v38 = vpop.xlane.xlu0 %4516 }
0x148c   : > { %v4514_v60 = vpop.xlane.xlu2 %4513  ;;  %6388 = vrcp.f32 %v4517_v38 }
0x148d   : > { %6390 = vrcp.f32 %v4514_v60 }
0x148e   : > { %6392 = vrcp.f32 %v4308_v56 }
0x1492   : > { %v4121_v19 = vpop.f32.mrf.mxu2  ;;  %v6389_v2 = vpop.eup %6388 }
0x1493   : > { %v6391_v11 = vpop.eup %6390  ;;  %v4537_v3 = vmul.f32 %v6389_v2, %v8063_v14 }
0x1494   : > { %v4536_v20 = vmul.f32 %v6391_v11, %v8065_v46  ;;  %v6393_v37 = vpop.eup %6392  ;;  %v4520_v59 = vpop.xlane.xlu2 %4519 }
0x1495   : > { %v4324_v14 = vmul.f32 %v6393_v37, %v8037_v29 }
0x1496   : > { %v4542_v22 = vpack.c.bf16 %v4537_v3, %v4536_v20 }
0x149a   : > { %v4123_v9 = vpop.f32.mrf.mxu2 }
0x149b   : > { %v4128_v0 = vpack.c.bf16 %v4123_v9, %v4121_v19 }
0x149d   : > { %5847 = vmatmul.msk.bf16.gmra.mxu3 %vm980_vm6, %v4128_v0 }
0x149e   : > { %v4546_v55 = vpop.permute.xlu0 %4545 }
0x149f   : > { %4572 = vmatpush.bf16.msrb.mxu1 %v4546_v55 }
0x14a2   : > { %5871 = vmatmul.msk.bf16.vlgmr.msrb.gmra.mxu1 %vm2290_vm8, %v4542_v22 }
0x14a9   : > { %v4305_v43 = vpop.xlane.xlu1 %4304 }
0x14aa   : > { %6394 = vrcp.f32 %v4305_v43 }
0x14ab   : > { %6396 = vrcp.f32 %v4520_v59 }
0x14b0   : > { %v6395_v63 = vpop.eup %6394 }
0x14b1   : > { %v4323_v46 = vmul.f32 %v6395_v63, %v8082_v1  ;;  %v6397_v27 = vpop.eup %6396 }
0x14b2   : > { %v4538_v29 = vmul.f32 %v6397_v27, %v8072_v13 }
0x14b3   : > { %v4328_v45 = vpack.c.bf16 %v4324_v14, %v4323_v46  ;;  %v6098_v46 = vld [vmem:[%s8503_s15 + $0x1] ss:$0 sm:$0xff] }
0x14b5   : > { %5859 = vmatmul.msk.bf16.gmra.mxu2 %vm2290_vm8, %v4328_v45 }
0x14b9   : > { %v4526_v36 = vpop.xlane.xlu1 %4525 }
0x14ba   : > { %v4359_v15 = vpop.f32.mrf.mxu2 }
0x14c2   : > { %v4361_v57 = vpop.f32.mrf.mxu2 }
0x14c3   : > { %v4374_v61 = vpack.c.bf16 %v4361_v57, %v4359_v15 }
0x14c5   : > { %5865 = vmatmul.msk.bf16.vlgmr.msra.gmra.mxu3 %vm980_vm6, %v4374_v61 }
0x14c9   : > { %v4314_v12 = vpop.xlane.xlu0 %4313 }
0x14de   : > { %v4523_v35 = vpop.xlane.xlu2 %4522 }
0x14df   : > { %6398 = vrcp.f32 %v4523_v35 }
0x14e0   : > { %6400 = vrcp.f32 %v4314_v12 }
0x14e5   : > { %v6399_v24 = vpop.eup %6398 }
0x14e6   : > { %v4539_v1 = vmul.f32 %v6399_v24, %v8105_v47  ;;  %v4311_v62 = vpop.xlane.xlu2 %4310  ;;  %v6401_v42 = vpop.eup %6400 }
0x14e7   : > { %6402 = vrcp.f32 %v4311_v62  ;;  %v4326_v8 = vmul.f32 %v6401_v42, %v8098_v41  ;;  %v6040_v41 = vld [vmem:[%s8502_s14 + $0x38] sm:$0xff] }
0x14e8   : > { %v4543_v33 = vpack.c.bf16 %v4539_v1, %v4538_v29  ;;  %6404 = vrcp.f32 %v4526_v36  ;;  %4614 = vmatpush.bf16.msra.mxu2 %v6040_v41 }
0x14ea   : > { %5872 = vmatmul.msk.bf16.gmra.mxu1 %vm2290_vm8, %v4543_v33 }
0x14ed   : > { %v6403_v4 = vpop.eup %6402 }
0x14ee   : > { %v4325_v16 = vmul.f32 %v6403_v4, %v8111_v40  ;;  %v4529_v50 = vpop.xlane.xlu2 %4528  ;;  %v6405_v13 = vpop.eup %6404 }
0x14ef   : > { %6406 = vrcp.f32 %v4529_v50  ;;  %v4540_v32 = vmul.f32 %v6405_v13, %v8089_v30 }
0x14f0   : > { %v4329_v52 = vpack.c.bf16 %v4326_v8, %v4325_v16  ;;  %v4153_v60 = vpop.f32.mrf.mxu3 }
0x14f1   : > { %v4193_v63 = vadd.f32 %v7947_v44, %v4153_v60 }
0x14f2   : > { %5860 = vmatmul.msk.bf16.gmra.mxu2 %vm2290_vm8, %v4329_v52 }
0x14f5   : > { %v6407_v47 = vpop.eup %6406 }
0x14f6   : > { %v4541_v28 = vmul.f32 %v6407_v47, %v8115_v26 }
0x14f8   : > { %v4544_v18 = vpack.c.bf16 %v4541_v28, %v4540_v32  ;;  %v4155_v11 = vpop.f32.mrf.mxu3 }
0x14f9   : > { %v4195_v59 = vadd.f32 %v7951_v39, %v4155_v11 }
0x14fa   : > { %5873 = vmatmul.msk.bf16.gmra.mxu1 %vm2290_vm8, %v4544_v18 }
0x1508   : > { %v4158_v55 = vpop.f32.mrf.mxu3 }
0x1509   : > { %v4198_v36 = vadd.f32 %v7959_v54, %v4158_v55 }
0x1510   : > { %v4160_v22 = vpop.f32.mrf.mxu3 }
0x1511   : > { %v4200_v16 = vadd.f32 %v7963_v6, %v4160_v22 }
0x151f   : > { %v4574_v40 = vpop.f32.mrf.mxu1 }
0x1520   : > { %v4163_v10 = vpop.f32.mrf.mxu3 }
0x1521   : > { %v4203_v28 = vadd.f32 %v7973_v31, %v4163_v10 }
0x1527   : > { %v4576_v34 = vpop.f32.mrf.mxu1 }
0x1528   : > { %v4589_v23 = vpack.c.bf16 %v4576_v34, %v4574_v40  ;;  %v4165_v43 = vpop.f32.mrf.mxu3 }
0x152a   : > { %5878 = vmatmul.msk.bf16.vlgmr.msra.gmra.mxu2 %vm980_vm6, %v4589_v23 }
0x1538   : > { %v4364_v5 = vpop.f32.mrf.mxu2 }
0x1540   : > { %v4366_v25 = vpop.f32.mrf.mxu2 }
0x1541   : > { %v4375_v56 = vpack.c.bf16 %v4366_v25, %v4364_v5 }
0x1543   : > { %5866 = vmatmul.msk.bf16.gmra.mxu3 %vm980_vm6, %v4375_v56 }
0x1548   : > { %v4401_v37 = vpop.f32.mrf.mxu3 }
0x1549   : > { %v4416_v14 = vadd.f32 %v4401_v37, %v4193_v63 }
0x1550   : > { %v4403_v61 = vpop.f32.mrf.mxu3 }
0x1551   : > { %v4417_v12 = vadd.f32 %v4403_v61, %v4195_v59 }
0x1567   : > { %v4579_v30 = vpop.f32.mrf.mxu1 }
0x156f   : > { %v4581_v26 = vpop.f32.mrf.mxu1 }
0x1570   : > { %v4590_v38 = vpack.c.bf16 %v4581_v26, %v4579_v30 }
0x1572   : > { %5879 = vmatmul.msk.bf16.gmra.mxu2 %vm980_vm6, %v4590_v38 }
0x1575   : > { %v4369_v19 = vpop.f32.mrf.mxu2 }
0x1577   : > { %v4584_v2 = vpop.f32.mrf.mxu1 }
0x157d   : > { %v4371_v9 = vpop.f32.mrf.mxu2 }
0x157e   : > { %v4376_v0 = vpack.c.bf16 %v4371_v9, %v4369_v19 }
0x157f   : > { %v4586_v3 = vpop.f32.mrf.mxu1 }
0x1580   : > { %v4591_v20 = vpack.c.bf16 %v4586_v3, %v4584_v2  ;;  %5867 = vmatmul.msk.bf16.gmra.mxu3 %vm980_vm6, %v4376_v0 }
0x1582   : > { %5880 = vmatmul.msk.bf16.gmra.mxu2 %vm980_vm6, %v4591_v20 }
0x15ad   : > { %v4616_v45 = vpop.f32.mrf.mxu2 }
0x15ae   : > { %v4631_v15 = vadd.f32 %v4616_v45, %v4416_v14 }
0x15b0   : > { %v4642_v57 = vadd.f32 %v6098_v46, %v4631_v15 }
0x15b2   : > { %v4648_v35 = vadd.f32 %v4642_v57, %v7770_v53 }
0x15b4   : > { %v4658_v27 = vsel %vm1774_vm2, %v4648_v35, 0.0 }
0x15b5   : > { %4659 = vadd.xlane.f32.xlu1 %v4658_v27  ;;  %v4618_v24 = vpop.f32.mrf.mxu2 }
0x15b6   : > { %v4632_v29 = vadd.f32 %v4618_v24, %v4417_v12 }
0x15b8   : > { %v4643_v44 = vadd.f32 %v6098_v46, %v4632_v29 }
0x15ba   : > { %v4649_v1 = vadd.f32 %v4643_v44, %v7773_v58 }
0x15bc   : > { %v4661_v62 = vsel %vm1774_vm2, %v4649_v1, 0.0 }
0x15bd   : > { %4662 = vadd.xlane.f32.xlu2 %v4661_v62  ;;  %v6044_v62 = vld [vmem:[%s8506_s18 + $0x38] sm:$0xff] }
0x15be   : > { %4862 = vmatpush.bf16.msrb.mxu3 %v6044_v62 }
0x15c6   : > { %v4406_v33 = vpop.f32.mrf.mxu3 }
0x15c7   : > { %v4418_v42 = vadd.f32 %v4406_v33, %v4198_v36  ;;  %v6043_v33 = vld [vmem:[%s8506_s18 + $0x30] sm:$0xff] }
0x15c8   : > { %4863 = vmatpush.bf16.msrb.mxu3 %v6043_v33 }
0x15ce   : > { %v4408_v53 = vpop.f32.mrf.mxu3 }
0x15cf   : > { %v4419_v52 = vadd.f32 %v4408_v53, %v4200_v16 }
0x15f5   : > { %v4621_v4 = vpop.f32.mrf.mxu2 }
0x15f6   : > { %v4633_v39 = vadd.f32 %v4621_v4, %v4418_v42  ;;  %v6042_v4 = vld [vmem:[%s8506_s18 + $0x28] sm:$0xff] }
0x15f7   : > { %4864 = vmatpush.bf16.msrb.mxu3 %v6042_v4 }
0x15f8   : > { %v4644_v8 = vadd.f32 %v6098_v46, %v4633_v39 }
0x15fa   : > { %v4650_v50 = vadd.f32 %v4644_v8, %v7785_v51  ;;  %v4205_v51 = vadd.f32 %v7984_v21, %v4165_v43  ;;  %v6041_v8 = vld [vmem:[%s8506_s18 + $0x20] sm:$0xff] }
0x15fb   : > { %4865 = vmatpush.bf16.msrb.mxu3 %v6041_v8 }
0x15fc   : > { %v4664_v13 = vsel %vm1774_vm2, %v4650_v50, 0.0 }
0x15fd   : > { %4665 = vadd.xlane.f32.xlu1 %v4664_v13  ;;  %v4623_v58 = vpop.f32.mrf.mxu2 }
0x15fe   : > { %v4634_v47 = vadd.f32 %v4623_v58, %v4419_v52 }
0x1600   : > { %v4645_v32 = vadd.f32 %v6098_v46, %v4634_v47 }
0x1602   : > { %v4651_v54 = vadd.f32 %v4645_v32, %v7788_v7 }
0x1603   : > { %v4411_v18 = vpop.f32.mrf.mxu3 }
0x1604   : > { %v4420_v41 = vadd.f32 %v4411_v18, %v4203_v28  ;;  %v4667_v40 = vsel %vm1774_vm2, %v4651_v54, 0.0 }
0x1605   : > { %4668 = vadd.xlane.f32.xlu2 %v4667_v40  ;;  %v4626_v34 = vpop.f32.mrf.mxu2 }
0x1606   : > { %v4635_v6 = vadd.f32 %v4626_v34, %v4420_v41 }
0x1608   : > { %v4646_v23 = vadd.f32 %v6098_v46, %v4635_v6 }
0x160a   : > { %v4652_v5 = vadd.f32 %v4646_v23, %v7799_v48  ;;  %v8222_v23 = vld [vmem:[%s8504_s16 + $0x1] ss:$0 sm:$0xff] }
0x160b   : > { %v4413_v25 = vpop.f32.mrf.mxu3 }
0x160c   : > { %v4421_v56 = vadd.f32 %v4413_v25, %v4205_v51  ;;  %v4670_v30 = vsel %vm1774_vm2, %v4652_v5, 0.0 }
0x160d   : > { %v4628_v26 = vpop.f32.mrf.mxu2  ;;  %4671 = vadd.xlane.f32.xlu1 %v4670_v30 }
0x160e   : > { %v4636_v31 = vadd.f32 %v4628_v26, %v4421_v56  ;;  %v8228_v56 = vld [vmem:[%s8505_s17 + $0x1] ss:$0 sm:$0xff] }
0x1610   : > { %v4647_v7 = vadd.f32 %v6098_v46, %v4636_v31 }
0x1612   : > { %v4653_v38 = vadd.f32 %v4647_v7, %v7802_v49 }
0x1614   : > { %v4673_v60 = vsel %vm1788_vm3, %v4653_v38, 0.0 }
0x1615   : > { %4674 = vadd.xlane.f32.xlu2 %v4673_v60 }
0x1628   : > { %v4660_v19 = vpop.xlane.xlu1 %4659 }
0x1629   : > { %v4676_v2 = vmul.f32 %v4660_v19, %v7519_v17 }
0x162b   : > { %v8170_v11 = vsub.f32 %v4648_v35, %v4676_v2 }
0x162d   : > { %v4688_v48 = vmul.f32 %v8170_v11, %v8170_v11 }
0x162f   : > { %v4694_v21 = vsel %vm1774_vm2, %v4688_v48, 0.0 }
0x1630   : > { %v4663_v9 = vpop.xlane.xlu2 %4662  ;;  %4695 = vadd.xlane.f32.xlu1 %v4694_v21 }
0x1631   : > { %v4677_v0 = vmul.f32 %v4663_v9, %v7519_v17 }
0x1633   : > { %v8176_v3 = vsub.f32 %v4649_v1, %v4677_v0 }
0x1635   : > { %v4689_v49 = vmul.f32 %v8176_v3, %v8176_v3 }
0x1637   : > { %v4697_v20 = vsel %vm1774_vm2, %v4689_v49, 0.0 }
0x1638   : > { %4698 = vadd.xlane.f32.xlu2 %v4697_v20 }
0x1670   : > { %v4666_v55 = vpop.xlane.xlu1 %4665 }
0x1671   : > { %v4678_v22 = vmul.f32 %v4666_v55, %v7519_v17 }
0x1673   : > { %v8182_v10 = vsub.f32 %v4650_v50, %v4678_v22 }
0x1675   : > { %v4690_v43 = vmul.f32 %v8182_v10, %v8182_v10 }
0x1677   : > { %v4700_v37 = vsel %vm1774_vm2, %v4690_v43, 0.0 }
0x1678   : > { %v4669_v63 = vpop.xlane.xlu2 %4668  ;;  %4701 = vadd.xlane.f32.xlu1 %v4700_v37 }
0x1679   : > { %v4679_v14 = vmul.f32 %v4669_v63, %v7519_v17 }
0x167b   : > { %v8188_v46 = vsub.f32 %v4651_v54, %v4679_v14 }
0x167d   : > { %v4691_v45 = vmul.f32 %v8188_v46, %v8188_v46 }
0x167f   : > { %v4703_v15 = vsel %vm1774_vm2, %v4691_v45, 0.0 }
0x1680   : > { %4704 = vadd.xlane.f32.xlu0 %v4703_v15  ;;  %v4672_v57 = vpop.xlane.xlu1 %4671 }
0x1681   : > { %v4680_v61 = vmul.f32 %v4672_v57, %v7519_v17 }
0x1683   : > { %v8194_v59 = vsub.f32 %v4652_v5, %v4680_v61 }
0x1685   : > { %v4692_v35 = vmul.f32 %v8194_v59, %v8194_v59 }
0x1687   : > { %v4706_v12 = vsel %vm1774_vm2, %v4692_v35, 0.0 }
0x1688   : > { %4707 = vadd.xlane.f32.xlu2 %v4706_v12  ;;  %v4675_v27 = vpop.xlane.xlu2 %4674 }
0x1689   : > { %v4681_v24 = vmul.f32 %v4675_v27, %v7519_v17 }
0x168b   : > { %v8200_v29 = vsub.f32 %v4653_v38, %v4681_v24 }
0x168d   : > { %v4693_v44 = vmul.f32 %v8200_v29, %v8200_v29 }
0x168f   : > { %v4709_v1 = vsel %vm1788_vm3, %v4693_v44, 0.0 }
0x1690   : > { %4710 = vadd.xlane.f32.xlu1 %v4709_v1 }
0x16a3   : > { %v4696_v36 = vpop.xlane.xlu1 %4695 }
0x16a4   : > { %v4712_v42 = vmul.f32 %v4696_v36, %v7519_v17 }
0x16a6   : > { %v4718_v39 = vadd.f32 1e-05, %v4712_v42 }
0x16a8   : > { %6408 = vrsqrt.f32 %v4718_v39  ;;  %vm4730_vm8 = vweird.f32 %v4718_v39 }
0x16ab   : > { %v4699_v53 = vpop.xlane.xlu2 %4698 }
0x16ac   : > { %v4713_v16 = vmul.f32 %v4699_v53, %v7519_v17 }
0x16ae   : > { %v6409_v50 = vpop.eup %6408  ;;  %v4719_v52 = vadd.f32 1e-05, %v4713_v16 }
0x16af   : > { %v4725_v13 = vmul.f32 %v6409_v50, %v4718_v39  ;;  %vm4731_vm6 = vweird.f32 %v6409_v50 }
0x16b0   : > { %6410 = vrsqrt.f32 %v4719_v52  ;;  %vm4732_vm9 = vmor %vm4730_vm8, %vm4731_vm6  ;;  %vm4740_vm15 = vweird.f32 %v4719_v52 }
0x16b1   : > { %v4726_v58 = vmul.f32 %v6409_v50, %v4725_v13 }
0x16b3   : > { %v4727_v47 = vmul.f32 0.5, %v4726_v58 }
0x16b5   : > { %v4728_v32 = vsub.f32 1.5, %v4727_v47 }
0x16b6   : > { %v6411_v28 = vpop.eup %6410 }
0x16b7   : > { %v4729_v54 = vmul.f32 %v6409_v50, %v4728_v32  ;;  %v4735_v18 = vmul.f32 %v6411_v28, %v4719_v52  ;;  %vm4741_vm14 = vweird.f32 %v6411_v28 }
0x16b8   : > { %vm4742_vm0 = vmor %vm4740_vm15, %vm4741_vm14 }
0x16b9   : > { %v4736_v41 = vmul.f32 %v6411_v28, %v4735_v18  ;;  %v4733_v40 = vsel %vm4732_vm9, %v6409_v50, %v4729_v54 }
0x16ba   : > { %v4784_v51 = vmul.f32 %v4733_v40, %v8170_v11 }
0x16bb   : > { %v4737_v34 = vmul.f32 0.5, %v4736_v41 }
0x16bc   : > { %v4793_v30 = vmul.f32 %v8222_v23, %v4784_v51 }
0x16bd   : > { %v4738_v6 = vsub.f32 1.5, %v4737_v34 }
0x16be   : > { %v8234_v7 = vadd.f32 %v8228_v56, %v4793_v30 }
0x16bf   : > { %v4739_v5 = vmul.f32 %v6411_v28, %v4738_v6 }
0x16c1   : > { %v4743_v25 = vsel %vm4742_vm0, %v6411_v28, %v4739_v5 }
0x16c2   : > { %v4785_v26 = vmul.f32 %v4743_v25, %v8176_v3 }
0x16c4   : > { %v4794_v31 = vmul.f32 %v8222_v23, %v4785_v26  ;;  %v6048_v26 = vld [vmem:[%s8508_s20 + $0x58] sm:$0xff] }
0x16c6   : > { %v8237_v38 = vadd.f32 %v8228_v56, %v4794_v31  ;;  %v6047_v31 = vld [vmem:[%s8508_s20 + $0x50] sm:$0xff] }
0x16c8   : > { %v4817_v60 = vpack.c.bf16 %v8237_v38, %v8234_v7 }
0x16ca   : > { %5909 = vmatmul.msk.bf16.vlgmr.msrb.gmra.mxu3 %vm1774_vm2, %v4817_v60  ;;  %v6101_v60 = vld [vmem:[%s8507_s19 + $0x1] ss:$0 sm:$0xff] }
0x16eb   : > { %v4702_v19 = vpop.xlane.xlu1 %4701 }
0x16ec   : > { %v4714_v2 = vmul.f32 %v4702_v19, %v7519_v17  ;;  %v6046_v19 = vld [vmem:[%s8508_s20 + $0x48] sm:$0xff] }
0x16ee   : > { %v4720_v11 = vadd.f32 1e-05, %v4714_v2 }
0x16f0   : > { %6412 = vrsqrt.f32 %v4720_v11  ;;  %vm4750_vm7 = vweird.f32 %v4720_v11 }
0x16f3   : > { %v4705_v48 = vpop.xlane.xlu0 %4704 }
0x16f4   : > { %v4715_v21 = vmul.f32 %v4705_v48, %v7519_v17  ;;  %v6045_v48 = vld [vmem:[%s8508_s20 + $0x40] sm:$0xff] }
0x16f6   : > { %v6413_v9 = vpop.eup %6412  ;;  %v4721_v0 = vadd.f32 1e-05, %v4715_v21 }
0x16f7   : > { %v4745_v3 = vmul.f32 %v6413_v9, %v4720_v11  ;;  %vm4751_vm1 = vweird.f32 %v6413_v9 }
0x16f8   : > { %6414 = vrsqrt.f32 %v4721_v0  ;;  %vm4752_vm4 = vmor %vm4750_vm7, %vm4751_vm1  ;;  %vm4760_vm10 = vweird.f32 %v4721_v0 }
0x16f9   : > { %v4746_v49 = vmul.f32 %v6413_v9, %v4745_v3 }
0x16fb   : > { %v4747_v20 = vmul.f32 0.5, %v4746_v49  ;;  %v4708_v55 = vpop.xlane.xlu2 %4707 }
0x16fc   : > { %v4716_v22 = vmul.f32 %v4708_v55, %v7519_v17 }
0x16fd   : > { %v4748_v43 = vsub.f32 1.5, %v4747_v20 }
0x16fe   : > { %v6415_v37 = vpop.eup %6414  ;;  %v4722_v63 = vadd.f32 1e-05, %v4716_v22 }
0x16ff   : > { %v4749_v14 = vmul.f32 %v6413_v9, %v4748_v43  ;;  %v4755_v45 = vmul.f32 %v6415_v37, %v4721_v0  ;;  %vm4761_vm5 = vweird.f32 %v6415_v37 }
0x1700   : > { %6416 = vrsqrt.f32 %v4722_v63  ;;  %vm4762_vm11 = vmor %vm4760_vm10, %vm4761_vm5  ;;  %vm4770_vm13 = vweird.f32 %v4722_v63 }
0x1701   : > { %v4756_v15 = vmul.f32 %v6415_v37, %v4755_v45  ;;  %v4753_v57 = vsel %vm4752_vm4, %v6413_v9, %v4749_v14 }
0x1702   : > { %v4786_v44 = vmul.f32 %v4753_v57, %v8182_v10 }
0x1703   : > { %v4757_v61 = vmul.f32 0.5, %v4756_v15  ;;  %v4711_v35 = vpop.xlane.xlu1 %4710 }
0x1704   : > { %v4717_v12 = vmul.f32 %v4711_v35, %v7519_v17  ;;  %v4795_v39 = vmul.f32 %v8222_v23, %v4786_v44 }
0x1705   : > { %v4758_v27 = vsub.f32 1.5, %v4757_v61 }
0x1706   : > { %v6417_v24 = vpop.eup %6416  ;;  %v4723_v1 = vadd.f32 1e-05, %v4717_v12  ;;  %v8251_v52 = vadd.f32 %v8228_v56, %v4795_v39 }
0x1707   : > { %v4759_v62 = vmul.f32 %v6415_v37, %v4758_v27  ;;  %v4765_v33 = vmul.f32 %v6417_v24, %v4722_v63  ;;  %vm4771_vm12 = vweird.f32 %v6417_v24 }
0x1708   : > { %6418 = vrsqrt.f32 %v4723_v1  ;;  %vm4772_vm6 = vmor %vm4770_vm13, %vm4771_vm12  ;;  %vm4780_vm9 = vweird.f32 %v4723_v1 }
0x1709   : > { %v4763_v36 = vsel %vm4762_vm11, %v6415_v37, %v4759_v62  ;;  %v4766_v42 = vmul.f32 %v6417_v24, %v4765_v33 }
0x170a   : > { %v4787_v4 = vmul.f32 %v4763_v36, %v8188_v46 }
0x170b   : > { %v4767_v8 = vmul.f32 0.5, %v4766_v42 }
0x170c   : > { %v4796_v53 = vmul.f32 %v8222_v23, %v4787_v4 }
0x170d   : > { %v4768_v16 = vsub.f32 1.5, %v4767_v8 }
0x170e   : > { %v6419_v50 = vpop.eup %6418  ;;  %v8254_v10 = vadd.f32 %v8228_v56, %v4796_v53 }
0x170f   : > { %v4769_v13 = vmul.f32 %v6417_v24, %v4768_v16  ;;  %v4775_v58 = vmul.f32 %v6419_v50, %v4723_v1  ;;  %vm4781_vm8 = vweird.f32 %v6419_v50 }
0x1710   : > { %v4818_v47 = vpack.c.bf16 %v8254_v10, %v8251_v52  ;;  %vm4782_vm14 = vmor %vm4780_vm9, %vm4781_vm8 }
0x1711   : > { %v4776_v46 = vmul.f32 %v6419_v50, %v4775_v58  ;;  %v4773_v32 = vsel %vm4772_vm6, %v6417_v24, %v4769_v13 }
0x1712   : > { %5910 = vmatmul.msk.bf16.gmra.mxu3 %vm1774_vm2, %v4818_v47  ;;  %v4788_v18 = vmul.f32 %v4773_v32, %v8194_v59  ;;  %v6052_v59 = vld [vmem:[%s8508_s20 + $0x78] sm:$0xff] }
0x1713   : > { %v4777_v28 = vmul.f32 0.5, %v4776_v46  ;;  %5009 = vmatpush.bf16.msrb.mxu0 %v6052_v59 }
0x1714   : > { %v4797_v6 = vmul.f32 %v8222_v23, %v4788_v18 }
0x1715   : > { %v4778_v54 = vsub.f32 1.5, %v4777_v28 }
0x1716   : > { %v8264_v5 = vadd.f32 %v8228_v56, %v4797_v6 }
0x1717   : > { %v4779_v41 = vmul.f32 %v6419_v50, %v4778_v54 }
0x1719   : > { %v4783_v40 = vsel %vm4782_vm14, %v6419_v50, %v4779_v41 }
0x171a   : > { %v4789_v34 = vmul.f32 %v4783_v40, %v8200_v29  ;;  %v6051_v29 = vld [vmem:[%s8508_s20 + $0x70] sm:$0xff] }
0x171b   : > { %5010 = vmatpush.bf16.msrb.mxu0 %v6051_v29 }
0x171c   : > { %v4798_v51 = vmul.f32 %v8222_v23, %v4789_v34  ;;  %v6050_v23 = vld [vmem:[%s8508_s20 + $0x68] sm:$0xff] }
0x171e   : > { %v8267_v25 = vadd.f32 %v8228_v56, %v4798_v51  ;;  %v6049_v56 = vld [vmem:[%s8508_s20 + $0x60] sm:$0xff] }
0x171f   : > { %5011 = vmatpush.bf16.msrb.mxu0 %v6050_v23 }
0x1720   : > { %v4819_v30 = vpack.c.bf16 %v8267_v25, %v8264_v5 }
0x1722   : > { %5911 = vmatmul.msk.bf16.gmra.mxu3 %vm1774_vm2, %v4819_v30 }
0x1723   : > { %5012 = vmatpush.bf16.msrb.mxu0 %v6049_v56 }
0x1727   : > { %5013 = vmatpush.bf16.msrb.mxu0 %v6048_v26 }
0x172b   : > { %5014 = vmatpush.bf16.msrb.mxu0 %v6047_v31 }
0x172f   : > { %5015 = vmatpush.bf16.msrb.mxu0 %v6046_v19 }
0x1733   : > { %5016 = vmatpush.bf16.msrb.mxu0 %v6045_v48 }
0x174d   : > { %v4867_v2 = vpop.f32.mrf.mxu3 }
0x174e   : > { %v4868_v11 = vadd.f32 %v6101_v60, %v4867_v2 }
0x1750   : > { %v4882_v21 = vmul.f32 %v4868_v11, %v4868_v11 }
0x1752   : > { %v4888_v9 = vmul.f32 %v4882_v21, %v4868_v11 }
0x1754   : > { %v4894_v0 = vmul.f32 0.044715, %v4888_v9 }
0x1755   : > { %v4869_v3 = vpop.f32.mrf.mxu3 }
0x1756   : > { %v4900_v49 = vadd.f32 %v4894_v0, %v4868_v11  ;;  %v4870_v20 = vadd.f32 %v6101_v60, %v4869_v3 }
0x1758   : > { %v4906_v55 = vmul.f32 0.7978846, %v4900_v49  ;;  %v4883_v22 = vmul.f32 %v4870_v20, %v4870_v20 }
0x175a   : > { %v4889_v43 = vmul.f32 %v4883_v22, %v4870_v20  ;;  %6420 = vtanh.f32 %v4906_v55 }
0x175c   : > { %v4895_v37 = vmul.f32 0.044715, %v4889_v43 }
0x175e   : > { %v4901_v63 = vadd.f32 %v4895_v37, %v4870_v20 }
0x1760   : > { %v4907_v14 = vmul.f32 0.7978846, %v4901_v63  ;;  %v6421_v45 = vpop.eup %6420  ;;  %v6102_v63 = vld [vmem:[%s8509_s21 + $0x1] ss:$0 sm:$0xff] }
0x1761   : > { %v4918_v15 = vadd.f32 1.0, %v6421_v45 }
0x1762   : > { %6422 = vtanh.f32 %v4907_v14 }
0x1763   : > { %v4924_v61 = vmul.f32 0.5, %v4918_v15 }
0x1765   : > { %v4930_v27 = vmul.f32 %v4924_v61, %v4868_v11 }
0x1768   : > { %v6423_v57 = vpop.eup %6422 }
0x1769   : > { %v4919_v35 = vadd.f32 1.0, %v6423_v57 }
0x176b   : > { %v4925_v12 = vmul.f32 0.5, %v4919_v35 }
0x176d   : > { %v4931_v24 = vmul.f32 %v4925_v12, %v4870_v20 }
0x176f   : > { %v4953_v44 = vpack.c.bf16 %v4931_v24, %v4930_v27 }
0x1771   : > { %5017 = vmatmul.bf16.vlgmr.msrb.gmra.mxu0 %v4953_v44 }
0x1795   : > { %v4872_v1 = vpop.f32.mrf.mxu3 }
0x1796   : > { %v4873_v62 = vadd.f32 %v6101_v60, %v4872_v1 }
0x1798   : > { %v4884_v33 = vmul.f32 %v4873_v62, %v4873_v62 }
0x179a   : > { %v4890_v36 = vmul.f32 %v4884_v33, %v4873_v62 }
0x179c   : > { %v4896_v42 = vmul.f32 0.044715, %v4890_v36 }
0x179d   : > { %v4874_v4 = vpop.f32.mrf.mxu3 }
0x179e   : > { %v4902_v39 = vadd.f32 %v4896_v42, %v4873_v62  ;;  %v4875_v8 = vadd.f32 %v6101_v60, %v4874_v4 }
0x17a0   : > { %v4908_v53 = vmul.f32 0.7978846, %v4902_v39  ;;  %v4885_v16 = vmul.f32 %v4875_v8, %v4875_v8 }
0x17a2   : > { %v4891_v50 = vmul.f32 %v4885_v16, %v4875_v8  ;;  %6424 = vtanh.f32 %v4908_v53 }
0x17a4   : > { %v4897_v13 = vmul.f32 0.044715, %v4891_v50 }
0x17a5   : > { %v4877_v58 = vpop.f32.mrf.mxu3 }
0x17a6   : > { %v4903_v47 = vadd.f32 %v4897_v13, %v4875_v8  ;;  %v4878_v46 = vadd.f32 %v6101_v60, %v4877_v58 }
0x17a8   : > { %v4909_v32 = vmul.f32 0.7978846, %v4903_v47  ;;  %v4886_v28 = vmul.f32 %v4878_v46, %v4878_v46  ;;  %v6425_v54 = vpop.eup %6424 }
0x17a9   : > { %v4920_v34 = vadd.f32 1.0, %v6425_v54 }
0x17aa   : > { %6426 = vtanh.f32 %v4909_v32  ;;  %v4892_v18 = vmul.f32 %v4886_v28, %v4878_v46 }
0x17ab   : > { %v4926_v56 = vmul.f32 0.5, %v4920_v34 }
0x17ac   : > { %v4898_v41 = vmul.f32 0.044715, %v4892_v18 }
0x17ad   : > { %v4879_v40 = vpop.f32.mrf.mxu3  ;;  %v4932_v2 = vmul.f32 %v4926_v56, %v4873_v62 }
0x17ae   : > { %v4904_v6 = vadd.f32 %v4898_v41, %v4878_v46  ;;  %v4880_v51 = vadd.f32 %v6101_v60, %v4879_v40 }
0x17b0   : > { %v6427_v30 = vpop.eup %6426  ;;  %v4910_v59 = vmul.f32 0.7978846, %v4904_v6  ;;  %v4887_v29 = vmul.f32 %v4880_v51, %v4880_v51 }
0x17b1   : > { %v4921_v23 = vadd.f32 1.0, %v6427_v30 }
0x17b2   : > { %v4893_v26 = vmul.f32 %v4887_v29, %v4880_v51  ;;  %6428 = vtanh.f32 %v4910_v59 }
0x17b3   : > { %v4927_v31 = vmul.f32 0.5, %v4921_v23 }
0x17b4   : > { %v4899_v19 = vmul.f32 0.044715, %v4893_v26 }
0x17b5   : > { %v4933_v11 = vmul.f32 %v4927_v31, %v4875_v8 }
0x17b6   : > { %v4905_v48 = vadd.f32 %v4899_v19, %v4880_v51 }
0x17b7   : > { %v4954_v21 = vpack.c.bf16 %v4933_v11, %v4932_v2 }
0x17b8   : > { %v4911_v9 = vmul.f32 0.7978846, %v4905_v48  ;;  %v6429_v0 = vpop.eup %6428 }
0x17b9   : > { %5022 = vmatmul.bf16.gmra.mxu0 %v4954_v21  ;;  %v4922_v3 = vadd.f32 1.0, %v6429_v0 }
0x17ba   : > { %6430 = vtanh.f32 %v4911_v9 }
0x17bb   : > { %v4928_v20 = vmul.f32 0.5, %v4922_v3 }
0x17bd   : > { %v4934_v22 = vmul.f32 %v4928_v20, %v4878_v46 }
0x17c0   : > { %v6431_v49 = vpop.eup %6430 }
0x17c1   : > { %v4923_v60 = vadd.f32 1.0, %v6431_v49 }
0x17c3   : > { %v4929_v55 = vmul.f32 0.5, %v4923_v60 }
0x17c5   : > { %v4935_v43 = vmul.f32 %v4929_v55, %v4880_v51 }
0x17c7   : > { %v4955_v37 = vpack.c.bf16 %v4935_v43, %v4934_v22 }
0x17c9   : > { %5027 = vmatmul.bf16.gmra.mxu0 %v4955_v37 }
0x17ee   : > { %v5018_v14 = vpop.f32.mrf.mxu0 }
0x17ef   : > { %v5019_v45 = vadd.f32 %v6102_v63, %v5018_v14 }
0x17f1   : > { %v5033_v15 = vadd.f32 %v5019_v45, %v8234_v7 }
0x17f3   : > { %v5043_v57 = vsel %vm1774_vm2, %v5033_v15, 0.0 }
0x17f4   : > { %5044 = vadd.xlane.f32.xlu0 %v5043_v57 }
0x17f6   : > { %v5020_v61 = vpop.f32.mrf.mxu0 }
0x17f7   : > { %v5021_v35 = vadd.f32 %v6102_v63, %v5020_v61 }
0x17f9   : > { %v5034_v12 = vadd.f32 %v5021_v35, %v8237_v38  ;;  %v8351_v35 = vld [vmem:[%s8510_s22 + $0x1] ss:$0 sm:$0xff] }
0x17fb   : > { %v5046_v27 = vsel %vm1774_vm2, %v5034_v12, 0.0 }
0x17fc   : > { %5047 = vadd.xlane.f32.xlu2 %v5046_v27 }
0x1836   : > { %v5023_v24 = vpop.f32.mrf.mxu0 }
0x1837   : > { %v5024_v44 = vadd.f32 %v6102_v63, %v5023_v24 }
0x1839   : > { %v5035_v1 = vadd.f32 %v5024_v44, %v8251_v52  ;;  %v8356_v44 = vld [vmem:[%s8511_s23 + $0x1] ss:$0 sm:$0xff] }
0x183b   : > { %v5049_v62 = vsel %vm1774_vm2, %v5035_v1, 0.0 }
0x183c   : > { %5050 = vadd.xlane.f32.xlu1 %v5049_v62 }
0x183e   : > { %v5025_v33 = vpop.f32.mrf.mxu0 }
0x183f   : > { %v5026_v36 = vadd.f32 %v6102_v63, %v5025_v33 }
0x1841   : > { %v5036_v7 = vadd.f32 %v5026_v36, %v8254_v10 }
0x1843   : > { %v5052_v42 = vsel %vm1774_vm2, %v5036_v7, 0.0 }
0x1844   : > { %5053 = vadd.xlane.f32.xlu0 %v5052_v42 }
0x1846   : > { %v5028_v4 = vpop.f32.mrf.mxu0 }
0x1847   : > { %v5029_v39 = vadd.f32 %v6102_v63, %v5028_v4 }
0x1849   : > { %v5037_v38 = vadd.f32 %v5029_v39, %v8264_v5 }
0x184b   : > { %v5055_v8 = vsel %vm1774_vm2, %v5037_v38, 0.0 }
0x184c   : > { %5056 = vadd.xlane.f32.xlu2 %v5055_v8 }
0x184e   : > { %v5030_v53 = vpop.f32.mrf.mxu0 }
0x184f   : > { %v5031_v16 = vadd.f32 %v6102_v63, %v5030_v53 }
0x1851   : > { %v5038_v52 = vadd.f32 %v5031_v16, %v8267_v25 }
0x1853   : > { %v5058_v50 = vsel %vm1788_vm3, %v5038_v52, 0.0 }
0x1854   : > { %5059 = vadd.xlane.f32.xlu1 %v5058_v50 }
0x1867   : > { %v5045_v13 = vpop.xlane.xlu0 %5044 }
0x1868   : > { %v5061_v10 = vmul.f32 %v5045_v13, %v7519_v17 }
0x186a   : > { %v5067_v58 = vsub.f32 %v5033_v15, %v5061_v10 }
0x186c   : > { %v5073_v47 = vmul.f32 %v5067_v58, %v5067_v58 }
0x186e   : > { %v5079_v46 = vsel %vm1774_vm2, %v5073_v47, 0.0 }
0x186f   : > { %5080 = vadd.xlane.f32.xlu0 %v5079_v46  ;;  %v5048_v32 = vpop.xlane.xlu2 %5047 }
0x1870   : > { %v5062_v5 = vmul.f32 %v5048_v32, %v7519_v17 }
0x1872   : > { %v8317_v28 = vsub.f32 %v5034_v12, %v5062_v5 }
0x1874   : > { %v5074_v54 = vmul.f32 %v8317_v28, %v8317_v28 }
0x1876   : > { %v5082_v25 = vsel %vm1774_vm2, %v5074_v54, 0.0 }
0x1877   : > { %5083 = vadd.xlane.f32.xlu2 %v5082_v25 }
0x18af   : > { %v5051_v18 = vpop.xlane.xlu1 %5050 }
0x18b0   : > { %v5063_v41 = vmul.f32 %v5051_v18, %v7519_v17 }
0x18b2   : > { %v8323_v40 = vsub.f32 %v5035_v1, %v5063_v41 }
0x18b4   : > { %v5075_v34 = vmul.f32 %v8323_v40, %v8323_v40 }
0x18b6   : > { %v5085_v6 = vsel %vm1774_vm2, %v5075_v34, 0.0 }
0x18b7   : > { %v5054_v51 = vpop.xlane.xlu0 %5053  ;;  %5086 = vadd.xlane.f32.xlu1 %v5085_v6 }
0x18b8   : > { %v5064_v30 = vmul.f32 %v5054_v51, %v7519_v17 }
0x18ba   : > { %v8329_v59 = vsub.f32 %v5036_v7, %v5064_v30 }
0x18bc   : > { %v5076_v29 = vmul.f32 %v8329_v59, %v8329_v59 }
0x18be   : > { %v5088_v23 = vsel %vm1774_vm2, %v5076_v29, 0.0 }
0x18bf   : > { %5089 = vadd.xlane.f32.xlu0 %v5088_v23  ;;  %v5057_v56 = vpop.xlane.xlu2 %5056 }
0x18c0   : > { %v5065_v26 = vmul.f32 %v5057_v56, %v7519_v17 }
0x18c2   : > { %v8335_v31 = vsub.f32 %v5037_v38, %v5065_v26 }
0x18c4   : > { %v5077_v19 = vmul.f32 %v8335_v31, %v8335_v31 }
0x18c6   : > { %v5091_v2 = vsel %vm1774_vm2, %v5077_v19, 0.0 }
0x18c7   : > { %v5060_v11 = vpop.xlane.xlu1 %5059  ;;  %5092 = vadd.xlane.f32.xlu2 %v5091_v2 }
0x18c8   : > { %v5066_v48 = vmul.f32 %v5060_v11, %v7519_v17 }
0x18ca   : > { %v8341_v21 = vsub.f32 %v5038_v52, %v5066_v48 }
0x18cc   : > { %v5078_v9 = vmul.f32 %v8341_v21, %v8341_v21 }
0x18ce   : > { %v5094_v0 = vsel %vm1788_vm3, %v5078_v9, 0.0 }
0x18cf   : > { %5095 = vadd.xlane.f32.xlu1 %v5094_v0 }
0x18e2   : > { %v5081_v3 = vpop.xlane.xlu0 %5080 }
0x18e3   : > { %v5097_v49 = vmul.f32 %v5081_v3, %v7519_v17 }
0x18e5   : > { %v5103_v60 = vadd.f32 1e-05, %v5097_v49 }
0x18e7   : > { %6432 = vrsqrt.f32 %v5103_v60  ;;  %vm5115_vm0 = vweird.f32 %v5103_v60 }
0x18ea   : > { %v5084_v20 = vpop.xlane.xlu2 %5083 }
0x18eb   : > { %v5098_v55 = vmul.f32 %v5084_v20, %v7519_v17 }
0x18ed   : > { %v6433_v22 = vpop.eup %6432  ;;  %v5104_v43 = vadd.f32 1e-05, %v5098_v55 }
0x18ee   : > { %v5110_v37 = vmul.f32 %v6433_v22, %v5103_v60  ;;  %vm5116_vm15 = vweird.f32 %v6433_v22 }
0x18ef   : > { %6434 = vrsqrt.f32 %v5104_v43  ;;  %vm5117_vm1 = vmor %vm5115_vm0, %vm5116_vm15  ;;  %vm5125_vm4 = vweird.f32 %v5104_v43 }
0x18f0   : > { %v5111_v63 = vmul.f32 %v6433_v22, %v5110_v37 }
0x18f2   : > { %v5112_v14 = vmul.f32 0.5, %v5111_v63 }
0x18f4   : > { %v5113_v45 = vsub.f32 1.5, %v5112_v14 }
0x18f5   : > { %v6435_v15 = vpop.eup %6434 }
0x18f6   : > { %v5114_v57 = vmul.f32 %v6433_v22, %v5113_v45  ;;  %v5120_v61 = vmul.f32 %v6435_v15, %v5104_v43  ;;  %vm5126_vm7 = vweird.f32 %v6435_v15 }
0x18f7   : > { %vm5127_vm5 = vmor %vm5125_vm4, %vm5126_vm7 }
0x18f8   : > { %v5121_v12 = vmul.f32 %v6435_v15, %v5120_v61  ;;  %v5118_v27 = vsel %vm5117_vm1, %v6433_v22, %v5114_v57 }
0x18f9   : > { %v5169_v24 = vmul.f32 %v5118_v27, %v5067_v58 }
0x18fa   : > { %v5122_v1 = vmul.f32 0.5, %v5121_v12 }
0x18fb   : > { %v5178_v62 = vmul.f32 %v8351_v35, %v5169_v24 }
0x18fc   : > { %v5123_v33 = vsub.f32 1.5, %v5122_v1 }
0x18fd   : > { %v8360_v36 = vadd.f32 %v8356_v44, %v5178_v62 }
0x18fe   : > { %v5124_v7 = vmul.f32 %v6435_v15, %v5123_v33 }
0x18ff   : > { %v5195_v42 = vsel %vm1774_vm2, %v8360_v36, 0.0 }
0x1900   : > { %5196 = vadd.xlane.f32.xlu0 %v5195_v42  ;;  %v5128_v4 = vsel %vm5127_vm5, %v6435_v15, %v5124_v7 }
0x1901   : > { %v5170_v39 = vmul.f32 %v5128_v4, %v8317_v28 }
0x1903   : > { %v5179_v38 = vmul.f32 %v8351_v35, %v5170_v39 }
0x1905   : > { %v8367_v8 = vadd.f32 %v8356_v44, %v5179_v38 }
0x1907   : > { %v5198_v53 = vsel %vm1774_vm2, %v8367_v8, 0.0 }
0x1908   : > { %5199 = vadd.xlane.f32.xlu2 %v5198_v53 }
0x192a   : > { %v5087_v16 = vpop.xlane.xlu1 %5086 }
0x192b   : > { %v5099_v52 = vmul.f32 %v5087_v16, %v7519_v17 }
0x192d   : > { %v5105_v50 = vadd.f32 1e-05, %v5099_v52 }
0x192f   : > { %6436 = vrsqrt.f32 %v5105_v50  ;;  %vm5135_vm11 = vweird.f32 %v5105_v50 }
0x1932   : > { %v5090_v13 = vpop.xlane.xlu0 %5089 }
0x1933   : > { %v5100_v10 = vmul.f32 %v5090_v13, %v7519_v17 }
0x1935   : > { %v6437_v58 = vpop.eup %6436  ;;  %v5106_v47 = vadd.f32 1e-05, %v5100_v10 }
0x1936   : > { %v5130_v46 = vmul.f32 %v6437_v58, %v5105_v50  ;;  %vm5136_vm10 = vweird.f32 %v6437_v58 }
0x1937   : > { %6438 = vrsqrt.f32 %v5106_v47  ;;  %vm5137_vm12 = vmor %vm5135_vm11, %vm5136_vm10  ;;  %vm5145_vm6 = vweird.f32 %v5106_v47 }
0x1938   : > { %v5131_v32 = vmul.f32 %v6437_v58, %v5130_v46 }
0x193a   : > { %v5132_v5 = vmul.f32 0.5, %v5131_v32  ;;  %v5093_v28 = vpop.xlane.xlu2 %5092 }
0x193b   : > { %v5101_v54 = vmul.f32 %v5093_v28, %v7519_v17 }
0x193c   : > { %v5133_v25 = vsub.f32 1.5, %v5132_v5 }
0x193d   : > { %v6439_v18 = vpop.eup %6438  ;;  %v5107_v41 = vadd.f32 1e-05, %v5101_v54 }
0x193e   : > { %v5134_v34 = vmul.f32 %v6437_v58, %v5133_v25  ;;  %v5140_v6 = vmul.f32 %v6439_v18, %v5106_v47  ;;  %vm5146_vm13 = vweird.f32 %v6439_v18 }
0x193f   : > { %6440 = vrsqrt.f32 %v5107_v41  ;;  %vm5147_vm8 = vmor %vm5145_vm6, %vm5146_vm13  ;;  %vm5155_vm14 = vweird.f32 %v5107_v41 }
0x1940   : > { %v5141_v51 = vmul.f32 %v6439_v18, %v5140_v6  ;;  %v5138_v30 = vsel %vm5137_vm12, %v6437_v58, %v5134_v34 }
0x1941   : > { %v5171_v29 = vmul.f32 %v5138_v30, %v8323_v40 }
0x1942   : > { %v5142_v23 = vmul.f32 0.5, %v5141_v51  ;;  %v5096_v56 = vpop.xlane.xlu1 %5095 }
0x1943   : > { %v5102_v26 = vmul.f32 %v5096_v56, %v7519_v17  ;;  %v5180_v19 = vmul.f32 %v8351_v35, %v5171_v29 }
0x1944   : > { %v5143_v2 = vsub.f32 1.5, %v5142_v23 }
0x1945   : > { %v6441_v11 = vpop.eup %6440  ;;  %v5108_v48 = vadd.f32 1e-05, %v5102_v26  ;;  %v5189_v9 = vadd.f32 %v8356_v44, %v5180_v19  ;;  %v6056_v19 = vld [vmem:[%s8514_s26 + $0x18] sm:$0xff] }
0x1946   : > { %v5144_v0 = vmul.f32 %v6439_v18, %v5143_v2  ;;  %v5150_v3 = vmul.f32 %v6441_v11, %v5107_v41  ;;  %vm5156_vm9 = vweird.f32 %v6441_v11  ;;  %5397 = vmatpush.bf16.msra.mxu1 %v6056_v19  ;;  %v6055_v2 = vld [vmem:[%s8514_s26 + $0x10] sm:$0xff] }
0x1947   : > { %6442 = vrsqrt.f32 %v5108_v48  ;;  %v5201_v49 = vsel %vm1774_vm2, %v5189_v9, 0.0  ;;  %vm5157_vm15 = vmor %vm5155_vm14, %vm5156_vm9  ;;  %vm5165_vm1 = vweird.f32 %v5108_v48 }
0x1948   : > { %v5151_v40 = vmul.f32 %v6441_v11, %v5150_v3  ;;  %5202 = vadd.xlane.f32.xlu1 %v5201_v49  ;;  %v5148_v60 = vsel %vm5147_vm8, %v6439_v18, %v5144_v0  ;;  %v6053_v3 = vld [vmem:[%s8514_s26] sm:$0xff] }
0x1949   : > { %v5172_v20 = vmul.f32 %v5148_v60, %v8329_v59 }
0x194a   : > { %v5152_v55 = vmul.f32 0.5, %v5151_v40  ;;  %5398 = vmatpush.bf16.msra.mxu1 %v6055_v2 }
0x194b   : > { %v5181_v22 = vmul.f32 %v8351_v35, %v5172_v20 }
0x194c   : > { %v5153_v43 = vsub.f32 1.5, %v5152_v55 }
0x194d   : > { %v6443_v37 = vpop.eup %6442  ;;  %v5190_v63 = vadd.f32 %v8356_v44, %v5181_v22 }
0x194e   : > { %v5154_v14 = vmul.f32 %v6441_v11, %v5153_v43  ;;  %v5160_v45 = vmul.f32 %v6443_v37, %v5108_v48  ;;  %vm5166_vm0 = vweird.f32 %v6443_v37 }
0x194f   : > { %v5204_v15 = vsel %vm1774_vm2, %v5190_v63, 0.0  ;;  %vm5167_vm7 = vmor %vm5165_vm1, %vm5166_vm0 }
0x1950   : > { %v5161_v57 = vmul.f32 %v6443_v37, %v5160_v45  ;;  %5205 = vadd.xlane.f32.xlu0 %v5204_v15  ;;  %v5158_v61 = vsel %vm5157_vm15, %v6441_v11, %v5154_v14 }
0x1951   : > { %v5173_v12 = vmul.f32 %v5158_v61, %v8335_v31 }
0x1952   : > { %v5162_v59 = vmul.f32 0.5, %v5161_v57 }
0x1953   : > { %v5182_v27 = vmul.f32 %v8351_v35, %v5173_v12 }
0x1954   : > { %v5163_v24 = vsub.f32 1.5, %v5162_v59  ;;  %v8446_v59 = vld [vmem:[%s8512_s24] ss:$0 sm:$0xff] }
0x1955   : > { %v5191_v1 = vadd.f32 %v8356_v44, %v5182_v27 }
0x1956   : > { %v5164_v62 = vmul.f32 %v6443_v37, %v5163_v24 }
0x1957   : > { %v5207_v33 = vsel %vm1774_vm2, %v5191_v1, 0.0 }
0x1958   : > { %5208 = vadd.xlane.f32.xlu2 %v5207_v33  ;;  %v5168_v7 = vsel %vm5167_vm7, %v6443_v37, %v5164_v62  ;;  %v8452_v62 = vld [vmem:[%s8513_s25] ss:$0 sm:$0xff] }
0x1959   : > { %v5174_v42 = vmul.f32 %v5168_v7, %v8341_v21 }
0x195b   : > { %v5183_v4 = vmul.f32 %v8351_v35, %v5174_v42 }
0x195d   : > { %v5192_v31 = vadd.f32 %v8356_v44, %v5183_v4 }
0x195f   : > { %v5210_v39 = vsel %vm1788_vm3, %v5192_v31, 0.0 }
0x1960   : > { %5211 = vadd.xlane.f32.xlu1 %v5210_v39 }
0x1973   : > { %v5197_v38 = vpop.xlane.xlu0 %5196 }
0x1974   : > { %v5213_v53 = vmul.f32 %v5197_v38, %v7519_v17 }
0x1976   : > { %v8393_v16 = vsub.f32 %v8360_v36, %v5213_v53 }
0x1978   : > { %v5225_v52 = vmul.f32 %v8393_v16, %v8393_v16 }
0x197a   : > { %v5231_v50 = vsel %vm1774_vm2, %v5225_v52, 0.0 }
0x197b   : > { %5232 = vadd.xlane.f32.xlu0 %v5231_v50  ;;  %v5200_v21 = vpop.xlane.xlu2 %5199 }
0x197c   : > { %v5214_v35 = vmul.f32 %v5200_v21, %v7519_v17 }
0x197e   : > { %v8400_v44 = vsub.f32 %v8367_v8, %v5214_v35 }
0x1980   : > { %v5226_v13 = vmul.f32 %v8400_v44, %v8400_v44 }
0x1982   : > { %v5234_v10 = vsel %vm1774_vm2, %v5226_v13, 0.0 }
0x1983   : > { %5235 = vadd.xlane.f32.xlu2 %v5234_v10 }
0x19bb   : > { %v5203_v36 = vpop.xlane.xlu1 %5202 }
0x19bc   : > { %v5215_v58 = vmul.f32 %v5203_v36, %v7519_v17 }
0x19be   : > { %v8406_v47 = vsub.f32 %v5189_v9, %v5215_v58  ;;  %v6054_v9 = vld [vmem:[%s8514_s26 + $0x8] sm:$0xff] }
0x19bf   : > { %5399 = vmatpush.bf16.msra.mxu1 %v6054_v9 }
0x19c0   : > { %v5227_v46 = vmul.f32 %v8406_v47, %v8406_v47 }
0x19c2   : > { %v5237_v32 = vsel %vm1774_vm2, %v5227_v46, 0.0 }
0x19c3   : > { %v5206_v5 = vpop.xlane.xlu0 %5205  ;;  %5238 = vadd.xlane.f32.xlu1 %v5237_v32  ;;  %5400 = vmatpush.bf16.msra.mxu1 %v6053_v3 }
0x19c4   : > { %v5216_v8 = vmul.f32 %v5206_v5, %v7519_v17 }
0x19c6   : > { %v8412_v28 = vsub.f32 %v5190_v63, %v5216_v8 }
0x19c8   : > { %v5228_v54 = vmul.f32 %v8412_v28, %v8412_v28 }
0x19ca   : > { %v5240_v25 = vsel %vm1774_vm2, %v5228_v54, 0.0 }
0x19cb   : > { %5241 = vadd.xlane.f32.xlu0 %v5240_v25  ;;  %v5209_v18 = vpop.xlane.xlu2 %5208 }
0x19cc   : > { %v5217_v41 = vmul.f32 %v5209_v18, %v7519_v17 }
0x19ce   : > { %v8418_v34 = vsub.f32 %v5191_v1, %v5217_v41 }
0x19d0   : > { %v5229_v6 = vmul.f32 %v8418_v34, %v8418_v34 }
0x19d2   : > { %v5243_v51 = vsel %vm1774_vm2, %v5229_v6, 0.0 }
0x19d3   : > { %v5212_v30 = vpop.xlane.xlu1 %5211  ;;  %5244 = vadd.xlane.f32.xlu2 %v5243_v51 }
0x19d4   : > { %v5218_v29 = vmul.f32 %v5212_v30, %v7519_v17 }
0x19d6   : > { %v8424_v23 = vsub.f32 %v5192_v31, %v5218_v29 }
0x19d8   : > { %v5230_v56 = vmul.f32 %v8424_v23, %v8424_v23 }
0x19da   : > { %v5246_v26 = vsel %vm1788_vm3, %v5230_v56, 0.0 }
0x19db   : > { %5247 = vadd.xlane.f32.xlu1 %v5246_v26 }
0x19ee   : > { %v5233_v11 = vpop.xlane.xlu0 %5232 }
0x19ef   : > { %v5249_v48 = vmul.f32 %v5233_v11, %v7519_v17 }
0x19f1   : > { %v5255_v0 = vadd.f32 1e-05, %v5249_v48 }
0x19f3   : > { %6444 = vrsqrt.f32 %v5255_v0  ;;  %vm5267_vm4 = vweird.f32 %v5255_v0 }
0x19f6   : > { %v5236_v49 = vpop.xlane.xlu2 %5235 }
0x19f7   : > { %v5250_v40 = vmul.f32 %v5236_v49, %v7519_v17 }
0x19f9   : > { %v6445_v60 = vpop.eup %6444  ;;  %v5256_v20 = vadd.f32 1e-05, %v5250_v40 }
0x19fa   : > { %v5262_v55 = vmul.f32 %v6445_v60, %v5255_v0  ;;  %vm5268_vm3 = vweird.f32 %v6445_v60 }
0x19fb   : > { %6446 = vrsqrt.f32 %v5256_v20  ;;  %vm5269_vm5 = vmor %vm5267_vm4, %vm5268_vm3  ;;  %vm5277_vm11 = vweird.f32 %v5256_v20 }
0x19fc   : > { %v5263_v22 = vmul.f32 %v6445_v60, %v5262_v55 }
0x19fe   : > { %v5264_v43 = vmul.f32 0.5, %v5263_v22 }
0x1a00   : > { %v5265_v37 = vsub.f32 1.5, %v5264_v43 }
0x1a01   : > { %v6447_v63 = vpop.eup %6446 }
0x1a02   : > { %v5266_v14 = vmul.f32 %v6445_v60, %v5265_v37  ;;  %v5272_v45 = vmul.f32 %v6447_v63, %v5256_v20  ;;  %vm5278_vm10 = vweird.f32 %v6447_v63 }
0x1a03   : > { %vm5279_vm12 = vmor %vm5277_vm11, %vm5278_vm10 }
0x1a04   : > { %v5273_v15 = vmul.f32 %v6447_v63, %v5272_v45  ;;  %v5270_v57 = vsel %vm5269_vm5, %v6445_v60, %v5266_v14 }
0x1a05   : > { %v5321_v27 = vmul.f32 %v5270_v57, %v8393_v16 }
0x1a06   : > { %v5274_v61 = vmul.f32 0.5, %v5273_v15 }
0x1a07   : > { %v5330_v33 = vmul.f32 %v8446_v59, %v5321_v27 }
0x1a08   : > { %v5275_v12 = vsub.f32 1.5, %v5274_v61 }
0x1a09   : > { %v5339_v4 = vadd.f32 %v8452_v62, %v5330_v33 }
0x1a0a   : > { %v5276_v24 = vmul.f32 %v6447_v63, %v5275_v12 }
0x1a0c   : > { %v5280_v1 = vsel %vm5279_vm12, %v6447_v63, %v5276_v24 }
0x1a0d   : > { %v5322_v7 = vmul.f32 %v5280_v1, %v8400_v44 }
0x1a0f   : > { %v5331_v42 = vmul.f32 %v8446_v59, %v5322_v7 }
0x1a11   : > { %v5340_v31 = vadd.f32 %v8452_v62, %v5331_v42 }
0x1a13   : > { %v5353_v39 = vpack.c.bf16 %v5340_v31, %v5339_v4 }
0x1a15   : > { %5979 = vmatmul.msk.bf16.vlgmr.msra.gmra.mxu1 %vm1774_vm2, %v5353_v39 }
0x1a36   : > { %v5239_v38 = vpop.xlane.xlu1 %5238 }
0x1a37   : > { %v5251_v53 = vmul.f32 %v5239_v38, %v7519_v17 }
0x1a39   : > { %v5257_v16 = vadd.f32 1e-05, %v5251_v53 }
0x1a3b   : > { %6448 = vrsqrt.f32 %v5257_v16  ;;  %vm5287_vm6 = vweird.f32 %v5257_v16 }
0x1a3e   : > { %v5242_v52 = vpop.xlane.xlu0 %5241 }
0x1a3f   : > { %v5252_v50 = vmul.f32 %v5242_v52, %v7519_v17 }
0x1a41   : > { %v6449_v21 = vpop.eup %6448  ;;  %v5258_v35 = vadd.f32 1e-05, %v5252_v50 }
0x1a42   : > { %v5282_v44 = vmul.f32 %v6449_v21, %v5257_v16  ;;  %vm5288_vm13 = vweird.f32 %v6449_v21 }
0x1a43   : > { %6450 = vrsqrt.f32 %v5258_v35  ;;  %vm5289_vm8 = vmor %vm5287_vm6, %vm5288_vm13  ;;  %vm5297_vm14 = vweird.f32 %v5258_v35 }
0x1a44   : > { %v5283_v13 = vmul.f32 %v6449_v21, %v5282_v44 }
0x1a46   : > { %v5284_v10 = vmul.f32 0.5, %v5283_v13  ;;  %v5245_v36 = vpop.xlane.xlu2 %5244 }
0x1a47   : > { %v5253_v58 = vmul.f32 %v5245_v36, %v7519_v17 }
0x1a48   : > { %v5285_v46 = vsub.f32 1.5, %v5284_v10 }
0x1a49   : > { %v6451_v32 = vpop.eup %6450  ;;  %v5259_v5 = vadd.f32 1e-05, %v5253_v58 }
0x1a4a   : > { %v5286_v8 = vmul.f32 %v6449_v21, %v5285_v46  ;;  %v5292_v54 = vmul.f32 %v6451_v32, %v5258_v35  ;;  %vm5298_vm9 = vweird.f32 %v6451_v32 }
0x1a4b   : > { %6452 = vrsqrt.f32 %v5259_v5  ;;  %vm5299_vm15 = vmor %vm5297_vm14, %vm5298_vm9  ;;  %vm5307_vm1 = vweird.f32 %v5259_v5 }
0x1a4c   : > { %v5293_v25 = vmul.f32 %v6451_v32, %v5292_v54  ;;  %v5290_v18 = vsel %vm5289_vm8, %v6449_v21, %v5286_v8 }
0x1a4d   : > { %v5323_v56 = vmul.f32 %v5290_v18, %v8406_v47 }
0x1a4e   : > { %v5294_v41 = vmul.f32 0.5, %v5293_v25  ;;  %v5248_v6 = vpop.xlane.xlu1 %5247 }
0x1a4f   : > { %v5254_v51 = vmul.f32 %v5248_v6, %v7519_v17  ;;  %v5332_v0 = vmul.f32 %v8446_v59, %v5323_v56 }
0x1a50   : > { %v5295_v30 = vsub.f32 1.5, %v5294_v41 }
0x1a51   : > { %v6453_v29 = vpop.eup %6452  ;;  %v5260_v26 = vadd.f32 1e-05, %v5254_v51  ;;  %v5341_v60 = vadd.f32 %v8452_v62, %v5332_v0 }
0x1a52   : > { %v5296_v19 = vmul.f32 %v6451_v32, %v5295_v30  ;;  %v5302_v2 = vmul.f32 %v6453_v29, %v5259_v5  ;;  %vm5308_vm0 = vweird.f32 %v6453_v29 }
0x1a53   : > { %6454 = vrsqrt.f32 %v5260_v26  ;;  %vm5309_vm7 = vmor %vm5307_vm1, %vm5308_vm0  ;;  %vm5317_vm4 = vweird.f32 %v5260_v26 }
0x1a54   : > { %v5300_v11 = vsel %vm5299_vm15, %v6451_v32, %v5296_v19  ;;  %v5303_v48 = vmul.f32 %v6453_v29, %v5302_v2 }
0x1a55   : > { %v5324_v9 = vmul.f32 %v5300_v11, %v8412_v28 }
0x1a56   : > { %v5304_v3 = vmul.f32 0.5, %v5303_v48 }
0x1a57   : > { %v5333_v17 = vmul.f32 %v8446_v59, %v5324_v9 }
0x1a58   : > { %v5305_v49 = vsub.f32 1.5, %v5304_v3 }
0x1a59   : > { %v6455_v40 = vpop.eup %6454  ;;  %v5342_v47 = vadd.f32 %v8452_v62, %v5333_v17 }
0x1a5a   : > { %v5306_v20 = vmul.f32 %v6453_v29, %v5305_v49  ;;  %v5312_v55 = vmul.f32 %v6455_v40, %v5260_v26  ;;  %vm5318_vm3 = vweird.f32 %v6455_v40 }
0x1a5b   : > { %v5354_v22 = vpack.c.bf16 %v5342_v47, %v5341_v60  ;;  %vm5319_vm5 = vmor %vm5317_vm4, %vm5318_vm3 }
0x1a5c   : > { %v5313_v43 = vmul.f32 %v6455_v40, %v5312_v55  ;;  %v5310_v28 = vsel %vm5309_vm7, %v6453_v29, %v5306_v20 }
0x1a5d   : > { %5980 = vmatmul.msk.bf16.gmra.mxu1 %vm1774_vm2, %v5354_v22  ;;  %v5325_v14 = vmul.f32 %v5310_v28, %v8418_v34  ;;  %v6107_v34 = vld [vmem:[%s8515_s27] ss:$0 sm:$0xff] }
0x1a5e   : > { %v5314_v37 = vmul.f32 0.5, %v5313_v43 }
0x1a5f   : > { %v5334_v61 = vmul.f32 %v8446_v59, %v5325_v14 }
0x1a60   : > { %v5315_v63 = vsub.f32 1.5, %v5314_v37 }
0x1a61   : > { %v5343_v27 = vadd.f32 %v8452_v62, %v5334_v61 }
0x1a62   : > { %v5316_v45 = vmul.f32 %v6455_v40, %v5315_v63 }
0x1a64   : > { %v5320_v15 = vsel %vm5319_vm5, %v6455_v40, %v5316_v45 }
0x1a65   : > { %v5326_v57 = vmul.f32 %v5320_v15, %v8424_v23 }
0x1a67   : > { %v5335_v12 = vmul.f32 %v8446_v59, %v5326_v57 }
0x1a69   : > { %v5344_v24 = vadd.f32 %v8452_v62, %v5335_v12 }
0x1a6b   : > { %v5355_v1 = vpack.c.bf16 %v5344_v24, %v5343_v27 }
0x1a6d   : > { %5981 = vmatmul.msk.bf16.gmra.mxu1 %vm1774_vm2, %v5355_v1 }
0x1a92   : > { %v5402_v23 = vpop.f32.mrf.mxu1 }
0x1a93   : > { %v5403_v33 = vadd.f32 %v6107_v34, %v5402_v23 }
0x1a95   : > { %5417 = vst [vmem:[%s862_s12] sm:$0xff] %v5403_v33 }
0x1a9a   : > { %v5404_v59 = vpop.f32.mrf.mxu1 }
0x1a9b   : > { %v5405_v7 = vadd.f32 %v6107_v34, %v5404_v59 }
0x1a9d   : > { %5418 = vst [vmem:[%s862_s12 + $0x8] sm:$0xff] %v5405_v7 }
0x1ada   : > { %v5407_v42 = vpop.f32.mrf.mxu1 }
0x1adb   : > { %v5408_v62 = vadd.f32 %v6107_v34, %v5407_v42 }
0x1add   : > { %5419 = vst [vmem:[%s862_s12 + $0x10] sm:$0xff] %v5408_v62 }
0x1ae2   : > { %v5409_v4 = vpop.f32.mrf.mxu1 }
0x1ae3   : > { %v5410_v31 = vadd.f32 %v6107_v34, %v5409_v4 }
0x1ae5   : > { %5420 = vst [vmem:[%s862_s12 + $0x18] sm:$0xff] %v5410_v31 }
0x1aea   : > { %v5412_v39 = vpop.f32.mrf.mxu1 }
0x1aeb   : > { %v5413_v38 = vadd.f32 %v6107_v34, %v5412_v39 }
0x1aed   : > { %5421 = vst [vmem:[%s862_s12 + $0x20] sm:$0xff] %v5413_v38 }
0x1af2   : > { %v5414_v53 = vpop.f32.mrf.mxu1 }
0x1af3   : > { %v5415_v16 = vadd.f32 %v6107_v34, %v5414_v53 }
0x1af5   : > { %5422 = vst [vmem:[%s862_s12 + $0x28] sm:$0x7f] %v5415_v16 }
0x1af6 PF: > { %s38_s8 = sadd.s32 1, %s6462_s8  }
0x1af7   : > { %p35_p4 = scmp.ge.s32.totalorder %s38_s8, 4  }
0x1af9   :  { %37 = sbr.rel (!%p35_p4) target bundleno = 14 (0xe), region = 198 }

</bundles_post_ra>
